<compile_context>
chip_gen: v6e
topology: v6e:2x2x1
jax: 0.10.0
libtpu: 0.0.40
codegen_flags: <defaults>
</compile_context>

<pallas_src>
import numpy as np
import jax
import jax.numpy as jnp
from jax.experimental import pallas as pl
from jax.experimental.pallas import tpu as pltpu

EPS = 1e-8
GAUSS_SIZE = 15
ALPHA = 1.0
NBINS = 5 * 5 * 5  # colour-map bins; values land in [1, 124] (see note below)


# ----------------------------------------------------------------------------
# deterministic "parameters" (kornia gaussian kernels) built in numpy
# ----------------------------------------------------------------------------
def _gaussian_1d(window_size, sigma):
    x = np.arange(window_size, dtype=np.float64) - window_size // 2
    if window_size % 2 == 0:
        x = x + 0.5
    g = np.exp(-(x ** 2) / (2.0 * sigma ** 2))
    return g / g.sum()


def make_big_gaussian(H, W):
    gy = _gaussian_1d(H, H / 3.0)
    gx = _gaussian_1d(W, W / 3.0)
    h = np.outer(gy, gx)
    h = h / h.max()
    return jnp.asarray(h, dtype=jnp.float32)


def _reflect_blur_matrix(n, k1d):
    """Banded matrix M (n,n) s.t. M @ x == 1D gaussian blur of x with
    reflect (mirror-without-edge) padding, i.e. kornia/F.pad 'reflect'."""
    K = len(k1d)
    pad = K // 2
    M = np.zeros((n, n), dtype=np.float64)
    for i in range(n):
        for t in range(K):
            j = i + t - pad
            if j < 0:
                j = -j
            elif j > n - 1:
                j = 2 * (n - 1) - j
            M[i, j] += float(k1d[t])
    return M


# ----------------------------------------------------------------------------
# kernel A: stats + blur(MXU) + normalize*prior + rgb->hsv colour map
# ----------------------------------------------------------------------------
def _analyze_kernel(v_ref, h_ref, kv_ref, kht_ref, mask_ref, cmap_ref):
    v = v_ref[0]                                              # (C, T, H, W)

    # frame-diff statistic: sum over C, mean over T-1 frame pairs
    d = jnp.mean(jnp.sum(jnp.abs(v[:, :-1] - v[:, 1:]), axis=0), axis=0)  # (H, W)
    # mean RGB of frames 1..T-1
    mean_rgb = jnp.mean(v[:, 1:], axis=1)                     # (C, H, W)

    # 15x15 gaussian blur, reflect-padded, as two MXU matmuls
    blurred = jnp.dot(
        jnp.dot(kv_ref[...], d, preferred_element_type=jnp.float32),
        kht_ref[...], preferred_element_type=jnp.float32)

    # per-image min/max normalisation, scaled by the big gaussian prior
    m = blurred - jnp.min(blurred)
    mask_ref[0] = (m / (jnp.max(m) + EPS)) * h_ref[...]

    # rgb -> hsv (kornia convention, hue in radians, first-max channel wins)
    r, g, b = mean_rgb[0], mean_rgb[1], mean_rgb[2]
    maxc = jnp.maximum(jnp.maximum(r, g), b)
    minc = jnp.minimum(jnp.minimum(r, g), b)
    delta = maxc - minc
    val = maxc
    s = delta * pl.reciprocal(val + EPS)                      # exact reciprocal
    deltac = jnp.where(delta == 0.0, 1.0, delta)
    inv_deltac = pl.reciprocal(deltac)                        # exact reciprocal
    rc, gc, bc = maxc - r, maxc - g, maxc - b
    hnum = jnp.where(maxc == r, bc - gc,
                     jnp.where(maxc == g, (rc - bc) + 2.0 * deltac,
                               (gc - rc) + 4.0 * deltac))
    hue = ((hnum * inv_deltac / 6.0) % 1.0) * (2.0 * np.pi)   # radians [0, 2pi)

    # getSeg_v2 quantisation (keeps the reference's extra 2*pi inside cos/sin)
    hx = (s * jnp.cos(hue * 2.0 * np.pi) + 1.0) * 0.5
    hy = (s * jnp.sin(hue * 2.0 * np.pi) + 1.0) * 0.5
    hq = jnp.round(hx * 4.0 + 1.0)
    sq = jnp.round(hy * 4.0 + 1.0)
    vq = jnp.round(val * 4.0 + 1.0)
    # NOTE: hq and sq can never both hit 5 (s*cos and s*sin can't both be
    # >= 0.75), so the colour index stays in [1, 124] and indexing size-125
    # tables directly matches the PyTorch reference exactly.
    cmap_ref[0] = (hq + (sq - 1.0) * 5.0 + (vq - 1.0) * 25.0).astype(jnp.int32)


def analyze(video, h_big, Kv, KhT):
    B, C, T, H, W = video.shape
    return pl.pallas_call(
        _analyze_kernel,
        out_shape=(jax.ShapeDtypeStruct((B, H, W), jnp.float32),
                   jax.ShapeDtypeStruct((B, H, W), jnp.int32)),
        grid=(B,),
        in_specs=[pl.BlockSpec((1, C, T, H, W), lambda b: (b, 0, 0, 0, 0)),
                  pl.BlockSpec((H, W), lambda b: (0, 0)),
                  pl.BlockSpec((H, H), lambda b: (0, 0)),
                  pl.BlockSpec((W, W), lambda b: (0, 0))],
        out_specs=(pl.BlockSpec((1, H, W), lambda b: (b, 0, 0)),
                   pl.BlockSpec((1, H, W), lambda b: (b, 0, 0))),
        compiler_params=pltpu.CompilerParams(
            dimension_semantics=("parallel",),
            vmem_limit_bytes=32 * 1024 * 1024),
    )(video, h_big, Kv, KhT)


# ----------------------------------------------------------------------------
# kernel B: blur(refine) + normalize + foreground/background fuse
# grid (B, T): both axes parallel; the rolled video is the SAME operand with
# a ((b-1) mod B) index_map — no materialised copy.
# ----------------------------------------------------------------------------
def _refine_fuse_kernel(ref_ref, kv_ref, kht_ref, v_ref, vr_ref, o_ref):
    rmap = ref_ref[...]                                       # (H, W)
    blurred = jnp.dot(
        jnp.dot(kv_ref[...], rmap, preferred_element_type=jnp.float32),
        kht_ref[...], preferred_element_type=jnp.float32)
    m = blurred - jnp.min(blurred)
    m = m / (jnp.max(m) + EPS)                                # final mask (H, W)

    v = v_ref[...]                                            # (C, H, W) frame t
    vr = vr_ref[...]                                          # (C, H, W) of batch (b-1)%B
    o_ref[...] = ALPHA * vr * (1.0 - m) + v * (1.0 - ALPHA + ALPHA * m)


def refine_fuse(refine, Kv, KhT, video):
    B, C, T, H, W = video.shape
    return pl.pallas_call(
        _refine_fuse_kernel,
        out_shape=jax.ShapeDtypeStruct((B, C, T, H, W), jnp.float32),
        grid=(B, T),
        in_specs=[pl.BlockSpec((None, H, W), lambda b, t: (b, 0, 0)),
                  pl.BlockSpec((H, H), lambda b, t: (0, 0)),
                  pl.BlockSpec((W, W), lambda b, t: (0, 0)),
                  pl.BlockSpec((None, C, None, H, W),
                               lambda b, t: (b, 0, t, 0, 0)),
                  # "rolled" view of the same video operand: batch (b-1) mod B
                  # (== index [2, 0, 1] of the reference when B == 3).
                  pl.BlockSpec((None, C, None, H, W),
                               lambda b, t: ((b + B - 1) % B, 0, t, 0, 0))],
        out_specs=pl.BlockSpec((None, C, None, H, W),
                               lambda b, t: (b, 0, t, 0, 0)),
        compiler_params=pltpu.CompilerParams(
            dimension_semantics=("parallel", "parallel"),
            vmem_limit_bytes=32 * 1024 * 1024),
    )(refine, Kv, KhT, video, video)


# ----------------------------------------------------------------------------
# plain-JAX glue: top-k sampling + histogram statistics -> ratio table
# ----------------------------------------------------------------------------
def forward_v2(video_clips, h_big, Kv, KhT):
    B, C, T, H, W = video_clips.shape

    mask, cmap = analyze(video_clips, h_big, Kv, KhT)         # Pallas kernel A

    mflat = mask.reshape(B, -1)
    cflat = cmap.reshape(B, -1)                               # int32 in [1, 124]

    # TODO(synk): exact sort-based top-k selection has no clean Pallas TPU
    # equivalent; done with lax.top_k in XLA.
    k = int(0.1 * H * W)
    fg_idx = jax.lax.top_k(mflat, k)[1]
    bg_idx = jax.lax.top_k(-mflat, k)[1]
    col_fg = jnp.take_along_axis(cflat, fg_idx, axis=1)
    col_bg = jnp.take_along_axis(cflat, bg_idx, axis=1)

    # TODO(synk): scatter-add histogram has no clean Pallas TPU equivalent.
    def bincount(c):
        return jnp.zeros((NBINS,), jnp.float32).at[c].add(1.0)

    dict_fg = jax.vmap(bincount)(col_fg)
    dict_bg = jax.vmap(bincount)(col_bg) + 1.0
    dict_fg = dict_fg / (jnp.sum(dict_fg, axis=-1, keepdims=True) + EPS)
    dict_bg = dict_bg / (jnp.sum(dict_bg, axis=-1, keepdims=True) + EPS)

    # Fold the two per-pixel lookups into one gather from the ratio table
    # ratio[c] = fg[c] / (fg[c] + bg[c])  (identical to pr_fg/(pr_fg+pr_bg)).
    ratio = dict_fg / (dict_fg + dict_bg)                     # (B, 125)
    # TODO(synk): table gather kept in XLA; an in-kernel one-hot/MXU lookup is
    # possible but was not worth the extra complexity at this size.
    refine = jnp.take_along_axis(ratio, cflat, axis=1).reshape(B, H, W)

    return refine_fuse(refine, Kv, KhT, video_clips)          # Pallas kernel B


if __name__ == "__main__":
    B, C, T, H, W = 3, 3, 4, 112, 112          # H=W=112 and B=3 fixed by the module
    key = jax.random.PRNGKey(0)
    video = jax.random.uniform(key, (B, C, T, H, W), dtype=jnp.float32)

    h_big = make_big_gaussian(H, W)
    k1d = _gaussian_1d(GAUSS_SIZE, GAUSS_SIZE / 3.0)
    Kv = jnp.asarray(_reflect_blur_matrix(H, k1d), dtype=jnp.float32)
    KhT = jnp.asarray(_reflect_blur_matrix(W, k1d).T, dtype=jnp.float32)

    out = jax.jit(forward_v2)(video, h_big, Kv, KhT)
    out = jax.block_until_ready(out)
    assert out.shape == (B, C, T, H, W)
    assert bool(jnp.all(jnp.isfinite(out)))
    print("KERNEL_OK")
</pallas_src>

<mosaic_0001>
module attributes {stable_mosaic.version = 11 : i64} {
  func.func @_analyze_kernel(%arg0: i32, %arg1: memref<1x3x4x112x112xf32, #tpu.memory_space<vmem>>, %arg2: memref<112x112xf32, #tpu.memory_space<vmem>>, %arg3: memref<112x112xf32, #tpu.memory_space<vmem>>, %arg4: memref<112x112xf32, #tpu.memory_space<vmem>>, %arg5: memref<1x112x112xf32, #tpu.memory_space<vmem>>, %arg6: memref<1x112x112xi32, #tpu.memory_space<vmem>>) attributes {dimension_semantics = [#tpu.dimension_semantics<parallel>], iteration_bounds = array<i64: 3>, scalar_prefetch = 0 : i64, scratch_operands = 0 : i64, tpu.core_type = #tpu.core_type<tc>, window_params = [{transform_indices = @transform_0, window_bounds = array<i64: 1, 3, 4, 112, 112>}, {pipeline_mode = #tpu.pipeline_mode<synchronous>, transform_indices = @transform_1, window_bounds = array<i64: 112, 112>}, {pipeline_mode = #tpu.pipeline_mode<synchronous>, transform_indices = @transform_2, window_bounds = array<i64: 112, 112>}, {pipeline_mode = #tpu.pipeline_mode<synchronous>, transform_indices = @transform_3, window_bounds = array<i64: 112, 112>}, {transform_indices = @transform_4, window_bounds = array<i64: 1, 112, 112>}, {transform_indices = @transform_5, window_bounds = array<i64: 1, 112, 112>}]} {
    %c0 = arith.constant 0 : index
    %c0_0 = arith.constant 0 : index
    %c0_1 = arith.constant 0 : index
    %c0_2 = arith.constant 0 : index
    %c0_3 = arith.constant 0 : index
    %0 = vector.load %arg1[%c0, %c0_0, %c0_1, %c0_2, %c0_3] : memref<1x3x4x112x112xf32, #tpu.memory_space<vmem>>, vector<1x3x4x112x112xf32>
    %1 = vector.shape_cast %0 : vector<1x3x4x112x112xf32> to vector<3x4x112x112xf32>
    %2 = vector.extract_strided_slice %1 {offsets = [0, 0, 0, 0], sizes = [3, 3, 112, 112], strides = [1, 1, 1, 1]} : vector<3x4x112x112xf32> to vector<3x3x112x112xf32>
    %3 = vector.extract_strided_slice %1 {offsets = [0, 1, 0, 0], sizes = [3, 3, 112, 112], strides = [1, 1, 1, 1]} : vector<3x4x112x112xf32> to vector<3x3x112x112xf32>
    %4 = arith.subf %2, %3 : vector<3x3x112x112xf32>
    %5 = math.absf %4 : vector<3x3x112x112xf32>
    %cst = arith.constant dense<0.000000e+00> : vector<3x112x112xf32>
    %6 = vector.multi_reduction <add>, %5, %cst [0] : vector<3x3x112x112xf32> to vector<3x112x112xf32>
    %cst_4 = arith.constant dense<0.000000e+00> : vector<112x112xf32>
    %7 = vector.multi_reduction <add>, %6, %cst_4 [0] : vector<3x112x112xf32> to vector<112x112xf32>
    %cst_5 = arith.constant 3.000000e+00 : f32
    %8 = vector.broadcast %cst_5 : f32 to vector<112x112xf32>
    %9 = arith.divf %7, %8 : vector<112x112xf32>
    %10 = vector.extract_strided_slice %1 {offsets = [0, 1, 0, 0], sizes = [3, 3, 112, 112], strides = [1, 1, 1, 1]} : vector<3x4x112x112xf32> to vector<3x3x112x112xf32>
    %cst_6 = arith.constant dense<0.000000e+00> : vector<3x112x112xf32>
    %11 = vector.multi_reduction <add>, %10, %cst_6 [1] : vector<3x3x112x112xf32> to vector<3x112x112xf32>
    %cst_7 = arith.constant 3.000000e+00 : f32
    %12 = vector.broadcast %cst_7 : f32 to vector<3x112x112xf32>
    %13 = arith.divf %11, %12 : vector<3x112x112xf32>
    %c0_8 = arith.constant 0 : index
    %c0_9 = arith.constant 0 : index
    %14 = vector.load %arg3[%c0_8, %c0_9] : memref<112x112xf32, #tpu.memory_space<vmem>>, vector<112x112xf32>
    %cst_10 = arith.constant dense<0.000000e+00> : vector<112x112xf32>
    %15 = tpu.matmul %14, %9, %cst_10 {dimension_numbers = #tpu.dot_dimension_numbers<[1], [0], [0], [1], [0, 0, 1, 1], [], []>} : vector<112x112xf32>, vector<112x112xf32>, vector<112x112xf32> -> vector<112x112xf32>
    %c0_11 = arith.constant 0 : index
    %c0_12 = arith.constant 0 : index
    %16 = vector.load %arg4[%c0_11, %c0_12] : memref<112x112xf32, #tpu.memory_space<vmem>>, vector<112x112xf32>
    %cst_13 = arith.constant dense<0.000000e+00> : vector<112x112xf32>
    %17 = tpu.matmul %15, %16, %cst_13 {dimension_numbers = #tpu.dot_dimension_numbers<[1], [0], [0], [1], [0, 0, 1, 1], [], []>} : vector<112x112xf32>, vector<112x112xf32>, vector<112x112xf32> -> vector<112x112xf32>
    %18 = vector.shape_cast %17 : vector<112x112xf32> to vector<1x112x112xf32>
    %cst_14 = arith.constant dense<0x7F800000> : vector<1xf32>
    %19 = vector.multi_reduction <minimumf>, %18, %cst_14 [1, 2] : vector<1x112x112xf32> to vector<1xf32>
    %20 = vector.shape_cast %19 : vector<1xf32> to vector<1x1x1xf32>
    %21 = vector.extract %20[0, 0, 0] : f32 from vector<1x1x1xf32>
    %22 = vector.broadcast %21 : f32 to vector<112x112xf32>
    %23 = arith.subf %17, %22 : vector<112x112xf32>
    %24 = vector.shape_cast %23 : vector<112x112xf32> to vector<1x112x112xf32>
    %cst_15 = arith.constant dense<0xFF800000> : vector<1xf32>
    %25 = vector.multi_reduction <maximumf>, %24, %cst_15 [1, 2] : vector<1x112x112xf32> to vector<1xf32>
    %26 = vector.shape_cast %25 : vector<1xf32> to vector<1x1x1xf32>
    %27 = vector.extract %26[0, 0, 0] : f32 from vector<1x1x1xf32>
    %cst_16 = arith.constant 9.99999993E-9 : f32
    %28 = arith.addf %27, %cst_16 : f32
    %29 = vector.broadcast %28 : f32 to vector<112x112xf32>
    %30 = arith.divf %23, %29 : vector<112x112xf32>
    %c0_17 = arith.constant 0 : index
    %c0_18 = arith.constant 0 : index
    %31 = vector.load %arg2[%c0_17, %c0_18] : memref<112x112xf32, #tpu.memory_space<vmem>>, vector<112x112xf32>
    %32 = arith.mulf %30, %31 : vector<112x112xf32>
    %c0_19 = arith.constant 0 : index
    %c0_20 = arith.constant 0 : index
    %c0_21 = arith.constant 0 : index
    %33 = vector.load %arg5[%c0_19, %c0_20, %c0_21] : memref<1x112x112xf32, #tpu.memory_space<vmem>>, vector<1x112x112xf32>
    %34 = vector.shape_cast %33 : vector<1x112x112xf32> to vector<112x112xf32>
    %35 = vector.shape_cast %32 : vector<112x112xf32> to vector<1x112x112xf32>
    tpu.vector_store %arg5[%c0_19, %c0_20, %c0_21], %35 {strides = array<i32>} : memref<1x112x112xf32, #tpu.memory_space<vmem>>, vector<1x112x112xf32>,
    %36 = vector.extract_strided_slice %13 {offsets = [0, 0, 0], sizes = [1, 112, 112], strides = [1, 1, 1]} : vector<3x112x112xf32> to vector<1x112x112xf32>
    %37 = vector.shape_cast %36 : vector<1x112x112xf32> to vector<112x112xf32>
    %38 = vector.extract_strided_slice %13 {offsets = [1, 0, 0], sizes = [1, 112, 112], strides = [1, 1, 1]} : vector<3x112x112xf32> to vector<1x112x112xf32>
    %39 = vector.shape_cast %38 : vector<1x112x112xf32> to vector<112x112xf32>
    %40 = vector.extract_strided_slice %13 {offsets = [2, 0, 0], sizes = [1, 112, 112], strides = [1, 1, 1]} : vector<3x112x112xf32> to vector<1x112x112xf32>
    %41 = vector.shape_cast %40 : vector<1x112x112xf32> to vector<112x112xf32>
    %42 = arith.maximumf %37, %39 : vector<112x112xf32>
    %43 = arith.maximumf %42, %41 : vector<112x112xf32>
    %44 = arith.minimumf %37, %39 : vector<112x112xf32>
    %45 = arith.minimumf %44, %41 : vector<112x112xf32>
    %46 = arith.subf %43, %45 : vector<112x112xf32>
    %cst_22 = arith.constant 9.99999993E-9 : f32
    %47 = vector.broadcast %cst_22 : f32 to vector<112x112xf32>
    %48 = arith.addf %43, %47 : vector<112x112xf32>
    %49 = tpu.reciprocal %48 : vector<112x112xf32> -> vector<112x112xf32>
    %50 = arith.mulf %46, %49 : vector<112x112xf32>
    %cst_23 = arith.constant 0.000000e+00 : f32
    %51 = vector.broadcast %cst_23 : f32 to vector<112x112xf32>
    %52 = arith.cmpf oeq, %46, %51 : vector<112x112xf32>
    %cst_24 = arith.constant 1.000000e+00 : f32
    %53 = vector.broadcast %cst_24 : f32 to vector<112x112xf32>
    %54 = arith.select %52, %53, %46 : vector<112x112xi1>, vector<112x112xf32>
    %55 = tpu.reciprocal %54 : vector<112x112xf32> -> vector<112x112xf32>
    %56 = arith.subf %43, %37 : vector<112x112xf32>
    %57 = arith.subf %43, %39 : vector<112x112xf32>
    %58 = arith.subf %43, %41 : vector<112x112xf32>
    %59 = arith.cmpf oeq, %43, %37 : vector<112x112xf32>
    %60 = arith.subf %58, %57 : vector<112x112xf32>
    %61 = arith.cmpf oeq, %43, %39 : vector<112x112xf32>
    %62 = arith.subf %56, %58 : vector<112x112xf32>
    %cst_25 = arith.constant 2.000000e+00 : f32
    %63 = vector.broadcast %cst_25 : f32 to vector<112x112xf32>
    %64 = arith.mulf %63, %54 : vector<112x112xf32>
    %65 = arith.addf %62, %64 : vector<112x112xf32>
    %66 = arith.subf %57, %56 : vector<112x112xf32>
    %cst_26 = arith.constant 4.000000e+00 : f32
    %67 = vector.broadcast %cst_26 : f32 to vector<112x112xf32>
    %68 = arith.mulf %67, %54 : vector<112x112xf32>
    %69 = arith.addf %66, %68 : vector<112x112xf32>
    %70 = arith.select %61, %65, %69 : vector<112x112xi1>, vector<112x112xf32>
    %71 = arith.select %59, %60, %70 : vector<112x112xi1>, vector<112x112xf32>
    %72 = arith.mulf %71, %55 : vector<112x112xf32>
    %cst_27 = arith.constant 6.000000e+00 : f32
    %73 = vector.broadcast %cst_27 : f32 to vector<112x112xf32>
    %74 = arith.divf %72, %73 : vector<112x112xf32>
    %cst_28 = arith.constant 1.000000e+00 : f32
    %75 = vector.broadcast %cst_28 : f32 to vector<112x112xf32>
    %76 = arith.remf %74, %75 : vector<112x112xf32>
    %cst_29 = arith.constant 0.000000e+00 : f32
    %77 = vector.broadcast %cst_29 : f32 to vector<112x112xf32>
    %78 = arith.cmpf one, %76, %77 : vector<112x112xf32>
    %cst_30 = arith.constant 0.000000e+00 : f32
    %79 = vector.broadcast %cst_30 : f32 to vector<112x112xf32>
    %80 = arith.cmpf olt, %76, %79 : vector<112x112xf32>
    %cst_31 = arith.constant 0.000000e+00 : f32
    %81 = arith.cmpf olt, %cst_28, %cst_31 : f32
    %82 = vector.broadcast %81 : i1 to vector<112x112xi1>
    %83 = vector.broadcast %82 : vector<112x112xi1> to vector<112x112xi1>
    %84 = arith.xori %80, %83 : vector<112x112xi1>
    %85 = arith.andi %84, %78 : vector<112x112xi1>
    %86 = vector.broadcast %cst_28 : f32 to vector<112x112xf32>
    %87 = arith.addf %76, %86 : vector<112x112xf32>
    %88 = arith.select %85, %87, %76 : vector<112x112xi1>, vector<112x112xf32>
    %cst_32 = arith.constant 6.28318548 : f32
    %89 = vector.broadcast %cst_32 : f32 to vector<112x112xf32>
    %90 = arith.mulf %88, %89 : vector<112x112xf32>
    %cst_33 = arith.constant 2.000000e+00 : f32
    %91 = vector.broadcast %cst_33 : f32 to vector<112x112xf32>
    %92 = arith.mulf %90, %91 : vector<112x112xf32>
    %cst_34 = arith.constant 3.14159274 : f32
    %93 = vector.broadcast %cst_34 : f32 to vector<112x112xf32>
    %94 = arith.mulf %92, %93 : vector<112x112xf32>
    %95 = math.cos %94 : vector<112x112xf32>
    %96 = arith.mulf %50, %95 : vector<112x112xf32>
    %cst_35 = arith.constant 1.000000e+00 : f32
    %97 = vector.broadcast %cst_35 : f32 to vector<112x112xf32>
    %98 = arith.addf %96, %97 : vector<112x112xf32>
    %cst_36 = arith.constant 5.000000e-01 : f32
    %99 = vector.broadcast %cst_36 : f32 to vector<112x112xf32>
    %100 = arith.mulf %98, %99 : vector<112x112xf32>
    %cst_37 = arith.constant 2.000000e+00 : f32
    %101 = vector.broadcast %cst_37 : f32 to vector<112x112xf32>
    %102 = arith.mulf %90, %101 : vector<112x112xf32>
    %cst_38 = arith.constant 3.14159274 : f32
    %103 = vector.broadcast %cst_38 : f32 to vector<112x112xf32>
    %104 = arith.mulf %102, %103 : vector<112x112xf32>
    %105 = math.sin %104 : vector<112x112xf32>
    %106 = arith.mulf %50, %105 : vector<112x112xf32>
    %cst_39 = arith.constant 1.000000e+00 : f32
    %107 = vector.broadcast %cst_39 : f32 to vector<112x112xf32>
    %108 = arith.addf %106, %107 : vector<112x112xf32>
    %cst_40 = arith.constant 5.000000e-01 : f32
    %109 = vector.broadcast %cst_40 : f32 to vector<112x112xf32>
    %110 = arith.mulf %108, %109 : vector<112x112xf32>
    %cst_41 = arith.constant 4.000000e+00 : f32
    %111 = vector.broadcast %cst_41 : f32 to vector<112x112xf32>
    %112 = arith.mulf %100, %111 : vector<112x112xf32>
    %cst_42 = arith.constant 1.000000e+00 : f32
    %113 = vector.broadcast %cst_42 : f32 to vector<112x112xf32>
    %114 = arith.addf %112, %113 : vector<112x112xf32>
    %115 = math.roundeven %114 : vector<112x112xf32>
    %cst_43 = arith.constant 4.000000e+00 : f32
    %116 = vector.broadcast %cst_43 : f32 to vector<112x112xf32>
    %117 = arith.mulf %110, %116 : vector<112x112xf32>
    %cst_44 = arith.constant 1.000000e+00 : f32
    %118 = vector.broadcast %cst_44 : f32 to vector<112x112xf32>
    %119 = arith.addf %117, %118 : vector<112x112xf32>
    %120 = math.roundeven %119 : vector<112x112xf32>
    %cst_45 = arith.constant 4.000000e+00 : f32
    %121 = vector.broadcast %cst_45 : f32 to vector<112x112xf32>
    %122 = arith.mulf %43, %121 : vector<112x112xf32>
    %cst_46 = arith.constant 1.000000e+00 : f32
    %123 = vector.broadcast %cst_46 : f32 to vector<112x112xf32>
    %124 = arith.addf %122, %123 : vector<112x112xf32>
    %125 = math.roundeven %124 : vector<112x112xf32>
    %cst_47 = arith.constant 1.000000e+00 : f32
    %126 = vector.broadcast %cst_47 : f32 to vector<112x112xf32>
    %127 = arith.subf %120, %126 : vector<112x112xf32>
    %cst_48 = arith.constant 5.000000e+00 : f32
    %128 = vector.broadcast %cst_48 : f32 to vector<112x112xf32>
    %129 = arith.mulf %127, %128 : vector<112x112xf32>
    %130 = arith.addf %115, %129 : vector<112x112xf32>
    %cst_49 = arith.constant 1.000000e+00 : f32
    %131 = vector.broadcast %cst_49 : f32 to vector<112x112xf32>
    %132 = arith.subf %125, %131 : vector<112x112xf32>
    %cst_50 = arith.constant 2.500000e+01 : f32
    %133 = vector.broadcast %cst_50 : f32 to vector<112x112xf32>
    %134 = arith.mulf %132, %133 : vector<112x112xf32>
    %135 = arith.addf %130, %134 : vector<112x112xf32>
    %136 = arith.fptosi %135 : vector<112x112xf32> to vector<112x112xi32>
    %c0_51 = arith.constant 0 : index
    %c0_52 = arith.constant 0 : index
    %c0_53 = arith.constant 0 : index
    %137 = vector.load %arg6[%c0_51, %c0_52, %c0_53] : memref<1x112x112xi32, #tpu.memory_space<vmem>>, vector<1x112x112xi32>
    %138 = vector.shape_cast %137 : vector<1x112x112xi32> to vector<112x112xi32>
    %139 = vector.shape_cast %136 : vector<112x112xi32> to vector<1x112x112xi32>
    tpu.vector_store %arg6[%c0_51, %c0_52, %c0_53], %139 {strides = array<i32>} : memref<1x112x112xi32, #tpu.memory_space<vmem>>, vector<1x112x112xi32>,
    return
  }
  func.func @transform_0(%arg0: i32) -> (i32, i32, i32, i32, i32) {
    %c0_i32 = arith.constant 0 : i32
    %c0_i32_0 = arith.constant 0 : i32
    %c0_i32_1 = arith.constant 0 : i32
    %c0_i32_2 = arith.constant 0 : i32
    %c0_i32_3 = arith.constant 0 : i32
    return %arg0, %c0_i32, %c0_i32_0, %c0_i32_1, %c0_i32_2 : i32, i32, i32, i32, i32
  }
  func.func @transform_1(%arg0: i32) -> (i32, i32) {
    %c0_i32 = arith.constant 0 : i32
    %c0_i32_0 = arith.constant 0 : i32
    %c0_i32_1 = arith.constant 0 : i32
    return %c0_i32, %c0_i32_0 : i32, i32
  }
  func.func @transform_2(%arg0: i32) -> (i32, i32) {
    %c0_i32 = arith.constant 0 : i32
    %c0_i32_0 = arith.constant 0 : i32
    %c0_i32_1 = arith.constant 0 : i32
    return %c0_i32, %c0_i32_0 : i32, i32
  }
  func.func @transform_3(%arg0: i32) -> (i32, i32) {
    %c0_i32 = arith.constant 0 : i32
    %c0_i32_0 = arith.constant 0 : i32
    %c0_i32_1 = arith.constant 0 : i32
    return %c0_i32, %c0_i32_0 : i32, i32
  }
  func.func @transform_4(%arg0: i32) -> (i32, i32, i32) {
    %c0_i32 = arith.constant 0 : i32
    %c0_i32_0 = arith.constant 0 : i32
    %c0_i32_1 = arith.constant 0 : i32
    return %arg0, %c0_i32, %c0_i32_0 : i32, i32, i32
  }
  func.func @transform_5(%arg0: i32) -> (i32, i32, i32) {
    %c0_i32 = arith.constant 0 : i32
    %c0_i32_0 = arith.constant 0 : i32
    %c0_i32_1 = arith.constant 0 : i32
    return %arg0, %c0_i32, %c0_i32_0 : i32, i32, i32
  }
}

module attributes {stable_mosaic.version = 11 : i64} {
  func.func @_refine_fuse_kernel(%arg0: i32, %arg1: i32, %arg2: memref<1x112x112xf32, #tpu.memory_space<vmem>>, %arg3: memref<112x112xf32, #tpu.memory_space<vmem>>, %arg4: memref<112x112xf32, #tpu.memory_space<vmem>>, %arg5: memref<1x3x1x112x112xf32, #tpu.memory_space<vmem>>, %arg6: memref<1x3x1x112x112xf32, #tpu.memory_space<vmem>>, %arg7: memref<1x3x1x112x112xf32, #tpu.memory_space<vmem>>) attributes {dimension_semantics = [#tpu.dimension_semantics<parallel>, #tpu.dimension_semantics<parallel>], iteration_bounds = array<i64: 3, 4>, scalar_prefetch = 0 : i64, scratch_operands = 0 : i64, tpu.core_type = #tpu.core_type<tc>, window_params = [{transform_indices = @transform_0, window_bounds = array<i64: 1, 112, 112>}, {pipeline_mode = #tpu.pipeline_mode<synchronous>, transform_indices = @transform_1, window_bounds = array<i64: 112, 112>}, {pipeline_mode = #tpu.pipeline_mode<synchronous>, transform_indices = @transform_2, window_bounds = array<i64: 112, 112>}, {transform_indices = @transform_3, window_bounds = array<i64: 1, 3, 1, 112, 112>}, {transform_indices = @transform_4, window_bounds = array<i64: 1, 3, 1, 112, 112>}, {transform_indices = @transform_5, window_bounds = array<i64: 1, 3, 1, 112, 112>}]} {
    %c0 = arith.constant 0 : index
    %c0_0 = arith.constant 0 : index
    %c0_1 = arith.constant 0 : index
    %0 = vector.load %arg2[%c0, %c0_0, %c0_1] : memref<1x112x112xf32, #tpu.memory_space<vmem>>, vector<1x112x112xf32>
    %1 = vector.shape_cast %0 : vector<1x112x112xf32> to vector<112x112xf32>
    %c0_2 = arith.constant 0 : index
    %c0_3 = arith.constant 0 : index
    %2 = vector.load %arg3[%c0_2, %c0_3] : memref<112x112xf32, #tpu.memory_space<vmem>>, vector<112x112xf32>
    %cst = arith.constant dense<0.000000e+00> : vector<112x112xf32>
    %3 = tpu.matmul %2, %1, %cst {dimension_numbers = #tpu.dot_dimension_numbers<[1], [0], [0], [1], [0, 0, 1, 1], [], []>} : vector<112x112xf32>, vector<112x112xf32>, vector<112x112xf32> -> vector<112x112xf32>
    %c0_4 = arith.constant 0 : index
    %c0_5 = arith.constant 0 : index
    %4 = vector.load %arg4[%c0_4, %c0_5] : memref<112x112xf32, #tpu.memory_space<vmem>>, vector<112x112xf32>
    %cst_6 = arith.constant dense<0.000000e+00> : vector<112x112xf32>
    %5 = tpu.matmul %3, %4, %cst_6 {dimension_numbers = #tpu.dot_dimension_numbers<[1], [0], [0], [1], [0, 0, 1, 1], [], []>} : vector<112x112xf32>, vector<112x112xf32>, vector<112x112xf32> -> vector<112x112xf32>
    %6 = vector.shape_cast %5 : vector<112x112xf32> to vector<1x112x112xf32>
    %cst_7 = arith.constant dense<0x7F800000> : vector<1xf32>
    %7 = vector.multi_reduction <minimumf>, %6, %cst_7 [1, 2] : vector<1x112x112xf32> to vector<1xf32>
    %8 = vector.shape_cast %7 : vector<1xf32> to vector<1x1x1xf32>
    %9 = vector.extract %8[0, 0, 0] : f32 from vector<1x1x1xf32>
    %10 = vector.broadcast %9 : f32 to vector<112x112xf32>
    %11 = arith.subf %5, %10 : vector<112x112xf32>
    %12 = vector.shape_cast %11 : vector<112x112xf32> to vector<1x112x112xf32>
    %cst_8 = arith.constant dense<0xFF800000> : vector<1xf32>
    %13 = vector.multi_reduction <maximumf>, %12, %cst_8 [1, 2] : vector<1x112x112xf32> to vector<1xf32>
    %14 = vector.shape_cast %13 : vector<1xf32> to vector<1x1x1xf32>
    %15 = vector.extract %14[0, 0, 0] : f32 from vector<1x1x1xf32>
    %cst_9 = arith.constant 9.99999993E-9 : f32
    %16 = arith.addf %15, %cst_9 : f32
    %17 = vector.broadcast %16 : f32 to vector<112x112xf32>
    %18 = arith.divf %11, %17 : vector<112x112xf32>
    %c0_10 = arith.constant 0 : index
    %c0_11 = arith.constant 0 : index
    %c0_12 = arith.constant 0 : index
    %c0_13 = arith.constant 0 : index
    %c0_14 = arith.constant 0 : index
    %19 = vector.load %arg5[%c0_10, %c0_11, %c0_12, %c0_13, %c0_14] : memref<1x3x1x112x112xf32, #tpu.memory_space<vmem>>, vector<1x3x1x112x112xf32>
    %20 = vector.shape_cast %19 : vector<1x3x1x112x112xf32> to vector<3x112x112xf32>
    %c0_15 = arith.constant 0 : index
    %c0_16 = arith.constant 0 : index
    %c0_17 = arith.constant 0 : index
    %c0_18 = arith.constant 0 : index
    %c0_19 = arith.constant 0 : index
    %21 = vector.load %arg6[%c0_15, %c0_16, %c0_17, %c0_18, %c0_19] : memref<1x3x1x112x112xf32, #tpu.memory_space<vmem>>, vector<1x3x1x112x112xf32>
    %22 = vector.shape_cast %21 : vector<1x3x1x112x112xf32> to vector<3x112x112xf32>
    %cst_20 = arith.constant 1.000000e+00 : f32
    %23 = vector.broadcast %cst_20 : f32 to vector<3x112x112xf32>
    %24 = arith.mulf %23, %22 : vector<3x112x112xf32>
    %cst_21 = arith.constant 1.000000e+00 : f32
    %25 = vector.broadcast %cst_21 : f32 to vector<112x112xf32>
    %26 = arith.subf %25, %18 : vector<112x112xf32>
    %27 = vector.shape_cast %26 : vector<112x112xf32> to vector<1x112x112xf32>
    %28 = vector.broadcast %27 : vector<1x112x112xf32> to vector<3x112x112xf32>
    %29 = arith.mulf %24, %28 : vector<3x112x112xf32>
    %cst_22 = arith.constant 1.000000e+00 : f32
    %30 = vector.broadcast %cst_22 : f32 to vector<112x112xf32>
    %31 = arith.mulf %30, %18 : vector<112x112xf32>
    %cst_23 = arith.constant 0.000000e+00 : f32
    %32 = vector.broadcast %cst_23 : f32 to vector<112x112xf32>
    %33 = arith.addf %32, %31 : vector<112x112xf32>
    %34 = vector.shape_cast %33 : vector<112x112xf32> to vector<1x112x112xf32>
    %35 = vector.broadcast %34 : vector<1x112x112xf32> to vector<3x112x112xf32>
    %36 = arith.mulf %20, %35 : vector<3x112x112xf32>
    %37 = arith.addf %29, %36 : vector<3x112x112xf32>
    %c0_24 = arith.constant 0 : index
    %c0_25 = arith.constant 0 : index
    %c0_26 = arith.constant 0 : index
    %c0_27 = arith.constant 0 : index
    %c0_28 = arith.constant 0 : index
    %38 = vector.load %arg7[%c0_24, %c0_25, %c0_26, %c0_27, %c0_28] : memref<1x3x1x112x112xf32, #tpu.memory_space<vmem>>, vector<1x3x1x112x112xf32>
    %39 = vector.shape_cast %38 : vector<1x3x1x112x112xf32> to vector<3x112x112xf32>
    %40 = vector.shape_cast %37 : vector<3x112x112xf32> to vector<1x3x1x112x112xf32>
    tpu.vector_store %arg7[%c0_24, %c0_25, %c0_26, %c0_27, %c0_28], %40 {strides = array<i32>} : memref<1x3x1x112x112xf32, #tpu.memory_space<vmem>>, vector<1x3x1x112x112xf32>,
    return
  }
  func.func @transform_0(%arg0: i32, %arg1: i32) -> (i32, i32, i32) {
    %c0_i32 = arith.constant 0 : i32
    %c0_i32_0 = arith.constant 0 : i32
    %c0_i32_1 = arith.constant 0 : i32
    return %arg0, %c0_i32, %c0_i32_0 : i32, i32, i32
  }
  func.func @transform_1(%arg0: i32, %arg1: i32) -> (i32, i32) {
    %c0_i32 = arith.constant 0 : i32
    %c0_i32_0 = arith.constant 0 : i32
    %c0_i32_1 = arith.constant 0 : i32
    return %c0_i32, %c0_i32_0 : i32, i32
  }
  func.func @transform_2(%arg0: i32, %arg1: i32) -> (i32, i32) {
    %c0_i32 = arith.constant 0 : i32
    %c0_i32_0 = arith.constant 0 : i32
    %c0_i32_1 = arith.constant 0 : i32
    return %c0_i32, %c0_i32_0 : i32, i32
  }
  func.func @transform_3(%arg0: i32, %arg1: i32) -> (i32, i32, i32, i32, i32) {
    %c0_i32 = arith.constant 0 : i32
    %c0_i32_0 = arith.constant 0 : i32
    %c0_i32_1 = arith.constant 0 : i32
    %c0_i32_2 = arith.constant 0 : i32
    return %arg0, %c0_i32, %arg1, %c0_i32_0, %c0_i32_1 : i32, i32, i32, i32, i32
  }
  func.func @transform_4(%arg0: i32, %arg1: i32) -> (i32, i32, i32, i32, i32) {
    %c3_i32 = arith.constant 3 : i32
    %0 = arith.addi %arg0, %c3_i32 : i32
    %c1_i32 = arith.constant 1 : i32
    %1 = arith.subi %0, %c1_i32 : i32
    %c3_i32_0 = arith.constant 3 : i32
    %c0_i32 = arith.constant 0 : i32
    %2 = arith.cmpi eq, %c3_i32_0, %c0_i32 : i32
    %c1_i32_1 = arith.constant 1 : i32
    %3 = arith.select %2, %c1_i32_1, %c3_i32_0 : i32
    %4 = arith.remsi %1, %3 : i32
    %c0_i32_2 = arith.constant 0 : i32
    %5 = arith.cmpi ne, %4, %c0_i32_2 : i32
    %c0_i32_3 = arith.constant 0 : i32
    %6 = arith.cmpi slt, %4, %c0_i32_3 : i32
    %c0_i32_4 = arith.constant 0 : i32
    %7 = arith.cmpi slt, %3, %c0_i32_4 : i32
    %8 = arith.xori %6, %7 : i1
    %9 = arith.andi %8, %5 : i1
    %10 = arith.addi %4, %3 : i32
    %11 = arith.select %9, %10, %4 : i32
    %c0_i32_5 = arith.constant 0 : i32
    %c0_i32_6 = arith.constant 0 : i32
    %c0_i32_7 = arith.constant 0 : i32
    %c0_i32_8 = arith.constant 0 : i32
    return %11, %c0_i32_5, %arg1, %c0_i32_6, %c0_i32_7 : i32, i32, i32, i32, i32
  }
  func.func @transform_5(%arg0: i32, %arg1: i32) -> (i32, i32, i32, i32, i32) {
    %c0_i32 = arith.constant 0 : i32
    %c0_i32_0 = arith.constant 0 : i32
    %c0_i32_1 = arith.constant 0 : i32
    %c0_i32_2 = arith.constant 0 : i32
    return %arg0, %c0_i32, %arg1, %c0_i32_0, %c0_i32_1 : i32, i32, i32, i32, i32
  }
}

</mosaic_0001>

<bundles_post_ra>
// kernel: neg.1
= control target key start
LH: loop header
LB: loop body
LE: loop exit
PB: predicated region body
PF: predicated region fallthrough
CT: control target
= control target key end

     0   :  { %s1576_s0 = inlined_call_operand.vmem [shape: f32[3,12544], index: 0, kind: input, shape index: {}]   ;;  %s1577_s1 = inlined_call_operand.vmem [shape: f32[3,12544], index: 1, kind: output, shape index: {}]  }
   0x1   :  { %v2_v0 = vld [vmem:[%s1576_s0] sm:$0x7]  ;;  %v784_v1 = vld [vmem:[%s1576_s0 + $0x4] sm:$0x7]  ;;  %v786_v2 = vld [vmem:[%s1576_s0 + $0x8] sm:$0x7] }
   0x2   :  { %v5_v3 = vxor.u32 2147483648, %v2_v0  ;;  %v12_v4 = vxor.u32 2147483648, %v784_v1  ;;  %v20_v5 = vxor.u32 2147483648, %v786_v2  ;;  %v788_v6 = vld [vmem:[%s1576_s0 + $0xc] sm:$0x7] }
   0x3   :  { %v28_v7 = vxor.u32 2147483648, %v788_v6  ;;  %v790_v8 = vld [vmem:[%s1576_s0 + $0x10] sm:$0x7]  ;;  %v792_v9 = vld [vmem:[%s1576_s0 + $0x14] sm:$0x7] }
   0x4   :  { %7 = vst [vmem:[%s1577_s1] sm:$0xf] %v5_v3  ;;  %785 = vst [vmem:[%s1577_s1 + $0x4] sm:$0xf] %v12_v4  ;;  %v36_v10 = vxor.u32 2147483648, %v790_v8  ;;  %v44_v11 = vxor.u32 2147483648, %v792_v9 }
   0x5   :  { %787 = vst [vmem:[%s1577_s1 + $0x8] sm:$0xf] %v20_v5  ;;  %v794_v12 = vld [vmem:[%s1576_s0 + $0x18] sm:$0x7]  ;;  %v796_v13 = vld [vmem:[%s1576_s0 + $0x1c] sm:$0x7] }
   0x6   :  { %789 = vst [vmem:[%s1577_s1 + $0xc] sm:$0xf] %v28_v7  ;;  %v52_v14 = vxor.u32 2147483648, %v794_v12  ;;  %v60_v15 = vxor.u32 2147483648, %v796_v13  ;;  %v798_v16 = vld [vmem:[%s1576_s0 + $0x20] sm:$0x7] }
   0x7   :  { %v800_v17 = vld [vmem:[%s1576_s0 + $0x24] sm:$0x7]  ;;  %791 = vst [vmem:[%s1577_s1 + $0x10] sm:$0xf] %v36_v10  ;;  %793 = vst [vmem:[%s1577_s1 + $0x14] sm:$0xf] %v44_v11 }
   0x8   :  { %v68_v18 = vxor.u32 2147483648, %v798_v16  ;;  %v76_v19 = vxor.u32 2147483648, %v800_v17  ;;  %v802_v20 = vld [vmem:[%s1576_s0 + $0x28] sm:$0x7]  ;;  %v804_v21 = vld [vmem:[%s1576_s0 + $0x2c] sm:$0x7] }
   0x9   :  { %795 = vst [vmem:[%s1577_s1 + $0x18] sm:$0xf] %v52_v14  ;;  %797 = vst [vmem:[%s1577_s1 + $0x1c] sm:$0xf] %v60_v15  ;;  %v84_v22 = vxor.u32 2147483648, %v802_v20  ;;  %v92_v23 = vxor.u32 2147483648, %v804_v21 }
   0xa   :  { %v806_v24 = vld [vmem:[%s1576_s0 + $0x30] sm:$0x7]  ;;  %v808_v25 = vld [vmem:[%s1576_s0 + $0x34] sm:$0x7]  ;;  %799 = vst [vmem:[%s1577_s1 + $0x20] sm:$0xf] %v68_v18 }
   0xb   :  { %801 = vst [vmem:[%s1577_s1 + $0x24] sm:$0xf] %v76_v19  ;;  %v100_v26 = vxor.u32 2147483648, %v806_v24  ;;  %v108_v27 = vxor.u32 2147483648, %v808_v25  ;;  %v810_v28 = vld [vmem:[%s1576_s0 + $0x38] sm:$0x7] }
   0xc   :  { %v812_v29 = vld [vmem:[%s1576_s0 + $0x3c] sm:$0x7]  ;;  %803 = vst [vmem:[%s1577_s1 + $0x28] sm:$0xf] %v84_v22  ;;  %805 = vst [vmem:[%s1577_s1 + $0x2c] sm:$0xf] %v92_v23 }
   0xd   :  { %v116_v30 = vxor.u32 2147483648, %v810_v28  ;;  %v124_v31 = vxor.u32 2147483648, %v812_v29  ;;  %v814_v32 = vld [vmem:[%s1576_s0 + $0x40] sm:$0x7]  ;;  %v816_v33 = vld [vmem:[%s1576_s0 + $0x44] sm:$0x7] }
   0xe   :  { %807 = vst [vmem:[%s1577_s1 + $0x30] sm:$0xf] %v100_v26  ;;  %809 = vst [vmem:[%s1577_s1 + $0x34] sm:$0xf] %v108_v27  ;;  %v132_v34 = vxor.u32 2147483648, %v814_v32  ;;  %v140_v35 = vxor.u32 2147483648, %v816_v33 }
   0xf   :  { %v818_v36 = vld [vmem:[%s1576_s0 + $0x48] sm:$0x7]  ;;  %v820_v37 = vld [vmem:[%s1576_s0 + $0x4c] sm:$0x7]  ;;  %811 = vst [vmem:[%s1577_s1 + $0x38] sm:$0xf] %v116_v30 }
  0x10   :  { %813 = vst [vmem:[%s1577_s1 + $0x3c] sm:$0xf] %v124_v31  ;;  %v148_v38 = vxor.u32 2147483648, %v818_v36  ;;  %v156_v39 = vxor.u32 2147483648, %v820_v37  ;;  %v822_v40 = vld [vmem:[%s1576_s0 + $0x50] sm:$0x7] }
  0x11   :  { %v824_v41 = vld [vmem:[%s1576_s0 + $0x54] sm:$0x7]  ;;  %815 = vst [vmem:[%s1577_s1 + $0x40] sm:$0xf] %v132_v34  ;;  %817 = vst [vmem:[%s1577_s1 + $0x44] sm:$0xf] %v140_v35 }
  0x12   :  { %v164_v42 = vxor.u32 2147483648, %v822_v40  ;;  %v172_v43 = vxor.u32 2147483648, %v824_v41  ;;  %v826_v44 = vld [vmem:[%s1576_s0 + $0x58] sm:$0x7]  ;;  %v828_v45 = vld [vmem:[%s1576_s0 + $0x5c] sm:$0x7] }
  0x13   :  { %819 = vst [vmem:[%s1577_s1 + $0x48] sm:$0xf] %v148_v38  ;;  %821 = vst [vmem:[%s1577_s1 + $0x4c] sm:$0xf] %v156_v39  ;;  %v180_v46 = vxor.u32 2147483648, %v826_v44  ;;  %v188_v47 = vxor.u32 2147483648, %v828_v45 }
  0x14   :  { %v830_v48 = vld [vmem:[%s1576_s0 + $0x60] sm:$0x7]  ;;  %v832_v49 = vld [vmem:[%s1576_s0 + $0x64] sm:$0x7]  ;;  %823 = vst [vmem:[%s1577_s1 + $0x50] sm:$0xf] %v164_v42 }
  0x15   :  { %825 = vst [vmem:[%s1577_s1 + $0x54] sm:$0xf] %v172_v43  ;;  %v196_v50 = vxor.u32 2147483648, %v830_v48  ;;  %v204_v51 = vxor.u32 2147483648, %v832_v49  ;;  %v834_v52 = vld [vmem:[%s1576_s0 + $0x68] sm:$0x7] }
  0x16   :  { %v836_v53 = vld [vmem:[%s1576_s0 + $0x6c] sm:$0x7]  ;;  %827 = vst [vmem:[%s1577_s1 + $0x58] sm:$0xf] %v180_v46  ;;  %829 = vst [vmem:[%s1577_s1 + $0x5c] sm:$0xf] %v188_v47 }
  0x17   :  { %v212_v54 = vxor.u32 2147483648, %v834_v52  ;;  %v220_v55 = vxor.u32 2147483648, %v836_v53  ;;  %v838_v56 = vld [vmem:[%s1576_s0 + $0x70] sm:$0x7]  ;;  %v840_v57 = vld [vmem:[%s1576_s0 + $0x74] sm:$0x7] }
  0x18   :  { %831 = vst [vmem:[%s1577_s1 + $0x60] sm:$0xf] %v196_v50  ;;  %833 = vst [vmem:[%s1577_s1 + $0x64] sm:$0xf] %v204_v51  ;;  %v228_v58 = vxor.u32 2147483648, %v838_v56  ;;  %v236_v59 = vxor.u32 2147483648, %v840_v57 }
  0x19   :  { %v842_v60 = vld [vmem:[%s1576_s0 + $0x78] sm:$0x7]  ;;  %v844_v61 = vld [vmem:[%s1576_s0 + $0x7c] sm:$0x7]  ;;  %835 = vst [vmem:[%s1577_s1 + $0x68] sm:$0xf] %v212_v54 }
  0x1a   :  { %837 = vst [vmem:[%s1577_s1 + $0x6c] sm:$0xf] %v220_v55  ;;  %v244_v62 = vxor.u32 2147483648, %v842_v60  ;;  %v252_v63 = vxor.u32 2147483648, %v844_v61  ;;  %v846_v0 = vld [vmem:[%s1576_s0 + $0x80] sm:$0x7] }
  0x1b   :  { %v848_v1 = vld [vmem:[%s1576_s0 + $0x84] sm:$0x7]  ;;  %839 = vst [vmem:[%s1577_s1 + $0x70] sm:$0xf] %v228_v58  ;;  %841 = vst [vmem:[%s1577_s1 + $0x74] sm:$0xf] %v236_v59 }
  0x1c   :  { %v260_v2 = vxor.u32 2147483648, %v846_v0  ;;  %v268_v3 = vxor.u32 2147483648, %v848_v1  ;;  %v850_v4 = vld [vmem:[%s1576_s0 + $0x88] sm:$0x7]  ;;  %v852_v5 = vld [vmem:[%s1576_s0 + $0x8c] sm:$0x7] }
  0x1d   :  { %843 = vst [vmem:[%s1577_s1 + $0x78] sm:$0xf] %v244_v62  ;;  %845 = vst [vmem:[%s1577_s1 + $0x7c] sm:$0xf] %v252_v63  ;;  %v276_v6 = vxor.u32 2147483648, %v850_v4  ;;  %v284_v7 = vxor.u32 2147483648, %v852_v5 }
  0x1e   :  { %v854_v8 = vld [vmem:[%s1576_s0 + $0x90] sm:$0x7]  ;;  %v856_v9 = vld [vmem:[%s1576_s0 + $0x94] sm:$0x7]  ;;  %847 = vst [vmem:[%s1577_s1 + $0x80] sm:$0xf] %v260_v2 }
  0x1f   :  { %849 = vst [vmem:[%s1577_s1 + $0x84] sm:$0xf] %v268_v3  ;;  %v292_v10 = vxor.u32 2147483648, %v854_v8  ;;  %v300_v11 = vxor.u32 2147483648, %v856_v9  ;;  %v858_v12 = vld [vmem:[%s1576_s0 + $0x98] sm:$0x7] }
  0x20   :  { %v860_v13 = vld [vmem:[%s1576_s0 + $0x9c] sm:$0x7]  ;;  %851 = vst [vmem:[%s1577_s1 + $0x88] sm:$0xf] %v276_v6  ;;  %853 = vst [vmem:[%s1577_s1 + $0x8c] sm:$0xf] %v284_v7 }
  0x21   :  { %v308_v14 = vxor.u32 2147483648, %v858_v12  ;;  %v316_v15 = vxor.u32 2147483648, %v860_v13  ;;  %v862_v16 = vld [vmem:[%s1576_s0 + $0xa0] sm:$0x7]  ;;  %v864_v17 = vld [vmem:[%s1576_s0 + $0xa4] sm:$0x7] }
  0x22   :  { %855 = vst [vmem:[%s1577_s1 + $0x90] sm:$0xf] %v292_v10  ;;  %857 = vst [vmem:[%s1577_s1 + $0x94] sm:$0xf] %v300_v11  ;;  %v324_v18 = vxor.u32 2147483648, %v862_v16  ;;  %v332_v19 = vxor.u32 2147483648, %v864_v17 }
  0x23   :  { %v866_v20 = vld [vmem:[%s1576_s0 + $0xa8] sm:$0x7]  ;;  %v868_v21 = vld [vmem:[%s1576_s0 + $0xac] sm:$0x7]  ;;  %859 = vst [vmem:[%s1577_s1 + $0x98] sm:$0xf] %v308_v14 }
  0x24   :  { %861 = vst [vmem:[%s1577_s1 + $0x9c] sm:$0xf] %v316_v15  ;;  %v340_v22 = vxor.u32 2147483648, %v866_v20  ;;  %v348_v23 = vxor.u32 2147483648, %v868_v21  ;;  %v870_v24 = vld [vmem:[%s1576_s0 + $0xb0] sm:$0x7] }
  0x25   :  { %v872_v25 = vld [vmem:[%s1576_s0 + $0xb4] sm:$0x7]  ;;  %863 = vst [vmem:[%s1577_s1 + $0xa0] sm:$0xf] %v324_v18  ;;  %865 = vst [vmem:[%s1577_s1 + $0xa4] sm:$0xf] %v332_v19 }
  0x26   :  { %v356_v26 = vxor.u32 2147483648, %v870_v24  ;;  %v364_v27 = vxor.u32 2147483648, %v872_v25  ;;  %v874_v28 = vld [vmem:[%s1576_s0 + $0xb8] sm:$0x7]  ;;  %v876_v29 = vld [vmem:[%s1576_s0 + $0xbc] sm:$0x7] }
  0x27   :  { %867 = vst [vmem:[%s1577_s1 + $0xa8] sm:$0xf] %v340_v22  ;;  %869 = vst [vmem:[%s1577_s1 + $0xac] sm:$0xf] %v348_v23  ;;  %v372_v30 = vxor.u32 2147483648, %v874_v28  ;;  %v380_v31 = vxor.u32 2147483648, %v876_v29 }
  0x28   :  { %v878_v32 = vld [vmem:[%s1576_s0 + $0xc0] sm:$0x7]  ;;  %v880_v33 = vld [vmem:[%s1576_s0 + $0xc4] sm:$0x7]  ;;  %871 = vst [vmem:[%s1577_s1 + $0xb0] sm:$0xf] %v356_v26 }
  0x29   :  { %873 = vst [vmem:[%s1577_s1 + $0xb4] sm:$0xf] %v364_v27  ;;  %v388_v34 = vxor.u32 2147483648, %v878_v32  ;;  %v396_v35 = vxor.u32 2147483648, %v880_v33  ;;  %v882_v36 = vld [vmem:[%s1576_s0 + $0xc8] sm:$0x7] }
  0x2a   :  { %v884_v37 = vld [vmem:[%s1576_s0 + $0xcc] sm:$0x7]  ;;  %875 = vst [vmem:[%s1577_s1 + $0xb8] sm:$0xf] %v372_v30  ;;  %877 = vst [vmem:[%s1577_s1 + $0xbc] sm:$0xf] %v380_v31 }
  0x2b   :  { %v404_v38 = vxor.u32 2147483648, %v882_v36  ;;  %v412_v39 = vxor.u32 2147483648, %v884_v37  ;;  %v886_v40 = vld [vmem:[%s1576_s0 + $0xd0] sm:$0x7]  ;;  %v888_v41 = vld [vmem:[%s1576_s0 + $0xd4] sm:$0x7] }
  0x2c   :  { %879 = vst [vmem:[%s1577_s1 + $0xc0] sm:$0xf] %v388_v34  ;;  %881 = vst [vmem:[%s1577_s1 + $0xc4] sm:$0xf] %v396_v35  ;;  %v420_v42 = vxor.u32 2147483648, %v886_v40  ;;  %v428_v43 = vxor.u32 2147483648, %v888_v41 }
  0x2d   :  { %v890_v44 = vld [vmem:[%s1576_s0 + $0xd8] sm:$0x7]  ;;  %v892_v45 = vld [vmem:[%s1576_s0 + $0xdc] sm:$0x7]  ;;  %883 = vst [vmem:[%s1577_s1 + $0xc8] sm:$0xf] %v404_v38 }
  0x2e   :  { %885 = vst [vmem:[%s1577_s1 + $0xcc] sm:$0xf] %v412_v39  ;;  %v436_v46 = vxor.u32 2147483648, %v890_v44  ;;  %v444_v47 = vxor.u32 2147483648, %v892_v45  ;;  %v894_v48 = vld [vmem:[%s1576_s0 + $0xe0] sm:$0x7] }
  0x2f   :  { %v896_v49 = vld [vmem:[%s1576_s0 + $0xe4] sm:$0x7]  ;;  %887 = vst [vmem:[%s1577_s1 + $0xd0] sm:$0xf] %v420_v42  ;;  %889 = vst [vmem:[%s1577_s1 + $0xd4] sm:$0xf] %v428_v43 }
  0x30   :  { %v452_v50 = vxor.u32 2147483648, %v894_v48  ;;  %v460_v51 = vxor.u32 2147483648, %v896_v49  ;;  %v898_v52 = vld [vmem:[%s1576_s0 + $0xe8] sm:$0x7]  ;;  %v900_v53 = vld [vmem:[%s1576_s0 + $0xec] sm:$0x7] }
  0x31   :  { %891 = vst [vmem:[%s1577_s1 + $0xd8] sm:$0xf] %v436_v46  ;;  %893 = vst [vmem:[%s1577_s1 + $0xdc] sm:$0xf] %v444_v47  ;;  %v468_v54 = vxor.u32 2147483648, %v898_v52  ;;  %v476_v55 = vxor.u32 2147483648, %v900_v53 }
  0x32   :  { %v902_v56 = vld [vmem:[%s1576_s0 + $0xf0] sm:$0x7]  ;;  %v904_v57 = vld [vmem:[%s1576_s0 + $0xf4] sm:$0x7]  ;;  %895 = vst [vmem:[%s1577_s1 + $0xe0] sm:$0xf] %v452_v50 }
  0x33   :  { %897 = vst [vmem:[%s1577_s1 + $0xe4] sm:$0xf] %v460_v51  ;;  %v484_v58 = vxor.u32 2147483648, %v902_v56  ;;  %v492_v59 = vxor.u32 2147483648, %v904_v57  ;;  %v906_v60 = vld [vmem:[%s1576_s0 + $0xf8] sm:$0x7] }
  0x34   :  { %v908_v61 = vld [vmem:[%s1576_s0 + $0xfc] sm:$0x7]  ;;  %899 = vst [vmem:[%s1577_s1 + $0xe8] sm:$0xf] %v468_v54  ;;  %901 = vst [vmem:[%s1577_s1 + $0xec] sm:$0xf] %v476_v55 }
  0x35   :  { %v500_v62 = vxor.u32 2147483648, %v906_v60  ;;  %v508_v63 = vxor.u32 2147483648, %v908_v61  ;;  %v910_v0 = vld [vmem:[%s1576_s0 + $0x100] sm:$0x7]  ;;  %v912_v1 = vld [vmem:[%s1576_s0 + $0x104] sm:$0x7] }
  0x36   :  { %903 = vst [vmem:[%s1577_s1 + $0xf0] sm:$0xf] %v484_v58  ;;  %905 = vst [vmem:[%s1577_s1 + $0xf4] sm:$0xf] %v492_v59  ;;  %v516_v2 = vxor.u32 2147483648, %v910_v0  ;;  %v524_v3 = vxor.u32 2147483648, %v912_v1 }
  0x37   :  { %v914_v4 = vld [vmem:[%s1576_s0 + $0x108] sm:$0x7]  ;;  %v916_v5 = vld [vmem:[%s1576_s0 + $0x10c] sm:$0x7]  ;;  %907 = vst [vmem:[%s1577_s1 + $0xf8] sm:$0xf] %v500_v62 }
  0x38   :  { %909 = vst [vmem:[%s1577_s1 + $0xfc] sm:$0xf] %v508_v63  ;;  %v532_v6 = vxor.u32 2147483648, %v914_v4  ;;  %v540_v7 = vxor.u32 2147483648, %v916_v5  ;;  %v918_v8 = vld [vmem:[%s1576_s0 + $0x110] sm:$0x7] }
  0x39   :  { %v920_v9 = vld [vmem:[%s1576_s0 + $0x114] sm:$0x7]  ;;  %911 = vst [vmem:[%s1577_s1 + $0x100] sm:$0xf] %v516_v2  ;;  %913 = vst [vmem:[%s1577_s1 + $0x104] sm:$0xf] %v524_v3 }
  0x3a   :  { %v548_v10 = vxor.u32 2147483648, %v918_v8  ;;  %v556_v11 = vxor.u32 2147483648, %v920_v9  ;;  %v922_v12 = vld [vmem:[%s1576_s0 + $0x118] sm:$0x7]  ;;  %v924_v13 = vld [vmem:[%s1576_s0 + $0x11c] sm:$0x7] }
  0x3b   :  { %915 = vst [vmem:[%s1577_s1 + $0x108] sm:$0xf] %v532_v6  ;;  %917 = vst [vmem:[%s1577_s1 + $0x10c] sm:$0xf] %v540_v7  ;;  %v564_v14 = vxor.u32 2147483648, %v922_v12  ;;  %v572_v15 = vxor.u32 2147483648, %v924_v13 }
  0x3c   :  { %v926_v16 = vld [vmem:[%s1576_s0 + $0x120] sm:$0x7]  ;;  %v928_v17 = vld [vmem:[%s1576_s0 + $0x124] sm:$0x7]  ;;  %919 = vst [vmem:[%s1577_s1 + $0x110] sm:$0xf] %v548_v10 }
  0x3d   :  { %921 = vst [vmem:[%s1577_s1 + $0x114] sm:$0xf] %v556_v11  ;;  %v580_v18 = vxor.u32 2147483648, %v926_v16  ;;  %v588_v19 = vxor.u32 2147483648, %v928_v17  ;;  %v930_v20 = vld [vmem:[%s1576_s0 + $0x128] sm:$0x7] }
  0x3e   :  { %v932_v21 = vld [vmem:[%s1576_s0 + $0x12c] sm:$0x7]  ;;  %923 = vst [vmem:[%s1577_s1 + $0x118] sm:$0xf] %v564_v14  ;;  %925 = vst [vmem:[%s1577_s1 + $0x11c] sm:$0xf] %v572_v15 }
  0x3f   :  { %v596_v22 = vxor.u32 2147483648, %v930_v20  ;;  %v604_v23 = vxor.u32 2147483648, %v932_v21  ;;  %v934_v24 = vld [vmem:[%s1576_s0 + $0x130] sm:$0x7]  ;;  %v936_v25 = vld [vmem:[%s1576_s0 + $0x134] sm:$0x7] }
  0x40   :  { %927 = vst [vmem:[%s1577_s1 + $0x120] sm:$0xf] %v580_v18  ;;  %929 = vst [vmem:[%s1577_s1 + $0x124] sm:$0xf] %v588_v19  ;;  %v612_v26 = vxor.u32 2147483648, %v934_v24  ;;  %v620_v27 = vxor.u32 2147483648, %v936_v25 }
  0x41   :  { %v938_v28 = vld [vmem:[%s1576_s0 + $0x138] sm:$0x7]  ;;  %v940_v29 = vld [vmem:[%s1576_s0 + $0x13c] sm:$0x7]  ;;  %931 = vst [vmem:[%s1577_s1 + $0x128] sm:$0xf] %v596_v22 }
  0x42   :  { %933 = vst [vmem:[%s1577_s1 + $0x12c] sm:$0xf] %v604_v23  ;;  %v628_v30 = vxor.u32 2147483648, %v938_v28  ;;  %v636_v31 = vxor.u32 2147483648, %v940_v29  ;;  %v942_v32 = vld [vmem:[%s1576_s0 + $0x140] sm:$0x7] }
  0x43   :  { %v944_v33 = vld [vmem:[%s1576_s0 + $0x144] sm:$0x7]  ;;  %935 = vst [vmem:[%s1577_s1 + $0x130] sm:$0xf] %v612_v26  ;;  %937 = vst [vmem:[%s1577_s1 + $0x134] sm:$0xf] %v620_v27 }
  0x44   :  { %v644_v34 = vxor.u32 2147483648, %v942_v32  ;;  %v652_v35 = vxor.u32 2147483648, %v944_v33  ;;  %v946_v36 = vld [vmem:[%s1576_s0 + $0x148] sm:$0x7]  ;;  %v948_v37 = vld [vmem:[%s1576_s0 + $0x14c] sm:$0x7] }
  0x45   :  { %939 = vst [vmem:[%s1577_s1 + $0x138] sm:$0xf] %v628_v30  ;;  %941 = vst [vmem:[%s1577_s1 + $0x13c] sm:$0xf] %v636_v31  ;;  %v660_v38 = vxor.u32 2147483648, %v946_v36  ;;  %v668_v39 = vxor.u32 2147483648, %v948_v37 }
  0x46   :  { %v950_v40 = vld [vmem:[%s1576_s0 + $0x150] sm:$0x7]  ;;  %v952_v41 = vld [vmem:[%s1576_s0 + $0x154] sm:$0x7]  ;;  %943 = vst [vmem:[%s1577_s1 + $0x140] sm:$0xf] %v644_v34 }
  0x47   :  { %945 = vst [vmem:[%s1577_s1 + $0x144] sm:$0xf] %v652_v35  ;;  %v676_v42 = vxor.u32 2147483648, %v950_v40  ;;  %v684_v43 = vxor.u32 2147483648, %v952_v41  ;;  %v954_v44 = vld [vmem:[%s1576_s0 + $0x158] sm:$0x7] }
  0x48   :  { %v956_v45 = vld [vmem:[%s1576_s0 + $0x15c] sm:$0x7]  ;;  %947 = vst [vmem:[%s1577_s1 + $0x148] sm:$0xf] %v660_v38  ;;  %949 = vst [vmem:[%s1577_s1 + $0x14c] sm:$0xf] %v668_v39 }
  0x49   :  { %v692_v46 = vxor.u32 2147483648, %v954_v44  ;;  %v700_v47 = vxor.u32 2147483648, %v956_v45  ;;  %v958_v48 = vld [vmem:[%s1576_s0 + $0x160] sm:$0x7]  ;;  %v960_v49 = vld [vmem:[%s1576_s0 + $0x164] sm:$0x7] }
  0x4a   :  { %951 = vst [vmem:[%s1577_s1 + $0x150] sm:$0xf] %v676_v42  ;;  %953 = vst [vmem:[%s1577_s1 + $0x154] sm:$0xf] %v684_v43  ;;  %v708_v50 = vxor.u32 2147483648, %v958_v48  ;;  %v716_v51 = vxor.u32 2147483648, %v960_v49 }
  0x4b   :  { %v962_v52 = vld [vmem:[%s1576_s0 + $0x168] sm:$0x7]  ;;  %v964_v53 = vld [vmem:[%s1576_s0 + $0x16c] sm:$0x7]  ;;  %955 = vst [vmem:[%s1577_s1 + $0x158] sm:$0xf] %v692_v46 }
  0x4c   :  { %957 = vst [vmem:[%s1577_s1 + $0x15c] sm:$0xf] %v700_v47  ;;  %v724_v54 = vxor.u32 2147483648, %v962_v52  ;;  %v732_v55 = vxor.u32 2147483648, %v964_v53  ;;  %v966_v56 = vld [vmem:[%s1576_s0 + $0x170] sm:$0x7] }
  0x4d   :  { %v968_v57 = vld [vmem:[%s1576_s0 + $0x174] sm:$0x7]  ;;  %959 = vst [vmem:[%s1577_s1 + $0x160] sm:$0xf] %v708_v50  ;;  %961 = vst [vmem:[%s1577_s1 + $0x164] sm:$0xf] %v716_v51 }
  0x4e   :  { %v740_v58 = vxor.u32 2147483648, %v966_v56  ;;  %v748_v59 = vxor.u32 2147483648, %v968_v57  ;;  %v970_v60 = vld [vmem:[%s1576_s0 + $0x178] sm:$0x7]  ;;  %v972_v61 = vld [vmem:[%s1576_s0 + $0x17c] sm:$0x7] }
  0x4f   :  { %963 = vst [vmem:[%s1577_s1 + $0x168] sm:$0xf] %v724_v54  ;;  %965 = vst [vmem:[%s1577_s1 + $0x16c] sm:$0xf] %v732_v55  ;;  %v756_v62 = vxor.u32 2147483648, %v970_v60  ;;  %v764_v63 = vxor.u32 2147483648, %v972_v61 }
  0x50   :  { %v974_v0 = vld [vmem:[%s1576_s0 + $0x180] sm:$0x7]  ;;  %v976_v1 = vld [vmem:[%s1576_s0 + $0x184] sm:$0x7]  ;;  %967 = vst [vmem:[%s1577_s1 + $0x170] sm:$0xf] %v740_v58 }
  0x51   :  { %969 = vst [vmem:[%s1577_s1 + $0x174] sm:$0xf] %v748_v59  ;;  %v772_v2 = vxor.u32 2147483648, %v974_v0  ;;  %v780_v3 = vxor.u32 2147483648, %v976_v1  ;;  %971 = vst [vmem:[%s1577_s1 + $0x178] sm:$0xf] %v756_v62 }
  0x52   :  { %973 = vst [vmem:[%s1577_s1 + $0x17c] sm:$0xf] %v764_v63 }
  0x53   :  { %975 = vst [vmem:[%s1577_s1 + $0x180] sm:$0xf] %v772_v2  ;;  %977 = vst [vmem:[%s1577_s1 + $0x184] sm:$0xf] %v780_v3 }

// kernel: forward_v2.2
= control target key start
LH: loop header
LB: loop body
LE: loop exit
PB: predicated region body
PF: predicated region fallthrough
CT: control target
= control target key end

     0   :  { %11 = vsyncpa [#allocation3], 0  ;;  %s10874_s0 = inlined_call_operand.hbm [shape: f32[3,3,4,112,112], index: 0, kind: input, shape index: {}]   ;;  %s10875_s1 = inlined_call_operand.hbm [shape: f32[112,112], index: 1, kind: input, shape index: {}]   ;;  %s10876_s2 = inlined_call_operand.hbm [shape: f32[112,112], index: 2, kind: input, shape index: {}]   ;;  %s10877_s3 = inlined_call_operand.hbm [shape: f32[112,112], index: 3, kind: input, shape index: {}]   ;;  %s10878_s4 = inlined_call_operand.vmem [shape: f32[3,112,112], index: 4, kind: output, shape index: {0}]   ;;  %s10879_s5 = inlined_call_operand.vmem [shape: s32[3,112,112], index: 5, kind: output, shape index: {1}]  }
   0x1   :  { %13 = vsyncpa [#allocation3 + $0x1], 0 }
   0x2   :  { %14 = vsyncpa [#allocation5], 0 }
   0x3   :  { %15 = vsyncpa [#allocation8], 0  ;;  %s7004_s18 = smov 0   ;;  %s7006_s19 = smov 0  }
   0x4   :  { %s7008_s20 = smov 0   ;;  %s7010_s21 = smov 0  }
   0x5 LB: > { %s7023_s22 = sadd.s32 4294967295, %s6960_s21   ;;  %p41_p0 = scmp.ne.s32.totalorder %s6952_s19, %s6948_s18  ;;  %s6960_s21 = sphi %s7010_s21, %s11003_s21   ;;  %s6956_s20 = sphi %s7008_s20, %s11002_s20   ;;  %s6952_s19 = sphi %s7006_s19, %s11001_s19   ;;  %s6948_s18 = sphi %s7004_s18, %s11000_s18  }
   0x6   : > { %p10880_p1 = scmp.eq.s32.totalorder %s7023_s22, 0  ;;  %p5779_p2 = scmp.ge.s32.totalorder %s6960_s21, 1 }
   0x7   : > { %p167_p3 = scmp.lt.s32.totalorder %s6960_s21, 4  ;;  %s6962_s25 = smov [#allocation4]  }
   0x8   : > { %p7031_p4 = por %p10880_p1, %p41_p0  ;;  %s179_s26 = sshll.u32 %s6962_s25, 4  ;;  %s180_s26 = int_to_ptr.vmem [resolvable:$true] %s179_s26 }
   0x9   : > { %p7035_p5 = pnand %p5779_p2, %p167_p3  ;;  %s6963_s28 = smov [#allocation6]  }
   0xa   : > { %s10889_s23 = scalar_select %p7031_p4, 1, 0 }
   0xb   : > { %s10890_s24 = scalar_select %p7035_p5, 1, 0 }
   0xc   : > { %p6557_p6 = pneg %p7035_p5  ;;  %s192_s29 = sshll.u32 %s6963_s28, 4  ;;  %s193_s29 = int_to_ptr.vmem [resolvable:$true] %s192_s29 }
   0xd   : > { %s6964_s30 = smov [#allocation7]   ;;  %s6823_s7 = scalar_lea.vmem %s180_s26, 1792 }
   0xe   : > { %p7043_p7 = pnand %p6557_p6, %p10880_p1  ;;  %s205_s6 = sshll.u32 %s6964_s30, 4  ;;  %s206_s6 = int_to_ptr.vmem [resolvable:$true] %s205_s6 }
   0xf   : > { %p6824_p9 = scmp.ne.s32.totalorder %s180_s26, %s6823_s7  ;;  %p6831_p12 = scmp.lt.s32.totalorder %s180_s26, %s180_s26 }
  0x10   : > { %p6814_p8 = pneg %p7043_p7  ;;  %p6832_p13 = scmp.lt.s32.totalorder %s6823_s7, %s6823_s7 }
  0x12   : > { %p6826_p10 = pnand %p6824_p9, %p6814_p8  ;;  %p6833_p0 = por %p6832_p13, %p6831_p12 }
  0x14   : > { %p6827_p11 = pneg %p6826_p10 }
  0x16   : > { %p6834_p2 = pnand %p6833_p0, %p6827_p11 }
  0x18   : > { %6837 = shalt.err (!%p6834_p2)
}
  0x19   : > { %s6965_s8 = smov 128   ;;  %s6966_s9 = smov 8  }
  0x1a   : > { %6560 = dma.hbm_to_vmem [thread:$0]  (!%p7043_p7), %s10875_s1, 1792, %s180_s26, [#allocation5], %s6965_s8, %s6965_s8, %s6966_s9  }
  0x1b   : > { %s6849_s12 = scalar_lea.vmem %s193_s29, 1792  ;;  %p6857_p10 = scmp.lt.s32.totalorder %s193_s29, %s193_s29 }
  0x1c   : > { %p6850_p3 = scmp.ne.s32.totalorder %s193_s29, %s6849_s12  ;;  %p6858_p11 = scmp.lt.s32.totalorder %s6849_s12, %s6849_s12 }
  0x1e   : > { %p6852_p6 = pnand %p6850_p3, %p6814_p8  ;;  %p6859_p12 = por %p6858_p11, %p6857_p10 }
  0x20   : > { %p6853_p9 = pneg %p6852_p6 }
  0x22   : > { %p6860_p13 = pnand %p6859_p12, %p6853_p9 }
  0x24   : > { %6863 = shalt.err (!%p6860_p13)
}
  0x25   : > { %6563 = dma.hbm_to_vmem [thread:$0]  (!%p7043_p7), %s10876_s2, 1792, %s193_s29, [#allocation5], %s6965_s8, %s6965_s8, %s6966_s9  }
  0x26   : > { %s6875_s15 = scalar_lea.vmem %s206_s6, 1792  ;;  %p6883_p6 = scmp.lt.s32.totalorder %s206_s6, %s206_s6 }
  0x27   : > { %p6876_p0 = scmp.ne.s32.totalorder %s206_s6, %s6875_s15  ;;  %p6884_p9 = scmp.lt.s32.totalorder %s6875_s15, %s6875_s15 }
  0x29   : > { %p6878_p2 = pnand %p6876_p0, %p6814_p8  ;;  %p6885_p10 = por %p6884_p9, %p6883_p6 }
  0x2b   : > { %p6879_p3 = pneg %p6878_p2 }
  0x2d   : > { %p6886_p11 = pnand %p6885_p10, %p6879_p3 }
  0x2f   : > { %6889 = shalt.err (!%p6886_p11)
}
  0x30   : > { %6566 = dma.hbm_to_vmem [thread:$0]  (!%p7043_p7), %s10877_s3, 1792, %s206_s6, [#allocation8], %s6965_s8, %s6965_s8, %s6966_s9  }
  0x31   : > { %s7083_s18 = sadd.s32 1, %s6960_s21   ;;  %s28_s26 = sadd.s32 1, %s6956_s20 }
  0x32   : > { %s25_s25 = ssub.s32 %s6960_s21, %s7083_s18  ;;  %p35_p12 = scmp.ne.s32.totalorder %s6956_s20, %s6952_s19 }
  0x33   : > { %p26_p8 = scmp.eq.s32.totalorder %s25_s25, 0  ;;  %p36_p13 = scmp.eq.s32.totalorder %s6960_s21, 0 }
  0x34   : > { %p6574_p0 = scmp.lt.s32.totalorder %s6960_s21, 3  ;;  %s219_s28 = sand.u32 1, %s6956_s20  }
  0x35   : > { %s7093_s27 = scalar_select %p26_p8, %s6956_s20, %s28_s26  }
  0x36   : > { %p37_p2 = por %p36_p13, %p35_p12  ;;  %s6115_s29 = smul.u32 1344, %s219_s28 }
  0x37   : > { %s6116_s30 = smul.u32 21504, %s6960_s21  ;;  %s7108_s14 = scalar_lea.sflag [#allocation3], %s219_s28 }
  0x38   : > { %p7097_p3 = pnand %p6574_p0, %p37_p2  ;;  %s223_s12 = scalar_lea.vmem [#allocation2], %s6115_s29 }
  0x39   : > { %s7104_s11 = scalar_lea.hbm %s10874_s0, %s6116_s30  ;;  %s230_s13 = sshll.u32 %s223_s12, 4  ;;  %s7106_s13 = int_to_ptr.vmem [resolvable:$true] %s230_s13 }
  0x3a   : > { %s6890_s21 = scalar_lea.hbm %s7104_s11, 21504  ;;  %p6892_p6 = pneg %p7097_p3 }
  0x3b   : > { %p6891_p7 = scmp.ne.s32.totalorder %s7104_s11, %s6890_s21  ;;  %s6895_s17 = scalar_lea.hbm %s10874_s0, 64512 }
  0x3c   : > { %p6896_p11 = scmp.lt.s32.totalorder %s7104_s11, %s10874_s0  ;;  %p6897_p8 = scmp.lt.s32.totalorder %s6895_s17, %s6890_s21 }
  0x3d   : > { %p6893_p9 = pnand %p6892_p6, %p6891_p7 }
  0x3e   : > { %p6898_p12 = por %p6897_p8, %p6896_p11 }
  0x3f   : > { %p6894_p10 = pneg %p6893_p9 }
  0x41   : > { %p6899_p13 = pnand %p6898_p12, %p6894_p10 }
  0x43   : > { %6902 = shalt.err (!%p6899_p13)
}
  0x44   : > { %s6903_s28 = scalar_lea.vmem %s7106_s13, 21504  ;;  %s6967_s29 = smov [#allocation2]  }
  0x45   : > { %p6904_p0 = scmp.ne.s32.totalorder %s7106_s13, %s6903_s28  ;;  %s6908_s30 = sshll.u32 %s6967_s29, 4  ;;  %s6909_s30 = int_to_ptr.vmem [resolvable:$false] %s6908_s30 }
  0x46   : > { %s6910_s6 = scalar_lea.vmem %s6909_s30, 43008  ;;  %p6911_p9 = scmp.lt.s32.totalorder %s7106_s13, %s6909_s30 }
  0x47   : > { %p6906_p2 = pnand %p6904_p0, %p6892_p6  ;;  %p6912_p1 = scmp.lt.s32.totalorder %s6910_s6, %s6903_s28 }
  0x49   : > { %p6907_p7 = pneg %p6906_p2  ;;  %p6913_p4 = por %p6912_p1, %p6911_p9 }
  0x4b   : > { %p6914_p5 = pnand %p6913_p4, %p6907_p7 }
  0x4d   : > { %6917 = shalt.err (!%p6914_p5)
}
  0x4e   : > { %6570 = dma.hbm_to_vmem [thread:$0]  (!%p7097_p3), %s7104_s11, 21504, %s7106_s13, %s7108_s14, %s6965_s8, %s6965_s8, %s6966_s9  }
  0x4f   : > { %p10893_p6 = scmp.ne.s32.totalorder %s10890_s24, 0 }
  0x50   : > { %s244_s10 = sand.u32 (!%p10893_p6), 1, %s6952_s19   ;;  %p10894_p1 = scmp.ne.s32.totalorder (!%p10893_p6), %s10889_s23, 0 }
  0x51   : > { %242 = sbr.rel (%p10893_p6) target bundleno = 1717 (0x6b5), region = 36  ;;  %s245_s21 = scalar_lea.sflag (!%p10893_p6), [#allocation3], %s244_s10 }
  0x52   : > { %s6117_s12 = smul.u32 (!%p10893_p6), 1344, %s244_s10 }
  0x54   : > { %s7135_s15 = scalar_lea.vmem (!%p10893_p6), [#allocation2], %s6117_s12 }
  0x56   : > { %6935 = dma.done.wait (%p10894_p1), %s245_s21, 21504  }
  0x57   : > { %6937 = vsyncadd (%p10894_p1), %s245_s21, 4294945792  ;;  %p10895_p4 = scmp.eq.s32.totalorder %s7023_s22, 0 }
  0x59   : > { %6939 = dma.done.wait (%p10895_p4), [#allocation5], 3584   ;;  %p10896_p5 = pmov %p10895_p4 }
  0x5a   : > { %p10897_p3 = pmov %p10895_p4 }
  0x5b   : > { %6941 = vsyncadd (%p10896_p5), [#allocation5], 4294963712 }
  0x5c   : > { %6943 = dma.done.wait (%p10897_p3), [#allocation8], 1792   ;;  %p10898_p10 = pmov %p10897_p3 }
  0x5d   : > { %v315_v0 = vld [vmem:[%s7135_s15 + $0x68] sm:$0xff]  ;;  %v329_v1 = vld [vmem:[%s7135_s15 + $0xd8] sm:$0xff]  ;;  %vm722_vm0 = vcmask 916480   ;;  %v314_v28 = vld [vmem:[%s7135_s15 + $0x60] sm:$0xff]  ;;  %p292_p11 = scmp.lt.s32.totalorder %s7023_s22, 2 }
  0x5e   : > { %6945 = vsyncadd (%p10898_p10), [#allocation8], 4294965504  ;;  %v343_v2 = vld [vmem:[%s7135_s15 + $0x148] sm:$0xff]  ;;  %v357_v3 = vld [vmem:[%s7135_s15 + $0x1b8] sm:$0xff]  ;;  %v483_v6 = vsub.f32 %v315_v0, %v329_v1  ;;  %v1083_v8 = vsel %vm722_vm0, %v329_v1, 0.0 }
  0x5f   : > { %v371_v4 = vld [vmem:[%s7135_s15 + $0x228] sm:$0xff]  ;;  %v385_v5 = vld [vmem:[%s7135_s15 + $0x298] sm:$0xff]  ;;  %v497_v7 = vsub.f32 %v329_v1, %v343_v2  ;;  %v1084_v9 = vsel %vm722_vm0, %v343_v2, 0.0  ;;  %v511_v13 = vsub.f32 %v343_v2, %v357_v3  ;;  %v1086_v16 = vsel %vm722_vm0, %v357_v3, 0.0  ;;  %v7167_v29 = vld [vmem:[%s7135_s15 + $0xd0] sm:$0xff]  ;;  %s11005_s22 = smov (!%p292_p11, %s7023_s22), 2 }
  0x60   : > { %v399_v10 = vld [vmem:[%s7135_s15 + $0x308] sm:$0xff]  ;;  %v413_v11 = vld [vmem:[%s7135_s15 + $0x378] sm:$0xff]  ;;  %v525_v14 = vsub.f32 %v371_v4, %v385_v5  ;;  %v1085_v15 = vadd.f32 %v1084_v9, %v1083_v8  ;;  %v609_v22 = vand.u32 2147483647, %v483_v6  ;;  %v1153_v23 = vsel %vm722_vm0, %v385_v5, 0.0  ;;  %v7182_v54 = vld [vmem:[%s7135_s15 + $0x140] sm:$0xff] }
  0x61   : > { %v427_v12 = vld [vmem:[%s7135_s15 + $0x3e8] sm:$0xff]  ;;  %v441_v17 = vld [vmem:[%s7135_s15 + $0x458] sm:$0xff]  ;;  %v539_v20 = vsub.f32 %v385_v5, %v399_v10  ;;  %v553_v21 = vsub.f32 %v399_v10, %v413_v11  ;;  %v623_v27 = vand.u32 2147483647, %v497_v7  ;;  %v637_v30 = vand.u32 2147483647, %v511_v13 }
  0x62   : > { %v455_v18 = vld [vmem:[%s7135_s15 + $0x4c8] sm:$0xff]  ;;  %v469_v19 = vld [vmem:[%s7135_s15 + $0x538] sm:$0xff]  ;;  %v567_v24 = vsub.f32 %v427_v12, %v441_v17  ;;  %v651_v31 = vand.u32 2147483647, %v525_v14  ;;  %v1087_v33 = vadd.f32 %v1086_v16, %v1085_v15  ;;  %v482_v37 = vsub.f32 %v314_v28, %v7167_v29  ;;  %v7187_v59 = vld [vmem:[%s7135_s15 + $0x1b0] sm:$0xff]  ;;  %s6118_s23 = smul.u32 112, %s11005_s22 }
  0x63   : > { %v581_v25 = vsub.f32 %v441_v17, %v455_v18  ;;  %v595_v26 = vsub.f32 %v455_v18, %v469_v19  ;;  %v665_v32 = vand.u32 2147483647, %v539_v20  ;;  %v679_v34 = vand.u32 2147483647, %v553_v21  ;;  %v370_v60 = vld [vmem:[%s7135_s15 + $0x220] sm:$0xff]  ;;  %v7193_v1 = vld [vmem:[%s7135_s15 + $0x290] sm:$0xff] }
  0x64   : > { %v693_v35 = vand.u32 2147483647, %v567_v24  ;;  %v788_v39 = vsel %vm722_vm0, %v609_v22, 0.0  ;;  %v789_v40 = vsel %vm722_vm0, %v651_v31, 0.0  ;;  %v858_v41 = vsel %vm722_vm0, %v623_v27, 0.0  ;;  %v7196_v2 = vld [vmem:[%s7135_s15 + $0x300] sm:$0xff]  ;;  %s7930_s9 = scalar_lea.vmem %s10879_s5, %s6118_s23  ;;  %s10825_s17 = scalar_lea.vmem %s10878_s4, %s6118_s23 }
  0x65   : > { %v707_v36 = vand.u32 2147483647, %v581_v25  ;;  %v721_v38 = vand.u32 2147483647, %v595_v26  ;;  %v790_v42 = vadd.f32 %v789_v40, %v788_v39  ;;  %v859_v44 = vsel %vm722_vm0, %v665_v32, 0.0  ;;  %v7199_v3 = vld [vmem:[%s7135_s15 + $0x370] sm:$0xff] }
  0x66   : > { %v791_v43 = vsel %vm722_vm0, %v693_v35, 0.0  ;;  %v860_v46 = vadd.f32 %v859_v44, %v858_v41  ;;  %v928_v47 = vsel %vm722_vm0, %v637_v30, 0.0  ;;  %v929_v48 = vsel %vm722_vm0, %v679_v34, 0.0  ;;  %v426_v7 = vld [vmem:[%s7135_s15 + $0x3e0] sm:$0xff]  ;;  %v7206_v8 = vld [vmem:[%s7135_s15 + $0x450] sm:$0xff]  ;;  %v7234_v27 = vld [vmem:[%s7135_s15 + $0x58] sm:$0xff] }
  0x67   : > { %v861_v45 = vsel %vm722_vm0, %v707_v36, 0.0  ;;  %v931_v49 = vsel %vm722_vm0, %v721_v38, 0.0  ;;  %v792_v50 = vadd.f32 %v791_v43, %v790_v42  ;;  %v930_v51 = vadd.f32 %v929_v48, %v928_v47  ;;  %v7209_v9 = vld [vmem:[%s7135_s15 + $0x4c0] sm:$0xff]  ;;  %v7219_v16 = vld [vmem:[%s7135_s15 + $0x530] sm:$0xff]  ;;  %v7237_v28 = vld [vmem:[%s7135_s15 + $0xc8] sm:$0xff] }
  0x68   : > { %v1154_v52 = vsel %vm722_vm0, %v399_v10, 0.0  ;;  %v1156_v53 = vsel %vm722_vm0, %v413_v11, 0.0  ;;  %v862_v55 = vadd.f32 %v861_v45, %v860_v46  ;;  %v1223_v57 = vsel %vm722_vm0, %v441_v17, 0.0  ;;  %v7244_v39 = vld [vmem:[%s7135_s15 + $0x138] sm:$0xff] }
  0x69   : > { %v1155_v56 = vadd.f32 %v1154_v52, %v1153_v23  ;;  %v1224_v58 = vsel %vm722_vm0, %v455_v18, 0.0  ;;  %v932_v61 = vadd.f32 %v931_v49, %v930_v51  ;;  %v998_v62 = vsel %vm722_vm0, %v792_v50, 0.0 }
  0x6a   : > { %v1225_v63 = vadd.f32 %v1224_v58, %v1223_v57  ;;  %v1226_v0 = vsel %vm722_vm0, %v469_v19, 0.0  ;;  %v999_v4 = vsel %vm722_vm0, %v862_v55, 0.0  ;;  %v7202_v6 = vmul.f32 0.33333334, %v1087_v33 }
  0x6b   : > { %v1157_v5 = vadd.f32 %v1156_v53, %v1155_v56  ;;  %v496_v10 = vsub.f32 %v7167_v29, %v7182_v54  ;;  %v1000_v11 = vadd.f32 %v999_v4, %v998_v62  ;;  %v1001_v12 = vsel %vm722_vm0, %v932_v61, 0.0  ;;  %v369_v4 = vld [vmem:[%s7135_s15 + $0x218] sm:$0xff] }
  0x6c   : > { %v1227_v13 = vadd.f32 %v1226_v0, %v1225_v63  ;;  %v510_v14 = vsub.f32 %v7182_v54, %v7187_v59  ;;  %v524_v17 = vsub.f32 %v370_v60, %v7193_v1  ;;  %v538_v18 = vsub.f32 %v7193_v1, %v7196_v2  ;;  %v7272_v0 = vld [vmem:[%s7135_s15 + $0x1a8] sm:$0xff] }
  0x6d   : > { %v7216_v15 = vmul.f32 0.33333334, %v1157_v5  ;;  %v552_v19 = vsub.f32 %v7196_v2, %v7199_v3  ;;  %v1002_v20 = vadd.f32 %v1001_v12, %v1000_v11  ;;  %v566_v22 = vsub.f32 %v426_v7, %v7206_v8  ;;  %v7276_v12 = vld [vmem:[%s7135_s15 + $0x288] sm:$0xff] }
  0x6e   : > { %v1269_v21 = vmul.f32 0.33333334, %v1227_v13  ;;  %v580_v23 = vsub.f32 %v7206_v8, %v7209_v9  ;;  %v608_v26 = vand.u32 2147483647, %v482_v37  ;;  %v594_v31 = vsub.f32 %v7209_v9, %v7219_v16  ;;  %v7279_v13 = vld [vmem:[%s7135_s15 + $0x2f8] sm:$0xff] }
  0x6f   : > { %v1811_v24 = vmax.f32 %v7202_v6, %v7216_v15  ;;  %v1839_v25 = vmin.f32 %v7202_v6, %v7216_v15  ;;  %v1017_v30 = vmul.f32 0.33333334, %v1002_v20  ;;  %v622_v32 = vand.u32 2147483647, %v496_v10 }
  0x70   : > { %v636_v33 = vand.u32 2147483647, %v510_v14  ;;  %v650_v36 = vand.u32 2147483647, %v524_v17  ;;  %v664_v38 = vand.u32 2147483647, %v538_v18  ;;  %v481_v42 = vsub.f32 %v7234_v27, %v7237_v28 }
  0x71   : > { %v7241_v34 = vmax.f32 %v1811_v24, %v1269_v21  ;;  %v1853_v35 = vmin.f32 %v1839_v25, %v1269_v21  ;;  %6017 = vmatprep.subr.mxu0 %v1017_v30  ;;  %v678_v40 = vand.u32 2147483647, %v552_v19  ;;  %v692_v37 = vand.u32 2147483647, %v566_v22  ;;  %v7282_v14 = vld [vmem:[%s7135_s15 + $0x368] sm:$0xff] }
  0x72   : > { %v706_v41 = vand.u32 2147483647, %v580_v23  ;;  %6018 = vmatpush3.msra.mxu0 %v1017_v30  ;;  %v495_v48 = vsub.f32 %v7237_v28, %v7244_v39  ;;  %v783_v50 = vsel %vm722_vm0, %v608_v26, 0.0  ;;  %v720_v53 = vand.u32 2147483647, %v594_v31  ;;  %v7289_v22 = vld [vmem:[%s7135_s15 + $0x448] sm:$0xff] }
  0x73   : > { %v7249_v43 = vsub.f32 %v7241_v34, %v1853_v35  ;;  %v1881_v44 = vadd.f32 1e-08, %v7241_v34  ;;  %v1965_v45 = vsub.f32 %v7241_v34, %v7202_v6  ;;  %v1979_v46 = vsub.f32 %v7241_v34, %v7216_v15  ;;  %v7292_v23 = vld [vmem:[%s7135_s15 + $0x4b8] sm:$0xff]  ;;  %v7296_v27 = vld [vmem:[%s7135_s15 + $0x528] sm:$0xff] }
  0x74   : > { %v1993_v47 = vsub.f32 %v7241_v34, %v1269_v21  ;;  %vm2007_vm1 = vcmp.eq.f32.partialorder %v7241_v34, %v7202_v6  ;;  %vm2035_vm2 = vcmp.eq.f32.partialorder %v7241_v34, %v7216_v15  ;;  %v784_v55 = vsel %vm722_vm0, %v650_v36, 0.0  ;;  %v425_v21 = vld [vmem:[%s7135_s15 + $0x3d8] sm:$0xff] }
  0x75   : > { %6621 = vrcp.f32 %v1881_v44  ;;  %vm1923_vm3 = vcmp.eq.f32.partialorder %v7249_v43, 0.0  ;;  %v2091_v49 = vsub.f32 %v1979_v46, %v1965_v45  ;;  %v785_v58 = vadd.f32 %v784_v55, %v783_v50 }
  0x76   : > { %v1937_v51 = vsel %vm1923_vm3, 1.0, %v7249_v43  ;;  %v2049_v52 = vsub.f32 %v1965_v45, %v1993_v47  ;;  %v786_v60 = vsel %vm722_vm0, %v692_v37, 0.0  ;;  %v853_v61 = vsel %vm722_vm0, %v622_v32, 0.0 }
  0x77   : > { %6623 = vrcp.f32 %v1937_v51  ;;  %v2063_v56 = vmul.f32 2.0, %v1937_v51  ;;  %v2105_v57 = vmul.f32 4.0, %v1937_v51  ;;  %v854_v62 = vsel %vm722_vm0, %v664_v38, 0.0 }
  0x78   : > { %v856_v63 = vsel %vm722_vm0, %v706_v41, 0.0  ;;  %v787_v10 = vadd.f32 %v786_v60, %v785_v58  ;;  %v855_v11 = vadd.f32 %v854_v62, %v853_v61  ;;  %v2021_v17 = vsub.f32 %v1993_v47, %v1979_v46 }
  0x79   : > { %v2077_v5 = vadd.f32 %v2063_v56, %v2049_v52  ;;  %v2119_v7 = vadd.f32 %v2105_v57, %v2091_v49  ;;  %v923_v18 = vsel %vm722_vm0, %v636_v33, 0.0  ;;  %v924_v19 = vsel %vm722_vm0, %v678_v40, 0.0 }
  0x7a   : > { %v926_v20 = vsel %vm722_vm0, %v720_v53, 0.0  ;;  %v857_v24 = vadd.f32 %v856_v63, %v855_v11  ;;  %v925_v25 = vadd.f32 %v924_v19, %v923_v18  ;;  %v993_v26 = vsel %vm722_vm0, %v787_v10, 0.0  ;;  %v312_v19 = vld [vmem:[%s7135_s15 + $0x50] sm:$0xff] }
  0x7b   : > { %v509_v30 = vsub.f32 %v7244_v39, %v7272_v0  ;;  %v2133_v31 = vsel %vm2035_vm2, %v2077_v5, %v2119_v7  ;;  %v523_v32 = vsub.f32 %v369_v4, %v7276_v12  ;;  %v537_v33 = vsub.f32 %v7276_v12, %v7279_v13 }
  0x7c   : > { %v551_v35 = vsub.f32 %v7279_v13, %v7282_v14  ;;  %v927_v36 = vadd.f32 %v926_v20, %v925_v25  ;;  %v994_v38 = vsel %vm722_vm0, %v857_v24, 0.0  ;;  %v565_v40 = vsub.f32 %v425_v21, %v7289_v22  ;;  %v326_v20 = vld [vmem:[%s7135_s15 + $0xc0] sm:$0xff]  ;;  %v340_v25 = vld [vmem:[%s7135_s15 + $0x130] sm:$0xff] }
  0x7d   : > { %v579_v37 = vsub.f32 %v7289_v22, %v7292_v23  ;;  %v995_v41 = vadd.f32 %v994_v38, %v993_v26  ;;  %v593_v15 = vsub.f32 %v7292_v23, %v7296_v27  ;;  %v607_v44 = vand.u32 2147483647, %v481_v42  ;;  %v368_v26 = vld [vmem:[%s7135_s15 + $0x210] sm:$0xff] }
  0x7e   : > { %v621_v45 = vand.u32 2147483647, %v495_v48  ;;  %v2147_v46 = vsel %vm2007_vm1, %v2021_v17, %v2133_v31  ;;  %v996_v47 = vsel %vm722_vm0, %v927_v36, 0.0  ;;  %v635_v49 = vand.u32 2147483647, %v509_v30  ;;  %v382_v30 = vld [vmem:[%s7135_s15 + $0x280] sm:$0xff] }
  0x7f   : > { %v649_v50 = vand.u32 2147483647, %v523_v32  ;;  %v997_v51 = vadd.f32 %v996_v47, %v995_v41  ;;  %v663_v52 = vand.u32 2147483647, %v537_v33  ;;  %v677_v53 = vand.u32 2147483647, %v551_v35 }
  0x80   : > { %v691_v55 = vand.u32 2147483647, %v565_v40  ;;  %v705_v56 = vand.u32 2147483647, %v579_v37  ;;  %v719_v57 = vand.u32 2147483647, %v593_v15  ;;  %v480_v41 = vsub.f32 %v312_v19, %v326_v20 }
  0x81   : > { %v778_v58 = vsel %vm722_vm0, %v607_v44, 0.0  ;;  %v779_v60 = vsel %vm722_vm0, %v649_v50, 0.0  ;;  %v1016_v48 = vmul.f32 0.33333334, %v997_v51  ;;  %v848_v62 = vsel %vm722_vm0, %v621_v45, 0.0  ;;  %v396_v33 = vld [vmem:[%s7135_s15 + $0x2f0] sm:$0xff] }
  0x82   : > { %v6622_v42 = vpop.eup %6621  ;;  %v780_v6 = vadd.f32 %v779_v60, %v778_v58  ;;  %v781_v61 = vsel %vm722_vm0, %v691_v55, 0.0  ;;  %v849_v4 = vsel %vm722_vm0, %v663_v52, 0.0  ;;  %v851_v5 = vsel %vm722_vm0, %v705_v56, 0.0  ;;  %v424_v38 = vld [vmem:[%s7135_s15 + $0x3d0] sm:$0xff]  ;;  %v438_v40 = vld [vmem:[%s7135_s15 + $0x440] sm:$0xff] }
  0x83   : > { %v7323_v63 = vmul.f32 %v6622_v42, %v7249_v43  ;;  %v918_v7 = vsel %vm722_vm0, %v635_v49, 0.0  ;;  %6019 = vmatprep.subr.mxu0 %v1016_v48  ;;  %v850_v17 = vadd.f32 %v849_v4, %v848_v62  ;;  %v919_v18 = vsel %vm722_vm0, %v677_v53, 0.0  ;;  %v452_v37 = vld [vmem:[%s7135_s15 + $0x4b0] sm:$0xff]  ;;  %v354_v50 = vld [vmem:[%s7135_s15 + $0x1a0] sm:$0xff] }
  0x84   : > { %v6624_v10 = vpop.eup %6623  ;;  %v782_v11 = vadd.f32 %v781_v61, %v780_v6  ;;  %v921_v43 = vsel %vm722_vm0, %v719_v57, 0.0  ;;  %6020 = vmatpush3.msra.mxu0 %v1016_v48  ;;  %v920_v24 = vadd.f32 %v919_v18, %v918_v7  ;;  %v494_v44 = vsub.f32 %v326_v20, %v340_v25  ;;  %v410_v57 = vld [vmem:[%s7135_s15 + $0x360] sm:$0xff] }
  0x85   : > { %v2161_v21 = vmul.f32 %v6624_v10, %v2147_v46  ;;  %v852_v31 = vadd.f32 %v851_v5, %v850_v17  ;;  %v522_v45 = vsub.f32 %v368_v26, %v382_v30  ;;  %v536_v51 = vsub.f32 %v382_v30, %v396_v33  ;;  %v466_v58 = vld [vmem:[%s7135_s15 + $0x520] sm:$0xff] }
  0x86   : > { %v988_v32 = vsel %vm722_vm0, %v782_v11, 0.0  ;;  %v922_v36 = vadd.f32 %v921_v43, %v920_v24  ;;  %v564_v52 = vsub.f32 %v424_v38, %v438_v40  ;;  %v578_v53 = vsub.f32 %v438_v40, %v452_v37 }
  0x87   : > { %v2176_v35 = vmul.f32 0.16666667, %v2161_v21  ;;  %v989_v15 = vsel %vm722_vm0, %v852_v31, 0.0  ;;  %v606_v60 = vand.u32 2147483647, %v480_v41  ;;  %v5508_v42 = vmul.f32 4.0, %v7241_v34 }
  0x88   : > { %v990_v47 = vadd.f32 %v989_v15, %v988_v32  ;;  %v991_v49 = vsel %vm722_vm0, %v922_v36, 0.0  ;;  %v508_v48 = vsub.f32 %v340_v25, %v354_v50  ;;  %v648_v6 = vand.u32 2147483647, %v522_v45 }
  0x89   : > { %v2307_v46 = vand.u32 2147483647, %v2176_v35  ;;  %v620_v4 = vand.u32 2147483647, %v494_v44  ;;  %v662_v5 = vand.u32 2147483647, %v536_v51  ;;  %v550_v7 = vsub.f32 %v396_v33, %v410_v57 }
  0x8a   : > { %v992_v56 = vadd.f32 %v991_v49, %v990_v47  ;;  %v592_v10 = vsub.f32 %v452_v37, %v466_v58  ;;  %v690_v11 = vand.u32 2147483647, %v564_v52  ;;  %v704_v17 = vand.u32 2147483647, %v578_v53 }
  0x8b   : > { %v2310_v55 = vfloor.f32 %v2307_v46  ;;  %v2315_v18 = vand.u32 2147483648, %v2176_v35  ;;  %v773_v43 = vsel %vm722_vm0, %v606_v60, 0.0  ;;  %v774_v19 = vsel %vm722_vm0, %v648_v6, 0.0  ;;  %v7382_v6 = vld [vmem:[%s7135_s15 + $0x48] sm:$0xff] }
  0x8c   : > { %v1015_v62 = vmul.f32 0.33333334, %v992_v56  ;;  %v7348_v21 = vadd.f32 1.0, %v5508_v42  ;;  %v775_v34 = vadd.f32 %v774_v19, %v773_v43  ;;  %v776_v24 = vsel %vm722_vm0, %v690_v11, 0.0  ;;  %v7407_v19 = vld [vmem:[%s7135_s15 + $0x2e8] sm:$0xff] }
  0x8d   : > { %v2311_v61 = vsub.f32 %v2307_v46, %v2310_v55  ;;  %v634_v26 = vand.u32 2147483647, %v508_v48  ;;  %v843_v30 = vsel %vm722_vm0, %v620_v4, 0.0  ;;  %v844_v31 = vsel %vm722_vm0, %v662_v5, 0.0  ;;  %v7392_v5 = vld [vmem:[%s7135_s15 + $0x198] sm:$0xff] }
  0x8e   : > { %6021 = vmatprep.subr.mxu0 %v1015_v62  ;;  %v676_v32 = vand.u32 2147483647, %v550_v7  ;;  %v718_v33 = vand.u32 2147483647, %v592_v10  ;;  %v777_v35 = vadd.f32 %v776_v24, %v775_v34  ;;  %v846_v36 = vsel %vm722_vm0, %v704_v17, 0.0  ;;  %v7395_v7 = vld [vmem:[%s7135_s15 + $0x208] sm:$0xff] }
  0x8f   : > { %vm2312_vm4 = vcmp.eq.f32.partialorder %v2311_v61, 1.0  ;;  %6022 = vmatpush3.msra.mxu0 %v1015_v62  ;;  %v1078_v40 = vsel %vm722_vm0, %v7167_v29, 0.0  ;;  %v1079_v37 = vsel %vm722_vm0, %v7182_v54, 0.0  ;;  %v845_v41 = vadd.f32 %v844_v31, %v843_v30  ;;  %v7388_v62 = vld [vmem:[%s7135_s15 + $0x128] sm:$0xff]  ;;  %v7398_v10 = vld [vmem:[%s7135_s15 + $0x278] sm:$0xff] }
  0x90   : > { %v2313_v20 = vsel %vm2312_vm4, 0.0, %v2311_v61  ;;  %v1080_v15 = vadd.f32 %v1079_v37, %v1078_v40  ;;  %v1081_v44 = vsel %vm722_vm0, %v7187_v59, 0.0  ;;  %v1148_v45 = vsel %vm722_vm0, %v7193_v1, 0.0  ;;  %v7385_v61 = vld [vmem:[%s7135_s15 + $0xb8] sm:$0xff] }
  0x91   : > { %v2314_v25 = vand.u32 2147483647, %v2313_v20  ;;  %v1149_v46 = vsel %vm722_vm0, %v7196_v2, 0.0  ;;  %v913_v49 = vsel %vm722_vm0, %v634_v26, 0.0  ;;  %v1151_v54 = vsel %vm722_vm0, %v7199_v3, 0.0  ;;  %v7410_v24 = vld [vmem:[%s7135_s15 + $0x358] sm:$0xff] }
  0x92   : > { %v1082_v29 = vadd.f32 %v1081_v44, %v1080_v15  ;;  %v1150_v50 = vadd.f32 %v1149_v46, %v1148_v45  ;;  %v1218_v59 = vsel %vm722_vm0, %v7206_v8, 0.0  ;;  %v1219_v1 = vsel %vm722_vm0, %v7209_v9, 0.0  ;;  %v7416_v26 = vld [vmem:[%s7135_s15 + $0x438] sm:$0xff]  ;;  %v7436_v45 = vld [vmem:[%s7135_s15 + $0x4a8] sm:$0xff] }
  0x93   : > { %v2316_v38 = vor.u32 %v2315_v18, %v2314_v25  ;;  %v1221_v2 = vsel %vm722_vm0, %v7219_v16, 0.0  ;;  %v847_v52 = vadd.f32 %v846_v36, %v845_v41  ;;  %v1220_v56 = vadd.f32 %v1219_v1, %v1218_v59  ;;  %v7413_v25 = vld [vmem:[%s7135_s15 + $0x3c8] sm:$0xff] }
  0x94   : > { %v1152_v55 = vadd.f32 %v1151_v54, %v1150_v50  ;;  %v7373_v3 = vmul.f32 0.33333334, %v1082_v29  ;;  %v914_v8 = vsel %vm722_vm0, %v676_v32, 0.0  ;;  %v916_v57 = vsel %vm722_vm0, %v718_v33, 0.0 }
  0x95   : > { %vm2330_vm5 = vcmp.ne.f32.partialorder %v2316_v38, 0.0  ;;  %vm2344_vm6 = vcmp.lt.f32.partialorder %v2316_v38, 0.0  ;;  %v2372_v47 = vadd.f32 1.0, %v2316_v38  ;;  %v983_v9 = vsel %vm722_vm0, %v777_v35, 0.0 }
  0x96   : > { %vm2358_vm7 = vmand %vm2344_vm6, %vm2330_vm5  ;;  %v984_v58 = vsel %vm722_vm0, %v847_v52, 0.0  ;;  %v1222_v60 = vadd.f32 %v1221_v2, %v1220_v56  ;;  %v7379_v42 = vmul.f32 0.33333334, %v1152_v55  ;;  %v915_v48 = vadd.f32 %v914_v8, %v913_v49  ;;  %v7465_v8 = vld [vmem:[%s7135_s15 + $0x518] sm:$0xff] }
  0x97   : > { %v2386_v51 = vsel %vm2358_vm7, %v2372_v47, %v2316_v38  ;;  %v6509_v4 = vcvt.f32.s32 %v7348_v21  ;;  %v985_v34 = vadd.f32 %v984_v58, %v983_v9  ;;  %v479_v30 = vsub.f32 %v7382_v6, %v7385_v61 }
  0x98   : > { %v2400_v53 = vmul.f32 6.2831855, %v2386_v51  ;;  %v1268_v17 = vmul.f32 0.33333334, %v1222_v60  ;;  %v1810_v18 = vmax.f32 %v7373_v3, %v7379_v42  ;;  %v1838_v43 = vmin.f32 %v7373_v3, %v7379_v42 }
  0x99   : > { %v917_v20 = vadd.f32 %v916_v57, %v915_v48  ;;  %v493_v31 = vsub.f32 %v7385_v61, %v7388_v62  ;;  %v507_v35 = vsub.f32 %v7388_v62, %v7392_v5  ;;  %v521_v36 = vsub.f32 %v7395_v7, %v7398_v10 }
  0x9a   : > { %v2414_v16 = vmul.f32 2.0, %v2400_v53  ;;  %v7428_v38 = vmax.f32 %v1810_v18, %v1268_v17  ;;  %v1852_v40 = vmin.f32 %v1838_v43, %v1268_v17  ;;  %v535_v41 = vsub.f32 %v7398_v10, %v7407_v19 }
  0x9b   : > { %v986_v37 = vsel %vm722_vm0, %v917_v20, 0.0  ;;  %v549_v46 = vsub.f32 %v7407_v19, %v7410_v24  ;;  %v563_v47 = vsub.f32 %v7413_v25, %v7416_v26  ;;  %v577_v53 = vsub.f32 %v7416_v26, %v7436_v45 }
  0x9c   : > { %v7400_v11 = vmul.f32 3.1415927, %v2414_v16  ;;  %v7443_v49 = vsub.f32 %v7428_v38, %v1852_v40  ;;  %v1880_v29 = vadd.f32 1e-08, %v7428_v38  ;;  %v1964_v50 = vsub.f32 %v7428_v38, %v7373_v3 }
  0x9d   : > { %v7450_v54 = vsub.f32 %v7428_v38, %v7379_v42  ;;  %v7453_v1 = vsub.f32 %v7428_v38, %v1268_v17  ;;  %v987_v2 = vadd.f32 %v986_v37, %v985_v34  ;;  %vm2006_vm9 = vcmp.eq.f32.partialorder %v7428_v38, %v7373_v3 }
  0x9e   : > { %v3768_v32 = vand.u32 2147483647, %v7400_v11  ;;  %v3771_v33 = vand.u32 2139095040, %v7400_v11  ;;  %6625 = vrcp.f32 %v1880_v29  ;;  %vm1922_vm8 = vcmp.eq.f32.partialorder %v7443_v49, 0.0 }
  0x9f   : > { %v2090_v52 = vsub.f32 %v7450_v54, %v1964_v50  ;;  %v1936_v56 = vsel %vm1922_vm8, 1.0, %v7443_v49  ;;  %vm2034_vm10 = vcmp.eq.f32.partialorder %v7428_v38, %v7379_v42  ;;  %v2048_v57 = vsub.f32 %v1964_v50, %v7453_v1 }
  0xa0   : > { %v3772_v15 = vshrl.u32 %v3771_v33, 23  ;;  %v3775_v44 = vand.u32 8388607, %v3768_v32  ;;  %6627 = vrcp.f32 %v1936_v56  ;;  %v2062_v9 = vmul.f32 2.0, %v1936_v56 }
  0xa1   : > { %v2104_v58 = vmul.f32 4.0, %v1936_v56  ;;  %v2020_v60 = vsub.f32 %v7453_v1, %v7450_v54  ;;  %v1014_v48 = vmul.f32 0.33333334, %v987_v2  ;;  %v591_v5 = vsub.f32 %v7436_v45, %v7465_v8 }
  0xa2   : > { %v5871_v59 = vadd.s32 4294967169, %v3772_v15  ;;  %v3776_v51 = vor.u32 8388608, %v3775_v44  ;;  %v2076_v61 = vadd.f32 %v2062_v9, %v2048_v57  ;;  %v605_v17 = vand.u32 2147483647, %v479_v30 }
  0xa3   : > { %v2118_v62 = vadd.f32 %v2104_v58, %v2090_v52  ;;  %6023 = vmatprep.subr.mxu0 %v1014_v48  ;;  %v619_v18 = vand.u32 2147483647, %v493_v31  ;;  %v7477_v19 = vand.u32 2147483647, %v507_v35  ;;  %v647_v20 = vand.u32 2147483647, %v521_v36 }
  0xa4   : > { %v3778_v55 = vadd.s32 1, %v5871_v59  ;;  %v7468_v16 = vshll.u32 %v3776_v51, 8  ;;  %6024 = vmatpush3.msra.mxu0 %v1014_v48  ;;  %v661_v34 = vand.u32 2147483647, %v535_v41  ;;  %v6968_v25 = vmov 683565275  }
  0xa5   : > { %v2132_v43 = vsel %vm2034_vm10, %v2076_v61, %v2118_v62  ;;  %v6969_v40 = vmov 2475754826   ;;  %v6970_v15 = vmov 2131351028   ;;  %v10887_v31 = vmov 2102212464  }
  0xa6   : > { %vm3779_vm11 = vcmp.gt.s32.totalorder %v3778_v55, 0  ;;  %v10885_v42 = vmov 920167782   ;;  %v675_v35 = vand.u32 2147483647, %v549_v46  ;;  %v2146_v57 = vsel %vm2006_vm9, %v2020_v60, %v2132_v43 }
  0xa7   : > { %v3780_v6 = vsel %vm3779_vm11, %v3778_v55, 0  ;;  %v689_v50 = vand.u32 2147483647, %v563_v47  ;;  %v10883_v1 = vmov 1326507024   ;;  %v5507_v45 = vmul.f32 4.0, %v7428_v38 }
  0xa8   : > { %v3781_v7 = vshrl.u32 %v3780_v6, 5  ;;  %v3782_v10 = vand.u32 31, %v3780_v6  ;;  %v703_v3 = vand.u32 2147483647, %v577_v53  ;;  %v838_v53 = vsel %vm722_vm0, %v619_v18, 0.0 }
  0xa9   : > { %v771_v26 = vsel %vm722_vm0, %v689_v50, 0.0  ;;  %vm7546_vm3 = vcmp.le.f32.partialorder %v3768_v32, 0.7853982  ;;  %vm3770_vm4 = vcmp.lt.s32.totalorder %v7400_v11, 0  ;;  %v7562_v32 = vld [vmem:[%s7135_s15 + $0x200] sm:$0xff] }
  0xaa   : > { %v3783_v24 = vsub.s32 32, %v3782_v10  ;;  %v3785_v33 = vshll.u32 %v6968_v25, %v3782_v10  ;;  %v3788_v37 = vshll.u32 %v6969_v40, %v3782_v10  ;;  %v3791_v30 = vshll.u32 %v6970_v15, %v3782_v10 }
  0xab   : > { %v3794_v44 = vshll.u32 %v10887_v31, %v3782_v10  ;;  %v3797_v29 = vshll.u32 %v10885_v42, %v3782_v10  ;;  %vm3800_vm12 = vcmp.lt.s32.totalorder %v3781_v7, 1  ;;  %vm3801_vm13 = vcmp.lt.s32.totalorder %v3781_v7, 2  ;;  %v6626_v9 = vpop.eup %6625 }
  0xac   : > { %v3784_v36 = vshrl.u32 %v6968_v25, %v3783_v24  ;;  %v3786_v41 = vshrl.u32 %v6969_v40, %v3783_v24  ;;  %v3789_v54 = vshrl.u32 %v6970_v15, %v3783_v24  ;;  %v3792_v59 = vshrl.u32 %v10887_v31, %v3783_v24 }
  0xad   : > { %v3795_v51 = vshrl.u32 %v10885_v42, %v3783_v24  ;;  %v3798_v2 = vshrl.u32 %v10883_v1, %v3783_v24  ;;  %vm3803_vm14 = vcmp.lt.s32.totalorder %v3781_v7, 4  ;;  %vm3802_vm15 = vcmp.lt.s32.totalorder %v3781_v7, 3 }
  0xae   : > { %v3787_v52 = vor.u32 %v3786_v41, %v3785_v33  ;;  %v3790_v55 = vor.u32 %v3789_v54, %v3788_v37  ;;  %v3793_v56 = vor.u32 %v3792_v59, %v3791_v30  ;;  %v7494_v33 = vmul.f32 %v6626_v9, %v7443_v49  ;;  %v6628_v37 = vpop.eup %6627 }
  0xaf   : > { %v3796_v46 = vor.u32 %v3795_v51, %v3794_v44  ;;  %v3799_v47 = vor.u32 %v3798_v2, %v3797_v29  ;;  %v768_v41 = vsel %vm722_vm0, %v605_v17, 0.0  ;;  %v717_v7 = vand.u32 2147483647, %v591_v5 }
  0xb0   : > { %v3804_v58 = vsel %vm3800_vm12, %v3784_v36, %v3787_v52  ;;  %v3805_v48 = vsel %vm3803_vm14, %v3793_v56, 2102212464  ;;  %v3808_v6 = vsel %vm3800_vm12, %v3787_v52, %v3790_v55  ;;  %v3812_v61 = vsel %vm3800_vm12, %v3790_v55, %v3793_v56 }
  0xb1   : > { %v3806_v62 = vsel %vm3802_vm15, %v3790_v55, %v3805_v48  ;;  %v3809_v10 = vsel %vm3803_vm14, %v3796_v46, 920167782  ;;  %v3813_v24 = vsel %vm3803_vm14, %v3799_v47, 1326507024  ;;  %v2160_v36 = vmul.f32 %v6628_v37, %v2146_v57 }
  0xb2   : > { %v3807_v30 = vsel %vm3801_vm13, %v3804_v58, %v3806_v62  ;;  %v3810_v44 = vsel %vm3802_vm15, %v3793_v56, %v3809_v10  ;;  %v3814_v29 = vsel %vm3802_vm15, %v3796_v46, %v3813_v24  ;;  %v769_v52 = vsel %vm722_vm0, %v647_v20, 0.0 }
  0xb3   : > { %v3811_v60 = vsel %vm3801_vm13, %v3808_v6, %v3810_v44  ;;  %v3815_v43 = vsel %vm3801_vm13, %v3812_v61, %v3814_v29  ;;  %v2175_v2 = vmul.f32 0.16666667, %v2160_v36  ;;  %v770_v17 = vadd.f32 %v769_v52, %v768_v41  ;;  %v7542_v52 = vld [vmem:[%s7135_s15 + $0xb0] sm:$0xff] }
  0xb4   : > { %v7504_v54 = vmul.u32.u64.low %v7468_v16, %v3815_v43  ;;  %v7505_v49 = vmul.u32.u64.high %v7468_v16, %v3815_v43, %v7504_v54  ;;  %v7508_v59 = vmul.u32.u64.low %v7468_v16, %v3811_v60  ;;  %v7509_v51 = vmul.u32.u64.high %v7468_v16, %v3811_v60, %v7508_v59 }
  0xb5   : > { %v839_v55 = vsel %vm722_vm0, %v661_v34, 0.0  ;;  %v841_v56 = vsel %vm722_vm0, %v703_v3, 0.0  ;;  %v3823_v46 = vmul.u32 %v7468_v16, %v3807_v30  ;;  %v2297_v47 = vand.u32 2147483647, %v2175_v2 }
  0xb6   : > { %v840_v57 = vadd.f32 %v839_v55, %v838_v53  ;;  %v908_v20 = vsel %vm722_vm0, %v7477_v19, 0.0  ;;  %vm3825_vm1 = vc.u32 %v7505_v49, %v7508_v59  ;;  %v3826_v18 = vadd.s32 1, %v7509_v51 }
  0xb7   : > { %v772_v50 = vadd.f32 %v771_v26, %v770_v17  ;;  %v2300_v9 = vfloor.f32 %v2297_v47  ;;  %v909_v5 = vsel %vm722_vm0, %v675_v35, 0.0  ;;  %v6510_v16 = vcvt.s32.f32 %v6509_v4  ;;  %v7554_v17 = vld [vmem:[%s7135_s15 + $0x120] sm:$0xff] }
  0xb8   : > { %v842_v8 = vadd.f32 %v841_v56, %v840_v57  ;;  %v3827_v34 = vsel %vm3825_vm1, %v3826_v18, %v7509_v51  ;;  %v910_v58 = vadd.f32 %v909_v5, %v908_v20  ;;  %v911_v48 = vsel %vm722_vm0, %v717_v7, 0.0 }
  0xb9   : > { %v3828_v19 = vadd.s32 %v3827_v34, %v3823_v46  ;;  %v2301_v6 = vsub.f32 %v2297_v47, %v2300_v9  ;;  %v978_v61 = vsel %vm722_vm0, %v772_v50, 0.0  ;;  %v6512_v62 = vand.u32 2147483648, %v7348_v21  ;;  %v7559_v46 = vld [vmem:[%s7135_s15 + $0x190] sm:$0xff]  ;;  %v7574_v9 = vld [vmem:[%s7135_s15 + $0x2e0] sm:$0xff] }
  0xba   : > { %v912_v10 = vadd.f32 %v911_v48, %v910_v58  ;;  %v979_v38 = vsel %vm722_vm0, %v842_v8, 0.0  ;;  %v2305_v35 = vand.u32 2147483648, %v2175_v2  ;;  %v7533_v37 = vadd.f32 1.0, %v5507_v45  ;;  %v7539_v2 = vld [vmem:[%s7135_s15 + $0x40] sm:$0xff]  ;;  %v7565_v47 = vld [vmem:[%s7135_s15 + $0x270] sm:$0xff] }
  0xbb   : > { %v3829_v24 = vadd.s32 536870912, %v3828_v19  ;;  %vm2302_vm2 = vcmp.eq.f32.partialorder %v2301_v6, 1.0  ;;  %v6511_v4 = vand.u32 2147483647, %v6510_v16  ;;  %v980_v44 = vadd.f32 %v979_v38, %v978_v61  ;;  %v7577_v45 = vld [vmem:[%s7135_s15 + $0x350] sm:$0xff]  ;;  %v7593_v48 = vld [vmem:[%s7135_s15 + $0x3c0] sm:$0xff] }
  0xbc   : > { %v2303_v30 = vsel %vm2302_vm2, 0.0, %v2301_v6  ;;  %v981_v29 = vsel %vm722_vm0, %v912_v10, 0.0  ;;  %v6507_v41 = vand.u32 2147483647, %v7348_v21  ;;  %v6501_v51 = vcvt.f32.s32 %v7533_v37  ;;  %v7606_v10 = vld [vmem:[%s7135_s15 + $0x4a0] sm:$0xff] }
  0xbd   : > { %v3830_v3 = vshrl.u32 %v3829_v24, 30  ;;  %v2304_v60 = vand.u32 2147483647, %v2303_v30  ;;  %v982_v43 = vadd.f32 %v981_v29, %v980_v44  ;;  %v7551_v53 = vor.u32 %v6512_v62, %v6511_v4 }
  0xbe   : > { %v3824_v57 = vadd.s32 %v7508_v59, %v7505_v49  ;;  %v6499_v50 = vand.u32 2147483647, %v7533_v37  ;;  %v478_v8 = vsub.f32 %v7539_v2, %v7542_v52  ;;  %v7582_v49 = vcvt.s32.f32 %v6501_v51 }
  0xbf   : > { %v3831_v36 = vshll.u32 %v3830_v3, 30  ;;  %v2306_v54 = vor.u32 %v2305_v35, %v2304_v60  ;;  %v1013_v7 = vmul.f32 0.33333334, %v982_v43  ;;  %v3854_v56 = vsub.s32 4, %v3830_v3  ;;  %v7621_v60 = vld [vmem:[%s7135_s15 + $0x510] sm:$0xff] }
  0xc0   : > { %v1073_v59 = vsel %vm722_vm0, %v7237_v28, 0.0  ;;  %v492_v34 = vsub.f32 %v7542_v52, %v7554_v17  ;;  %v1074_v58 = vsel %vm722_vm0, %v7244_v39, 0.0  ;;  %v506_v6 = vsub.f32 %v7554_v17, %v7559_v46 }
  0xc1   : > { %v7556_v55 = vsub.s32 %v3828_v19, %v3831_v36  ;;  %vm2329_vm5 = vcmp.ne.f32.partialorder %v2306_v54, 0.0  ;;  %vm2343_vm6 = vcmp.lt.f32.partialorder %v2306_v54, 0.0  ;;  %v2371_v18 = vadd.f32 1.0, %v2306_v54  ;;  %6025 = vmatprep.subr.mxu0 %v1013_v7  ;;  %v7596_v19 = vld [vmem:[%s7135_s15 + $0x430] sm:$0xff] }
  0xc2   : > { %vm7568_vm7 = vmand %vm2343_vm6, %vm2329_vm5  ;;  %6026 = vmatpush3.msra.mxu0 %v1013_v7  ;;  %v520_v28 = vsub.f32 %v7562_v32, %v7565_v47  ;;  %v3855_v62 = vsel %vm3770_vm4, %v3854_v56, %v3830_v3  ;;  %v534_v39 = vsub.f32 %v7565_v47, %v7574_v9  ;;  %v548_v38 = vsub.f32 %v7574_v9, %v7577_v45 }
  0xc3   : > { %v3834_v5 = vsub.s32 0, %v7556_v55  ;;  %v2385_v16 = vsel %vm7568_vm7, %v2371_v18, %v2306_v54  ;;  %v1075_v35 = vadd.f32 %v1074_v58, %v1073_v59  ;;  %v1076_v4 = vsel %vm722_vm0, %v7272_v0, 0.0 }
  0xc4   : > { %v2399_v24 = vmul.f32 6.2831855, %v2385_v16  ;;  %v1143_v30 = vsel %vm722_vm0, %v7276_v12, 0.0  ;;  %v1144_v29 = vsel %vm722_vm0, %v7279_v13, 0.0  ;;  %v1213_v3 = vsel %vm722_vm0, %v7289_v22, 0.0 }
  0xc5   : > { %v5872_v61 = vmin.u32 %v3834_v5, %v7556_v55  ;;  %v562_v43 = vsub.f32 %v7593_v48, %v7596_v19  ;;  %v3857_v36 = vsel %vm7546_vm3, 0, %v3855_v62  ;;  %v1146_v0 = vsel %vm722_vm0, %v7282_v14, 0.0 }
  0xc6   : > { %v2413_v54 = vmul.f32 2.0, %v2399_v24  ;;  %v576_v12 = vsub.f32 %v7596_v19, %v7606_v10  ;;  %v1077_v13 = vadd.f32 %v1076_v4, %v1075_v35  ;;  %v1145_v2 = vadd.f32 %v1144_v29, %v1143_v30 }
  0xc7   : > { %v3836_v44 = vclz %v5872_v61  ;;  %v1214_v22 = vsel %vm722_vm0, %v7292_v23, 0.0  ;;  %v7633_v52 = vand.u32 3, %v3857_v36  ;;  %v590_v56 = vsub.f32 %v7606_v10, %v7621_v60 }
  0xc8   : > { %v7635_v7 = vmul.f32 3.1415927, %v2413_v54  ;;  %v1215_v17 = vadd.f32 %v1214_v22, %v1213_v3  ;;  %v5358_v46 = vadd.s32 3, %v3857_v36  ;;  %v1147_v14 = vadd.f32 %v1146_v0, %v1145_v2 }
  0xc9   : > { %v5873_v51 = vadd.s32 4294967294, %v3836_v44  ;;  %v1216_v32 = vsel %vm722_vm0, %v7296_v27, 0.0  ;;  %v7643_v23 = vand.u32 2147483647, %v478_v8  ;;  %v7646_v59 = vmul.f32 0.33333334, %v1077_v13 }
  0xca   : > { %v3665_v20 = vand.u32 2147483647, %v7635_v7  ;;  %v3668_v18 = vand.u32 2139095040, %v7635_v7  ;;  %v1217_v48 = vadd.f32 %v1216_v32, %v1215_v17  ;;  %v7650_v19 = vand.u32 2147483647, %v492_v34 }
  0xcb   : > { %vm5874_vm8 = vcmp.lt.s32.totalorder %v5873_v51, 0  ;;  %v7652_v62 = vmul.f32 0.33333334, %v1147_v14  ;;  %v7654_v24 = vand.u32 2147483647, %v506_v6  ;;  %v7662_v3 = vand.u32 3, %v5358_v46 }
  0xcc   : > { %v3839_v47 = vsel %vm5874_vm8, 0, %v5873_v51  ;;  %v3669_v16 = vshrl.u32 %v3668_v18, 23  ;;  %v3672_v58 = vand.u32 8388607, %v3665_v20  ;;  %v1267_v4 = vmul.f32 0.33333334, %v1217_v48 }
  0xcd   : > { %v3840_v9 = vsub.s32 32, %v3839_v47  ;;  %v3841_v45 = vshll.u32 %v7556_v55, %v3839_v47  ;;  %v3844_v5 = vsub.s32 4294967266, %v3839_v47  ;;  %v7656_v55 = vand.u32 2147483647, %v520_v28 }
  0xce   : > { %v5867_v8 = vadd.s32 4294967169, %v3669_v16  ;;  %v3673_v35 = vor.u32 8388608, %v3672_v58  ;;  %v1809_v29 = vmax.f32 %v7646_v59, %v7652_v62  ;;  %v1837_v34 = vmin.f32 %v7646_v59, %v7652_v62 }
  0xcf   : > { %v3842_v27 = vshrl.u32 %v3824_v57, %v3840_v9  ;;  %v3845_v61 = vadd.s32 127, %v3844_v5  ;;  %v7664_v36 = vand.u32 2147483647, %v534_v39  ;;  %v7666_v6 = vand.u32 2147483647, %v548_v38 }
  0xd0   : > { %v3675_v57 = vadd.s32 1, %v5867_v8  ;;  %v7668_v51 = vmax.f32 %v1809_v29, %v1267_v4  ;;  %v1851_v28 = vmin.f32 %v1837_v34, %v1267_v4  ;;  %v7670_v13 = vshll.u32 %v3673_v35, 8 }
  0xd1   : > { %v3843_v30 = vor.u32 %v3842_v27, %v3841_v45  ;;  %v3846_v44 = vshll.u32 %v3845_v61, 23  ;;  %v7672_v2 = vand.u32 2147483647, %v562_v43  ;;  %v7674_v22 = vand.u32 2147483647, %v576_v12 }
  0xd2   : > { %vm3676_vm9 = vcmp.gt.s32.totalorder %v3675_v57, 0  ;;  %v7677_v14 = vsub.f32 %v7668_v51, %v1851_v28  ;;  %v1879_v39 = vadd.f32 1e-08, %v7668_v51  ;;  %v7682_v47 = vsub.f32 %v7668_v51, %v7646_v59 }
  0xd3   : > { %v3847_v54 = vor.u32 4788187, %v3846_v44  ;;  %v3850_v0 = vcvt.s32.f32 %v3843_v30  ;;  %v3677_v46 = vsel %vm3676_vm9, %v3675_v57, 0  ;;  %v7686_v18 = vsub.f32 %v7668_v51, %v7652_v62 }
  0xd4   : > { %v3678_v38 = vshrl.u32 %v3677_v46, 5  ;;  %v3679_v32 = vand.u32 31, %v3677_v46  ;;  %6629 = vrcp.f32 %v1879_v39  ;;  %vm1921_vm10 = vcmp.eq.f32.partialorder %v7677_v14, 0.0 }
  0xd5   : > { %v3848_v17 = vand.u32 2147483647, %v3847_v54  ;;  %v7690_v12 = vsub.f32 %v7668_v51, %v1267_v4  ;;  %vm3866_vm15 = vcmp.eq.s32.totalorder %v7633_v52, 2  ;;  %vm3863_vm1 = vcmp.eq.s32.totalorder %v7633_v52, 0 }
  0xd6   : > { %v3680_v9 = vsub.s32 32, %v3679_v32  ;;  %v3682_v45 = vshll.u32 %v6968_v25, %v3679_v32  ;;  %v3685_v5 = vshll.u32 %v6969_v40, %v3679_v32  ;;  %v3688_v16 = vshll.u32 %v6970_v15, %v3679_v32 }
  0xd7   : > { %v3851_v43 = vmul.f32 %v3850_v0, %v3848_v17  ;;  %v3691_v48 = vshll.u32 %v10887_v31, %v3679_v32  ;;  %v3694_v27 = vshll.u32 %v10885_v42, %v3679_v32  ;;  %vm3697_vm11 = vcmp.lt.s32.totalorder %v3678_v38, 1 }
  0xd8   : > { %v3681_v61 = vshrl.u32 %v6968_v25, %v3680_v9  ;;  %v3683_v8 = vshrl.u32 %v6969_v40, %v3680_v9  ;;  %v3686_v35 = vshrl.u32 %v6970_v15, %v3680_v9  ;;  %v3689_v4 = vshrl.u32 %v10887_v31, %v3680_v9 }
  0xd9   : > { %v3852_v58 = vxor.u32 2147483648, %v3851_v43  ;;  %v3692_v44 = vshrl.u32 %v10885_v42, %v3680_v9  ;;  %v3695_v29 = vshrl.u32 %v10883_v1, %v3680_v9  ;;  %vm3698_vm12 = vcmp.lt.s32.totalorder %v3678_v38, 2 }
  0xda   : > { %v3684_v57 = vor.u32 %v3683_v8, %v3682_v45  ;;  %v3687_v54 = vor.u32 %v3686_v35, %v3685_v5  ;;  %v3690_v0 = vor.u32 %v3689_v4, %v3688_v16  ;;  %vm3699_vm13 = vcmp.lt.s32.totalorder %v3678_v38, 3 }
  0xdb   : > { %v3853_v30 = vsel %vm3770_vm4, %v3852_v58, %v3851_v43  ;;  %v3693_v28 = vor.u32 %v3692_v44, %v3691_v48  ;;  %v3696_v17 = vor.u32 %v3695_v29, %v3694_v27  ;;  %vm3700_vm14 = vcmp.lt.s32.totalorder %v3678_v38, 4 }
  0xdc   : > { %v3856_v34 = vsel %vm7546_vm3, %v7400_v11, %v3853_v30  ;;  %v3701_v46 = vsel %vm3697_vm11, %v3681_v61, %v3684_v57  ;;  %v3705_v39 = vsel %vm3697_vm11, %v3684_v57, %v3687_v54  ;;  %v3702_v32 = vsel %vm3700_vm14, %v3690_v0, 2102212464 }
  0xdd   : > { %6631 = vcosq.f32 %v3856_v34  ;;  %v3706_v43 = vsel %vm3700_vm14, %v3693_v28, 920167782  ;;  %v3709_v9 = vsel %vm3697_vm11, %v3687_v54, %v3690_v0  ;;  %v3710_v58 = vsel %vm3700_vm14, %v3696_v17, 1326507024 }
  0xde   : > { %6633 = vsinq.f32 %v3856_v34  ;;  %v3703_v26 = vsel %vm3699_vm13, %v3687_v54, %v3702_v32  ;;  %v3707_v30 = vsel %vm3699_vm13, %v3690_v0, %v3706_v43  ;;  %v3711_v45 = vsel %vm3699_vm13, %v3693_v28, %v3710_v58 }
  0xdf   : > { %v1935_v5 = vsel %vm1921_vm10, 1.0, %v7677_v14  ;;  %v3704_v16 = vsel %vm3698_vm12, %v3701_v46, %v3703_v26  ;;  %v3708_v48 = vsel %vm3698_vm12, %v3705_v39, %v3707_v30  ;;  %v3712_v27 = vsel %vm3698_vm12, %v3709_v9, %v3711_v45 }
  0xe0   : > { %6635 = vrcp.f32 %v1935_v5  ;;  %v7719_v61 = vmul.u32.u64.low %v7670_v13, %v3712_v27  ;;  %v7720_v8 = vmul.u32.u64.high %v7670_v13, %v3712_v27, %v7719_v61  ;;  %v3720_v44 = vmul.u32 %v7670_v13, %v3704_v16 }
  0xe1   : > { %v7723_v35 = vmul.u32.u64.low %v7670_v13, %v3708_v48  ;;  %v7724_v4 = vmul.u32.u64.high %v7670_v13, %v3708_v48, %v7723_v35  ;;  %vm2005_vm2 = vcmp.eq.f32.partialorder %v7668_v51, %v7646_v59  ;;  %v2019_v38 = vsub.f32 %v7690_v12, %v7686_v18  ;;  %v6630_v34 = vpop.eup %6629 }
  0xe2   : > { %v763_v29 = vsel %vm722_vm0, %v7643_v23, 0.0  ;;  %vm3862_vm3 = vcmp.lt.s32.totalorder %v7633_v52, 2  ;;  %vm5360_vm4 = vcmp.lt.s32.totalorder %v7662_v3, 2  ;;  %v2047_v57 = vsub.f32 %v7682_v47, %v7690_v12 }
  0xe3   : > { %v2061_v54 = vmul.f32 2.0, %v1935_v5  ;;  %v2089_v13 = vsub.f32 %v7686_v18, %v7682_v47  ;;  %v2103_v0 = vmul.f32 4.0, %v1935_v5  ;;  %vm3860_vm5 = vweird.f32 %v7400_v11 }
  0xe4   : > { %v7743_v28 = vmul.f32 %v6630_v34, %v7677_v14  ;;  %vm2033_vm6 = vcmp.eq.f32.partialorder %v7668_v51, %v7652_v62  ;;  %v716_v23 = vand.u32 2147483647, %v590_v56  ;;  %v764_v12 = vsel %vm722_vm0, %v7656_v55, 0.0 }
  0xe5   : > { %vm3722_vm7 = vc.u32 %v7720_v8, %v7723_v35  ;;  %v3723_v47 = vadd.s32 1, %v7724_v4  ;;  %v2075_v18 = vadd.f32 %v2061_v54, %v2047_v57  ;;  %v766_v14 = vsel %vm722_vm0, %v7672_v2, 0.0 }
  0xe6   : > { %vm7759_vm8 = vcmp.lt.f32.partialorder %v6507_v41, 8388608.0  ;;  %v2117_v10 = vadd.f32 %v2103_v0, %v2089_v13  ;;  %v765_v60 = vadd.f32 %v764_v12, %v763_v29  ;;  %v833_v56 = vsel %vm722_vm0, %v7650_v19, 0.0 }
  0xe7   : > { %v834_v55 = vsel %vm722_vm0, %v7664_v36, 0.0  ;;  %v3724_v46 = vsel %vm3722_vm7, %v3723_v47, %v7724_v4  ;;  %v836_v2 = vsel %vm722_vm0, %v7674_v22, 0.0  ;;  %v903_v41 = vsel %vm722_vm0, %v7654_v24, 0.0 }
  0xe8   : > { %v835_v39 = vadd.f32 %v834_v55, %v833_v56  ;;  %v3725_v32 = vadd.s32 %v3724_v46, %v3720_v44  ;;  %v2131_v43 = vsel %vm2033_vm6, %v2075_v18, %v2117_v10  ;;  %v767_v9 = vadd.f32 %v766_v14, %v765_v60 }
  0xe9   : > { %v904_v19 = vsel %vm722_vm0, %v7666_v6, 0.0  ;;  %vm5364_vm9 = vcmp.eq.s32.totalorder %v7662_v3, 2  ;;  %v906_v30 = vsel %vm722_vm0, %v716_v23, 0.0  ;;  %vm5361_vm10 = vcmp.eq.s32.totalorder %v7662_v3, 0 }
  0xea   : > { %v6632_v58 = vpop.eup %6631  ;;  %v837_v36 = vadd.f32 %v836_v2, %v835_v39  ;;  %v905_v26 = vadd.f32 %v904_v19, %v903_v41  ;;  %v3726_v24 = vadd.s32 536870912, %v3725_v32  ;;  %v973_v5 = vsel %vm722_vm0, %v767_v9, 0.0 }
  0xeb   : > { %v6634_v22 = vpop.eup %6633  ;;  %v3867_v45 = vxor.u32 2147483648, %v6632_v58  ;;  %v2145_v16 = vsel %vm2005_vm2, %v2019_v38, %v2131_v43  ;;  %v6504_v54 = vand.u32 2147483648, %v7533_v37  ;;  %v6503_v23 = vand.u32 2147483647, %v7582_v49 }
  0xec   : > { %v3864_v62 = vxor.u32 2147483648, %v6634_v22  ;;  %v907_v6 = vadd.f32 %v906_v30, %v905_v26  ;;  %v974_v48 = vsel %vm722_vm0, %v837_v36, 0.0  ;;  %v7787_v4 = vshrl.u32 %v3726_v24, 30 }
  0xed   : > { %v3868_v27 = vsel %vm3866_vm15, %v3867_v45, %v6634_v22  ;;  %v5366_v61 = vsel %vm5364_vm9, %v3867_v45, %v6634_v22  ;;  %v975_v44 = vadd.f32 %v974_v48, %v973_v5  ;;  %v6636_v29 = vpop.eup %6635  ;;  %v6514_v3 = vsel %vm7759_vm8, %v7551_v53, %v7348_v21 }
  0xee   : > { %v3865_v34 = vsel %vm3863_vm1, %v6632_v58, %v3864_v62  ;;  %v5363_v57 = vsel %vm5361_vm10, %v6632_v58, %v3864_v62  ;;  %v976_v59 = vsel %vm722_vm0, %v907_v6, 0.0  ;;  %v3728_v0 = vshll.u32 %v7787_v4, 30 }
  0xef   : > { %v3869_v38 = vsel %vm3862_vm3, %v3865_v34, %v3868_v27  ;;  %v5367_v13 = vsel %vm5360_vm4, %v5363_v57, %v5366_v61  ;;  %v2159_v18 = vmul.f32 %v6636_v29, %v2145_v16  ;;  %v977_v14 = vadd.f32 %v976_v59, %v975_v44  ;;  %v7839_v59 = vld [vmem:[%s7135_s15 + $0xa8] sm:$0xff] }
  0xf0   : > { %v3870_v12 = vsel %vm3860_vm5, nan, %v3869_v38  ;;  %v5368_v47 = vsel %vm3860_vm5, nan, %v5367_v13  ;;  %v7805_v60 = vsub.s32 %v3725_v32, %v3728_v0  ;;  %v6505_v39 = vor.u32 %v6504_v54, %v6503_v23 }
  0xf1   : > { %v3884_v10 = vmul.f32 %v3870_v12, %v7323_v63  ;;  %v5382_v52 = vmul.f32 %v5368_v47, %v7323_v63  ;;  %v2174_v49 = vmul.f32 0.16666667, %v2159_v18  ;;  %v1012_v56 = vmul.f32 0.33333334, %v977_v14 }
  0xf2   : > { %v3731_v11 = vsub.s32 0, %v7805_v60  ;;  %vm7814_vm11 = vcmp.lt.f32.partialorder %v6499_v50, 8388608.0  ;;  %v5958_v21 = vadd.f32 -1.0, %v6514_v3  ;;  %vm3667_vm12 = vcmp.lt.s32.totalorder %v7635_v7, 0 }
  0xf3   : > { %v3898_v55 = vadd.f32 1.0, %v3884_v10  ;;  %v5396_v46 = vadd.f32 1.0, %v5382_v52  ;;  %v2287_v63 = vand.u32 2147483647, %v2174_v49  ;;  %6027 = vmatprep.subr.mxu0 %v1012_v56  ;;  %v6506_v58 = vsel %vm7814_vm11, %v6505_v39, %v7533_v37 }
  0xf4   : > { %v5868_v17 = vmin.u32 %v3731_v11, %v7805_v60  ;;  %6028 = vmatpush3.msra.mxu0 %v1012_v56  ;;  %v7824_v22 = vmul.f32 25.0, %v5958_v21  ;;  %v7827_v45 = vadd.f32 -1.0, %v6506_v58  ;;  %v3721_v5 = vadd.s32 %v7723_v35, %v7720_v8  ;;  %v7836_v35 = vld [vmem:[%s7135_s15 + $0x38] sm:$0xff] }
  0xf5   : > { %v3912_v41 = vmul.f32 0.5, %v3898_v55  ;;  %v5410_v32 = vmul.f32 0.5, %v5396_v46  ;;  %v2290_v53 = vfloor.f32 %v2287_v63  ;;  %v3751_v37 = vsub.s32 4, %v7787_v4 }
  0xf6   : > { %v3733_v19 = vclz %v5868_v17  ;;  %v2295_v62 = vand.u32 2147483648, %v2174_v49  ;;  %vm7844_vm15 = vcmp.le.f32.partialorder %v3665_v20, 0.7853982  ;;  %v477_v3 = vsub.f32 %v7836_v35, %v7839_v59  ;;  %v6735_v17 = vld [vmem:[%s7135_s15 + $0xc0] sm:$0xff] }
  0xf7   : > { %v5424_v43 = vmul.f32 4.0, %v3912_v41  ;;  %v5466_v9 = vmul.f32 4.0, %v5410_v32  ;;  %v2291_v50 = vsub.f32 %v2287_v63, %v2290_v53  ;;  %v3752_v10 = vsel %vm3667_vm12, %v3751_v37, %v7787_v4  ;;  %v6736_v53 = vld [vmem:[%s7135_s15 + $0x130] sm:$0xff] }
  0xf8   : > { %v5869_v30 = vadd.s32 4294967294, %v3733_v19  ;;  %v1068_v21 = vsel %vm722_vm0, %v6735_v17, 0.0  ;;  %v407_v17 = vld [vmem:[%s7135_s15 + $0x348] sm:$0xff] }
  0xf9   : > { %v7822_v36 = vadd.f32 1.0, %v5424_v43  ;;  %v5480_v26 = vadd.f32 1.0, %v5466_v9  ;;  %vm2292_vm13 = vcmp.eq.f32.partialorder %v2291_v50, 1.0  ;;  %v1069_v43 = vsel %vm722_vm0, %v6736_v53, 0.0  ;;  %v7874_v9 = vld [vmem:[%s7135_s15 + $0x188] sm:$0xff] }
  0xfa   : > { %vm5870_vm14 = vcmp.lt.s32.totalorder %v5869_v30, 0  ;;  %v2293_v48 = vsel %vm2292_vm13, 0.0, %v2291_v50  ;;  %v3754_v50 = vsel %vm7844_vm15, 0, %v3752_v10  ;;  %vm3757_vm13 = vweird.f32 %v7635_v7 }
  0xfb   : > { %v6285_v24 = vcvt.f32.s32 %v7822_v36  ;;  %v6288_v16 = vand.u32 2147483648, %v7822_v36  ;;  %v6397_v6 = vcvt.f32.s32 %v5480_v26  ;;  %v6395_v61 = vand.u32 2147483647, %v5480_v26 }
  0xfc   : > { %v6400_v44 = vand.u32 2147483648, %v5480_v26  ;;  %v3736_v29 = vsel %vm5870_vm14, 0, %v5869_v30  ;;  %v6283_v38 = vand.u32 2147483647, %v7822_v36  ;;  %v2294_v0 = vand.u32 2147483647, %v2293_v48 }
  0xfd   : > { %v6286_v27 = vcvt.s32.f32 %v6285_v24  ;;  %v6398_v34 = vcvt.s32.f32 %v6397_v6  ;;  %v3737_v57 = vsub.s32 32, %v3736_v29  ;;  %v3738_v54 = vshll.u32 %v7805_v60, %v3736_v29  ;;  %v7856_v60 = vld [vmem:[%s7135_s15 + $0x118] sm:$0xff] }
  0xfe   : > { %v3741_v8 = vsub.s32 4294967266, %v3736_v29  ;;  %vm7848_vm1 = vcmp.lt.f32.partialorder %v6395_v61, 8388608.0  ;;  %v2296_v52 = vor.u32 %v2295_v62, %v2294_v0  ;;  %vm7861_vm2 = vcmp.lt.f32.partialorder %v6283_v38, 8388608.0  ;;  %v6738_v62 = vld [vmem:[%s7135_s15 + $0x2f0] sm:$0xff]  ;;  %v7893_v61 = vld [vmem:[%s7135_s15 + $0x1f8] sm:$0xff] }
  0xff   : > { %v6287_v13 = vand.u32 2147483647, %v6286_v27  ;;  %v6399_v23 = vand.u32 2147483647, %v6398_v34  ;;  %v3739_v47 = vshrl.u32 %v3721_v5, %v3737_v57  ;;  %v491_v63 = vsub.f32 %v7839_v59, %v7856_v60  ;;  %v6737_v5 = vld [vmem:[%s7135_s15 + $0x280] sm:$0xff] }
 0x100   : > { %v3742_v18 = vadd.s32 127, %v3741_v8  ;;  %vm2328_vm3 = vcmp.ne.f32.partialorder %v2296_v52, 0.0  ;;  %vm2342_vm4 = vcmp.lt.f32.partialorder %v2296_v52, 0.0  ;;  %v2370_v4 = vadd.f32 1.0, %v2296_v52  ;;  %v6740_v8 = vld [vmem:[%s7135_s15 + $0x360] sm:$0xff] }
 0x101   : > { %v6289_v20 = vor.u32 %v6288_v16, %v6287_v13  ;;  %v6401_v49 = vor.u32 %v6400_v44, %v6399_v23  ;;  %v3740_v56 = vor.u32 %v3739_v47, %v3738_v54  ;;  %vm2356_vm5 = vmand %vm2342_vm4, %vm2328_vm3  ;;  %v1070_v24 = vadd.f32 %v1069_v43, %v1068_v21  ;;  %v7896_v44 = vld [vmem:[%s7135_s15 + $0x268] sm:$0xff]  ;;  %v6741_v23 = vld [vmem:[%s7135_s15 + $0x440] sm:$0xff] }
 0x102   : > { %v3743_v55 = vshll.u32 %v3742_v18, 23  ;;  %v2384_v32 = vsel %vm2356_vm5, %v2370_v4, %v2296_v52  ;;  %v1138_v37 = vsel %vm722_vm0, %v6737_v5, 0.0  ;;  %v1139_v16 = vsel %vm722_vm0, %v6738_v62, 0.0  ;;  %v6742_v18 = vld [vmem:[%s7135_s15 + $0x4b0] sm:$0xff]  ;;  %v421_v43 = vld [vmem:[%s7135_s15 + $0x3b8] sm:$0xff] }
 0x103   : > { %v6402_v11 = vsel %vm7848_vm1, %v6401_v49, %v5480_v26  ;;  %v3747_v2 = vcvt.s32.f32 %v3740_v56  ;;  %v6290_v19 = vsel %vm7861_vm2, %v6289_v20, %v7822_v36  ;;  %v2398_v26 = vmul.f32 6.2831855, %v2384_v32  ;;  %v6739_v36 = vld [vmem:[%s7135_s15 + $0x1a0] sm:$0xff]  ;;  %v393_v32 = vld [vmem:[%s7135_s15 + $0x2d8] sm:$0xff] }
 0x104   : > { %v3744_v39 = vor.u32 4788187, %v3743_v55  ;;  %v5944_v41 = vadd.f32 -1.0, %v6402_v11  ;;  %v1071_v27 = vsel %vm722_vm0, %v6739_v36, 0.0  ;;  %v505_v29 = vsub.f32 %v7856_v60, %v7874_v9  ;;  %v435_v9 = vld [vmem:[%s7135_s15 + $0x428] sm:$0xff] }
 0x105   : > { %v2412_v48 = vmul.f32 2.0, %v2398_v26  ;;  %v5254_v57 = vadd.s32 3, %v3754_v50  ;;  %v1140_v54 = vadd.f32 %v1139_v16, %v1138_v37  ;;  %v1141_v38 = vsel %vm722_vm0, %v6740_v8, 0.0  ;;  %v7941_v26 = vld [vmem:[%s7135_s15 + $0x498] sm:$0xff]  ;;  %v7949_v37 = vld [vmem:[%s7135_s15 + $0x508] sm:$0xff] }
 0x106   : > { %v3745_v58 = vand.u32 2147483647, %v3744_v39  ;;  %v5564_v30 = vmul.f32 5.0, %v5944_v41  ;;  %v1208_v47 = vsel %vm722_vm0, %v6741_v23, 0.0  ;;  %v1209_v14 = vsel %vm722_vm0, %v6742_v18, 0.0 }
 0x107   : > { %v7903_v0 = vmul.f32 3.1415927, %v2412_v48  ;;  %v1072_v52 = vadd.f32 %v1071_v27, %v1070_v24  ;;  %v1210_v20 = vadd.f32 %v1209_v14, %v1208_v47  ;;  %v519_v49 = vsub.f32 %v7893_v61, %v7896_v44 }
 0x108   : > { %v3748_v6 = vmul.f32 %v3747_v2, %v3745_v58  ;;  %v5578_v34 = vadd.f32 %v6290_v19, %v5564_v30  ;;  %v1142_v4 = vadd.f32 %v1141_v38, %v1140_v54  ;;  %v7919_v39 = vand.u32 3, %v3754_v50  ;;  %v6743_v2 = vld [vmem:[%s7135_s15 + $0x520] sm:$0xff] }
 0x109   : > { %v3562_v55 = vand.u32 2147483647, %v7903_v0  ;;  %v3565_v46 = vand.u32 2139095040, %v7903_v0  ;;  %v1211_v41 = vsel %vm722_vm0, %v6743_v2, 0.0  ;;  %v7932_v21 = vand.u32 3, %v5254_v57 }
 0x10a   : > { %v3749_v13 = vxor.u32 2147483648, %v3748_v6  ;;  %v5620_v10 = vadd.f32 %v7824_v22, %v5578_v34  ;;  %v1212_v58 = vadd.f32 %v1211_v41, %v1210_v20  ;;  %v7938_v50 = vmul.f32 0.33333334, %v1072_v52 }
 0x10b   : > { %v3566_v12 = vshrl.u32 %v3565_v46, 23  ;;  %v3569_v53 = vand.u32 8388607, %v3562_v55  ;;  %v7944_v24 = vmul.f32 4.0, %v7668_v51  ;;  %v7946_v5 = vmul.f32 0.33333334, %v1142_v4 }
 0x10c   : > { %v3750_v56 = vsel %vm3667_vm12, %v3749_v13, %v3748_v6  ;;  %v6541_v11 = vtrunc.f32 %v5620_v10  ;;  %v533_v62 = vsub.f32 %v7896_v44, %v393_v32  ;;  %v1266_v6 = vmul.f32 0.33333334, %v1212_v58 }
 0x10d   : > { %v3753_v22 = vsel %vm7844_vm15, %v7635_v7, %v3750_v56  ;;  %v5863_v30 = vadd.s32 4294967169, %v3566_v12  ;;  %v3570_v16 = vor.u32 8388608, %v3569_v53  ;;  %v547_v48 = vsub.f32 %v393_v32, %v407_v17 }
 0x10e   : > { %6637 = vcosq.f32 %v3753_v22  ;;  %v6542_v19 = vcvt.f32.s32 %v6541_v11  ;;  %v561_v36 = vsub.f32 %v421_v43, %v435_v9  ;;  %v1808_v61 = vmax.f32 %v7938_v50, %v7946_v5 }
 0x10f   : > { %6639 = vsinq.f32 %v3753_v22  ;;  %v3572_v27 = vadd.s32 1, %v5863_v30  ;;  %v1836_v51 = vmin.f32 %v7938_v50, %v7946_v5  ;;  %v575_v34 = vsub.f32 %v435_v9, %v7941_v26 }
 0x110   : > { %5648 = vst.msk [vmem:[%s7930_s9 + $0x68] sm:$0xff] %vm722_vm0, %v6542_v19  ;;  %vm3763_vm6 = vcmp.eq.s32.totalorder %v7919_v39, 2  ;;  %vm5260_vm7 = vcmp.eq.s32.totalorder %v7932_v21, 2  ;;  %v589_v44 = vsub.f32 %v7941_v26, %v7949_v37  ;;  %v7966_v57 = vand.u32 2147483647, %v477_v3 }
 0x111   : > { %v7971_v54 = vand.u32 2147483647, %v491_v63  ;;  %v7973_v8 = vand.u32 2147483647, %v505_v29  ;;  %vm3760_vm8 = vcmp.eq.s32.totalorder %v7919_v39, 0  ;;  %vm5257_vm9 = vcmp.eq.s32.totalorder %v7932_v21, 0 }
 0x112   : > { %vm3573_vm10 = vcmp.gt.s32.totalorder %v3572_v27, 0  ;;  %v7977_v38 = vmax.f32 %v1808_v61, %v1266_v6  ;;  %v1850_v13 = vmin.f32 %v1836_v51, %v1266_v6  ;;  %v7979_v23 = vand.u32 2147483647, %v519_v49 }
 0x113   : > { %vm3759_vm11 = vcmp.lt.s32.totalorder %v7919_v39, 2  ;;  %vm5256_vm12 = vcmp.lt.s32.totalorder %v7932_v21, 2  ;;  %v3574_v35 = vsel %vm3573_vm10, %v3572_v27, 0  ;;  %v7983_v59 = vshll.u32 %v3570_v16, 8 }
 0x114   : > { %v7985_v60 = vand.u32 2147483647, %v533_v62  ;;  %v7987_v3 = vand.u32 2147483647, %v547_v48  ;;  %v3575_v63 = vshrl.u32 %v3574_v35, 5  ;;  %v3576_v29 = vand.u32 31, %v3574_v35 }
 0x115   : > { %v7990_v47 = vand.u32 2147483647, %v561_v36  ;;  %v7992_v18 = vand.u32 2147483647, %v575_v34  ;;  %v7995_v14 = vsub.f32 %v7977_v38, %v1850_v13  ;;  %v1878_v10 = vadd.f32 1e-08, %v7977_v38 }
 0x116   : > { %v8000_v52 = vsub.f32 %v7977_v38, %v7938_v50  ;;  %v8004_v20 = vsub.f32 %v7977_v38, %v7946_v5  ;;  %v3577_v49 = vsub.s32 32, %v3576_v29  ;;  %v3579_v56 = vshll.u32 %v6968_v25, %v3576_v29 }
 0x117   : > { %v3582_v46 = vshll.u32 %v6969_v40, %v3576_v29  ;;  %v3585_v4 = vshll.u32 %v6970_v15, %v3576_v29  ;;  %v3588_v11 = vshll.u32 %v10887_v31, %v3576_v29  ;;  %v3591_v22 = vshll.u32 %v10885_v42, %v3576_v29 }
 0x118   : > { %vm3594_vm14 = vcmp.lt.s32.totalorder %v3575_v63, 1  ;;  %v8012_v2 = vsub.f32 %v7977_v38, %v1266_v6  ;;  %v3580_v41 = vshrl.u32 %v6969_v40, %v3577_v49  ;;  %v3583_v32 = vshrl.u32 %v6970_v15, %v3577_v49 }
 0x119   : > { %v3586_v17 = vshrl.u32 %v10887_v31, %v3577_v49  ;;  %vm3595_vm15 = vcmp.lt.s32.totalorder %v3575_v63, 2  ;;  %v3578_v53 = vshrl.u32 %v6968_v25, %v3577_v49  ;;  %v3589_v43 = vshrl.u32 %v10885_v42, %v3577_v49 }
 0x11a   : > { %v3592_v9 = vshrl.u32 %v10883_v1, %v3577_v49  ;;  %vm3596_vm1 = vcmp.lt.s32.totalorder %v3575_v63, 3  ;;  %v3581_v30 = vor.u32 %v3580_v41, %v3579_v56  ;;  %v3584_v62 = vor.u32 %v3583_v32, %v3582_v46 }
 0x11b   : > { %v6638_v12 = vpop.eup %6637  ;;  %v3587_v16 = vor.u32 %v3586_v17, %v3585_v4  ;;  %v3590_v48 = vor.u32 %v3589_v43, %v3588_v11  ;;  %vm3597_vm2 = vcmp.lt.s32.totalorder %v3575_v63, 4  ;;  %6641 = vrcp.f32 %v1878_v10 }
 0x11c   : > { %v6640_v19 = vpop.eup %6639  ;;  %v3764_v58 = vxor.u32 2147483648, %v6638_v12  ;;  %v3593_v61 = vor.u32 %v3592_v9, %v3591_v22  ;;  %v3598_v35 = vsel %vm3594_vm14, %v3578_v53, %v3581_v30  ;;  %v3602_v29 = vsel %vm3594_vm14, %v3581_v30, %v3584_v62 }
 0x11d   : > { %v3761_v6 = vxor.u32 2147483648, %v6640_v19  ;;  %v3599_v51 = vsel %vm3597_vm2, %v3587_v16, 2102212464  ;;  %v3603_v46 = vsel %vm3597_vm2, %v3590_v48, 920167782  ;;  %v3606_v41 = vsel %vm3594_vm14, %v3584_v62, %v3587_v16 }
 0x11e   : > { %v3765_v36 = vsel %vm3763_vm6, %v3764_v58, %v6640_v19  ;;  %v5262_v27 = vsel %vm5260_vm7, %v3764_v58, %v6640_v19  ;;  %v3600_v56 = vsel %vm3596_vm1, %v3584_v62, %v3599_v51  ;;  %v3604_v22 = vsel %vm3596_vm1, %v3587_v16, %v3603_v46 }
 0x11f   : > { %v3762_v34 = vsel %vm3760_vm8, %v6638_v12, %v3761_v6  ;;  %v5259_v13 = vsel %vm5257_vm9, %v6638_v12, %v3761_v6  ;;  %v3605_v21 = vsel %vm3595_vm15, %v3602_v29, %v3604_v22  ;;  %v3607_v17 = vsel %vm3597_vm2, %v3593_v61, 1326507024 }
 0x120   : > { %v3766_v10 = vsel %vm3759_vm11, %v3762_v34, %v3765_v36  ;;  %v5263_v49 = vsel %vm5256_vm12, %v5259_v13, %v5262_v27  ;;  %v3601_v12 = vsel %vm3595_vm15, %v3598_v35, %v3600_v56  ;;  %v3608_v53 = vsel %vm3596_vm1, %v3590_v48, %v3607_v17 }
 0x121   : > { %v3767_v4 = vsel %vm3757_vm13, nan, %v3766_v10  ;;  %v5264_v11 = vsel %vm3757_vm13, nan, %v5263_v49  ;;  %v8050_v43 = vmul.u32.u64.low %v7983_v59, %v3605_v21  ;;  %v8051_v7 = vmul.u32.u64.high %v7983_v59, %v3605_v21, %v8050_v43 }
 0x122   : > { %v3883_v39 = vmul.f32 %v3767_v4, %v7494_v33  ;;  %v5381_v32 = vmul.f32 %v5264_v11, %v7494_v33  ;;  %v3609_v58 = vsel %vm3595_vm15, %v3606_v41, %v3608_v53  ;;  %vm1920_vm3 = vcmp.eq.f32.partialorder %v7995_v14, 0.0 }
 0x123   : > { %v8057_v33 = vmul.u32.u64.low %v7983_v59, %v3609_v58  ;;  %v8058_v30 = vmul.u32.u64.high %v7983_v59, %v3609_v58, %v8057_v33  ;;  %v1934_v62 = vsel %vm1920_vm3, 1.0, %v7995_v14  ;;  %v715_v16 = vand.u32 2147483647, %v589_v44 }
 0x124   : > { %v3897_v9 = vadd.f32 1.0, %v3883_v39  ;;  %v5395_v19 = vadd.f32 1.0, %v5381_v32  ;;  %v3617_v36 = vmul.u32 %v7983_v59, %v3601_v12  ;;  %6643 = vrcp.f32 %v1934_v62 }
 0x125   : > { %v3620_v63 = vadd.s32 1, %v8051_v7  ;;  %v2046_v27 = vsub.f32 %v8000_v52, %v8012_v2  ;;  %v2060_v61 = vmul.f32 2.0, %v1934_v62  ;;  %v2088_v51 = vsub.f32 %v8004_v20, %v8000_v52 }
 0x126   : > { %v3911_v6 = vmul.f32 0.5, %v3897_v9  ;;  %v5409_v48 = vmul.f32 0.5, %v5395_v19  ;;  %v2102_v35 = vmul.f32 4.0, %v1934_v62  ;;  %v758_v26 = vsel %vm722_vm0, %v7966_v57, 0.0 }
 0x127   : > { %vm3619_vm4 = vc.u32 %v8058_v30, %v8050_v43  ;;  %vm2004_vm5 = vcmp.eq.f32.partialorder %v7977_v38, %v7938_v50  ;;  %v2074_v37 = vadd.f32 %v2060_v61, %v2046_v27  ;;  %v759_v44 = vsel %vm722_vm0, %v7979_v23, 0.0 }
 0x128   : > { %v5423_v34 = vmul.f32 4.0, %v3911_v6  ;;  %v5465_v13 = vmul.f32 4.0, %v5409_v48  ;;  %v6642_v59 = vpop.eup %6641  ;;  %v3621_v10 = vsel %vm3619_vm4, %v3620_v63, %v8051_v7  ;;  %v2116_v49 = vadd.f32 %v2102_v35, %v2088_v51 }
 0x129   : > { %v3622_v56 = vadd.s32 %v3621_v10, %v3617_v36  ;;  %v8082_v57 = vmul.f32 %v6642_v59, %v7995_v14  ;;  %v2018_v46 = vsub.f32 %v8012_v2, %v8004_v20  ;;  %vm2032_vm6 = vcmp.eq.f32.partialorder %v7977_v38, %v7946_v5 }
 0x12a   : > { %v8078_v29 = vadd.f32 1.0, %v5423_v34  ;;  %v5479_v52 = vadd.f32 1.0, %v5465_v13  ;;  %v760_v11 = vadd.f32 %v759_v44, %v758_v26  ;;  %v761_v22 = vsel %vm722_vm0, %v7990_v47, 0.0 }
 0x12b   : > { %v3623_v32 = vadd.s32 536870912, %v3622_v56  ;;  %v828_v14 = vsel %vm722_vm0, %v7971_v54, 0.0  ;;  %v2130_v17 = vsel %vm2032_vm6, %v2074_v37, %v2116_v49  ;;  %v829_v47 = vsel %vm722_vm0, %v7985_v60, 0.0 }
 0x12c   : > { %v6277_v4 = vcvt.f32.s32 %v8078_v29  ;;  %v6387_v23 = vand.u32 2147483647, %v5479_v52  ;;  %v6275_v41 = vand.u32 2147483647, %v8078_v29  ;;  %v6389_v39 = vcvt.f32.s32 %v5479_v52 }
 0x12d   : > { %v6280_v20 = vand.u32 2147483648, %v8078_v29  ;;  %v6392_v2 = vand.u32 2147483648, %v5479_v52  ;;  %v3624_v53 = vshrl.u32 %v3623_v32, 30  ;;  %v830_v9 = vadd.f32 %v829_v47, %v828_v14 }
 0x12e   : > { %v6278_v21 = vcvt.s32.f32 %v6277_v4  ;;  %vm8095_vm7 = vcmp.lt.f32.partialorder %v6387_v23, 8388608.0  ;;  %v6390_v12 = vcvt.s32.f32 %v6389_v39  ;;  %v831_v19 = vsel %vm722_vm0, %v7992_v18, 0.0 }
 0x12f   : > { %v898_v54 = vsel %vm722_vm0, %v7973_v8, 0.0  ;;  %v3625_v33 = vshll.u32 %v3624_v53, 30  ;;  %v2144_v62 = vsel %vm2004_vm5, %v2018_v46, %v2130_v17  ;;  %v899_v6 = vsel %vm722_vm0, %v7987_v3, 0.0 }
 0x130   : > { %v6279_v7 = vand.u32 2147483647, %v6278_v21  ;;  %v6391_v58 = vand.u32 2147483647, %v6390_v12  ;;  %v762_v48 = vadd.f32 %v761_v22, %v760_v11  ;;  %v832_v36 = vadd.f32 %v831_v19, %v830_v9 }
 0x131   : > { %v900_v60 = vadd.f32 %v899_v6, %v898_v54  ;;  %v901_v63 = vsel %vm722_vm0, %v715_v16, 0.0  ;;  %v6644_v27 = vpop.eup %6643  ;;  %v8111_v51 = vsub.s32 %v3622_v56, %v3625_v33  ;;  %v8114_v8 = vadd.f32 1.0, %v7944_v24  ;;  %v8149_v54 = vld [vmem:[%s7135_s15 + $0x30] sm:$0xff] }
 0x132   : > { %v6281_v61 = vor.u32 %v6280_v20, %v6279_v7  ;;  %v6393_v18 = vor.u32 %v6392_v2, %v6391_v58  ;;  %vm8116_vm8 = vcmp.lt.f32.partialorder %v6275_v41, 8388608.0  ;;  %v3648_v50 = vsub.s32 4, %v3624_v53 }
 0x133   : > { %v2158_v13 = vmul.f32 %v6644_v27, %v2144_v62  ;;  %v902_v3 = vadd.f32 %v901_v63, %v900_v60  ;;  %v5605_v16 = vmul.f32 25.0, %v7827_v45  ;;  %v3628_v26 = vsub.s32 0, %v8111_v51 }
 0x134   : > { %v6394_v35 = vsel %vm8095_vm7, %v6393_v18, %v5479_v52  ;;  %v968_v59 = vsel %vm722_vm0, %v762_v48, 0.0  ;;  %v969_v24 = vsel %vm722_vm0, %v832_v36, 0.0  ;;  %v6282_v10 = vsel %vm8116_vm8, %v6281_v61, %v8078_v29  ;;  %v8160_v48 = vld [vmem:[%s7135_s15 + $0x1f0] sm:$0xff]  ;;  %v8163_v36 = vld [vmem:[%s7135_s15 + $0x260] sm:$0xff] }
 0x135   : > { %v5943_v37 = vadd.f32 -1.0, %v6394_v35  ;;  %v2173_v44 = vmul.f32 0.16666667, %v2158_v13  ;;  %vm3564_vm9 = vcmp.lt.s32.totalorder %v7903_v0, 0  ;;  %v5864_v49 = vmin.u32 %v3628_v26, %v8111_v51  ;;  %v8167_v18 = vld [vmem:[%s7135_s15 + $0x180] sm:$0xff] }
 0x136   : > { %v6493_v52 = vcvt.f32.s32 %v8114_v8  ;;  %v3649_v45 = vsel %vm3564_vm9, %v3648_v50, %v3624_v53  ;;  %v971_v4 = vsel %vm722_vm0, %v902_v3, 0.0  ;;  %v970_v11 = vadd.f32 %v969_v24, %v968_v59  ;;  %v8178_v50 = vld [vmem:[%s7135_s15 + $0x340] sm:$0xff]  ;;  %v8193_v24 = vld [vmem:[%s7135_s15 + $0x490] sm:$0xff] }
 0x137   : > { %v5563_v56 = vmul.f32 5.0, %v5943_v37  ;;  %v2277_v46 = vand.u32 2147483647, %v2173_v44  ;;  %v3630_v23 = vclz %v5864_v49  ;;  %vm8137_vm10 = vcmp.le.f32.partialorder %v3562_v55, 0.7853982  ;;  %v8190_v59 = vld [vmem:[%s7135_s15 + $0x420] sm:$0xff] }
 0x138   : > { %v3651_v39 = vsel %vm8137_vm10, 0, %v3649_v45  ;;  %v972_v14 = vadd.f32 %v971_v4, %v970_v11  ;;  %v8143_v20 = vcvt.s32.f32 %v6493_v52  ;;  %v3618_v2 = vadd.s32 %v8050_v43, %v8058_v30  ;;  %v8152_v43 = vld [vmem:[%s7135_s15 + $0xa0] sm:$0xff]  ;;  %v8155_v30 = vld [vmem:[%s7135_s15 + $0x110] sm:$0xff] }
 0x139   : > { %v5577_v22 = vadd.f32 %v6282_v10, %v5563_v56  ;;  %v5865_v41 = vadd.s32 4294967294, %v3630_v23  ;;  %v2280_v32 = vfloor.f32 %v2277_v46  ;;  %v5150_v53 = vadd.s32 3, %v3651_v39  ;;  %v8204_v4 = vld [vmem:[%s7135_s15 + $0x500] sm:$0xff] }
 0x13a   : > { %v1011_v17 = vmul.f32 0.33333334, %v972_v14  ;;  %v2285_v47 = vand.u32 2147483648, %v2173_v44  ;;  %v6491_v33 = vand.u32 2147483647, %v8114_v8  ;;  %v5505_v6 = vmul.f32 4.0, %v7977_v38 }
 0x13b   : > { %v5619_v21 = vadd.f32 %v5605_v16, %v5577_v22  ;;  %vm5866_vm11 = vcmp.lt.s32.totalorder %v5865_v41, 0  ;;  %v2281_v55 = vsub.f32 %v2277_v46, %v2280_v32  ;;  %v6496_v27 = vand.u32 2147483648, %v8114_v8  ;;  %v8187_v44 = vld [vmem:[%s7135_s15 + $0x3b0] sm:$0xff]  ;;  %v6744_v14 = vld [vmem:[%s7135_s15 + $0xb8] sm:$0xff] }
 0x13c   : > { %v3633_v12 = vsel %vm5866_vm11, 0, %v5865_v41  ;;  %6029 = vmatprep.subr.mxu0 %v1011_v17  ;;  %v8174_v38 = vand.u32 3, %v3651_v39  ;;  %v6495_v34 = vand.u32 2147483647, %v8143_v20  ;;  %v476_v13 = vsub.f32 %v8149_v54, %v8152_v43 }
 0x13d   : > { %v6539_v5 = vtrunc.f32 %v5619_v21  ;;  %v3634_v7 = vsub.s32 32, %v3633_v12  ;;  %v3635_v9 = vshll.u32 %v8111_v51, %v3633_v12  ;;  %v3638_v19 = vsub.s32 4294967266, %v3633_v12  ;;  %6030 = vmatpush3.msra.mxu0 %v1011_v17  ;;  %v8170_v51 = vld [vmem:[%s7135_s15 + $0x2d0] sm:$0xff]  ;;  %v6746_v17 = vld [vmem:[%s7135_s15 + $0x198] sm:$0xff] }
 0x13e   : > { %vm2282_vm12 = vcmp.eq.f32.partialorder %v2281_v55, 1.0  ;;  %v490_v3 = vsub.f32 %v8152_v43, %v8155_v30  ;;  %v8184_v26 = vand.u32 3, %v5150_v53  ;;  %v8195_v10 = vadd.f32 1.0, %v5505_v6 }
 0x13f   : > { %v6540_v58 = vcvt.f32.s32 %v6539_v5  ;;  %v2283_v62 = vsel %vm2282_vm12, 0.0, %v2281_v55  ;;  %v3636_v60 = vshrl.u32 %v3618_v2, %v3634_v7  ;;  %v3639_v63 = vadd.s32 127, %v3638_v19  ;;  %v6745_v2 = vld [vmem:[%s7135_s15 + $0x128] sm:$0xff] }
 0x140   : > { %v2284_v61 = vand.u32 2147483647, %v2283_v62  ;;  %v504_v49 = vsub.f32 %v8155_v30, %v8167_v18  ;;  %v518_v52 = vsub.f32 %v8160_v48, %v8163_v36  ;;  %v532_v56 = vsub.f32 %v8163_v36, %v8170_v51  ;;  %v6748_v30 = vld [vmem:[%s7135_s15 + $0x2e8] sm:$0xff]  ;;  %v6749_v48 = vld [vmem:[%s7135_s15 + $0x358] sm:$0xff] }
 0x141   : > { %5647 = vst.msk [vmem:[%s7930_s9 + $0x60] sm:$0xff] %vm722_vm0, %v6540_v58  ;;  %v3637_v35 = vor.u32 %v3636_v60, %v3635_v9  ;;  %v3640_v16 = vshll.u32 %v3639_v63, 23  ;;  %v546_v22 = vsub.f32 %v8170_v51, %v8178_v50  ;;  %v560_v41 = vsub.f32 %v8187_v44, %v8190_v59  ;;  %v6750_v60 = vld [vmem:[%s7135_s15 + $0x438] sm:$0xff]  ;;  %v6751_v51 = vld [vmem:[%s7135_s15 + $0x4a8] sm:$0xff] }
 0x142   : > { %v2286_v37 = vor.u32 %v2285_v47, %v2284_v61  ;;  %v574_v39 = vsub.f32 %v8190_v59, %v8193_v24  ;;  %v1063_v21 = vsel %vm722_vm0, %v6744_v14, 0.0  ;;  %v1064_v55 = vsel %vm722_vm0, %v6745_v2, 0.0  ;;  %v6747_v47 = vld [vmem:[%s7135_s15 + $0x278] sm:$0xff] }
 0x143   : > { %v3641_v45 = vor.u32 4788187, %v3640_v16  ;;  %v3644_v46 = vcvt.s32.f32 %v3637_v35  ;;  %v1066_v5 = vsel %vm722_vm0, %v6746_v17, 0.0  ;;  %v1065_v53 = vadd.f32 %v1064_v55, %v1063_v21  ;;  %v6752_v44 = vld [vmem:[%s7135_s15 + $0x518] sm:$0xff] }
 0x144   : > { %vm2327_vm13 = vcmp.ne.f32.partialorder %v2286_v37, 0.0  ;;  %vm2341_vm14 = vcmp.lt.f32.partialorder %v2286_v37, 0.0  ;;  %v2369_v11 = vadd.f32 1.0, %v2286_v37  ;;  %v1133_v7 = vsel %vm722_vm0, %v6747_v47, 0.0 }
 0x145   : > { %vm8206_vm15 = vmand %vm2341_vm14, %vm2327_vm13  ;;  %v3642_v32 = vand.u32 2147483647, %v3641_v45  ;;  %v588_v9 = vsub.f32 %v8193_v24, %v8204_v4  ;;  %v6485_v43 = vcvt.f32.s32 %v8195_v10  ;;  %v1134_v58 = vsel %vm722_vm0, %v6748_v30, 0.0 }
 0x146   : > { %v2383_v12 = vsel %vm8206_vm15, %v2369_v11, %v2286_v37  ;;  %v1067_v62 = vadd.f32 %v1066_v5, %v1065_v53  ;;  %v1135_v6 = vadd.f32 %v1134_v58, %v1133_v7  ;;  %v1136_v36 = vsel %vm722_vm0, %v6749_v48, 0.0 }
 0x147   : > { %v3645_v19 = vmul.f32 %v3644_v46, %v3642_v32  ;;  %v2397_v54 = vmul.f32 6.2831855, %v2383_v12  ;;  %v1203_v63 = vsel %vm722_vm0, %v6750_v60, 0.0  ;;  %v1204_v50 = vsel %vm722_vm0, %v6751_v51, 0.0 }
 0x148   : > { %v602_v35 = vand.u32 2147483647, %v476_v13  ;;  %v1137_v16 = vadd.f32 %v1136_v36, %v1135_v6  ;;  %v1205_v37 = vadd.f32 %v1204_v50, %v1203_v63  ;;  %v1206_v59 = vsel %vm722_vm0, %v6752_v44, 0.0 }
 0x149   : > { %v3646_v61 = vxor.u32 2147483648, %v3645_v19  ;;  %v2411_v18 = vmul.f32 2.0, %v2397_v54  ;;  %v8239_v24 = vmul.f32 0.33333334, %v1067_v62  ;;  %v616_v4 = vand.u32 2147483647, %v490_v3 }
 0x14a   : > { %v630_v23 = vand.u32 2147483647, %v504_v49  ;;  %v1207_v32 = vadd.f32 %v1206_v59, %v1205_v37  ;;  %v8248_v13 = vmul.f32 0.33333334, %v1137_v16  ;;  %v644_v14 = vand.u32 2147483647, %v518_v52 }
 0x14b   : > { %v3647_v45 = vsel %vm3564_vm9, %v3646_v61, %v3645_v19  ;;  %v8243_v46 = vmul.f32 3.1415927, %v2411_v18  ;;  %v658_v55 = vand.u32 2147483647, %v532_v56  ;;  %v753_v49 = vsel %vm722_vm0, %v602_v35, 0.0 }
 0x14c   : > { %v3650_v11 = vsel %vm8137_vm10, %v7903_v0, %v3647_v45  ;;  %v1265_v17 = vmul.f32 0.33333334, %v1207_v32  ;;  %v1807_v3 = vmax.f32 %v8239_v24, %v8248_v13  ;;  %v1835_v52 = vmin.f32 %v8239_v24, %v8248_v13 }
 0x14d   : > { %6645 = vcosq.f32 %v3650_v11  ;;  %v3459_v21 = vand.u32 2147483647, %v8243_v46  ;;  %v3462_v2 = vand.u32 2139095040, %v8243_v46  ;;  %v686_v12 = vand.u32 2147483647, %v560_v41 }
 0x14e   : > { %6647 = vsinq.f32 %v3650_v11  ;;  %v8259_v53 = vmax.f32 %v1807_v3, %v1265_v17  ;;  %v8261_v47 = vand.u32 2147483647, %v546_v22  ;;  %v700_v56 = vand.u32 2147483647, %v574_v39 }
 0x14f   : > { %v3463_v5 = vshrl.u32 %v3462_v2, 23  ;;  %v3466_v29 = vand.u32 8388607, %v3459_v21  ;;  %v754_v7 = vsel %vm722_vm0, %v644_v14, 0.0  ;;  %v1849_v30 = vmin.f32 %v1835_v52, %v1265_v17 }
 0x150   : > { %v755_v58 = vadd.f32 %v754_v7, %v753_v49  ;;  %vm3660_vm1 = vcmp.eq.s32.totalorder %v8174_v38, 2  ;;  %vm5156_vm2 = vcmp.eq.s32.totalorder %v8184_v26, 2  ;;  %v1877_v62 = vadd.f32 1e-08, %v8259_v53 }
 0x151   : > { %v5859_v19 = vadd.s32 4294967169, %v3463_v5  ;;  %v3467_v54 = vor.u32 8388608, %v3466_v29  ;;  %v8269_v41 = vsub.f32 %v8259_v53, %v8239_v24  ;;  %v8273_v22 = vsub.f32 %v8259_v53, %v8248_v13 }
 0x152   : > { %v8276_v39 = vsub.f32 %v8259_v53, %v1265_v17  ;;  %vm3657_vm3 = vcmp.eq.s32.totalorder %v8174_v38, 0  ;;  %vm5153_vm4 = vcmp.eq.s32.totalorder %v8184_v26, 0  ;;  %v8281_v48 = vsub.f32 %v8259_v53, %v1849_v30 }
 0x153   : > { %v3469_v6 = vadd.s32 1, %v5859_v19  ;;  %v8283_v36 = vand.u32 2147483647, %v588_v9  ;;  %v756_v60 = vsel %vm722_vm0, %v686_v12, 0.0  ;;  %vm3656_vm5 = vcmp.lt.s32.totalorder %v8174_v38, 2 }
 0x154   : > { %vm5152_vm6 = vcmp.lt.s32.totalorder %v8184_v26, 2  ;;  %v8288_v63 = vshll.u32 %v3467_v54, 8  ;;  %6649 = vrcp.f32 %v1877_v62  ;;  %v2017_v61 = vsub.f32 %v8276_v39, %v8273_v22 }
 0x155   : > { %v823_v18 = vsel %vm722_vm0, %v616_v4, 0.0  ;;  %vm3654_vm7 = vweird.f32 %v7903_v0  ;;  %vm3470_vm8 = vcmp.gt.s32.totalorder %v3469_v6, 0  ;;  %vm1919_vm9 = vcmp.eq.f32.partialorder %v8281_v48, 0.0 }
 0x156   : > { %v2045_v9 = vsub.f32 %v8269_v41, %v8276_v39  ;;  %v2087_v51 = vsub.f32 %v8273_v22, %v8269_v41  ;;  %v3471_v50 = vsel %vm3470_vm8, %v3469_v6, 0  ;;  %v1933_v35 = vsel %vm1919_vm9, 1.0, %v8281_v48 }
 0x157   : > { %v8300_v16 = vadd.f32 %v756_v60, %v755_v58  ;;  %v824_v37 = vsel %vm722_vm0, %v658_v55, 0.0  ;;  %v8303_v44 = vshrl.u32 %v3471_v50, 5  ;;  %v3473_v59 = vand.u32 31, %v3471_v50 }
 0x158   : > { %6651 = vrcp.f32 %v1933_v35  ;;  %v8306_v45 = vsel %vm722_vm0, %v700_v56, 0.0  ;;  %v2059_v4 = vmul.f32 2.0, %v1933_v35  ;;  %v8308_v11 = vmul.f32 4.0, %v1933_v35 }
 0x159   : > { %v8310_v32 = vadd.f32 %v824_v37, %v823_v18  ;;  %v8313_v14 = vsel %vm722_vm0, %v630_v23, 0.0  ;;  %v3474_v2 = vsub.s32 32, %v3473_v59  ;;  %v3476_v17 = vshll.u32 %v6968_v25, %v3473_v59 }
 0x15a   : > { %v3479_v55 = vshll.u32 %v6969_v40, %v3473_v59  ;;  %v3482_v3 = vshll.u32 %v6970_v15, %v3473_v59  ;;  %v6646_v49 = vpop.eup %6645  ;;  %v3485_v5 = vshll.u32 %v10887_v31, %v3473_v59  ;;  %v3488_v29 = vshll.u32 %v10885_v42, %v3473_v59 }
 0x15b   : > { %vm3491_vm10 = vcmp.lt.s32.totalorder %v8303_v44, 1  ;;  %vm3492_vm11 = vcmp.lt.s32.totalorder %v8303_v44, 2  ;;  %v6648_v52 = vpop.eup %6647  ;;  %v3661_v12 = vxor.u32 2147483648, %v6646_v49  ;;  %v3475_v23 = vshrl.u32 %v6968_v25, %v3474_v2 }
 0x15c   : > { %v3477_v56 = vshrl.u32 %v6969_v40, %v3474_v2  ;;  %v3480_v7 = vshrl.u32 %v6970_v15, %v3474_v2  ;;  %v3658_v19 = vxor.u32 2147483648, %v6648_v52  ;;  %v3483_v54 = vshrl.u32 %v10887_v31, %v3474_v2 }
 0x15d   : > { %v3486_v30 = vshrl.u32 %v10885_v42, %v3474_v2  ;;  %v3489_v58 = vshrl.u32 %v10883_v1, %v3474_v2  ;;  %v3662_v62 = vsel %vm3660_vm1, %v3661_v12, %v6648_v52  ;;  %v5158_v6 = vsel %vm5156_vm2, %v3661_v12, %v6648_v52 }
 0x15e   : > { %v3478_v60 = vor.u32 %v3477_v56, %v3476_v17  ;;  %v3481_v18 = vor.u32 %v3480_v7, %v3479_v55  ;;  %v3659_v50 = vsel %vm3657_vm3, %v6646_v49, %v3658_v19  ;;  %v5155_v35 = vsel %vm5153_vm4, %v6646_v49, %v3658_v19 }
 0x15f   : > { %v3484_v37 = vor.u32 %v3483_v54, %v3482_v3  ;;  %v3487_v59 = vor.u32 %v3486_v30, %v3485_v5  ;;  %vm2031_vm12 = vcmp.eq.f32.partialorder %v8259_v53, %v8248_v13  ;;  %v3663_v2 = vsel %vm3656_vm5, %v3659_v50, %v3662_v62 }
 0x160   : > { %v5159_v1 = vsel %vm5152_vm6, %v5155_v35, %v5158_v6  ;;  %v3490_v52 = vor.u32 %v3489_v58, %v3488_v29  ;;  %vm3493_vm13 = vcmp.lt.s32.totalorder %v8303_v44, 3  ;;  %vm2003_vm14 = vcmp.eq.f32.partialorder %v8259_v53, %v8239_v24 }
 0x161   : > { %v3664_v17 = vsel %vm3654_vm7, nan, %v3663_v2  ;;  %v5160_v55 = vsel %vm3654_vm7, nan, %v5159_v1  ;;  %vm3494_vm15 = vcmp.lt.s32.totalorder %v8303_v44, 4  ;;  %v3495_v38 = vsel %vm3491_vm10, %v3475_v23, %v3478_v60  ;;  %v6650_v3 = vpop.eup %6649 }
 0x162   : > { %v3882_v26 = vmul.f32 %v3664_v17, %v7743_v28  ;;  %v5380_v49 = vmul.f32 %v5160_v55, %v7743_v28  ;;  %v3496_v5 = vsel %vm3494_vm15, %v3484_v37, 2102212464  ;;  %v3499_v29 = vsel %vm3491_vm10, %v3478_v60, %v3481_v18 }
 0x163   : > { %v3497_v12 = vsel %vm3493_vm13, %v3481_v18, %v3496_v5  ;;  %v3500_v56 = vsel %vm3494_vm15, %v3487_v59, 920167782  ;;  %v3503_v1 = vsel %vm3491_vm10, %v3481_v18, %v3484_v37  ;;  %v3504_v0 = vsel %vm3494_vm15, %v3490_v52, 1326507024 }
 0x164   : > { %v3896_v7 = vadd.f32 1.0, %v3882_v26  ;;  %v5394_v19 = vadd.f32 1.0, %v5380_v49  ;;  %v3501_v23 = vsel %vm3493_vm13, %v3484_v37, %v3500_v56  ;;  %v894_v28 = vsel %vm722_vm0, %v8261_v47, 0.0 }
 0x165   : > { %v6652_v54 = vpop.eup %6651  ;;  %v3498_v30 = vsel %vm3492_vm11, %v3495_v38, %v3497_v12  ;;  %v3502_v58 = vsel %vm3492_vm11, %v3499_v29, %v3501_v23  ;;  %v3505_v62 = vsel %vm3493_vm13, %v3487_v59, %v3504_v0  ;;  %v8371_v6 = vmul.f32 %v6650_v3, %v8281_v48 }
 0x166   : > { %v3910_v60 = vmul.f32 0.5, %v3896_v7  ;;  %v5408_v18 = vmul.f32 0.5, %v5394_v19  ;;  %v3506_v50 = vsel %vm3492_vm11, %v3503_v1, %v3505_v62  ;;  %v2073_v47 = vadd.f32 %v2059_v4, %v2045_v9 }
 0x167   : > { %v8379_v35 = vmul.u32.u64.low %v8288_v63, %v3506_v50  ;;  %v8380_v37 = vmul.u32.u64.high %v8288_v63, %v3506_v50, %v8379_v35  ;;  %v8383_v2 = vmul.u32.u64.low %v8288_v63, %v3502_v58  ;;  %v8384_v52 = vmul.u32.u64.high %v8288_v63, %v3502_v58, %v8383_v2 }
 0x168   : > { %v5422_v48 = vmul.f32 4.0, %v3910_v60  ;;  %v5464_v59 = vmul.f32 4.0, %v5408_v18  ;;  %v2115_v44 = vadd.f32 %v8308_v11, %v2087_v51  ;;  %v827_v17 = vadd.f32 %v8306_v45, %v8310_v32 }
 0x169   : > { %vm8395_vm1 = vcmp.lt.f32.partialorder %v6491_v33, 8388608.0  ;;  %v6497_v4 = vor.u32 %v6496_v27, %v6495_v34  ;;  %v6486_v55 = vcvt.s32.f32 %v6485_v43  ;;  %v3514_v51 = vmul.u32 %v8288_v63, %v3498_v30 }
 0x16a   : > { %v5436_v41 = vadd.f32 1.0, %v5422_v48  ;;  %v5478_v38 = vadd.f32 1.0, %v5464_v59  ;;  %v2129_v45 = vsel %vm2031_vm12, %v2073_v47, %v2115_v44  ;;  %vm3516_vm2 = vc.u32 %v8380_v37, %v8383_v2 }
 0x16b   : > { %v3517_v33 = vadd.s32 1, %v8384_v52  ;;  %v2143_v20 = vsel %vm2003_vm14, %v2017_v61, %v2129_v45  ;;  %v895_v27 = vadd.f32 %v894_v28, %v8313_v14  ;;  %v896_v43 = vsel %vm722_vm0, %v8283_v36, 0.0 }
 0x16c   : > { %v6269_v34 = vcvt.f32.s32 %v5436_v41  ;;  %v963_v13 = vsel %vm722_vm0, %v8300_v16, 0.0  ;;  %v964_v63 = vsel %vm722_vm0, %v827_v17, 0.0  ;;  %v6272_v11 = vand.u32 2147483648, %v5436_v41 }
 0x16d   : > { %v6381_v32 = vcvt.f32.s32 %v5478_v38  ;;  %v3518_v3 = vsel %vm3516_vm2, %v3517_v33, %v8384_v52  ;;  %v2157_v22 = vmul.f32 %v6652_v54, %v2143_v20  ;;  %v6379_v26 = vand.u32 2147483647, %v5478_v38 }
 0x16e   : > { %v6270_v39 = vcvt.s32.f32 %v6269_v34  ;;  %v6384_v24 = vand.u32 2147483648, %v5478_v38  ;;  %v3519_v61 = vadd.s32 %v3518_v3, %v3514_v51  ;;  %v897_v5 = vadd.f32 %v896_v43, %v895_v27 }
 0x16f   : > { %v6382_v49 = vcvt.s32.f32 %v6381_v32  ;;  %v2172_v14 = vmul.f32 0.16666667, %v2157_v22  ;;  %v965_v29 = vadd.f32 %v964_v63, %v963_v13  ;;  %v6267_v12 = vand.u32 2147483647, %v5436_v41  ;;  %v6753_v22 = vld [vmem:[%s7135_s15 + $0xb0] sm:$0xff] }
 0x170   : > { %v6271_v36 = vand.u32 2147483647, %v6270_v39  ;;  %v6498_v16 = vsel %vm8395_vm1, %v6497_v4, %v8114_v8  ;;  %v3520_v56 = vadd.s32 536870912, %v3519_v61  ;;  %v6488_v0 = vand.u32 2147483648, %v8195_v10 }
 0x171   : > { %v6383_v1 = vand.u32 2147483647, %v6382_v49  ;;  %v2267_v7 = vand.u32 2147483647, %v2172_v14  ;;  %v966_v19 = vsel %vm722_vm0, %v897_v5, 0.0  ;;  %vm6380_vm3 = vcmp.lt.f32.partialorder %v6379_v26, 8388608.0 }
 0x172   : > { %v8430_v23 = vshrl.u32 %v3520_v56, 30  ;;  %v6487_v28 = vand.u32 2147483647, %v6486_v55  ;;  %v967_v54 = vadd.f32 %v966_v19, %v965_v29  ;;  %v6273_v30 = vor.u32 %v6272_v11, %v6271_v36 }
 0x173   : > { %v6385_v58 = vor.u32 %v6384_v24, %v6383_v1  ;;  %v6483_v62 = vand.u32 2147483647, %v8195_v10  ;;  %v2270_v60 = vfloor.f32 %v2267_v7  ;;  %vm8433_vm4 = vcmp.lt.f32.partialorder %v6267_v12, 8388608.0  ;;  %v6754_v24 = vld [vmem:[%s7135_s15 + $0x120] sm:$0xff]  ;;  %v6756_v1 = vld [vmem:[%s7135_s15 + $0x270] sm:$0xff] }
 0x174   : > { %v5956_v8 = vadd.f32 -1.0, %v6498_v16  ;;  %v3522_v50 = vshll.u32 %v8430_v23, 30  ;;  %v1010_v52 = vmul.f32 0.33333334, %v967_v54  ;;  %v6489_v44 = vor.u32 %v6488_v0, %v6487_v28  ;;  %v6755_v16 = vld [vmem:[%s7135_s15 + $0x190] sm:$0xff] }
 0x175   : > { %v6386_v47 = vsel %vm6380_vm3, %v6385_v58, %v5478_v38  ;;  %v2271_v35 = vsub.f32 %v2267_v7, %v2270_v60  ;;  %v6274_v17 = vsel %vm8433_vm4, %v6273_v30, %v5436_v41  ;;  %vm6484_vm5 = vcmp.lt.f32.partialorder %v6483_v62, 8388608.0  ;;  %v6757_v7 = vld [vmem:[%s7135_s15 + $0x2e0] sm:$0xff]  ;;  %v6758_v60 = vld [vmem:[%s7135_s15 + $0x350] sm:$0xff] }
 0x176   : > { %v5942_v48 = vadd.f32 -1.0, %v6386_v47  ;;  %v8438_v59 = vsub.s32 %v3519_v61, %v3522_v50  ;;  %6031 = vmatprep.subr.mxu0 %v1010_v52  ;;  %v5604_v4 = vmul.f32 25.0, %v5956_v8  ;;  %v2275_v45 = vand.u32 2147483648, %v2172_v14  ;;  %v6759_v8 = vld [vmem:[%s7135_s15 + $0x430] sm:$0xff]  ;;  %v6760_v47 = vld [vmem:[%s7135_s15 + $0x4a0] sm:$0xff] }
 0x177   : > { %vm2272_vm6 = vcmp.eq.f32.partialorder %v2271_v35, 1.0  ;;  %6032 = vmatpush3.msra.mxu0 %v1010_v52  ;;  %v6490_v20 = vsel %vm6484_vm5, %v6489_v44, %v8195_v10  ;;  %vm3461_vm7 = vcmp.lt.s32.totalorder %v8243_v46, 0  ;;  %v5504_v32 = vmul.f32 4.0, %v8259_v53  ;;  %v8474_v52 = vld [vmem:[%s7135_s15 + $0x28] sm:$0xff] }
 0x178   : > { %v5562_v9 = vmul.f32 5.0, %v5942_v48  ;;  %v3525_v55 = vsub.s32 0, %v8438_v59  ;;  %v2273_v51 = vsel %vm2272_vm6, 0.0, %v2271_v35  ;;  %v8445_v41 = vadd.f32 -1.0, %v6490_v20  ;;  %v8477_v48 = vld [vmem:[%s7135_s15 + $0x98] sm:$0xff] }
 0x179   : > { %v2274_v27 = vand.u32 2147483647, %v2273_v51  ;;  %v1058_v10 = vsel %vm722_vm0, %v6753_v22, 0.0  ;;  %v3515_v26 = vadd.s32 %v8383_v2, %v8380_v37  ;;  %v1059_v61 = vsel %vm722_vm0, %v6754_v24, 0.0  ;;  %v6761_v51 = vld [vmem:[%s7135_s15 + $0x510] sm:$0xff] }
 0x17a   : > { %v5576_v38 = vadd.f32 %v6274_v17, %v5562_v9  ;;  %v5860_v33 = vmin.u32 %v3525_v55, %v8438_v59  ;;  %v3545_v49 = vsub.s32 4, %v8430_v23  ;;  %v1060_v5 = vadd.f32 %v1059_v61, %v1058_v10 }
 0x17b   : > { %v2276_v13 = vor.u32 %v2275_v45, %v2274_v27  ;;  %v8459_v2 = vadd.f32 1.0, %v5504_v32  ;;  %v1061_v56 = vsel %vm722_vm0, %v6755_v16, 0.0  ;;  %v1128_v0 = vsel %vm722_vm0, %v6756_v1, 0.0  ;;  %v8504_v32 = vld [vmem:[%s7135_s15 + $0x178] sm:$0xff] }
 0x17c   : > { %v5618_v34 = vadd.f32 %v5604_v4, %v5576_v38  ;;  %v3527_v43 = vclz %v5860_v33  ;;  %v1129_v19 = vsel %vm722_vm0, %v6757_v7, 0.0  ;;  %v1062_v58 = vadd.f32 %v1061_v56, %v1060_v5 }
 0x17d   : > { %vm2326_vm8 = vcmp.ne.f32.partialorder %v2276_v13, 0.0  ;;  %vm2340_vm9 = vcmp.lt.f32.partialorder %v2276_v13, 0.0  ;;  %v2368_v3 = vadd.f32 1.0, %v2276_v13  ;;  %v1130_v62 = vadd.f32 %v1129_v19, %v1128_v0 }
 0x17e   : > { %v6537_v63 = vtrunc.f32 %v5618_v34  ;;  %v5861_v11 = vadd.s32 4294967294, %v3527_v43  ;;  %vm2354_vm11 = vmand %vm2340_vm9, %vm2326_vm8  ;;  %v1131_v18 = vsel %vm722_vm0, %v6758_v60, 0.0  ;;  %v1198_v50 = vsel %vm722_vm0, %v6759_v8, 0.0  ;;  %v8490_v34 = vld [vmem:[%s7135_s15 + $0x108] sm:$0xff] }
 0x17f   : > { %v2382_v14 = vsel %vm2354_vm11, %v2368_v3, %v2276_v13  ;;  %v1199_v35 = vsel %vm722_vm0, %v6760_v47, 0.0  ;;  %v3546_v4 = vsel %vm3461_vm7, %v3545_v49, %v8430_v23  ;;  %v1132_v55 = vadd.f32 %v1131_v18, %v1130_v62 }
 0x180   : > { %v6538_v39 = vcvt.f32.s32 %v6537_v63  ;;  %vm5862_vm10 = vcmp.lt.s32.totalorder %v5861_v11, 0  ;;  %v2396_v37 = vmul.f32 6.2831855, %v2382_v14  ;;  %v1200_v9 = vadd.f32 %v1199_v35, %v1198_v50 }
 0x181   : > { %v3530_v53 = vsel %vm5862_vm10, 0, %v5861_v11  ;;  %v1201_v45 = vsel %vm722_vm0, %v6761_v51, 0.0  ;;  %v8486_v38 = vmul.f32 0.33333334, %v1062_v58  ;;  %v475_v43 = vsub.f32 %v8474_v52, %v8477_v48 }
 0x182   : > { %5646 = vst.msk [vmem:[%s7930_s9 + $0x58] sm:$0xff] %vm722_vm0, %v6538_v39  ;;  %v3531_v29 = vsub.s32 32, %v3530_v53  ;;  %v3532_v12 = vshll.u32 %v8438_v59, %v3530_v53  ;;  %v3535_v36 = vsub.s32 4294967266, %v3530_v53  ;;  %v2410_v30 = vmul.f32 2.0, %v2396_v37 }
 0x183   : > { %vm8496_vm12 = vcmp.le.f32.partialorder %v3459_v21, 0.7853982  ;;  %v1202_v63 = vadd.f32 %v1201_v45, %v1200_v9  ;;  %v8501_v11 = vmul.f32 0.33333334, %v1132_v55  ;;  %v8509_v10 = vmul.f32 25.0, %v8445_v41  ;;  %v8513_v21 = vld [vmem:[%s7135_s15 + $0x1e8] sm:$0xff] }
 0x184   : > { %v3533_v28 = vshrl.u32 %v3515_v26, %v3531_v29  ;;  %v3536_v54 = vadd.s32 127, %v3535_v36  ;;  %v8479_v17 = vmul.f32 3.1415927, %v2410_v30  ;;  %v3548_v22 = vsel %vm8496_vm12, 0, %v3546_v4  ;;  %v8516_v26 = vld [vmem:[%s7135_s15 + $0x258] sm:$0xff] }
 0x185   : > { %v6477_v39 = vcvt.f32.s32 %v8459_v2  ;;  %v1264_v61 = vmul.f32 0.33333334, %v1202_v63  ;;  %v1806_v53 = vmax.f32 %v8486_v38, %v8501_v11  ;;  %v1834_v49 = vmin.f32 %v8486_v38, %v8501_v11 }
 0x186   : > { %v3534_v59 = vor.u32 %v3533_v28, %v3532_v12  ;;  %v3537_v44 = vshll.u32 %v3536_v54, 23  ;;  %v3356_v27 = vand.u32 2147483647, %v8479_v17  ;;  %v3359_v13 = vand.u32 2139095040, %v8479_v17 }
 0x187   : > { %v489_v41 = vsub.f32 %v8477_v48, %v8490_v34  ;;  %v503_v29 = vsub.f32 %v8490_v34, %v8504_v32  ;;  %v8528_v36 = vmax.f32 %v1806_v53, %v1264_v61  ;;  %v1848_v37 = vmin.f32 %v1834_v49, %v1264_v61 }
 0x188   : > { %v3538_v33 = vor.u32 4788187, %v3537_v44  ;;  %v3541_v20 = vcvt.s32.f32 %v3534_v59  ;;  %v3360_v24 = vshrl.u32 %v3359_v13, 23  ;;  %v3363_v5 = vand.u32 8388607, %v3356_v27 }
 0x189   : > { %v517_v16 = vsub.f32 %v8513_v21, %v8516_v26  ;;  %v8532_v1 = vand.u32 3, %v3548_v22  ;;  %v5046_v0 = vadd.s32 3, %v3548_v22  ;;  %v6475_v7 = vand.u32 2147483647, %v8459_v2 }
 0x18a   : > { %v3539_v3 = vand.u32 2147483647, %v3538_v33  ;;  %v5855_v12 = vadd.s32 4294967169, %v3360_v24  ;;  %v8535_v28 = vcvt.s32.f32 %v6477_v39  ;;  %v8538_v54 = vsub.f32 %v8528_v36, %v1848_v37 }
 0x18b   : > { %v1876_v30 = vadd.f32 1e-08, %v8528_v36  ;;  %v3364_v62 = vor.u32 8388608, %v3363_v5  ;;  %v1960_v60 = vsub.f32 %v8528_v36, %v8486_v38  ;;  %v8546_v18 = vsub.f32 %v8528_v36, %v1264_v61 }
 0x18c   : > { %v3542_v14 = vmul.f32 %v3541_v20, %v3539_v3  ;;  %v3366_v19 = vadd.s32 1, %v5855_v12  ;;  %vm1918_vm14 = vcmp.eq.f32.partialorder %v8538_v54, 0.0  ;;  %v8555_v35 = vsub.f32 %v8528_v36, %v8501_v11 }
 0x18d   : > { %6653 = vrcp.f32 %v1876_v30  ;;  %v1932_v47 = vsel %vm1918_vm14, 1.0, %v8538_v54  ;;  %v8557_v59 = vand.u32 3, %v5046_v0  ;;  %v8559_v4 = vshll.u32 %v3364_v62, 8 }
 0x18e   : > { %v3543_v56 = vxor.u32 2147483648, %v3542_v14  ;;  %vm3367_vm13 = vcmp.gt.s32.totalorder %v3366_v19, 0  ;;  %vm2030_vm15 = vcmp.eq.f32.partialorder %v8528_v36, %v8501_v11  ;;  %v2044_v55 = vsub.f32 %v1960_v60, %v8546_v18 }
 0x18f   : > { %v3368_v50 = vsel %vm3367_vm13, %v3366_v19, 0  ;;  %vm2002_vm1 = vcmp.eq.f32.partialorder %v8528_v36, %v8486_v38  ;;  %v2058_v63 = vmul.f32 2.0, %v1932_v47  ;;  %v2086_v3 = vsub.f32 %v8555_v35, %v1960_v60 }
 0x190   : > { %v3544_v58 = vsel %vm3461_vm7, %v3543_v56, %v3542_v14  ;;  %v3369_v44 = vshrl.u32 %v3368_v50, 5  ;;  %v3370_v9 = vand.u32 31, %v3368_v50  ;;  %vm3557_vm2 = vcmp.eq.s32.totalorder %v8532_v1, 2 }
 0x191   : > { %v3547_v8 = vsel %vm8496_vm12, %v8243_v46, %v3544_v58  ;;  %vm3554_vm4 = vcmp.eq.s32.totalorder %v8532_v1, 0  ;;  %vm5049_vm5 = vcmp.eq.s32.totalorder %v8557_v59, 0  ;;  %v10927_v49 = vmov 1326507024  }
 0x192   : > { %6655 = vcosq.f32 %v3547_v8  ;;  %v3371_v51 = vsub.s32 32, %v3370_v9  ;;  %v3373_v45 = vshll.u32 %v6968_v25, %v3370_v9  ;;  %v3376_v33 = vshll.u32 %v6969_v40, %v3370_v9 }
 0x193   : > { %6657 = vsinq.f32 %v3547_v8  ;;  %v3379_v20 = vshll.u32 %v6970_v15, %v3370_v9  ;;  %v3382_v23 = vshll.u32 %v10887_v31, %v3370_v9  ;;  %v3385_v13 = vshll.u32 %v10885_v42, %v3370_v9 }
 0x194   : > { %6659 = vrcp.f32 %v1932_v47  ;;  %v3374_v22 = vshrl.u32 %v6969_v40, %v3371_v51  ;;  %v3377_v39 = vshrl.u32 %v6970_v15, %v3371_v51  ;;  %v3380_v24 = vshrl.u32 %v10887_v31, %v3371_v51 }
 0x195   : > { %vm3388_vm3 = vcmp.lt.s32.totalorder %v3369_v44, 1  ;;  %v3372_v61 = vshrl.u32 %v6968_v25, %v3371_v51  ;;  %v3383_v53 = vshrl.u32 %v10885_v42, %v3371_v51  ;;  %v3386_v14 = vshrl.u32 %v10927_v49, %v3371_v51 }
 0x196   : > { %vm3390_vm6 = vcmp.lt.s32.totalorder %v3369_v44, 3  ;;  %v3375_v5 = vor.u32 %v3374_v22, %v3373_v45  ;;  %v3378_v12 = vor.u32 %v3377_v39, %v3376_v33  ;;  %v3381_v37 = vor.u32 %v3380_v24, %v3379_v20 }
 0x197   : > { %vm3391_vm7 = vcmp.lt.s32.totalorder %v3369_v44, 4  ;;  %vm3551_vm8 = vweird.f32 %v8243_v46  ;;  %v3384_v56 = vor.u32 %v3383_v53, %v3382_v23  ;;  %v3387_v0 = vor.u32 %v3386_v14, %v3385_v13 }
 0x198   : > { %v2072_v19 = vadd.f32 %v2058_v63, %v2044_v55  ;;  %v2100_v30 = vmul.f32 4.0, %v1932_v47  ;;  %vm3389_vm9 = vcmp.lt.s32.totalorder %v3369_v44, 2  ;;  %v3393_v58 = vsel %vm3391_vm7, %v3381_v37, 2102212464 }
 0x199   : > { %v3396_v62 = vsel %vm3388_vm3, %v3375_v5, %v3378_v12  ;;  %v3400_v60 = vsel %vm3388_vm3, %v3378_v12, %v3381_v37  ;;  %v3397_v8 = vsel %vm3391_vm7, %v3384_v56, 920167782  ;;  %v3401_v50 = vsel %vm3391_vm7, %v3387_v0, 1326507024  ;;  %v391_v0 = vld [vmem:[%s7135_s15 + $0x2c8] sm:$0xff] }
 0x19a   : > { %v2016_v9 = vsub.f32 %v8546_v18, %v8555_v35  ;;  %v2114_v51 = vadd.f32 %v2100_v30, %v2086_v3  ;;  %v3392_v45 = vsel %vm3388_vm3, %v3372_v61, %v3375_v5  ;;  %v3394_v33 = vsel %vm3390_vm6, %v3378_v12, %v3393_v58  ;;  %v6654_v55 = vpop.eup %6653 }
 0x19b   : > { %v3398_v20 = vsel %vm3390_vm6, %v3381_v37, %v3397_v8  ;;  %v3402_v47 = vsel %vm3390_vm6, %v3384_v56, %v3401_v50  ;;  %vm5052_vm10 = vcmp.eq.s32.totalorder %v8557_v59, 2  ;;  %v3395_v53 = vsel %vm3389_vm9, %v3392_v45, %v3394_v33  ;;  %v447_v45 = vld [vmem:[%s7135_s15 + $0x488] sm:$0xff] }
 0x19c   : > { %v3399_v23 = vsel %vm3389_vm9, %v3396_v62, %v3398_v20  ;;  %v3403_v13 = vsel %vm3389_vm9, %v3400_v60, %v3402_v47  ;;  %v2128_v18 = vsel %vm2030_vm15, %v2072_v19, %v2114_v51  ;;  %v8607_v14 = vmul.f32 %v6654_v55, %v8538_v54  ;;  %v405_v19 = vld [vmem:[%s7135_s15 + $0x338] sm:$0xff] }
 0x19d   : > { %v8597_v63 = vmul.u32.u64.low %v8559_v4, %v3403_v13  ;;  %v8598_v3 = vmul.u32.u64.high %v8559_v4, %v3403_v13, %v8597_v63  ;;  %v8601_v22 = vmul.u32.u64.low %v8559_v4, %v3399_v23  ;;  %v8602_v39 = vmul.u32.u64.high %v8559_v4, %v3399_v23, %v8601_v22  ;;  %v433_v51 = vld [vmem:[%s7135_s15 + $0x418] sm:$0xff] }
 0x19e   : > { %v2142_v11 = vsel %vm2002_vm1, %v2016_v9, %v2128_v18  ;;  %vm3553_vm11 = vcmp.lt.s32.totalorder %v8532_v1, 2  ;;  %vm5048_vm12 = vcmp.lt.s32.totalorder %v8557_v59, 2  ;;  %v6480_v37 = vand.u32 2147483648, %v8459_v2  ;;  %v419_v9 = vld [vmem:[%s7135_s15 + $0x3a8] sm:$0xff]  ;;  %v461_v13 = vld [vmem:[%s7135_s15 + $0x4f8] sm:$0xff] }
 0x19f   : > { %v6656_v35 = vpop.eup %6655  ;;  %v6479_v56 = vand.u32 2147483647, %v8535_v28  ;;  %v3411_v62 = vmul.u32 %v8559_v4, %v3395_v53  ;;  %vm3413_vm13 = vc.u32 %v8598_v3, %v8601_v22  ;;  %v3414_v8 = vadd.s32 1, %v8602_v39 }
 0x1a0   : > { %v6658_v24 = vpop.eup %6657  ;;  %v3558_v61 = vxor.u32 2147483648, %v6656_v35  ;;  %v531_v33 = vsub.f32 %v8516_v26, %v391_v0  ;;  %v545_v20 = vsub.f32 %v391_v0, %v405_v19  ;;  %vm8649_vm14 = vcmp.lt.f32.partialorder %v6475_v7, 8388608.0 }
 0x1a1   : > { %v6660_v5 = vpop.eup %6659  ;;  %v3555_v12 = vxor.u32 2147483648, %v6658_v24  ;;  %v3415_v55 = vsel %vm3413_vm13, %v3414_v8, %v8602_v39  ;;  %v8653_v46 = vor.u32 %v6480_v37, %v6479_v56  ;;  %v559_v63 = vsub.f32 %v419_v9, %v433_v51 }
 0x1a2   : > { %v3559_v44 = vsel %vm3557_vm2, %v3558_v61, %v6658_v24  ;;  %v5054_v54 = vsel %vm5052_vm10, %v3558_v61, %v6658_v24  ;;  %v2156_v38 = vmul.f32 %v6660_v5, %v2142_v11  ;;  %v3416_v18 = vadd.s32 %v3415_v55, %v3411_v62 }
 0x1a3   : > { %v3556_v30 = vsel %vm3554_vm4, %v6656_v35, %v3555_v12  ;;  %v5051_v58 = vsel %vm5049_vm5, %v6656_v35, %v3555_v12  ;;  %v573_v11 = vsub.f32 %v433_v51, %v447_v45  ;;  %v587_v5 = vsub.f32 %v447_v45, %v461_v13  ;;  %v306_v35 = vld [vmem:[%s7135_s15 + $0x20] sm:$0xff] }
 0x1a4   : > { %v3560_v60 = vsel %vm3553_vm11, %v3556_v30, %v3559_v44  ;;  %v5055_v28 = vsel %vm5048_vm12, %v5051_v58, %v5054_v54  ;;  %v8632_v50 = vmul.f32 0.16666667, %v2156_v38  ;;  %v601_v39 = vand.u32 2147483647, %v475_v43 }
 0x1a5   : > { %v3561_v59 = vsel %vm3551_vm8, nan, %v3560_v60  ;;  %v5056_v4 = vsel %vm3551_vm8, nan, %v5055_v28  ;;  %v643_v7 = vand.u32 2147483647, %v517_v16  ;;  %v615_v37 = vand.u32 2147483647, %v489_v41 }
 0x1a6   : > { %v3881_v1 = vmul.f32 %v3561_v59, %v8082_v57  ;;  %v5379_v47 = vmul.f32 %v5056_v4, %v8082_v57  ;;  %v2257_v23 = vand.u32 2147483647, %v8632_v50  ;;  %v3417_v57 = vadd.s32 536870912, %v3416_v18 }
 0x1a7   : > { %v6482_v38 = vsel %vm8649_vm14, %v8653_v46, %v8459_v2  ;;  %v629_v52 = vand.u32 2147483647, %v503_v29  ;;  %v657_v43 = vand.u32 2147483647, %v531_v33  ;;  %v685_v16 = vand.u32 2147483647, %v559_v63 }
 0x1a8   : > { %v3895_v24 = vadd.f32 1.0, %v3881_v1  ;;  %v5393_v61 = vadd.f32 1.0, %v5379_v47  ;;  %v2260_v53 = vfloor.f32 %v2257_v23  ;;  %v8664_v56 = vshrl.u32 %v3417_v57, 30  ;;  %v334_v46 = vld [vmem:[%s7135_s15 + $0x100] sm:$0xff] }
 0x1a9   : > { %v748_v41 = vsel %vm722_vm0, %v601_v39, 0.0  ;;  %v749_v19 = vsel %vm722_vm0, %v643_v7, 0.0  ;;  %v671_v62 = vand.u32 2147483647, %v545_v20  ;;  %v818_v60 = vsel %vm722_vm0, %v615_v37, 0.0 }
 0x1aa   : > { %v3909_v12 = vmul.f32 0.5, %v3895_v24  ;;  %v5407_v44 = vmul.f32 0.5, %v5393_v61  ;;  %v2261_v54 = vsub.f32 %v2257_v23, %v2260_v53  ;;  %v3419_v0 = vshll.u32 %v8664_v56, 30 }
 0x1ab   : > { %v2265_v29 = vand.u32 2147483648, %v8632_v50  ;;  %v819_v28 = vsel %vm722_vm0, %v657_v43, 0.0  ;;  %v699_v9 = vand.u32 2147483647, %v573_v11  ;;  %v713_v51 = vand.u32 2147483647, %v587_v5 }
 0x1ac   : > { %v5421_v21 = vmul.f32 4.0, %v3909_v12  ;;  %v5463_v26 = vmul.f32 4.0, %v5407_v44  ;;  %vm2262_vm15 = vcmp.eq.f32.partialorder %v2261_v54, 1.0  ;;  %v8679_v34 = vsub.s32 %v3416_v18, %v3419_v0 }
 0x1ad   : > { %v2263_v48 = vsel %vm2262_vm15, 0.0, %v2261_v54  ;;  %v750_v59 = vadd.f32 %v749_v19, %v748_v41  ;;  %v751_v20 = vsel %vm722_vm0, %v685_v16, 0.0  ;;  %v820_v23 = vadd.f32 %v819_v28, %v818_v60 }
 0x1ae   : > { %v8676_v30 = vadd.f32 1.0, %v5421_v21  ;;  %v5477_v58 = vadd.f32 1.0, %v5463_v26  ;;  %v2264_v32 = vand.u32 2147483647, %v2263_v48  ;;  %v3422_v33 = vsub.s32 0, %v8679_v34 }
 0x1af   : > { %v3412_v61 = vadd.s32 %v8601_v22, %v8598_v3  ;;  %v752_v53 = vadd.f32 %v751_v20, %v750_v59  ;;  %v821_v11 = vsel %vm722_vm0, %v699_v9, 0.0  ;;  %vm3358_vm5 = vcmp.lt.s32.totalorder %v8479_v17, 0 }
 0x1b0   : > { %v6261_v8 = vcvt.f32.s32 %v8676_v30  ;;  %v6259_v4 = vand.u32 2147483647, %v8676_v30  ;;  %v6373_v45 = vcvt.f32.s32 %v5477_v58  ;;  %v6264_v47 = vand.u32 2147483648, %v8676_v30 }
 0x1b1   : > { %v6371_v55 = vand.u32 2147483647, %v5477_v58  ;;  %v6376_v13 = vand.u32 2147483648, %v5477_v58  ;;  %v5856_v18 = vmin.u32 %v3422_v33, %v8679_v34  ;;  %v2266_v63 = vor.u32 %v2265_v29, %v2264_v32  ;;  %v6763_v32 = vld [vmem:[%s7135_s15 + $0x118] sm:$0xff] }
 0x1b2   : > { %v6262_v1 = vcvt.s32.f32 %v6261_v8  ;;  %v6374_v50 = vcvt.s32.f32 %v6373_v45  ;;  %vm8692_vm1 = vcmp.lt.f32.partialorder %v6259_v4, 8388608.0  ;;  %v822_v22 = vadd.f32 %v821_v11, %v820_v23  ;;  %v6765_v23 = vld [vmem:[%s7135_s15 + $0x268] sm:$0xff] }
 0x1b3   : > { %v3424_v39 = vclz %v5856_v18  ;;  %vm2325_vm2 = vcmp.ne.f32.partialorder %v2266_v63, 0.0  ;;  %vm8696_vm3 = vcmp.lt.f32.partialorder %v6371_v55, 8388608.0  ;;  %vm2339_vm4 = vcmp.lt.f32.partialorder %v2266_v63, 0.0 }
 0x1b4   : > { %v6263_v24 = vand.u32 2147483647, %v6262_v1  ;;  %v6375_v5 = vand.u32 2147483647, %v6374_v50  ;;  %v2367_v44 = vadd.f32 1.0, %v2266_v63  ;;  %vm2353_vm6 = vmand %vm2339_vm4, %vm2325_vm2  ;;  %v888_v37 = vsel %vm722_vm0, %v629_v52, 0.0 }
 0x1b5   : > { %v5857_v3 = vadd.s32 4294967294, %v3424_v39  ;;  %v8703_v21 = vmul.f32 4.0, %v8528_v36  ;;  %v889_v26 = vsel %vm722_vm0, %v671_v62, 0.0  ;;  %v891_v16 = vsel %vm722_vm0, %v713_v51, 0.0  ;;  %v6762_v62 = vld [vmem:[%s7135_s15 + $0xa8] sm:$0xff] }
 0x1b6   : > { %v6265_v7 = vor.u32 %v6264_v47, %v6263_v24  ;;  %v6377_v54 = vor.u32 %v6376_v13, %v6375_v5  ;;  %v2381_v43 = vsel %vm2353_vm6, %v2367_v44, %v2266_v63  ;;  %vm8714_vm8 = vcmp.le.f32.partialorder %v3356_v27, 0.7853982  ;;  %v6764_v47 = vld [vmem:[%s7135_s15 + $0x188] sm:$0xff]  ;;  %v6766_v24 = vld [vmem:[%s7135_s15 + $0x2d8] sm:$0xff] }
 0x1b7   : > { %vm5858_vm7 = vcmp.lt.s32.totalorder %v5857_v3, 0  ;;  %v2395_v41 = vmul.f32 6.2831855, %v2381_v43  ;;  %v1053_v60 = vsel %vm722_vm0, %v6762_v62, 0.0  ;;  %v3442_v27 = vsub.s32 4, %v8664_v56 }
 0x1b8   : > { %v6266_v0 = vsel %vm8692_vm1, %v6265_v7, %v8676_v30  ;;  %v6378_v48 = vsel %vm8696_vm3, %v6377_v54, %v5477_v58  ;;  %v3427_v36 = vsel %vm5858_vm7, 0, %v5857_v3  ;;  %v1054_v30 = vsel %vm722_vm0, %v6763_v32, 0.0 }
 0x1b9   : > { %v5941_v19 = vadd.f32 -1.0, %v6378_v48  ;;  %v3428_v29 = vsub.s32 32, %v3427_v36  ;;  %v3429_v58 = vshll.u32 %v8679_v34, %v3427_v36  ;;  %v3432_v28 = vsub.s32 4294967266, %v3427_v36 }
 0x1ba   : > { %v2409_v8 = vmul.f32 2.0, %v2395_v41  ;;  %v890_v51 = vadd.f32 %v889_v26, %v888_v37  ;;  %v958_v59 = vsel %vm722_vm0, %v752_v53, 0.0  ;;  %v1055_v20 = vadd.f32 %v1054_v30, %v1053_v60  ;;  %v6767_v37 = vld [vmem:[%s7135_s15 + $0x348] sm:$0xff] }
 0x1bb   : > { %v5561_v9 = vmul.f32 5.0, %v5941_v19  ;;  %v3430_v4 = vshrl.u32 %v3412_v61, %v3428_v29  ;;  %v3433_v45 = vadd.s32 127, %v3432_v28  ;;  %v1056_v55 = vsel %vm722_vm0, %v6764_v47, 0.0  ;;  %v6768_v26 = vld [vmem:[%s7135_s15 + $0x428] sm:$0xff] }
 0x1bc   : > { %v8725_v33 = vmul.f32 3.1415927, %v2409_v8  ;;  %v1123_v34 = vsel %vm722_vm0, %v6765_v23, 0.0  ;;  %v959_v50 = vsel %vm722_vm0, %v822_v22, 0.0  ;;  %v1124_v61 = vsel %vm722_vm0, %v6766_v24, 0.0  ;;  %v6770_v30 = vld [vmem:[%s7135_s15 + $0x508] sm:$0xff] }
 0x1bd   : > { %v5575_v1 = vadd.f32 %v6266_v0, %v5561_v9  ;;  %v3431_v13 = vor.u32 %v3430_v4, %v3429_v58  ;;  %v3434_v18 = vshll.u32 %v3433_v45, 23  ;;  %v3443_v11 = vsel %vm3358_vm5, %v3442_v27, %v8664_v56  ;;  %v6769_v0 = vld [vmem:[%s7135_s15 + $0x498] sm:$0xff] }
 0x1be   : > { %v3253_v63 = vand.u32 2147483647, %v8725_v33  ;;  %v3256_v57 = vand.u32 2139095040, %v8725_v33  ;;  %v892_v5 = vadd.f32 %v891_v16, %v890_v51  ;;  %v1057_v44 = vadd.f32 %v1056_v55, %v1055_v20 }
 0x1bf   : > { %v5617_v53 = vadd.f32 %v8509_v10, %v5575_v1  ;;  %v3435_v39 = vor.u32 4788187, %v3434_v18  ;;  %v3438_v7 = vcvt.s32.f32 %v3431_v13  ;;  %v1125_v22 = vadd.f32 %v1124_v61, %v1123_v34 }
 0x1c0   : > { %v3260_v12 = vand.u32 8388607, %v3253_v63  ;;  %v3257_v3 = vshrl.u32 %v3256_v57, 23  ;;  %v1126_v10 = vsel %vm722_vm0, %v6767_v37, 0.0  ;;  %v3445_v56 = vsel %vm8714_vm8, 0, %v3443_v11 }
 0x1c1   : > { %v6535_v54 = vtrunc.f32 %v5617_v53  ;;  %v3436_v43 = vand.u32 2147483647, %v3435_v39  ;;  %v1193_v16 = vsel %vm722_vm0, %v6768_v26, 0.0  ;;  %v1194_v48 = vsel %vm722_vm0, %v6769_v0, 0.0 }
 0x1c2   : > { %v5851_v19 = vadd.s32 4294967169, %v3257_v3  ;;  %v1127_v36 = vadd.f32 %v1126_v10, %v1125_v22  ;;  %v1195_v62 = vadd.f32 %v1194_v48, %v1193_v16  ;;  %v3261_v32 = vor.u32 8388608, %v3260_v12 }
 0x1c3   : > { %v6536_v41 = vcvt.f32.s32 %v6535_v54  ;;  %v3439_v60 = vmul.f32 %v3438_v7, %v3436_v43  ;;  %v1196_v29 = vsel %vm722_vm0, %v6770_v30, 0.0  ;;  %v8752_v58 = vmul.f32 0.33333334, %v1057_v44 }
 0x1c4   : > { %v3263_v28 = vadd.s32 1, %v5851_v19  ;;  %v1197_v8 = vadd.f32 %v1196_v29, %v1195_v62  ;;  %v8756_v9 = vmul.f32 0.33333334, %v1127_v36  ;;  %v960_v27 = vadd.f32 %v959_v50, %v958_v59 }
 0x1c5   : > { %5645 = vst.msk [vmem:[%s7930_s9 + $0x50] sm:$0xff] %vm722_vm0, %v6536_v41  ;;  %v3440_v51 = vxor.u32 2147483648, %v3439_v60  ;;  %v8758_v4 = vand.u32 3, %v3445_v56  ;;  %v8761_v45 = vadd.f32 1.0, %v8703_v21  ;;  %v961_v20 = vsel %vm722_vm0, %v892_v5, 0.0 }
 0x1c6   : > { %vm3264_vm9 = vcmp.gt.s32.totalorder %v3263_v28, 0  ;;  %v8764_v1 = vmul.f32 0.33333334, %v1197_v8  ;;  %v1805_v47 = vmax.f32 %v8752_v58, %v8756_v9  ;;  %v1833_v55 = vmin.f32 %v8752_v58, %v8756_v9 }
 0x1c7   : > { %v3441_v59 = vsel %vm3358_vm5, %v3440_v51, %v3439_v60  ;;  %v4942_v23 = vadd.s32 3, %v3445_v56  ;;  %v3265_v34 = vsel %vm3264_vm9, %v3263_v28, 0  ;;  %v962_v50 = vadd.f32 %v961_v20, %v960_v27 }
 0x1c8   : > { %v3444_v21 = vsel %vm8714_vm8, %v8479_v17, %v3441_v59  ;;  %v3266_v13 = vshrl.u32 %v3265_v34, 5  ;;  %v3267_v18 = vand.u32 31, %v3265_v34  ;;  %v8775_v24 = vshll.u32 %v3261_v32, 8 }
 0x1c9   : > { %6661 = vcosq.f32 %v3444_v21  ;;  %v8778_v61 = vmax.f32 %v1805_v47, %v8764_v1  ;;  %v1847_v53 = vmin.f32 %v1833_v55, %v8764_v1  ;;  %v1009_v11 = vmul.f32 0.33333334, %v962_v50 }
 0x1ca   : > { %6663 = vsinq.f32 %v3444_v21  ;;  %v3268_v57 = vsub.s32 32, %v3267_v18  ;;  %v3270_v5 = vshll.u32 %v6968_v25, %v3267_v18  ;;  %v3273_v39 = vshll.u32 %v6969_v40, %v3267_v18 }
 0x1cb   : > { %v3276_v52 = vshll.u32 %v6970_v15, %v3267_v18  ;;  %v3279_v7 = vshll.u32 %v10887_v31, %v3267_v18  ;;  %v3282_v12 = vshll.u32 %v10885_v42, %v3267_v18  ;;  %vm3285_vm10 = vcmp.lt.s32.totalorder %v3266_v13, 1  ;;  %6033 = vmatprep.subr.mxu0 %v1009_v11 }
 0x1cc   : > { %v3269_v44 = vshrl.u32 %v6968_v25, %v3268_v57  ;;  %v3271_v54 = vshrl.u32 %v6969_v40, %v3268_v57  ;;  %v3274_v3 = vshrl.u32 %v6970_v15, %v3268_v57  ;;  %v3277_v22 = vshrl.u32 %v10887_v31, %v3268_v57  ;;  %6034 = vmatpush3.msra.mxu0 %v1009_v11 }
 0x1cd   : > { %v3280_v37 = vshrl.u32 %v10885_v42, %v3268_v57  ;;  %v3283_v10 = vshrl.u32 %v10927_v49, %v3268_v57  ;;  %vm3286_vm11 = vcmp.lt.s32.totalorder %v3266_v13, 2  ;;  %vm3287_vm12 = vcmp.lt.s32.totalorder %v3266_v13, 3 }
 0x1ce   : > { %vm3454_vm13 = vcmp.eq.s32.totalorder %v8758_v4, 2  ;;  %v3272_v43 = vor.u32 %v3271_v54, %v3270_v5  ;;  %v3275_v56 = vor.u32 %v3274_v3, %v3273_v39  ;;  %v3278_v26 = vor.u32 %v3277_v22, %v3276_v52 }
 0x1cf   : > { %vm3288_vm15 = vcmp.lt.s32.totalorder %v3266_v13, 4  ;;  %vm3451_vm1 = vcmp.eq.s32.totalorder %v8758_v4, 0  ;;  %v3281_v16 = vor.u32 %v3280_v37, %v3279_v7  ;;  %v3284_v0 = vor.u32 %v3283_v10, %v3282_v12 }
 0x1d0   : > { %v8795_v48 = vsub.f32 %v8778_v61, %v1847_v53  ;;  %v1875_v41 = vadd.f32 1e-08, %v8778_v61  ;;  %vm3450_vm2 = vcmp.lt.s32.totalorder %v8758_v4, 2  ;;  %v3289_v19 = vsel %vm3285_vm10, %v3269_v44, %v3272_v43 }
 0x1d1   : > { %v3290_v36 = vsel %vm3288_vm15, %v3278_v26, 2102212464  ;;  %v3293_v62 = vsel %vm3285_vm10, %v3272_v43, %v3275_v56  ;;  %v3297_v60 = vsel %vm3285_vm10, %v3275_v56, %v3278_v26  ;;  %v3294_v30 = vsel %vm3288_vm15, %v3281_v16, 920167782 }
 0x1d2   : > { %v3291_v32 = vsel %vm3287_vm12, %v3275_v56, %v3290_v36  ;;  %v3298_v29 = vsel %vm3288_vm15, %v3284_v0, 1326507024  ;;  %6665 = vrcp.f32 %v1875_v41  ;;  %v4943_v28 = vand.u32 3, %v4942_v23 }
 0x1d3   : > { %v3295_v8 = vsel %vm3287_vm12, %v3278_v26, %v3294_v30  ;;  %v3299_v27 = vsel %vm3287_vm12, %v3281_v16, %v3298_v29  ;;  %vm1917_vm3 = vcmp.eq.f32.partialorder %v8795_v48, 0.0  ;;  %v3292_v51 = vsel %vm3286_vm11, %v3289_v19, %v3291_v32 }
 0x1d4   : > { %v3296_v20 = vsel %vm3286_vm11, %v3293_v62, %v3295_v8  ;;  %v3300_v47 = vsel %vm3286_vm11, %v3297_v60, %v3299_v27  ;;  %v1931_v55 = vsel %vm1917_vm3, 1.0, %v8795_v48  ;;  %v1959_v21 = vsub.f32 %v8778_v61, %v8752_v58  ;;  %v320_v8 = vld [vmem:[%s7135_s15 + $0x90] sm:$0xff] }
 0x1d5   : > { %v8811_v59 = vmul.u32.u64.low %v8775_v24, %v3300_v47  ;;  %v8812_v34 = vmul.u32.u64.high %v8775_v24, %v3300_v47, %v8811_v59  ;;  %v8815_v23 = vmul.u32.u64.low %v8775_v24, %v3296_v20  ;;  %v8816_v50 = vmul.u32.u64.high %v8775_v24, %v3296_v20, %v8815_v23  ;;  %v348_v20 = vld [vmem:[%s7135_s15 + $0x170] sm:$0xff]  ;;  %v362_v47 = vld [vmem:[%s7135_s15 + $0x1e0] sm:$0xff] }
 0x1d6   : > { %6667 = vrcp.f32 %v1931_v55  ;;  %v1973_v18 = vsub.f32 %v8778_v61, %v8756_v9  ;;  %v1987_v13 = vsub.f32 %v8778_v61, %v8764_v1  ;;  %v6662_v53 = vpop.eup %6661  ;;  %vm4945_vm4 = vcmp.eq.s32.totalorder %v4943_v28, 0 }
 0x1d7   : > { %vm4948_vm5 = vcmp.eq.s32.totalorder %v4943_v28, 2  ;;  %v2057_v11 = vmul.f32 2.0, %v1931_v55  ;;  %v2099_v57 = vmul.f32 4.0, %v1931_v55  ;;  %v6664_v5 = vpop.eup %6663  ;;  %v3455_v39 = vxor.u32 2147483648, %v6662_v53  ;;  %v376_v55 = vld [vmem:[%s7135_s15 + $0x250] sm:$0xff] }
 0x1d8   : > { %v3308_v52 = vmul.u32 %v8775_v24, %v3292_v51  ;;  %v2043_v7 = vsub.f32 %v1959_v21, %v1987_v13  ;;  %v2085_v12 = vsub.f32 %v1973_v18, %v1959_v21  ;;  %v3452_v44 = vxor.u32 2147483648, %v6664_v5  ;;  %v390_v21 = vld [vmem:[%s7135_s15 + $0x2c0] sm:$0xff] }
 0x1d9   : > { %vm4944_vm6 = vcmp.lt.s32.totalorder %v4943_v28, 2  ;;  %vm3310_vm7 = vc.u32 %v8812_v34, %v8815_v23  ;;  %v3311_v54 = vadd.s32 1, %v8816_v50  ;;  %vm3448_vm8 = vweird.f32 %v8479_v17 }
 0x1da   : > { %v3456_v1 = vsel %vm3454_vm13, %v3455_v39, %v6664_v5  ;;  %v4950_v3 = vsel %vm4948_vm5, %v3455_v39, %v6664_v5  ;;  %v2071_v22 = vadd.f32 %v2057_v11, %v2043_v7  ;;  %v3453_v24 = vsel %vm3451_vm1, %v6662_v53, %v3452_v44  ;;  %v418_v5 = vld [vmem:[%s7135_s15 + $0x3a0] sm:$0xff]  ;;  %v432_v39 = vld [vmem:[%s7135_s15 + $0x410] sm:$0xff] }
 0x1db   : > { %v4947_v37 = vsel %vm4945_vm4, %v6662_v53, %v3452_v44  ;;  %v3312_v10 = vsel %vm3310_vm7, %v3311_v54, %v8816_v50  ;;  %v2113_v43 = vadd.f32 %v2099_v57, %v2085_v12  ;;  %v3457_v56 = vsel %vm3450_vm2, %v3453_v24, %v3456_v1 }
 0x1dc   : > { %v4951_v26 = vsel %vm4944_vm6, %v4947_v37, %v4950_v3  ;;  %v3313_v16 = vadd.s32 %v3312_v10, %v3308_v52  ;;  %vm2029_vm9 = vcmp.eq.f32.partialorder %v8778_v61, %v8756_v9  ;;  %v3458_v17 = vsel %vm3448_vm8, nan, %v3457_v56  ;;  %v446_v52 = vld [vmem:[%s7135_s15 + $0x480] sm:$0xff] }
 0x1dd   : > { %v4952_v0 = vsel %vm3448_vm8, nan, %v4951_v26  ;;  %v6469_v41 = vcvt.f32.s32 %v8761_v45  ;;  %v3880_v19 = vmul.f32 %v3458_v17, %v8371_v6  ;;  %v2015_v60 = vsub.f32 %v1987_v13, %v1973_v18  ;;  %v404_v18 = vld [vmem:[%s7135_s15 + $0x330] sm:$0xff] }
 0x1de   : > { %v5378_v36 = vmul.f32 %v4952_v0, %v8371_v6  ;;  %v3314_v62 = vadd.s32 536870912, %v3313_v16  ;;  %v5954_v9 = vadd.f32 -1.0, %v6482_v38  ;;  %vm2001_vm10 = vcmp.eq.f32.partialorder %v8778_v61, %v8752_v58 }
 0x1df   : > { %v6666_v4 = vpop.eup %6665  ;;  %v2127_v32 = vsel %vm2029_vm9, %v2071_v22, %v2113_v43  ;;  %v3894_v30 = vadd.f32 1.0, %v3880_v19  ;;  %v8858_v2 = vcvt.s32.f32 %v6469_v41  ;;  %v6472_v50 = vand.u32 2147483648, %v8761_v45 }
 0x1e0   : > { %v5392_v29 = vadd.f32 1.0, %v5378_v36  ;;  %v8851_v28 = vshrl.u32 %v3314_v62, 30  ;;  %v8854_v6 = vmul.f32 %v6666_v4, %v8795_v48  ;;  %v2141_v51 = vsel %vm2001_vm10, %v2015_v60, %v2127_v32  ;;  %v460_v62 = vld [vmem:[%s7135_s15 + $0x4f0] sm:$0xff] }
 0x1e1   : > { %v3908_v38 = vmul.f32 0.5, %v3894_v30  ;;  %v8865_v48 = vmul.f32 25.0, %v5954_v9  ;;  %v474_v13 = vsub.f32 %v306_v35, %v320_v8  ;;  %v488_v7 = vsub.f32 %v320_v8, %v334_v46 }
 0x1e2   : > { %v5406_v27 = vmul.f32 0.5, %v5392_v29  ;;  %v3316_v58 = vshll.u32 %v8851_v28, 30  ;;  %v6471_v12 = vand.u32 2147483647, %v8858_v2  ;;  %v502_v54 = vsub.f32 %v334_v46, %v348_v20 }
 0x1e3   : > { %v6668_v59 = vpop.eup %6667  ;;  %v5420_v53 = vmul.f32 4.0, %v3908_v38  ;;  %v516_v1 = vsub.f32 %v362_v47, %v376_v55  ;;  %v530_v37 = vsub.f32 %v376_v55, %v390_v21  ;;  %vm3255_vm14 = vcmp.lt.s32.totalorder %v8725_v33, 0 }
 0x1e4   : > { %v5462_v11 = vmul.f32 4.0, %v5406_v27  ;;  %v8870_v57 = vsub.s32 %v3313_v16, %v3316_v58  ;;  %v2155_v44 = vmul.f32 %v6668_v59, %v2141_v51  ;;  %v544_v10 = vsub.f32 %v390_v21, %v404_v18 }
 0x1e5   : > { %v8876_v3 = vadd.f32 1.0, %v5420_v53  ;;  %v558_v43 = vsub.f32 %v418_v5, %v432_v39  ;;  %v572_v56 = vsub.f32 %v432_v39, %v446_v52  ;;  %v600_v17 = vand.u32 2147483647, %v474_v13 }
 0x1e6   : > { %v5476_v22 = vadd.f32 1.0, %v5462_v11  ;;  %v3319_v24 = vsub.s32 0, %v8870_v57  ;;  %v2170_v16 = vmul.f32 0.16666667, %v2155_v44  ;;  %v614_v0 = vand.u32 2147483647, %v488_v7 }
 0x1e7   : > { %v6253_v26 = vcvt.f32.s32 %v8876_v3  ;;  %vm8883_vm11 = vcmp.le.f32.partialorder %v3253_v63, 0.7853982  ;;  %v8889_v60 = vand.u32 2147483647, %v502_v54  ;;  %v642_v4 = vand.u32 2147483647, %v516_v1 }
 0x1e8   : > { %v6365_v41 = vcvt.f32.s32 %v5476_v22  ;;  %v5852_v36 = vmin.u32 %v3319_v24, %v8870_v57  ;;  %v6363_v32 = vand.u32 2147483647, %v5476_v22  ;;  %v3339_v30 = vsub.s32 4, %v8851_v28 }
 0x1e9   : > { %v6254_v9 = vcvt.s32.f32 %v6253_v26  ;;  %v656_v29 = vand.u32 2147483647, %v530_v37  ;;  %v6256_v35 = vand.u32 2147483648, %v8876_v3  ;;  %v6368_v46 = vand.u32 2147483648, %v5476_v22 }
 0x1ea   : > { %v6366_v8 = vcvt.s32.f32 %v6365_v41  ;;  %v3321_v38 = vclz %v5852_v36  ;;  %v6251_v63 = vand.u32 2147483647, %v8876_v3  ;;  %v2247_v58 = vand.u32 2147483647, %v2170_v16 }
 0x1eb   : > { %v6255_v27 = vand.u32 2147483647, %v6254_v9  ;;  %v586_v51 = vsub.f32 %v446_v52, %v460_v62  ;;  %v3309_v47 = vadd.s32 %v8815_v23, %v8812_v34  ;;  %v8896_v59 = vand.u32 2147483647, %v544_v10  ;;  %v6774_v52 = vld [vmem:[%s7135_s15 + $0x260] sm:$0xff] }
 0x1ec   : > { %v6367_v20 = vand.u32 2147483647, %v6366_v8  ;;  %v5853_v55 = vadd.s32 4294967294, %v3321_v38  ;;  %vm8898_vm12 = vcmp.lt.f32.partialorder %v6363_v32, 8388608.0  ;;  %v2250_v18 = vfloor.f32 %v2247_v58 }
 0x1ed   : > { %v684_v13 = vand.u32 2147483647, %v558_v43  ;;  %v698_v53 = vand.u32 2147483647, %v572_v56  ;;  %v6257_v11 = vor.u32 %v6256_v35, %v6255_v27  ;;  %v3340_v39 = vsel %vm3255_vm14, %v3339_v30, %v8851_v28 }
 0x1ee   : > { %v6369_v5 = vor.u32 %v6368_v46, %v6367_v20  ;;  %vm5854_vm13 = vcmp.lt.s32.totalorder %v5853_v55, 0  ;;  %vm8905_vm15 = vcmp.lt.f32.partialorder %v6251_v63, 8388608.0  ;;  %v2251_v23 = vsub.f32 %v2247_v58, %v2250_v18  ;;  %v6771_v20 = vld [vmem:[%s7135_s15 + $0xa0] sm:$0xff] }
 0x1ef   : > { %v3324_v34 = vsel %vm5854_vm13, 0, %v5853_v55  ;;  %v8909_v7 = vand.u32 2147483647, %v586_v51  ;;  %v3342_v10 = vsel %vm8883_vm11, 0, %v3340_v39  ;;  %v2255_v28 = vand.u32 2147483648, %v2170_v16 }
 0x1f0   : > { %v6370_v44 = vsel %vm8898_vm12, %v6369_v5, %v5476_v22  ;;  %v3325_v54 = vsub.s32 32, %v3324_v34  ;;  %v3326_v1 = vshll.u32 %v8870_v57, %v3324_v34  ;;  %v3329_v24 = vsub.s32 4294967266, %v3324_v34 }
 0x1f1   : > { %v5940_v37 = vadd.f32 -1.0, %v6370_v44  ;;  %vm2252_vm1 = vcmp.eq.f32.partialorder %v2251_v23, 1.0  ;;  %v6258_v43 = vsel %vm8905_vm15, %v6257_v11, %v8876_v3  ;;  %v743_v22 = vsel %vm722_vm0, %v600_v17, 0.0 }
 0x1f2   : > { %v3327_v56 = vshrl.u32 %v3309_v47, %v3325_v54  ;;  %v3330_v26 = vadd.s32 127, %v3329_v24  ;;  %v2253_v41 = vsel %vm2252_vm1, 0.0, %v2251_v23  ;;  %v744_v57 = vsel %vm722_vm0, %v642_v4, 0.0 }
 0x1f3   : > { %v5560_v36 = vmul.f32 5.0, %v5940_v37  ;;  %v2254_v62 = vand.u32 2147483647, %v2253_v41  ;;  %v8921_v30 = vand.u32 3, %v3342_v10  ;;  %v8923_v35 = vadd.s32 3, %v3342_v10  ;;  %v6777_v41 = vld [vmem:[%s7135_s15 + $0x420] sm:$0xff] }
 0x1f4   : > { %v3328_v9 = vor.u32 %v3327_v56, %v3326_v1  ;;  %v3331_v32 = vshll.u32 %v3330_v26, 23  ;;  %v813_v3 = vsel %vm722_vm0, %v614_v0, 0.0  ;;  %v814_v46 = vsel %vm722_vm0, %v656_v29, 0.0  ;;  %v6772_v0 = vld [vmem:[%s7135_s15 + $0x110] sm:$0xff]  ;;  %v6776_v56 = vld [vmem:[%s7135_s15 + $0x340] sm:$0xff] }
 0x1f5   : > { %v5574_v16 = vadd.f32 %v6258_v43, %v5560_v36  ;;  %v2256_v8 = vor.u32 %v2255_v28, %v2254_v62  ;;  %v745_v27 = vadd.f32 %v744_v57, %v743_v22  ;;  %v746_v17 = vsel %vm722_vm0, %v684_v13, 0.0  ;;  %v6773_v13 = vld [vmem:[%s7135_s15 + $0x180] sm:$0xff]  ;;  %v6775_v1 = vld [vmem:[%s7135_s15 + $0x2d0] sm:$0xff] }
 0x1f6   : > { %v3332_v38 = vor.u32 4788187, %v3331_v32  ;;  %v3335_v63 = vcvt.s32.f32 %v3328_v9  ;;  %v1048_v47 = vsel %vm722_vm0, %v6771_v20, 0.0  ;;  %v1049_v29 = vsel %vm722_vm0, %v6772_v0, 0.0  ;;  %v6778_v36 = vld [vmem:[%s7135_s15 + $0x490] sm:$0xff]  ;;  %v6779_v22 = vld [vmem:[%s7135_s15 + $0x500] sm:$0xff] }
 0x1f7   : > { %v5616_v4 = vadd.f32 %v8865_v48, %v5574_v16  ;;  %vm2324_vm2 = vcmp.ne.f32.partialorder %v2256_v8, 0.0  ;;  %vm2338_vm3 = vcmp.lt.f32.partialorder %v2256_v8, 0.0  ;;  %v2366_v58 = vadd.f32 1.0, %v2256_v8 }
 0x1f8   : > { %v3333_v51 = vand.u32 2147483647, %v3332_v38  ;;  %vm2352_vm4 = vmand %vm2338_vm3, %vm2324_vm2  ;;  %v815_v55 = vadd.f32 %v814_v46, %v813_v3  ;;  %v1050_v11 = vadd.f32 %v1049_v29, %v1048_v47  ;;  %v1051_v48 = vsel %vm722_vm0, %v6773_v13, 0.0 }
 0x1f9   : > { %v6533_v21 = vtrunc.f32 %v5616_v4  ;;  %v2380_v18 = vsel %vm2352_vm4, %v2366_v58, %v2256_v8  ;;  %v1118_v34 = vsel %vm722_vm0, %v6774_v52, 0.0  ;;  %v816_v23 = vsel %vm722_vm0, %v698_v53, 0.0 }
 0x1fa   : > { %v3336_v5 = vmul.f32 %v3335_v63, %v3333_v51  ;;  %v2394_v39 = vmul.f32 6.2831855, %v2380_v18  ;;  %v1052_v54 = vadd.f32 %v1051_v48, %v1050_v11  ;;  %v1119_v24 = vsel %vm722_vm0, %v6775_v1, 0.0 }
 0x1fb   : > { %v6534_v44 = vcvt.f32.s32 %v6533_v21  ;;  %v883_v37 = vsel %vm722_vm0, %v8889_v60, 0.0  ;;  %v1120_v43 = vadd.f32 %v1119_v24, %v1118_v34  ;;  %v1121_v26 = vsel %vm722_vm0, %v6776_v56, 0.0 }
 0x1fc   : > { %v3337_v10 = vxor.u32 2147483648, %v3336_v5  ;;  %v2408_v28 = vmul.f32 2.0, %v2394_v39  ;;  %v1188_v53 = vsel %vm722_vm0, %v6777_v41, 0.0  ;;  %v1189_v62 = vsel %vm722_vm0, %v6778_v36, 0.0 }
 0x1fd   : > { %5644 = vst.msk [vmem:[%s7930_s9 + $0x48] sm:$0xff] %vm722_vm0, %v6534_v44  ;;  %v1191_v57 = vsel %vm722_vm0, %v6779_v22, 0.0  ;;  %v884_v60 = vsel %vm722_vm0, %v8896_v59, 0.0  ;;  %v1122_v16 = vadd.f32 %v1121_v26, %v1120_v43  ;;  %v1190_v8 = vadd.f32 %v1189_v62, %v1188_v53 }
 0x1fe   : > { %v3338_v9 = vsel %vm3255_vm14, %v3337_v10, %v3336_v5  ;;  %v8956_v32 = vmul.f32 3.1415927, %v2408_v28  ;;  %v8961_v46 = vmul.f32 0.33333334, %v1052_v54  ;;  %v747_v38 = vadd.f32 %v746_v17, %v745_v27 }
 0x1ff   : > { %v3341_v3 = vsel %vm8883_vm11, %v8725_v33, %v3338_v9  ;;  %v817_v63 = vadd.f32 %v816_v23, %v815_v55  ;;  %v885_v58 = vadd.f32 %v884_v60, %v883_v37  ;;  %v1192_v51 = vadd.f32 %v1191_v57, %v1190_v8 }
 0x200   : > { %6669 = vcosq.f32 %v3341_v3  ;;  %v3150_v4 = vand.u32 2147483647, %v8956_v32  ;;  %v3153_v59 = vand.u32 2139095040, %v8956_v32  ;;  %v8965_v20 = vmul.f32 0.33333334, %v1122_v16 }
 0x201   : > { %6671 = vsinq.f32 %v3341_v3  ;;  %v886_v47 = vsel %vm722_vm0, %v8909_v7, 0.0  ;;  %v8970_v19 = vand.u32 3, %v8923_v35  ;;  %v6467_v17 = vand.u32 2147483647, %v8761_v45 }
 0x202   : > { %v3154_v0 = vshrl.u32 %v3153_v59, 23  ;;  %v3157_v27 = vand.u32 8388607, %v3150_v4  ;;  %v1262_v29 = vmul.f32 0.33333334, %v1192_v51  ;;  %v1804_v55 = vmax.f32 %v8961_v46, %v8965_v20 }
 0x203   : > { %v1832_v21 = vmin.f32 %v8961_v46, %v8965_v20  ;;  %v8983_v7 = vor.u32 %v6472_v50, %v6471_v12  ;;  %v887_v18 = vadd.f32 %v886_v47, %v885_v58  ;;  %v953_v11 = vsel %vm722_vm0, %v747_v38, 0.0 }
 0x204   : > { %v5847_v35 = vadd.s32 4294967169, %v3154_v0  ;;  %vm3351_vm5 = vcmp.eq.s32.totalorder %v8921_v30, 2  ;;  %v3158_v13 = vor.u32 8388608, %v3157_v27  ;;  %v8987_v48 = vmax.f32 %v1804_v55, %v1262_v29 }
 0x205   : > { %v1846_v5 = vmin.f32 %v1832_v21, %v1262_v29  ;;  %v954_v39 = vsel %vm722_vm0, %v817_v63, 0.0  ;;  %vm3348_vm6 = vcmp.eq.s32.totalorder %v8921_v30, 0  ;;  %vm4841_vm7 = vcmp.eq.s32.totalorder %v8970_v19, 0 }
 0x206   : > { %vm4844_vm8 = vcmp.eq.s32.totalorder %v8970_v19, 2  ;;  %v3160_v2 = vadd.s32 1, %v5847_v35  ;;  %v8994_v50 = vmul.f32 4.0, %v8778_v61  ;;  %vm3347_vm9 = vcmp.lt.s32.totalorder %v8921_v30, 2 }
 0x207   : > { %vm4840_vm10 = vcmp.lt.s32.totalorder %v8970_v19, 2  ;;  %v8999_v12 = vsub.f32 %v8987_v48, %v1846_v5  ;;  %v1874_v52 = vadd.f32 1e-08, %v8987_v48  ;;  %v9004_v34 = vsub.f32 %v8987_v48, %v8961_v46 }
 0x208   : > { %v9008_v23 = vsub.f32 %v8987_v48, %v8965_v20  ;;  %vm3345_vm14 = vweird.f32 %v8725_v33  ;;  %vm3161_vm11 = vcmp.gt.s32.totalorder %v3160_v2, 0  ;;  %v9012_v61 = vsub.f32 %v8987_v48, %v1262_v29 }
 0x209   : > { %v9014_v44 = vadd.f32 %v954_v39, %v953_v11  ;;  %v9017_v54 = vsel %vm722_vm0, %v887_v18, 0.0  ;;  %v3162_v1 = vsel %vm3161_vm11, %v3160_v2, 0  ;;  %v9019_v24 = vshll.u32 %v3158_v13, 8 }
 0x20a   : > { %6673 = vrcp.f32 %v1874_v52  ;;  %vm1916_vm12 = vcmp.eq.f32.partialorder %v8999_v12, 0.0  ;;  %v9022_v37 = vshrl.u32 %v3162_v1, 5  ;;  %v3164_v10 = vand.u32 31, %v3162_v1 }
 0x20b   : > { %v1930_v28 = vsel %vm1916_vm12, 1.0, %v8999_v12  ;;  %v2084_v43 = vsub.f32 %v9008_v23, %v9004_v34  ;;  %v2014_v56 = vsub.f32 %v9012_v61, %v9008_v23  ;;  %v2042_v26 = vsub.f32 %v9004_v34, %v9012_v61 }
 0x20c   : > { %6675 = vrcp.f32 %v1930_v28  ;;  %v2056_v41 = vmul.f32 2.0, %v1930_v28  ;;  %v3165_v53 = vsub.s32 32, %v3164_v10  ;;  %v3167_v36 = vshll.u32 %v6968_v25, %v3164_v10 }
 0x20d   : > { %v3170_v62 = vshll.u32 %v6969_v40, %v3164_v10  ;;  %v3173_v22 = vshll.u32 %v6970_v15, %v3164_v10  ;;  %v6670_v57 = vpop.eup %6669  ;;  %v3176_v60 = vshll.u32 %v10887_v31, %v3164_v10  ;;  %v3179_v9 = vshll.u32 %v10885_v42, %v3164_v10 }
 0x20e   : > { %vm3182_vm13 = vcmp.lt.s32.totalorder %v9022_v37, 1  ;;  %vm3183_vm15 = vcmp.lt.s32.totalorder %v9022_v37, 2  ;;  %v6672_v16 = vpop.eup %6671  ;;  %v3352_v8 = vxor.u32 2147483648, %v6670_v57  ;;  %v3166_v3 = vshrl.u32 %v6968_v25, %v3165_v53 }
 0x20f   : > { %v3168_v38 = vshrl.u32 %v6969_v40, %v3165_v53  ;;  %v3171_v63 = vshrl.u32 %v6970_v15, %v3165_v53  ;;  %v3349_v59 = vxor.u32 2147483648, %v6672_v16  ;;  %v3174_v58 = vshrl.u32 %v10887_v31, %v3165_v53 }
 0x210   : > { %v3177_v51 = vshrl.u32 %v10885_v42, %v3165_v53  ;;  %v3180_v47 = vshrl.u32 %v10927_v49, %v3165_v53  ;;  %v3353_v0 = vsel %vm3351_vm5, %v3352_v8, %v6672_v16  ;;  %v4846_v27 = vsel %vm4844_vm8, %v3352_v8, %v6672_v16 }
 0x211   : > { %v3169_v29 = vor.u32 %v3168_v38, %v3167_v36  ;;  %v3172_v55 = vor.u32 %v3171_v63, %v3170_v62  ;;  %v3350_v21 = vsel %vm3348_vm6, %v6670_v57, %v3349_v59  ;;  %v4843_v35 = vsel %vm4841_vm7, %v6670_v57, %v3349_v59 }
 0x212   : > { %v3175_v18 = vor.u32 %v3174_v58, %v3173_v22  ;;  %v3178_v11 = vor.u32 %v3177_v51, %v3176_v60  ;;  %vm2028_vm1 = vcmp.eq.f32.partialorder %v8987_v48, %v8965_v20  ;;  %v3354_v13 = vsel %vm3347_vm9, %v3350_v21, %v3353_v0 }
 0x213   : > { %v4847_v5 = vsel %vm4840_vm10, %v4843_v35, %v4846_v27  ;;  %vm9060_vm2 = vcmp.lt.f32.partialorder %v6467_v17, 8388608.0  ;;  %v3181_v2 = vor.u32 %v3180_v47, %v3179_v9  ;;  %vm3184_vm3 = vcmp.lt.s32.totalorder %v9022_v37, 3 }
 0x214   : > { %vm2000_vm4 = vcmp.eq.f32.partialorder %v8987_v48, %v8961_v46  ;;  %v3355_v52 = vsel %vm3345_vm14, nan, %v3354_v13  ;;  %v4848_v30 = vsel %vm3345_vm14, nan, %v4847_v5  ;;  %vm3185_vm5 = vcmp.lt.s32.totalorder %v9022_v37, 4 }
 0x215   : > { %v3186_v19 = vsel %vm3182_vm13, %v3166_v3, %v3169_v29  ;;  %v3879_v17 = vmul.f32 %v3355_v52, %v8607_v14  ;;  %v5377_v1 = vmul.f32 %v4848_v30, %v8607_v14  ;;  %v3187_v10 = vsel %vm3185_vm5, %v3175_v18, 2102212464  ;;  %v305_v30 = vld [vmem:[%s7135_s15 + $0x18] sm:$0xff] }
 0x216   : > { %v3190_v53 = vsel %vm3182_vm13, %v3169_v29, %v3172_v55  ;;  %v3188_v36 = vsel %vm3184_vm3, %v3172_v55, %v3187_v10  ;;  %v3191_v62 = vsel %vm3185_vm5, %v3178_v11, 920167782  ;;  %v3194_v33 = vsel %vm3182_vm13, %v3172_v55, %v3175_v18 }
 0x217   : > { %v3195_v22 = vsel %vm3185_vm5, %v3181_v2, 1326507024  ;;  %v6674_v57 = vpop.eup %6673  ;;  %v3893_v60 = vadd.f32 1.0, %v3879_v17  ;;  %v5391_v9 = vadd.f32 1.0, %v5377_v1  ;;  %v3192_v16 = vsel %vm3184_vm3, %v3175_v18, %v3191_v62 }
 0x218   : > { %v2098_v8 = vmul.f32 4.0, %v1930_v28  ;;  %v3189_v14 = vsel %vm3183_vm15, %v3186_v19, %v3188_v36  ;;  %v3193_v3 = vsel %vm3183_vm15, %v3190_v53, %v3192_v16  ;;  %v3196_v38 = vsel %vm3184_vm3, %v3178_v11, %v3195_v22  ;;  %v319_v19 = vld [vmem:[%s7135_s15 + $0x88] sm:$0xff]  ;;  %v333_v53 = vld [vmem:[%s7135_s15 + $0xf8] sm:$0xff] }
 0x219   : > { %v9091_v63 = vmul.f32 %v6674_v57, %v8999_v12  ;;  %v6676_v59 = vpop.eup %6675  ;;  %v3907_v58 = vmul.f32 0.5, %v3893_v60  ;;  %v5405_v51 = vmul.f32 0.5, %v5391_v9  ;;  %v3197_v47 = vsel %vm3183_vm15, %v3194_v33, %v3196_v38  ;;  %v361_v9 = vld [vmem:[%s7135_s15 + $0x1d8] sm:$0xff]  ;;  %v347_v38 = vld [vmem:[%s7135_s15 + $0x168] sm:$0xff] }
 0x21a   : > { %v2070_v0 = vadd.f32 %v2056_v41, %v2042_v26  ;;  %v9096_v28 = vmul.u32.u64.low %v9019_v24, %v3197_v47  ;;  %v9097_v27 = vmul.u32.u64.high %v9019_v24, %v3197_v47, %v9096_v28  ;;  %v2112_v12 = vadd.f32 %v2098_v8, %v2084_v43  ;;  %v6781_v47 = vld [vmem:[%s7135_s15 + $0x108] sm:$0xff] }
 0x21b   : > { %v9100_v29 = vmul.u32.u64.low %v9019_v24, %v3193_v3  ;;  %v9101_v55 = vmul.u32.u64.high %v9019_v24, %v3193_v3, %v9100_v29  ;;  %v5419_v21 = vmul.f32 4.0, %v3907_v58  ;;  %v5461_v35 = vmul.f32 4.0, %v5405_v51  ;;  %v389_v58 = vld [vmem:[%s7135_s15 + $0x2b8] sm:$0xff] }
 0x21c   : > { %v957_v37 = vadd.f32 %v9017_v54, %v9014_v44  ;;  %v3205_v26 = vmul.u32 %v9019_v24, %v3189_v14  ;;  %v9111_v41 = vadd.f32 1.0, %v8994_v50  ;;  %v2126_v13 = vsel %vm2028_vm1, %v2070_v0, %v2112_v12 }
 0x21d   : > { %v9113_v18 = vadd.f32 1.0, %v5419_v21  ;;  %v5475_v11 = vadd.f32 1.0, %v5461_v35  ;;  %v6474_v34 = vsel %vm9060_vm2, %v8983_v7, %v8761_v45  ;;  %vm3207_vm6 = vc.u32 %v9097_v27, %v9100_v29  ;;  %v403_v21 = vld [vmem:[%s7135_s15 + $0x328] sm:$0xff] }
 0x21e   : > { %v1008_v5 = vmul.f32 0.33333334, %v957_v37  ;;  %v3208_v44 = vadd.s32 1, %v9101_v55  ;;  %v2140_v50 = vsel %vm2000_vm4, %v2014_v56, %v2126_v13  ;;  %v6461_v7 = vcvt.f32.s32 %v9111_v41  ;;  %v431_v13 = vld [vmem:[%s7135_s15 + $0x408] sm:$0xff] }
 0x21f   : > { %v6245_v20 = vcvt.f32.s32 %v9113_v18  ;;  %v6357_v54 = vcvt.f32.s32 %v5475_v11  ;;  %v2154_v24 = vmul.f32 %v6676_v59, %v2140_v50  ;;  %v6355_v39 = vand.u32 2147483647, %v5475_v11  ;;  %v375_v59 = vld [vmem:[%s7135_s15 + $0x248] sm:$0xff] }
 0x220   : > { %6035 = vmatprep.subr.mxu0 %v1008_v5  ;;  %v3209_v45 = vsel %vm3207_vm6, %v3208_v44, %v9101_v55  ;;  %v5953_v23 = vadd.f32 -1.0, %v6474_v34  ;;  %v6248_v46 = vand.u32 2147483648, %v9113_v18  ;;  %v6360_v2 = vand.u32 2147483648, %v5475_v11  ;;  %v9168_v44 = vld [vmem:[%s7135_s15 + $0x478] sm:$0xff] }
 0x221   : > { %6036 = vmatpush3.msra.mxu0 %v1008_v5  ;;  %v6246_v43 = vcvt.s32.f32 %v6245_v20  ;;  %v3210_v61 = vadd.s32 %v3209_v45, %v3205_v26  ;;  %v6358_v56 = vcvt.s32.f32 %v6357_v54  ;;  %v9135_v52 = vmul.f32 0.16666667, %v2154_v24  ;;  %v417_v26 = vld [vmem:[%s7135_s15 + $0x398] sm:$0xff] }
 0x222   : > { %v6243_v17 = vand.u32 2147483647, %v9113_v18  ;;  %v9141_v62 = vcvt.s32.f32 %v6461_v7  ;;  %vm9144_vm7 = vcmp.lt.f32.partialorder %v6355_v39, 8388608.0  ;;  %v5601_v57 = vmul.f32 25.0, %v5953_v23 }
 0x223   : > { %v6247_v1 = vand.u32 2147483647, %v6246_v43  ;;  %v3211_v10 = vadd.s32 536870912, %v3210_v61  ;;  %v6359_v36 = vand.u32 2147483647, %v6358_v56  ;;  %v473_v16 = vsub.f32 %v305_v30, %v319_v19 }
 0x224   : > { %v2237_v33 = vand.u32 2147483647, %v9135_v52  ;;  %v487_v51 = vsub.f32 %v319_v19, %v333_v53  ;;  %vm9152_vm8 = vcmp.lt.f32.partialorder %v6243_v17, 8388608.0  ;;  %v6459_v28 = vand.u32 2147483647, %v9111_v41 }
 0x225   : > { %v3212_v60 = vshrl.u32 %v3211_v10, 30  ;;  %v6249_v8 = vor.u32 %v6248_v46, %v6247_v1  ;;  %v6361_v14 = vor.u32 %v6360_v2, %v6359_v36  ;;  %v6464_v55 = vand.u32 2147483648, %v9111_v41 }
 0x226   : > { %v2240_v3 = vfloor.f32 %v2237_v33  ;;  %vm3152_vm9 = vcmp.lt.s32.totalorder %v8956_v32, 0  ;;  %v6463_v12 = vand.u32 2147483647, %v9141_v62  ;;  %v501_v50 = vsub.f32 %v333_v53, %v347_v38 }
 0x227   : > { %v3213_v0 = vshll.u32 %v3212_v60, 30  ;;  %v6362_v35 = vsel %vm9144_vm7, %v6361_v14, %v5475_v11  ;;  %v515_v20 = vsub.f32 %v361_v9, %v375_v59  ;;  %v6250_v54 = vsel %vm9152_vm8, %v6249_v8, %v9113_v18  ;;  %v9174_v11 = vld [vmem:[%s7135_s15 + $0x4e8] sm:$0xff] }
 0x228   : > { %v2241_v37 = vsub.f32 %v2237_v33, %v2240_v3  ;;  %v5939_v5 = vadd.f32 -1.0, %v6362_v35  ;;  %v529_v45 = vsub.f32 %v375_v59, %v389_v58  ;;  %v543_v7 = vsub.f32 %v389_v58, %v403_v21  ;;  %v6780_v59 = vld [vmem:[%s7135_s15 + $0x98] sm:$0xff] }
 0x229   : > { %v9165_v34 = vsub.s32 %v3210_v61, %v3213_v0  ;;  %vm9178_vm14 = vcmp.le.f32.partialorder %v3150_v4, 0.7853982  ;;  %v557_v23 = vsub.f32 %v417_v26, %v431_v13  ;;  %v599_v61 = vand.u32 2147483647, %v473_v16 }
 0x22a   : > { %vm2242_vm10 = vcmp.eq.f32.partialorder %v2241_v37, 1.0  ;;  %v5559_v24 = vmul.f32 5.0, %v5939_v5  ;;  %v2245_v56 = vand.u32 2147483648, %v9135_v52  ;;  %v5501_v18 = vmul.f32 4.0, %v8987_v48 }
 0x22b   : > { %v3216_v39 = vsub.s32 0, %v9165_v34  ;;  %v2243_v46 = vsel %vm2242_vm10, 0.0, %v2241_v37  ;;  %v571_v2 = vsub.f32 %v431_v13, %v9168_v44  ;;  %v3236_v17 = vsub.s32 4, %v3212_v60 }
 0x22c   : > { %v5573_v30 = vadd.f32 %v6250_v54, %v5559_v24  ;;  %v585_v4 = vsub.f32 %v9168_v44, %v9174_v11  ;;  %v3206_v1 = vadd.s32 %v9100_v29, %v9097_v27  ;;  %v2244_v10 = vand.u32 2147483647, %v2243_v46  ;;  %v6783_v24 = vld [vmem:[%s7135_s15 + $0x258] sm:$0xff] }
 0x22d   : > { %v5848_v19 = vmin.u32 %v3216_v39, %v9165_v34  ;;  %v9191_v53 = vand.u32 2147483647, %v487_v51  ;;  %v9193_v36 = vand.u32 2147483647, %v501_v50  ;;  %v641_v33 = vand.u32 2147483647, %v515_v20 }
 0x22e   : > { %v5615_v52 = vadd.f32 %v5601_v57, %v5573_v30  ;;  %v9196_v22 = vsel %vm722_vm0, %v599_v61, 0.0  ;;  %v2246_v9 = vor.u32 %v2245_v56, %v2244_v10  ;;  %v9198_v16 = vadd.f32 1.0, %v5501_v18  ;;  %v6785_v30 = vld [vmem:[%s7135_s15 + $0x338] sm:$0xff] }
 0x22f   : > { %v3218_v48 = vclz %v5848_v19  ;;  %v9200_v8 = vand.u32 2147483647, %v529_v45  ;;  %v9202_v14 = vand.u32 2147483647, %v543_v7  ;;  %v3237_v3 = vsel %vm3152_vm9, %v3236_v17, %v3212_v60  ;;  %v6782_v45 = vld [vmem:[%s7135_s15 + $0x178] sm:$0xff] }
 0x230   : > { %v6531_v27 = vtrunc.f32 %v5615_v52  ;;  %v683_v38 = vand.u32 2147483647, %v557_v23  ;;  %vm2323_vm11 = vcmp.ne.f32.partialorder %v2246_v9, 0.0  ;;  %vm2337_vm12 = vcmp.lt.f32.partialorder %v2246_v9, 0.0  ;;  %v6784_v23 = vld [vmem:[%s7135_s15 + $0x2c8] sm:$0xff]  ;;  %v6786_v17 = vld [vmem:[%s7135_s15 + $0x418] sm:$0xff] }
 0x231   : > { %v5849_v29 = vadd.s32 4294967294, %v3218_v48  ;;  %v2365_v57 = vadd.f32 1.0, %v2246_v9  ;;  %v1043_v58 = vsel %vm722_vm0, %v6780_v59, 0.0  ;;  %vm2351_vm15 = vmand %vm2337_vm12, %vm2323_vm11  ;;  %v1044_v0 = vsel %vm722_vm0, %v6781_v47, 0.0  ;;  %v6787_v52 = vld [vmem:[%s7135_s15 + $0x488] sm:$0xff] }
 0x232   : > { %v6532_v51 = vcvt.f32.s32 %v6531_v27  ;;  %v9210_v21 = vand.u32 2147483647, %v571_v2  ;;  %v3239_v35 = vsel %vm9178_vm14, 0, %v3237_v3  ;;  %v1045_v26 = vadd.f32 %v1044_v0, %v1043_v58 }
 0x233   : > { %vm5850_vm13 = vcmp.lt.s32.totalorder %v5849_v29, 0  ;;  %v2379_v37 = vsel %vm2351_vm15, %v2365_v57, %v2246_v9  ;;  %v9217_v54 = vand.u32 3, %v3239_v35  ;;  %v1046_v7 = vsel %vm722_vm0, %v6782_v45, 0.0  ;;  %v6788_v57 = vld [vmem:[%s7135_s15 + $0x4f8] sm:$0xff] }
 0x234   : > { %v3221_v60 = vsel %vm5850_vm13, 0, %v5849_v29  ;;  %5643 = vst.msk [vmem:[%s7930_s9 + $0x40] sm:$0xff] %vm722_vm0, %v6532_v51  ;;  %v2393_v20 = vmul.f32 6.2831855, %v2379_v37  ;;  %v1113_v39 = vsel %vm722_vm0, %v6783_v24, 0.0  ;;  %v1114_v61 = vsel %vm722_vm0, %v6784_v23, 0.0 }
 0x235   : > { %v3222_v13 = vsub.s32 32, %v3221_v60  ;;  %v3223_v5 = vshll.u32 %v9165_v34, %v3221_v60  ;;  %v3226_v50 = vsub.s32 4294967266, %v3221_v60  ;;  %v1047_v34 = vadd.f32 %v1046_v7, %v1045_v26 }
 0x236   : > { %v2407_v18 = vmul.f32 2.0, %v2393_v20  ;;  %v1115_v2 = vadd.f32 %v1114_v61, %v1113_v39  ;;  %v1116_v19 = vsel %vm722_vm0, %v6785_v30, 0.0  ;;  %v1183_v10 = vsel %vm722_vm0, %v6786_v17, 0.0 }
 0x237   : > { %v3224_v46 = vshrl.u32 %v3206_v1, %v3222_v13  ;;  %v3227_v56 = vadd.s32 127, %v3226_v50  ;;  %v1184_v48 = vsel %vm722_vm0, %v6787_v52, 0.0  ;;  %v1186_v59 = vsel %vm722_vm0, %v6788_v57, 0.0 }
 0x238   : > { %v9231_v29 = vmul.f32 3.1415927, %v2407_v18  ;;  %v1185_v3 = vadd.f32 %v1184_v48, %v1183_v10  ;;  %v1117_v1 = vadd.f32 %v1116_v19, %v1115_v2  ;;  %v9235_v58 = vmul.f32 0.33333334, %v1047_v34 }
 0x239   : > { %v3225_v9 = vor.u32 %v3224_v46, %v3223_v5  ;;  %v3228_v27 = vshll.u32 %v3227_v56, 23  ;;  %v739_v51 = vsel %vm722_vm0, %v641_v33, 0.0  ;;  %v4734_v60 = vadd.s32 3, %v3239_v35 }
 0x23a   : > { %v3047_v37 = vand.u32 2147483647, %v9231_v29  ;;  %v3050_v26 = vand.u32 2139095040, %v9231_v29  ;;  %v1187_v13 = vadd.f32 %v1186_v59, %v1185_v3  ;;  %v9240_v5 = vmul.f32 0.33333334, %v1117_v1 }
 0x23b   : > { %v3229_v47 = vor.u32 4788187, %v3228_v27  ;;  %v3232_v0 = vcvt.s32.f32 %v3225_v9  ;;  %v9245_v50 = vand.u32 2147483647, %v585_v4  ;;  %v740_v33 = vadd.f32 %v739_v51, %v9196_v22 }
 0x23c   : > { %v3054_v45 = vand.u32 8388607, %v3047_v37  ;;  %v741_v35 = vsel %vm722_vm0, %v683_v38, 0.0  ;;  %v3051_v7 = vshrl.u32 %v3050_v26, 23  ;;  %v1261_v24 = vmul.f32 0.33333334, %v1187_v13 }
 0x23d   : > { %v3230_v20 = vand.u32 2147483647, %v3229_v47  ;;  %v1803_v39 = vmax.f32 %v9235_v58, %v9240_v5  ;;  %v1831_v23 = vmin.f32 %v9235_v58, %v9240_v5  ;;  %v808_v11 = vsel %vm722_vm0, %v9191_v53, 0.0 }
 0x23e   : > { %v3055_v44 = vor.u32 8388608, %v3054_v45  ;;  %v809_v4 = vsel %vm722_vm0, %v9200_v8, 0.0  ;;  %v9259_v46 = vand.u32 3, %v4734_v60  ;;  %v5843_v22 = vadd.s32 4294967169, %v3051_v7 }
 0x23f   : > { %v3233_v61 = vmul.f32 %v3232_v0, %v3230_v20  ;;  %v9261_v38 = vmax.f32 %v1803_v39, %v1261_v24  ;;  %v1845_v56 = vmin.f32 %v1831_v23, %v1261_v24  ;;  %v9265_v2 = vadd.f32 %v741_v35, %v740_v33 }
 0x240   : > { %v9263_v34 = vshll.u32 %v3055_v44, 8  ;;  %v9267_v30 = vadd.f32 %v809_v4, %v808_v11  ;;  %v3057_v19 = vadd.s32 1, %v5843_v22  ;;  %v9275_v8 = vsel %vm722_vm0, %v9210_v21, 0.0 }
 0x241   : > { %v3234_v18 = vxor.u32 2147483648, %v3233_v61  ;;  %v9270_v17 = vsub.f32 %v9261_v38, %v1845_v56  ;;  %v1873_v53 = vadd.f32 1e-08, %v9261_v38  ;;  %v1957_v52 = vsub.f32 %v9261_v38, %v9235_v58 }
 0x242   : > { %v9283_v48 = vsub.f32 %v9261_v38, %v9240_v5  ;;  %v9286_v9 = vsub.f32 %v9261_v38, %v1261_v24  ;;  %vm3058_vm1 = vcmp.gt.s32.totalorder %v3057_v19, 0  ;;  %v9295_v1 = vsel %vm722_vm0, %v9193_v36, 0.0 }
 0x243   : > { %v3235_v10 = vsel %vm3152_vm9, %v3234_v18, %v3233_v61  ;;  %6677 = vrcp.f32 %v1873_v53  ;;  %vm1915_vm2 = vcmp.eq.f32.partialorder %v9270_v17, 0.0  ;;  %v3059_v21 = vsel %vm3058_vm1, %v3057_v19, 0 }
 0x244   : > { %v3238_v27 = vsel %vm9178_vm14, %v8956_v32, %v3235_v10  ;;  %v1929_v3 = vsel %vm1915_vm2, 1.0, %v9270_v17  ;;  %v3060_v57 = vshrl.u32 %v3059_v21, 5  ;;  %v3061_v59 = vand.u32 31, %v3059_v21 }
 0x245   : > { %6679 = vcosq.f32 %v3238_v27  ;;  %v2013_v51 = vsub.f32 %v9286_v9, %v9283_v48  ;;  %vm2027_vm3 = vcmp.eq.f32.partialorder %v9261_v38, %v9240_v5  ;;  %v2041_v43 = vsub.f32 %v1957_v52, %v9286_v9 }
 0x246   : > { %6681 = vsinq.f32 %v3238_v27  ;;  %v2055_v47 = vmul.f32 2.0, %v1929_v3  ;;  %v3062_v0 = vsub.s32 32, %v3061_v59  ;;  %v3064_v60 = vshll.u32 %v6968_v25, %v3061_v59 }
 0x247   : > { %6683 = vrcp.f32 %v1929_v3  ;;  %v3067_v26 = vshll.u32 %v6969_v40, %v3061_v59  ;;  %v3070_v36 = vshll.u32 %v6970_v15, %v3061_v59  ;;  %vm1999_vm4 = vcmp.eq.f32.partialorder %v9261_v38, %v9235_v58 }
 0x248   : > { %v3073_v13 = vshll.u32 %v10887_v31, %v3061_v59  ;;  %v3076_v20 = vshll.u32 %v10885_v42, %v3061_v59  ;;  %vm3079_vm5 = vcmp.lt.s32.totalorder %v3060_v57, 1  ;;  %v2083_v45 = vsub.f32 %v9283_v48, %v1957_v52 }
 0x249   : > { %vm3248_vm6 = vcmp.eq.s32.totalorder %v9217_v54, 2  ;;  %vm4740_vm7 = vcmp.eq.s32.totalorder %v9259_v46, 2  ;;  %v3063_v33 = vshrl.u32 %v6968_v25, %v3062_v0  ;;  %v3065_v35 = vshrl.u32 %v6969_v40, %v3062_v0 }
 0x24a   : > { %v3068_v7 = vshrl.u32 %v6970_v15, %v3062_v0  ;;  %v3071_v24 = vshrl.u32 %v10887_v31, %v3062_v0  ;;  %vm3245_vm8 = vcmp.eq.s32.totalorder %v9217_v54, 0  ;;  %vm4737_vm9 = vcmp.eq.s32.totalorder %v9259_v46, 0 }
 0x24b   : > { %v3074_v39 = vshrl.u32 %v10885_v42, %v3062_v0  ;;  %v3077_v23 = vshrl.u32 %v10927_v49, %v3062_v0  ;;  %vm3080_vm10 = vcmp.lt.s32.totalorder %v3060_v57, 2  ;;  %vm3081_vm14 = vcmp.lt.s32.totalorder %v3060_v57, 3 }
 0x24c   : > { %vm3244_vm11 = vcmp.lt.s32.totalorder %v9217_v54, 2  ;;  %vm4736_vm12 = vcmp.lt.s32.totalorder %v9259_v46, 2  ;;  %v3066_v61 = vor.u32 %v3065_v35, %v3064_v60  ;;  %v3069_v44 = vor.u32 %v3068_v7, %v3067_v26 }
 0x24d   : > { %v3072_v11 = vor.u32 %v3071_v24, %v3070_v36  ;;  %vm3082_vm13 = vcmp.lt.s32.totalorder %v3060_v57, 4  ;;  %vm3242_vm15 = vweird.f32 %v8956_v32  ;;  %v3075_v4 = vor.u32 %v3074_v39, %v3073_v13 }
 0x24e   : > { %v3078_v22 = vor.u32 %v3077_v23, %v3076_v20  ;;  %v2069_v56 = vadd.f32 %v2055_v47, %v2041_v43  ;;  %v2097_v18 = vmul.f32 4.0, %v1929_v3  ;;  %v3083_v19 = vsel %vm3079_vm5, %v3063_v33, %v3066_v61 }
 0x24f   : > { %v3084_v53 = vsel %vm3082_vm13, %v3072_v11, 2102212464  ;;  %v3087_v10 = vsel %vm3079_vm5, %v3066_v61, %v3069_v44  ;;  %v3091_v52 = vsel %vm3079_vm5, %v3069_v44, %v3072_v11  ;;  %v3088_v9 = vsel %vm3082_vm13, %v3075_v4, 920167782 }
 0x250   : > { %v3085_v48 = vsel %vm3081_vm14, %v3069_v44, %v3084_v53  ;;  %v3092_v27 = vsel %vm3082_vm13, %v3078_v22, 1326507024  ;;  %v2111_v21 = vadd.f32 %v2097_v18, %v2083_v45  ;;  %v3089_v59 = vsel %vm3081_vm14, %v3072_v11, %v3088_v9  ;;  %v6678_v47 = vpop.eup %6677 }
 0x251   : > { %v3093_v0 = vsel %vm3081_vm14, %v3075_v4, %v3092_v27  ;;  %v812_v43 = vadd.f32 %v9275_v8, %v9267_v30  ;;  %v879_v3 = vsel %vm722_vm0, %v9202_v14, 0.0  ;;  %v3086_v60 = vsel %vm3080_vm10, %v3083_v19, %v3085_v48 }
 0x252   : > { %v3090_v26 = vsel %vm3080_vm10, %v3087_v10, %v3089_v59  ;;  %v3094_v36 = vsel %vm3080_vm10, %v3091_v52, %v3093_v0  ;;  %v2125_v13 = vsel %vm2027_vm3, %v2069_v56, %v2111_v21  ;;  %v6680_v20 = vpop.eup %6679  ;;  %v9349_v7 = vmul.f32 %v6678_v47, %v9270_v17 }
 0x253   : > { %v9340_v45 = vmul.u32.u64.low %v9263_v34, %v3094_v36  ;;  %v9341_v33 = vmul.u32.u64.high %v9263_v34, %v3094_v36, %v9340_v45  ;;  %v9344_v30 = vmul.u32.u64.low %v9263_v34, %v3090_v26  ;;  %v9345_v8 = vmul.u32.u64.high %v9263_v34, %v3090_v26, %v9344_v30  ;;  %v6682_v14 = vpop.eup %6681 }
 0x254   : > { %v3249_v35 = vxor.u32 2147483648, %v6680_v20  ;;  %v2139_v5 = vsel %vm1999_vm4, %v2013_v51, %v2125_v13  ;;  %v880_v57 = vadd.f32 %v879_v3, %v9295_v1  ;;  %v6684_v24 = vpop.eup %6683  ;;  %v3246_v39 = vxor.u32 2147483648, %v6682_v14 }
 0x255   : > { %v881_v23 = vsel %vm722_vm0, %v9245_v50, 0.0  ;;  %v948_v61 = vsel %vm722_vm0, %v9265_v2, 0.0  ;;  %v949_v44 = vsel %vm722_vm0, %v812_v43, 0.0  ;;  %v2153_v58 = vmul.f32 %v6684_v24, %v2139_v5 }
 0x256   : > { %v3250_v17 = vsel %vm3248_vm6, %v3249_v35, %v6682_v14  ;;  %v4742_v11 = vsel %vm4740_vm7, %v3249_v35, %v6682_v14  ;;  %v882_v51 = vadd.f32 %v881_v23, %v880_v57  ;;  %v3247_v1 = vsel %vm3245_vm8, %v6680_v20, %v3246_v39 }
 0x257   : > { %v4739_v4 = vsel %vm4737_vm9, %v6680_v20, %v3246_v39  ;;  %v3102_v50 = vmul.u32 %v9263_v34, %v3086_v60  ;;  %vm3104_vm1 = vc.u32 %v9341_v33, %v9344_v30  ;;  %v3251_v2 = vsel %vm3244_vm11, %v3247_v1, %v3250_v17  ;;  %v9410_v17 = vld [vmem:[%s7135_s15 + $0x10] sm:$0xff] }
 0x258   : > { %v4743_v22 = vsel %vm4736_vm12, %v4739_v4, %v4742_v11  ;;  %v3105_v56 = vadd.s32 1, %v9345_v8  ;;  %v2168_v18 = vmul.f32 0.16666667, %v2153_v58  ;;  %v3252_v19 = vsel %vm3242_vm15, nan, %v3251_v2  ;;  %v9413_v11 = vld [vmem:[%s7135_s15 + $0x80] sm:$0xff] }
 0x259   : > { %v4744_v53 = vsel %vm3242_vm15, nan, %v4743_v22  ;;  %v950_v10 = vadd.f32 %v949_v44, %v948_v61  ;;  %v951_v34 = vsel %vm722_vm0, %v882_v51, 0.0  ;;  %v3878_v52 = vmul.f32 %v3252_v19, %v8854_v6 }
 0x25a   : > { %v5376_v54 = vmul.f32 %v4744_v53, %v8854_v6  ;;  %v3106_v48 = vsel %vm3104_vm1, %v3105_v56, %v9345_v8  ;;  %v2227_v46 = vand.u32 2147483647, %v2168_v18  ;;  %vm9386_vm2 = vcmp.lt.f32.partialorder %v6459_v28, 8388608.0 }
 0x25b   : > { %v3107_v9 = vadd.s32 %v3106_v48, %v3102_v50  ;;  %v952_v27 = vadd.f32 %v951_v34, %v950_v10  ;;  %v3892_v21 = vadd.f32 1.0, %v3878_v52  ;;  %v6465_v43 = vor.u32 %v6464_v55, %v6463_v12 }
 0x25c   : > { %v5390_v59 = vadd.f32 1.0, %v5376_v54  ;;  %v2230_v0 = vfloor.f32 %v2227_v46  ;;  %v6453_v26 = vcvt.f32.s32 %v9198_v16  ;;  %v2235_v57 = vand.u32 2147483648, %v2168_v18 }
 0x25d   : > { %v3108_v6 = vadd.s32 536870912, %v3107_v9  ;;  %v1007_v3 = vmul.f32 0.33333334, %v952_v27  ;;  %v3906_v47 = vmul.f32 0.5, %v3892_v21  ;;  %v6466_v62 = vsel %vm9386_vm2, %v6465_v43, %v9111_v41 }
 0x25e   : > { %v5404_v60 = vmul.f32 0.5, %v5390_v59  ;;  %v2231_v36 = vsub.f32 %v2227_v46, %v2230_v0  ;;  %v6454_v14 = vcvt.s32.f32 %v6453_v26  ;;  %v5952_v39 = vadd.f32 -1.0, %v6466_v62  ;;  %v9449_v26 = vld [vmem:[%s7135_s15 + $0x160] sm:$0xff] }
 0x25f   : > { %v9395_v13 = vshrl.u32 %v3108_v6, 30  ;;  %6037 = vmatprep.subr.mxu0 %v1007_v3  ;;  %v5418_v20 = vmul.f32 4.0, %v3906_v47  ;;  %v6456_v44 = vand.u32 2147483648, %v9198_v16  ;;  %v6451_v53 = vand.u32 2147483647, %v9198_v16 }
 0x260   : > { %v5460_v28 = vmul.f32 4.0, %v5404_v60  ;;  %vm2232_vm3 = vcmp.eq.f32.partialorder %v2231_v36, 1.0  ;;  %6038 = vmatpush3.msra.mxu0 %v1007_v3  ;;  %v6455_v4 = vand.u32 2147483647, %v6454_v14  ;;  %v5600_v19 = vmul.f32 25.0, %v5952_v39  ;;  %v9441_v3 = vld [vmem:[%s7135_s15 + $0xf0] sm:$0xff] }
 0x261   : > { %v3110_v55 = vshll.u32 %v9395_v13, 30  ;;  %v2233_v12 = vsel %vm2232_vm3, 0.0, %v2231_v36  ;;  %v9401_v45 = vadd.f32 1.0, %v5418_v20  ;;  %v472_v10 = vsub.f32 %v9410_v17, %v9413_v11  ;;  %v9452_v36 = vld [vmem:[%s7135_s15 + $0x1d0] sm:$0xff]  ;;  %v9455_v20 = vld [vmem:[%s7135_s15 + $0x240] sm:$0xff] }
 0x262   : > { %v5474_v8 = vadd.f32 1.0, %v5460_v28  ;;  %v2234_v5 = vand.u32 2147483647, %v2233_v12  ;;  %vm3049_vm8 = vcmp.lt.s32.totalorder %v9231_v29, 0  ;;  %v9429_v59 = vor.u32 %v6456_v44, %v6455_v4  ;;  %v6789_v28 = vld [vmem:[%s7135_s15 + $0x90] sm:$0xff] }
 0x263   : > { %v9403_v35 = vsub.s32 %v3107_v9, %v3110_v55  ;;  %v6237_v24 = vcvt.f32.s32 %v9401_v45  ;;  %v6235_v23 = vand.u32 2147483647, %v9401_v45  ;;  %v6240_v51 = vand.u32 2147483648, %v9401_v45  ;;  %v6790_v55 = vld [vmem:[%s7135_s15 + $0x100] sm:$0xff]  ;;  %v6791_v4 = vld [vmem:[%s7135_s15 + $0x170] sm:$0xff] }
 0x264   : > { %v6349_v61 = vcvt.f32.s32 %v5474_v8  ;;  %v6347_v1 = vand.u32 2147483647, %v5474_v8  ;;  %v6352_v2 = vand.u32 2147483648, %v5474_v8  ;;  %v2236_v56 = vor.u32 %v2235_v57, %v2234_v5 }
 0x265   : > { %v3113_v41 = vsub.s32 0, %v9403_v35  ;;  %v6238_v58 = vcvt.s32.f32 %v6237_v24  ;;  %vm9420_vm4 = vcmp.lt.f32.partialorder %v6235_v23, 8388608.0  ;;  %vm9433_vm10 = vcmp.le.f32.partialorder %v3047_v37, 0.7853982 }
 0x266   : > { %v6350_v50 = vcvt.s32.f32 %v6349_v61  ;;  %vm2322_vm5 = vcmp.ne.f32.partialorder %v2236_v56, 0.0  ;;  %vm9424_vm6 = vcmp.lt.f32.partialorder %v6347_v1, 8388608.0  ;;  %vm2336_vm7 = vcmp.lt.f32.partialorder %v2236_v56, 0.0 }
 0x267   : > { %v5844_v22 = vmin.u32 %v3113_v41, %v9403_v35  ;;  %v6239_v18 = vand.u32 2147483647, %v6238_v58  ;;  %v2364_v9 = vadd.f32 1.0, %v2236_v56  ;;  %vm2350_vm9 = vmand %vm2336_vm7, %vm2322_vm5  ;;  %v3103_v32 = vadd.s32 %v9344_v30, %v9341_v33 }
 0x268   : > { %v6351_v52 = vand.u32 2147483647, %v6350_v50  ;;  %v3133_v43 = vsub.s32 4, %v9395_v13  ;;  %v1038_v62 = vsel %vm722_vm0, %v6789_v28, 0.0  ;;  %v1039_v12 = vsel %vm722_vm0, %v6790_v55, 0.0  ;;  %v6795_v28 = vld [vmem:[%s7135_s15 + $0x410] sm:$0xff] }
 0x269   : > { %v3115_v54 = vclz %v5844_v22  ;;  %v6241_v48 = vor.u32 %v6240_v51, %v6239_v18  ;;  %v2378_v6 = vsel %vm2350_vm9, %v2364_v9, %v2236_v56  ;;  %v486_v24 = vsub.f32 %v9413_v11, %v9441_v3  ;;  %v6796_v55 = vld [vmem:[%s7135_s15 + $0x480] sm:$0xff] }
 0x26a   : > { %v6353_v27 = vor.u32 %v6352_v2, %v6351_v52  ;;  %v2392_v37 = vmul.f32 6.2831855, %v2378_v6  ;;  %v500_v39 = vsub.f32 %v9441_v3, %v9449_v26  ;;  %v514_v23 = vsub.f32 %v9452_v36, %v9455_v20  ;;  %v6792_v2 = vld [vmem:[%s7135_s15 + $0x250] sm:$0xff]  ;;  %v6793_v52 = vld [vmem:[%s7135_s15 + $0x2c0] sm:$0xff] }
 0x26b   : > { %v5845_v21 = vadd.s32 4294967294, %v3115_v54  ;;  %v6242_v47 = vsel %vm9420_vm4, %v6241_v48, %v9401_v45  ;;  %v1040_v58 = vadd.f32 %v1039_v12, %v1038_v62  ;;  %v3134_v1 = vsel %vm3049_vm8, %v3133_v43, %v9395_v13 }
 0x26c   : > { %v6354_v60 = vsel %vm9424_vm6, %v6353_v27, %v5474_v8  ;;  %v2406_v5 = vmul.f32 2.0, %v2392_v37  ;;  %v1041_v50 = vsel %vm722_vm0, %v6791_v4, 0.0  ;;  %v1108_v22 = vsel %vm722_vm0, %v6792_v2, 0.0 }
 0x26d   : > { %vm5846_vm14 = vcmp.lt.s32.totalorder %v5845_v21, 0  ;;  %v5938_v33 = vadd.f32 -1.0, %v6354_v60  ;;  %v1109_v54 = vsel %vm722_vm0, %v6793_v52, 0.0  ;;  %v5500_v13 = vmul.f32 4.0, %v9261_v38  ;;  %v6794_v60 = vld [vmem:[%s7135_s15 + $0x330] sm:$0xff]  ;;  %v9492_v38 = vld [vmem:[%s7135_s15 + $0x320] sm:$0xff] }
 0x26e   : > { %v3118_v30 = vsel %vm5846_vm14, 0, %v5845_v21  ;;  %v9468_v44 = vmul.f32 3.1415927, %v2406_v5  ;;  %v1042_v43 = vadd.f32 %v1041_v50, %v1040_v58  ;;  %v1111_v37 = vsel %vm722_vm0, %v6794_v60, 0.0  ;;  %v6797_v58 = vld [vmem:[%s7135_s15 + $0x4f0] sm:$0xff] }
 0x26f   : > { %v3119_v45 = vsub.s32 32, %v3118_v30  ;;  %v3120_v8 = vshll.u32 %v9403_v35, %v3118_v30  ;;  %v3123_v14 = vsub.s32 4294967266, %v3118_v30  ;;  %v5558_v57 = vmul.f32 5.0, %v5938_v33  ;;  %v9471_v35 = vld [vmem:[%s7135_s15 + $0x2b0] sm:$0xff] }
 0x270   : > { %v2944_v34 = vand.u32 2147483647, %v9468_v44  ;;  %v2947_v46 = vand.u32 2139095040, %v9468_v44  ;;  %v528_v9 = vsub.f32 %v9455_v20, %v9471_v35  ;;  %v1178_v62 = vsel %vm722_vm0, %v6795_v28, 0.0 }
 0x271   : > { %v3121_v61 = vshrl.u32 %v3103_v32, %v3119_v45  ;;  %v3124_v41 = vadd.s32 127, %v3123_v14  ;;  %v5572_v51 = vadd.f32 %v6242_v47, %v5558_v57  ;;  %v3136_v32 = vsel %vm9433_vm10, 0, %v3134_v1  ;;  %v9501_v57 = vld [vmem:[%s7135_s15 + $0x390] sm:$0xff] }
 0x272   : > { %v2948_v47 = vshrl.u32 %v2947_v46, 23  ;;  %v2951_v30 = vand.u32 8388607, %v2944_v34  ;;  %v1179_v12 = vsel %vm722_vm0, %v6796_v55, 0.0  ;;  %v9508_v1 = vmul.f32 0.33333334, %v1042_v43 }
 0x273   : > { %v3122_v56 = vor.u32 %v3121_v61, %v3120_v8  ;;  %v3125_v18 = vshll.u32 %v3124_v41, 23  ;;  %v5614_v48 = vadd.f32 %v5600_v19, %v5572_v51  ;;  %v1110_v19 = vadd.f32 %v1109_v54, %v1108_v22  ;;  %v9504_v61 = vld [vmem:[%s7135_s15 + $0x400] sm:$0xff] }
 0x274   : > { %v5839_v8 = vadd.s32 4294967169, %v2948_v47  ;;  %v1180_v5 = vadd.f32 %v1179_v12, %v1178_v62  ;;  %v1181_v51 = vsel %vm722_vm0, %v6797_v58, 0.0  ;;  %v542_v4 = vsub.f32 %v9471_v35, %v9492_v38 }
 0x275   : > { %v3126_v27 = vor.u32 4788187, %v3125_v18  ;;  %v3129_v21 = vcvt.s32.f32 %v3122_v56  ;;  %v6529_v6 = vtrunc.f32 %v5614_v48  ;;  %v1112_v14 = vadd.f32 %v1111_v37, %v1110_v19  ;;  %v9517_v18 = vld [vmem:[%s7135_s15 + $0x470] sm:$0xff] }
 0x276   : > { %v4630_v50 = vadd.s32 3, %v3136_v32  ;;  %v2954_v2 = vadd.s32 1, %v5839_v8  ;;  %v1182_v22 = vadd.f32 %v1181_v51, %v1180_v5  ;;  %v2952_v54 = vor.u32 8388608, %v2951_v30 }
 0x277   : > { %v3127_v33 = vand.u32 2147483647, %v3126_v27  ;;  %v6530_v45 = vcvt.f32.s32 %v6529_v6  ;;  %v9514_v56 = vmul.f32 0.33333334, %v1112_v14  ;;  %v9519_v48 = vadd.f32 1.0, %v5500_v13 }
 0x278   : > { %v556_v46 = vsub.f32 %v9501_v57, %v9504_v61  ;;  %vm2955_vm11 = vcmp.gt.s32.totalorder %v2954_v2, 0  ;;  %v9523_v27 = vmul.f32 0.33333334, %v1182_v22  ;;  %v9531_v47 = vand.u32 3, %v3136_v32 }
 0x279   : > { %v3130_v41 = vmul.f32 %v3129_v21, %v3127_v33  ;;  %5642 = vst.msk [vmem:[%s7930_s9 + $0x38] sm:$0xff] %vm722_vm0, %v6530_v45  ;;  %v1802_v21 = vmax.f32 %v9508_v1, %v9514_v56  ;;  %v1830_v43 = vmin.f32 %v9508_v1, %v9514_v56  ;;  %v2956_v19 = vsel %vm2955_vm11, %v2954_v2, 0 }
 0x27a   : > { %v570_v13 = vsub.f32 %v9504_v61, %v9517_v18  ;;  %v9538_v37 = vand.u32 3, %v4630_v50  ;;  %v2957_v33 = vshrl.u32 %v2956_v19, 5  ;;  %v2958_v30 = vand.u32 31, %v2956_v19 }
 0x27b   : > { %v3131_v52 = vxor.u32 2147483648, %v3130_v41  ;;  %v9540_v28 = vshll.u32 %v2952_v54, 8  ;;  %v9543_v62 = vmax.f32 %v1802_v21, %v9523_v27  ;;  %v1844_v32 = vmin.f32 %v1830_v43, %v9523_v27 }
 0x27c   : > { %v2959_v55 = vsub.s32 32, %v2958_v30  ;;  %v2961_v12 = vshll.u32 %v6968_v25, %v2958_v30  ;;  %v2964_v45 = vshll.u32 %v6969_v40, %v2958_v30  ;;  %v2967_v0 = vshll.u32 %v6970_v15, %v2958_v30 }
 0x27d   : > { %v3132_v6 = vsel %vm3049_vm8, %v3131_v52, %v3130_v41  ;;  %v2970_v8 = vshll.u32 %v10887_v31, %v2958_v30  ;;  %v2973_v14 = vshll.u32 %v10885_v42, %v2958_v30  ;;  %vm2976_vm12 = vcmp.lt.s32.totalorder %v2957_v33, 1 }
 0x27e   : > { %v3135_v60 = vsel %vm9433_vm10, %v9231_v29, %v3132_v6  ;;  %v2960_v5 = vshrl.u32 %v6968_v25, %v2959_v55  ;;  %v2962_v41 = vshrl.u32 %v6969_v40, %v2959_v55  ;;  %v2965_v58 = vshrl.u32 %v6970_v15, %v2959_v55 }
 0x27f   : > { %6685 = vcosq.f32 %v3135_v60  ;;  %v2968_v51 = vshrl.u32 %v10887_v31, %v2959_v55  ;;  %v2971_v50 = vshrl.u32 %v10885_v42, %v2959_v55  ;;  %v2974_v2 = vshrl.u32 %v10927_v49, %v2959_v55 }
 0x280   : > { %6687 = vsinq.f32 %v3135_v60  ;;  %vm2977_vm13 = vcmp.lt.s32.totalorder %v2957_v33, 2  ;;  %vm2978_vm15 = vcmp.lt.s32.totalorder %v2957_v33, 3  ;;  %vm3145_vm1 = vcmp.eq.s32.totalorder %v9531_v47, 2 }
 0x281   : > { %vm4636_vm2 = vcmp.eq.s32.totalorder %v9538_v37, 2  ;;  %v2963_v22 = vor.u32 %v2962_v41, %v2961_v12  ;;  %v2966_v52 = vor.u32 %v2965_v58, %v2964_v45  ;;  %v2969_v54 = vor.u32 %v2968_v51, %v2967_v0 }
 0x282   : > { %vm2979_vm3 = vcmp.lt.s32.totalorder %v2957_v33, 4  ;;  %vm3142_vm4 = vcmp.eq.s32.totalorder %v9531_v47, 0  ;;  %vm4633_vm5 = vcmp.eq.s32.totalorder %v9538_v37, 0  ;;  %v2972_v21 = vor.u32 %v2971_v50, %v2970_v8 }
 0x283   : > { %v2975_v43 = vor.u32 %v2974_v2, %v2973_v14  ;;  %v9562_v6 = vsub.f32 %v9543_v62, %v1844_v32  ;;  %v1872_v19 = vadd.f32 1e-08, %v9543_v62  ;;  %vm3141_vm6 = vcmp.lt.s32.totalorder %v9531_v47, 2 }
 0x284   : > { %vm4632_vm7 = vcmp.lt.s32.totalorder %v9538_v37, 2  ;;  %v2980_v60 = vsel %vm2976_vm12, %v2960_v5, %v2963_v22  ;;  %v2981_v30 = vsel %vm2979_vm3, %v2969_v54, 2102212464  ;;  %v2984_v55 = vsel %vm2976_vm12, %v2963_v22, %v2966_v52 }
 0x285   : > { %v2988_v12 = vsel %vm2976_vm12, %v2966_v52, %v2969_v54  ;;  %vm3139_vm8 = vweird.f32 %v9231_v29  ;;  %v2982_v45 = vsel %vm2978_vm15, %v2966_v52, %v2981_v30  ;;  %v2985_v32 = vsel %vm2979_vm3, %v2972_v21, 920167782 }
 0x286   : > { %v2989_v0 = vsel %vm2979_vm3, %v2975_v43, 1326507024  ;;  %6689 = vrcp.f32 %v1872_v19  ;;  %v2986_v8 = vsel %vm2978_vm15, %v2969_v54, %v2985_v32  ;;  %vm1914_vm9 = vcmp.eq.f32.partialorder %v9562_v6, 0.0 }
 0x287   : > { %v2990_v14 = vsel %vm2978_vm15, %v2972_v21, %v2989_v0  ;;  %v598_v5 = vand.u32 2147483647, %v472_v10  ;;  %v2983_v41 = vsel %vm2977_vm13, %v2980_v60, %v2982_v45  ;;  %v2987_v58 = vsel %vm2977_vm13, %v2984_v55, %v2986_v8 }
 0x288   : > { %v2991_v51 = vsel %vm2977_vm13, %v2988_v12, %v2990_v14  ;;  %v1928_v50 = vsel %vm1914_vm9, 1.0, %v9562_v6  ;;  %v9590_v52 = vmul.u32.u64.low %v9540_v28, %v2987_v58  ;;  %v9591_v54 = vmul.u32.u64.high %v9540_v28, %v2987_v58, %v9590_v52 }
 0x289   : > { %v9586_v2 = vmul.u32.u64.low %v9540_v28, %v2991_v51  ;;  %v9587_v22 = vmul.u32.u64.high %v9540_v28, %v2991_v51, %v9586_v2  ;;  %6691 = vrcp.f32 %v1928_v50  ;;  %v1956_v17 = vsub.f32 %v9543_v62, %v9508_v1  ;;  %v9635_v51 = vld [vmem:[%s7135_s15 + $0x4e0] sm:$0xff] }
 0x28a   : > { %v1970_v10 = vsub.f32 %v9543_v62, %v9514_v56  ;;  %v1984_v33 = vsub.f32 %v9543_v62, %v9523_v27  ;;  %v2054_v43 = vmul.f32 2.0, %v1928_v50  ;;  %v2096_v19 = vmul.f32 4.0, %v1928_v50 }
 0x28b   : > { %v612_v60 = vand.u32 2147483647, %v486_v24  ;;  %v626_v30 = vand.u32 2147483647, %v500_v39  ;;  %vm9608_vm10 = vcmp.lt.f32.partialorder %v6451_v53, 8388608.0  ;;  %v2999_v27 = vmul.u32 %v9540_v28, %v2983_v41 }
 0x28c   : > { %v6686_v21 = vpop.eup %6685  ;;  %v2040_v32 = vsub.f32 %v1956_v17, %v1984_v33  ;;  %v2082_v0 = vsub.f32 %v1970_v10, %v1956_v17  ;;  %vm3001_vm14 = vc.u32 %v9587_v22, %v9590_v52  ;;  %v3002_v11 = vadd.s32 1, %v9591_v54 }
 0x28d   : > { %v6688_v55 = vpop.eup %6687  ;;  %v3146_v12 = vxor.u32 2147483648, %v6686_v21  ;;  %v640_v3 = vand.u32 2147483647, %v514_v23  ;;  %vm2026_vm11 = vcmp.eq.f32.partialorder %v9543_v62, %v9514_v56  ;;  %v654_v50 = vand.u32 2147483647, %v528_v9 }
 0x28e   : > { %v3143_v8 = vxor.u32 2147483648, %v6688_v55  ;;  %v2068_v24 = vadd.f32 %v2054_v43, %v2040_v32  ;;  %v2110_v39 = vadd.f32 %v2096_v19, %v2082_v0  ;;  %v3003_v41 = vsel %vm3001_vm14, %v3002_v11, %v9591_v54 }
 0x28f   : > { %v3147_v53 = vsel %vm3145_vm1, %v3146_v12, %v6688_v55  ;;  %v4638_v26 = vsel %vm4636_vm2, %v3146_v12, %v6688_v55  ;;  %v3004_v58 = vadd.s32 %v3003_v41, %v2999_v27  ;;  %vm1998_vm12 = vcmp.eq.f32.partialorder %v9543_v62, %v9508_v1 }
 0x290   : > { %v3144_v28 = vsel %vm3142_vm4, %v6686_v21, %v3143_v8  ;;  %v4635_v14 = vsel %vm4633_vm5, %v6686_v21, %v3143_v8  ;;  %v2012_v56 = vsub.f32 %v1984_v33, %v1970_v10  ;;  %v2124_v21 = vsel %vm2026_vm11, %v2068_v24, %v2110_v39 }
 0x291   : > { %v3148_v36 = vsel %vm3141_vm6, %v3144_v28, %v3147_v53  ;;  %v4639_v23 = vsel %vm4632_vm7, %v4635_v14, %v4638_v26  ;;  %v3005_v17 = vadd.s32 536870912, %v3004_v58  ;;  %v584_v20 = vsub.f32 %v9517_v18, %v9635_v51 }
 0x292   : > { %v3149_v2 = vsel %vm3139_vm8, nan, %v3148_v36  ;;  %v4640_v54 = vsel %vm3139_vm8, nan, %v4639_v23  ;;  %v668_v9 = vand.u32 2147483647, %v542_v4  ;;  %v682_v29 = vand.u32 2147483647, %v556_v46 }
 0x293   : > { %v3877_v47 = vmul.f32 %v3149_v2, %v9091_v63  ;;  %v5375_v37 = vmul.f32 %v4640_v54, %v9091_v63  ;;  %v6690_v43 = vpop.eup %6689  ;;  %v696_v1 = vand.u32 2147483647, %v570_v13  ;;  %v9659_v33 = vshrl.u32 %v3005_v17, 30 }
 0x294   : > { %v9662_v19 = vmul.f32 %v6690_v43, %v9562_v6  ;;  %v2138_v55 = vsel %vm1998_vm12, %v2012_v56, %v2124_v21  ;;  %v733_v12 = vsel %vm722_vm0, %v598_v5, 0.0  ;;  %v734_v35 = vsel %vm722_vm0, %v640_v3, 0.0 }
 0x295   : > { %v3891_v10 = vadd.f32 1.0, %v3877_v47  ;;  %v5389_v63 = vadd.f32 1.0, %v5375_v37  ;;  %v803_v4 = vsel %vm722_vm0, %v612_v60, 0.0  ;;  %v3007_v27 = vshll.u32 %v9659_v33, 30 }
 0x296   : > { %v804_v13 = vsel %vm722_vm0, %v654_v50, 0.0  ;;  %v6692_v32 = vpop.eup %6691  ;;  %v6458_v6 = vsel %vm9608_vm10, %v9429_v59, %v9198_v16  ;;  %v6445_v0 = vcvt.f32.s32 %v9519_v48  ;;  %v710_v8 = vand.u32 2147483647, %v584_v20 }
 0x297   : > { %v3905_v57 = vmul.f32 0.5, %v3891_v10  ;;  %v5403_v46 = vmul.f32 0.5, %v5389_v63  ;;  %v736_v5 = vsel %vm722_vm0, %v682_v29, 0.0  ;;  %v9675_v60 = vsub.s32 %v3004_v58, %v3007_v27 }
 0x298   : > { %v735_v53 = vadd.f32 %v734_v35, %v733_v12  ;;  %v2152_v26 = vmul.f32 %v6692_v32, %v2138_v55  ;;  %v805_v24 = vadd.f32 %v804_v13, %v803_v4  ;;  %v873_v39 = vsel %vm722_vm0, %v626_v30, 0.0 }
 0x299   : > { %v5417_v11 = vmul.f32 4.0, %v3905_v57  ;;  %v5459_v3 = vmul.f32 4.0, %v5403_v46  ;;  %v874_v28 = vsel %vm722_vm0, %v668_v9, 0.0  ;;  %v3010_v16 = vsub.s32 0, %v9675_v60 }
 0x29a   : > { %v806_v59 = vsel %vm722_vm0, %v696_v1, 0.0  ;;  %v5951_v45 = vadd.f32 -1.0, %v6458_v6  ;;  %v6443_v36 = vand.u32 2147483647, %v9519_v48  ;;  %v2167_v50 = vmul.f32 0.16666667, %v2152_v26 }
 0x29b   : > { %v5431_v14 = vadd.f32 1.0, %v5417_v11  ;;  %v5473_v41 = vadd.f32 1.0, %v5459_v3  ;;  %v737_v58 = vadd.f32 %v736_v5, %v735_v53  ;;  %v875_v2 = vadd.f32 %v874_v28, %v873_v39 }
 0x29c   : > { %v5840_v56 = vmin.u32 %v3010_v16, %v9675_v60  ;;  %v807_v47 = vadd.f32 %v806_v59, %v805_v24  ;;  %v876_v30 = vsel %vm722_vm0, %v710_v8, 0.0  ;;  %v6446_v43 = vcvt.s32.f32 %v6445_v0 }
 0x29d   : > { %v6229_v23 = vcvt.f32.s32 %v5431_v14  ;;  %v6341_v54 = vcvt.f32.s32 %v5473_v41  ;;  %v6227_v37 = vand.u32 2147483647, %v5431_v14  ;;  %v6339_v21 = vand.u32 2147483647, %v5473_v41 }
 0x29e   : > { %v6232_v20 = vand.u32 2147483648, %v5431_v14  ;;  %v6344_v29 = vand.u32 2147483648, %v5473_v41  ;;  %v3012_v1 = vclz %v5840_v56  ;;  %v6448_v63 = vand.u32 2147483648, %v9519_v48 }
 0x29f   : > { %v6230_v17 = vcvt.s32.f32 %v6229_v23  ;;  %v6342_v9 = vcvt.s32.f32 %v6341_v54  ;;  %v2217_v55 = vand.u32 2147483647, %v2167_v50  ;;  %v877_v12 = vadd.f32 %v876_v30, %v875_v2 }
 0x2a0   : > { %v5841_v4 = vadd.s32 4294967294, %v3012_v1  ;;  %v943_v57 = vsel %vm722_vm0, %v737_v58, 0.0  ;;  %v944_v46 = vsel %vm722_vm0, %v807_v47, 0.0  ;;  %vm9687_vm13 = vcmp.lt.f32.partialorder %v6339_v21, 8388608.0 }
 0x2a1   : > { %v6231_v10 = vand.u32 2147483647, %v6230_v17  ;;  %v6343_v35 = vand.u32 2147483647, %v6342_v9  ;;  %v3000_v13 = vadd.s32 %v9590_v52, %v9587_v22  ;;  %v6447_v32 = vand.u32 2147483647, %v6446_v43 }
 0x2a2   : > { %v2220_v6 = vfloor.f32 %v2217_v55  ;;  %vm9693_vm15 = vcmp.lt.f32.partialorder %v6227_v37, 8388608.0  ;;  %vm5842_vm1 = vcmp.lt.s32.totalorder %v5841_v4, 0  ;;  %v945_v53 = vadd.f32 %v944_v46, %v943_v57  ;;  %v6800_v46 = vld [vmem:[%s7135_s15 + $0x168] sm:$0xff] }
 0x2a3   : > { %v6233_v8 = vor.u32 %v6232_v20, %v6231_v10  ;;  %v6345_v5 = vor.u32 %v6344_v29, %v6343_v35  ;;  %v3015_v11 = vsel %vm5842_vm1, 0, %v5841_v4  ;;  %v946_v26 = vsel %vm722_vm0, %v877_v12, 0.0 }
 0x2a4   : > { %v2221_v3 = vsub.f32 %v2217_v55, %v2220_v6  ;;  %v3016_v39 = vsub.s32 32, %v3015_v11  ;;  %v3017_v22 = vshll.u32 %v9675_v60, %v3015_v11  ;;  %v3020_v52 = vsub.s32 4294967266, %v3015_v11  ;;  %v6801_v6 = vld [vmem:[%s7135_s15 + $0x248] sm:$0xff] }
 0x2a5   : > { %v6346_v24 = vsel %vm9687_vm13, %v6345_v5, %v5473_v41  ;;  %v3030_v16 = vsub.s32 4, %v9659_v33  ;;  %v2225_v59 = vand.u32 2147483648, %v2167_v50  ;;  %v6234_v23 = vsel %vm9693_vm15, %v6233_v8, %v5431_v14 }
 0x2a6   : > { %v5937_v28 = vadd.f32 -1.0, %v6346_v24  ;;  %vm2222_vm2 = vcmp.eq.f32.partialorder %v2221_v3, 1.0  ;;  %v3018_v58 = vshrl.u32 %v3000_v13, %v3016_v39  ;;  %v3021_v2 = vadd.s32 127, %v3020_v52 }
 0x2a7   : > { %v2223_v54 = vsel %vm2222_vm2, 0.0, %v2221_v3  ;;  %v5599_v47 = vmul.f32 25.0, %v5951_v45  ;;  %v947_v37 = vadd.f32 %v946_v26, %v945_v53  ;;  %vm2946_vm3 = vcmp.lt.s32.totalorder %v9468_v44, 0  ;;  %v6802_v3 = vld [vmem:[%s7135_s15 + $0x2b8] sm:$0xff] }
 0x2a8   : > { %v5557_v56 = vmul.f32 5.0, %v5937_v28  ;;  %v2224_v30 = vand.u32 2147483647, %v2223_v54  ;;  %v3019_v41 = vor.u32 %v3018_v58, %v3017_v22  ;;  %v3022_v17 = vshll.u32 %v3021_v2, 23  ;;  %v6803_v22 = vld [vmem:[%s7135_s15 + $0x328] sm:$0xff] }
 0x2a9   : > { %v1006_v43 = vmul.f32 0.33333334, %v947_v37  ;;  %v3031_v14 = vsel %vm2946_vm3, %v3030_v16, %v9659_v33  ;;  %vm9710_vm4 = vcmp.lt.f32.partialorder %v6443_v36, 8388608.0  ;;  %v9714_v9 = vor.u32 %v6448_v63, %v6447_v32  ;;  %v6798_v36 = vld [vmem:[%s7135_s15 + $0x88] sm:$0xff]  ;;  %v6799_v63 = vld [vmem:[%s7135_s15 + $0xf8] sm:$0xff] }
 0x2aa   : > { %v5571_v21 = vadd.f32 %v6234_v23, %v5557_v56  ;;  %v2226_v60 = vor.u32 %v2225_v59, %v2224_v30  ;;  %v3023_v50 = vor.u32 4788187, %v3022_v17  ;;  %v3026_v20 = vcvt.s32.f32 %v3019_v41  ;;  %v6804_v16 = vld [vmem:[%s7135_s15 + $0x408] sm:$0xff]  ;;  %v6805_v23 = vld [vmem:[%s7135_s15 + $0x478] sm:$0xff] }
 0x2ab   : > { %6039 = vmatprep.subr.mxu0 %v1006_v43  ;;  %vm9718_vm7 = vcmp.le.f32.partialorder %v2944_v34, 0.7853982  ;;  %v1033_v55 = vsel %vm722_vm0, %v6798_v36, 0.0  ;;  %v1034_v12 = vsel %vm722_vm0, %v6799_v63, 0.0  ;;  %v1036_v34 = vsel %vm722_vm0, %v6800_v46, 0.0 }
 0x2ac   : > { %v5613_v29 = vadd.f32 %v5599_v47, %v5571_v21  ;;  %vm2321_vm5 = vcmp.ne.f32.partialorder %v2226_v60, 0.0  ;;  %vm2335_vm6 = vcmp.lt.f32.partialorder %v2226_v60, 0.0  ;;  %v2363_v1 = vadd.f32 1.0, %v2226_v60  ;;  %6040 = vmatpush3.msra.mxu0 %v1006_v43 }
 0x2ad   : > { %v3024_v33 = vand.u32 2147483647, %v3023_v50  ;;  %vm2349_vm8 = vmand %vm2335_vm6, %vm2321_vm5  ;;  %v1035_v57 = vadd.f32 %v1034_v12, %v1033_v55  ;;  %v3033_v13 = vsel %vm9718_vm7, 0, %v3031_v14  ;;  %v1103_v0 = vsel %vm722_vm0, %v6801_v6, 0.0 }
 0x2ae   : > { %v6527_v35 = vtrunc.f32 %v5613_v29  ;;  %v2377_v4 = vsel %vm2349_vm8, %v2363_v1, %v2226_v60  ;;  %v5499_v5 = vmul.f32 4.0, %v9543_v62  ;;  %v1104_v53 = vsel %vm722_vm0, %v6802_v3, 0.0  ;;  %v6806_v62 = vld [vmem:[%s7135_s15 + $0x4e8] sm:$0xff] }
 0x2af   : > { %v3027_v27 = vmul.f32 %v3026_v20, %v3024_v33  ;;  %v2391_v32 = vmul.f32 6.2831855, %v2377_v4  ;;  %v1037_v11 = vadd.f32 %v1036_v34, %v1035_v57  ;;  %v1105_v39 = vadd.f32 %v1104_v53, %v1103_v0 }
 0x2b0   : > { %v6528_v8 = vcvt.f32.s32 %v6527_v35  ;;  %v1106_v52 = vsel %vm722_vm0, %v6803_v22, 0.0  ;;  %v4526_v28 = vadd.s32 3, %v3033_v13  ;;  %v1173_v59 = vsel %vm722_vm0, %v6804_v16, 0.0 }
 0x2b1   : > { %v3028_v26 = vxor.u32 2147483648, %v3027_v27  ;;  %v2405_v24 = vmul.f32 2.0, %v2391_v32  ;;  %v1174_v58 = vsel %vm722_vm0, %v6805_v23, 0.0  ;;  %v1176_v2 = vsel %vm722_vm0, %v6806_v62, 0.0 }
 0x2b2   : > { %5641 = vst.msk [vmem:[%s7930_s9 + $0x30] sm:$0xff] %vm722_vm0, %v6528_v8  ;;  %v1107_v47 = vadd.f32 %v1106_v52, %v1105_v39  ;;  %v1175_v30 = vadd.f32 %v1174_v58, %v1173_v59  ;;  %v9752_v41 = vmul.f32 0.33333334, %v1037_v11  ;;  %v9756_v60 = vadd.f32 1.0, %v5499_v5 }
 0x2b3   : > { %v3029_v54 = vsel %vm2946_vm3, %v3028_v26, %v3027_v27  ;;  %v9747_v56 = vmul.f32 3.1415927, %v2405_v24  ;;  %v6450_v43 = vsel %vm9710_vm4, %v9714_v9, %v9519_v48  ;;  %v9764_v14 = vand.u32 3, %v3033_v13 }
 0x2b4   : > { %v3032_v37 = vsel %vm9718_vm7, %v9468_v44, %v3029_v54  ;;  %v1177_v50 = vadd.f32 %v1176_v2, %v1175_v30  ;;  %v9762_v20 = vmul.f32 0.33333334, %v1107_v47  ;;  %v9766_v29 = vand.u32 3, %v4526_v28 }
 0x2b5   : > { %6693 = vcosq.f32 %v3032_v37  ;;  %v2841_v17 = vand.u32 2147483647, %v9747_v56  ;;  %v2844_v21 = vand.u32 2139095040, %v9747_v56  ;;  %v6437_v48 = vcvt.f32.s32 %v9756_v60 }
 0x2b6   : > { %6695 = vsinq.f32 %v3032_v37  ;;  %v1259_v33 = vmul.f32 0.33333334, %v1177_v50  ;;  %v1801_v36 = vmax.f32 %v9752_v41, %v9762_v20  ;;  %v1829_v55 = vmin.f32 %v9752_v41, %v9762_v20 }
 0x2b7   : > { %v2845_v1 = vshrl.u32 %v2844_v21, 23  ;;  %v2848_v10 = vand.u32 8388607, %v2841_v17  ;;  %v9775_v9 = vadd.f32 -1.0, %v6450_v43  ;;  %vm3039_vm9 = vcmp.eq.s32.totalorder %v9764_v14, 0 }
 0x2b8   : > { %v9777_v12 = vmax.f32 %v1801_v36, %v1259_v33  ;;  %v1843_v35 = vmin.f32 %v1829_v55, %v1259_v33  ;;  %vm3042_vm10 = vcmp.eq.s32.totalorder %v9764_v14, 2  ;;  %vm4529_vm14 = vcmp.eq.s32.totalorder %v9766_v29, 0 }
 0x2b9   : > { %v5835_v45 = vadd.s32 4294967169, %v2845_v1  ;;  %v2849_v63 = vor.u32 8388608, %v2848_v10  ;;  %vm3038_vm11 = vcmp.lt.s32.totalorder %v9764_v14, 2  ;;  %vm4528_vm12 = vcmp.lt.s32.totalorder %v9766_v29, 2 }
 0x2ba   : > { %v9785_v57 = vsub.f32 %v9777_v12, %v1843_v35  ;;  %v1871_v46 = vadd.f32 1e-08, %v9777_v12  ;;  %v9790_v34 = vsub.f32 %v9777_v12, %v9752_v41  ;;  %v9794_v27 = vsub.f32 %v9777_v12, %v9762_v20 }
 0x2bb   : > { %v2851_v4 = vadd.s32 1, %v5835_v45  ;;  %vm3036_vm13 = vweird.f32 %v9468_v44  ;;  %vm4532_vm15 = vcmp.eq.s32.totalorder %v9766_v29, 2  ;;  %v9798_v13 = vcvt.s32.f32 %v6437_v48 }
 0x2bc   : > { %v9801_v32 = vsub.f32 %v9777_v12, %v1259_v33  ;;  %v9803_v0 = vshll.u32 %v2849_v63, 8  ;;  %6697 = vrcp.f32 %v1871_v46  ;;  %vm1913_vm2 = vcmp.eq.f32.partialorder %v9785_v57, 0.0 }
 0x2bd   : > { %vm2852_vm1 = vcmp.gt.s32.totalorder %v2851_v4, 0  ;;  %v1927_v11 = vsel %vm1913_vm2, 1.0, %v9785_v57  ;;  %v2081_v3 = vsub.f32 %v9794_v27, %v9790_v34  ;;  %vm2025_vm5 = vcmp.eq.f32.partialorder %v9777_v12, %v9762_v20 }
 0x2be   : > { %v2853_v6 = vsel %vm2852_vm1, %v2851_v4, 0  ;;  %6699 = vrcp.f32 %v1927_v11  ;;  %v2011_v53 = vsub.f32 %v9801_v32, %v9794_v27  ;;  %v2039_v26 = vsub.f32 %v9790_v34, %v9801_v32  ;;  %v9933_v32 = vld [vmem:[%s7135_s15 + $0x468] sm:$0xff] }
 0x2bf   : > { %v9806_v8 = vshrl.u32 %v2853_v6, 5  ;;  %v2855_v5 = vand.u32 31, %v2853_v6  ;;  %v2053_v24 = vmul.f32 2.0, %v1927_v11  ;;  %vm1997_vm8 = vcmp.eq.f32.partialorder %v9777_v12, %v9752_v41 }
 0x2c1   : > { %v2856_v39 = vsub.s32 32, %v2855_v5  ;;  %v2858_v22 = vshll.u32 %v6968_v25, %v2855_v5  ;;  %v2861_v52 = vshll.u32 %v6969_v40, %v2855_v5  ;;  %v2864_v28 = vshll.u32 %v6970_v15, %v2855_v5 }
 0x2c2   : > { %v6694_v16 = vpop.eup %6693  ;;  %v2867_v59 = vshll.u32 %v10887_v31, %v2855_v5  ;;  %v2870_v23 = vshll.u32 %v10885_v42, %v2855_v5  ;;  %vm2873_vm3 = vcmp.lt.s32.totalorder %v9806_v8, 1  ;;  %vm2874_vm4 = vcmp.lt.s32.totalorder %v9806_v8, 2 }
 0x2c3   : > { %v6696_v58 = vpop.eup %6695  ;;  %v3043_v62 = vxor.u32 2147483648, %v6694_v16  ;;  %v2857_v2 = vshrl.u32 %v6968_v25, %v2856_v39  ;;  %v2859_v54 = vshrl.u32 %v6969_v40, %v2856_v39  ;;  %v2862_v47 = vshrl.u32 %v6970_v15, %v2856_v39 }
 0x2c4   : > { %v3040_v30 = vxor.u32 2147483648, %v6696_v58  ;;  %v2865_v37 = vshrl.u32 %v10887_v31, %v2856_v39  ;;  %v2868_v21 = vshrl.u32 %v10885_v42, %v2856_v39  ;;  %v2871_v43 = vshrl.u32 %v10927_v49, %v2856_v39 }
 0x2c5   : > { %v3044_v50 = vsel %vm3042_vm10, %v3043_v62, %v6696_v58  ;;  %v4534_v1 = vsel %vm4532_vm15, %v3043_v62, %v6696_v58  ;;  %v2860_v10 = vor.u32 %v2859_v54, %v2858_v22  ;;  %v2863_v33 = vor.u32 %v2862_v47, %v2861_v52 }
 0x2c6   : > { %v3041_v36 = vsel %vm3039_vm9, %v6694_v16, %v3040_v30  ;;  %v4531_v55 = vsel %vm4529_vm14, %v6694_v16, %v3040_v30  ;;  %v2866_v45 = vor.u32 %v2865_v37, %v2864_v28  ;;  %v2869_v48 = vor.u32 %v2868_v21, %v2867_v59 }
 0x2c7   : > { %v3045_v63 = vsel %vm3038_vm11, %v3041_v36, %v3044_v50  ;;  %v4535_v35 = vsel %vm4528_vm12, %v4531_v55, %v4534_v1  ;;  %v2872_v4 = vor.u32 %v2871_v43, %v2870_v23  ;;  %vm2875_vm6 = vcmp.lt.s32.totalorder %v9806_v8, 3  ;;  %v303_v1 = vld [vmem:[%s7135_s15 + $0x8] sm:$0xff] }
 0x2c8   : > { %v3046_v46 = vsel %vm3036_vm13, nan, %v3045_v63  ;;  %v4536_v6 = vsel %vm3036_vm13, nan, %v4535_v35  ;;  %vm2876_vm7 = vcmp.lt.s32.totalorder %v9806_v8, 4  ;;  %v2877_v5 = vsel %vm2873_vm3, %v2857_v2, %v2860_v10 }
 0x2c9   : > { %v3876_v14 = vmul.f32 %v3046_v46, %v9349_v7  ;;  %v5374_v39 = vmul.f32 %v4536_v6, %v9349_v7  ;;  %v2878_v29 = vsel %vm2876_vm7, %v2866_v45, 2102212464  ;;  %v2881_v22 = vsel %vm2873_vm3, %v2860_v10, %v2863_v33  ;;  %v6698_v59 = vpop.eup %6697  ;;  %v9873_v10 = vld [vmem:[%s7135_s15 + $0x78] sm:$0xff]  ;;  %v9901_v6 = vld [vmem:[%s7135_s15 + $0x2a8] sm:$0xff] }
 0x2ca   : > { %v2879_v52 = vsel %vm2875_vm6, %v2863_v33, %v2878_v29  ;;  %v2882_v28 = vsel %vm2876_vm7, %v2869_v48, 920167782  ;;  %v2885_v44 = vsel %vm2873_vm3, %v2863_v33, %v2866_v45  ;;  %v2886_v16 = vsel %vm2876_vm7, %v2872_v4, 1326507024  ;;  %v359_v4 = vld [vmem:[%s7135_s15 + $0x1c8] sm:$0xff]  ;;  %v9898_v46 = vld [vmem:[%s7135_s15 + $0x238] sm:$0xff] }
 0x2cb   : > { %v3890_v23 = vadd.f32 1.0, %v3876_v14  ;;  %v5388_v58 = vadd.f32 1.0, %v5374_v39  ;;  %v2883_v7 = vsel %vm2875_vm6, %v2866_v45, %v2882_v28  ;;  %v2095_v62 = vmul.f32 4.0, %v1927_v11  ;;  %v6700_v37 = vpop.eup %6699  ;;  %v415_v39 = vld [vmem:[%s7135_s15 + $0x388] sm:$0xff]  ;;  %v9913_v29 = vld [vmem:[%s7135_s15 + $0x3f8] sm:$0xff] }
 0x2cc   : > { %v2880_v2 = vsel %vm2874_vm4, %v2877_v5, %v2879_v52  ;;  %v2884_v54 = vsel %vm2874_vm4, %v2881_v22, %v2883_v7  ;;  %v2887_v47 = vsel %vm2875_vm6, %v2869_v48, %v2886_v16  ;;  %v9867_v30 = vmul.f32 %v6698_v59, %v9785_v57 }
 0x2cd   : > { %v3904_v21 = vmul.f32 0.5, %v3890_v23  ;;  %v5402_v43 = vmul.f32 0.5, %v5388_v58  ;;  %v2888_v11 = vsel %vm2874_vm4, %v2885_v44, %v2887_v47  ;;  %v2067_v50 = vadd.f32 %v2053_v24, %v2039_v26  ;;  %v9890_v26 = vld [vmem:[%s7135_s15 + $0xe8] sm:$0xff]  ;;  %v1270_v24 = vld [vmem:[#allocation6] sm:$0xff] }
 0x2ce   : > { %v9876_v33 = vmul.u32.u64.low %v9803_v0, %v2888_v11  ;;  %v9877_v36 = vmul.u32.u64.high %v9803_v0, %v2888_v11, %v9876_v33  ;;  %v9880_v57 = vmul.u32.u64.low %v9803_v0, %v2884_v54  ;;  %v9881_v55 = vmul.u32.u64.high %v9803_v0, %v2884_v54, %v9880_v57  ;;  %6045 = vmatprep.mubr.msk.f32.mxu0 %vm722_vm0, %v1270_v24 }
 0x2cf   : > { %v5416_v45 = vmul.f32 4.0, %v3904_v21  ;;  %v5458_v48 = vmul.f32 4.0, %v5402_v43  ;;  %v2109_v8 = vadd.f32 %v2095_v62, %v2081_v3  ;;  %v9893_v63 = vmul.f32 25.0, %v9775_v9  ;;  %v9937_v62 = vld [vmem:[%s7135_s15 + $0x158] sm:$0xff] }
 0x2d0   : > { %v6435_v35 = vand.u32 2147483647, %v9756_v60  ;;  %v471_v5 = vsub.f32 %v303_v1, %v9873_v10  ;;  %v2896_v14 = vmul.u32 %v9803_v0, %v2880_v2  ;;  %vm2898_vm9 = vc.u32 %v9877_v36, %v9880_v57  ;;  %v9942_v1 = vld [vmem:[%s7135_s15 + $0x318] sm:$0xff] }
 0x2d1   : > { %v9905_v34 = vadd.f32 1.0, %v5416_v45  ;;  %v5472_v3 = vadd.f32 1.0, %v5458_v48  ;;  %v2123_v9 = vsel %vm2025_vm5, %v2067_v50, %v2109_v8  ;;  %v2899_v22 = vadd.s32 1, %v9881_v55 }
 0x2d2   : > { %v2137_v0 = vsel %vm1997_vm8, %v2011_v53, %v2123_v9  ;;  %v485_v20 = vsub.f32 %v9873_v10, %v9890_v26  ;;  %v6439_v28 = vand.u32 2147483647, %v9798_v13  ;;  %v513_v44 = vsub.f32 %v359_v4, %v9898_v46 }
 0x2d3   : > { %v6221_v52 = vcvt.f32.s32 %v9905_v34  ;;  %v527_v16 = vsub.f32 %v9898_v46, %v9901_v6  ;;  %v6333_v59 = vcvt.f32.s32 %v5472_v3  ;;  %v2900_v23 = vsel %vm2898_vm9, %v2899_v22, %v9881_v55 }
 0x2d4   : > { %v2151_v27 = vmul.f32 %v6700_v37, %v2137_v0  ;;  %v555_v41 = vsub.f32 %v415_v39, %v9913_v29  ;;  %v6331_v58 = vand.u32 2147483647, %v5472_v3  ;;  %v2901_v7 = vadd.s32 %v2900_v23, %v2896_v14  ;;  %v9953_v0 = vld [vmem:[%s7135_s15 + $0x4d8] sm:$0xff] }
 0x2d5   : > { %v6222_v53 = vcvt.s32.f32 %v6221_v52  ;;  %v597_v2 = vand.u32 2147483647, %v471_v5  ;;  %v6224_v54 = vand.u32 2147483648, %v9905_v34  ;;  %v6334_v47 = vcvt.s32.f32 %v6333_v59 }
 0x2d6   : > { %v6336_v21 = vand.u32 2147483648, %v5472_v3  ;;  %v2166_v43 = vmul.f32 0.16666667, %v2151_v27  ;;  %v6219_v11 = vand.u32 2147483647, %v9905_v34  ;;  %v2902_v37 = vadd.s32 536870912, %v2901_v7 }
 0x2d7   : > { %v6223_v50 = vand.u32 2147483647, %v6222_v53  ;;  %v569_v33 = vsub.f32 %v9913_v29, %v9933_v32  ;;  %v6335_v55 = vand.u32 2147483647, %v6334_v47  ;;  %v499_v48 = vsub.f32 %v9890_v26, %v9937_v62 }
 0x2d8   : > { %v2207_v45 = vand.u32 2147483647, %v2166_v43  ;;  %v639_v8 = vand.u32 2147483647, %v513_v44  ;;  %vm9948_vm10 = vcmp.lt.f32.partialorder %v6331_v58, 8388608.0  ;;  %v2903_v4 = vshrl.u32 %v2902_v37, 30 }
 0x2d9   : > { %v611_v5 = vand.u32 2147483647, %v485_v20  ;;  %v653_v14 = vand.u32 2147483647, %v527_v16  ;;  %v6225_v9 = vor.u32 %v6224_v54, %v6223_v50  ;;  %v6337_v39 = vor.u32 %v6336_v21, %v6335_v55 }
 0x2da   : > { %v2210_v22 = vfloor.f32 %v2207_v45  ;;  %v541_v52 = vsub.f32 %v9901_v6, %v9942_v1  ;;  %vm9957_vm14 = vcmp.lt.f32.partialorder %v6219_v11, 8388608.0  ;;  %v2904_v44 = vshll.u32 %v2903_v4, 30 }
 0x2db   : > { %v681_v23 = vand.u32 2147483647, %v555_v41  ;;  %v695_v27 = vand.u32 2147483647, %v569_v33  ;;  %v6338_v53 = vsel %vm9948_vm10, %v6337_v39, %v5472_v3  ;;  %v728_v16 = vsel %vm722_vm0, %v597_v2, 0.0 }
 0x2dc   : > { %v2211_v20 = vsub.f32 %v2207_v45, %v2210_v22  ;;  %v729_v58 = vsel %vm722_vm0, %v639_v8, 0.0  ;;  %v5936_v54 = vadd.f32 -1.0, %v6338_v53  ;;  %v9965_v47 = vsub.s32 %v2901_v7, %v2904_v44 }
 0x2dd   : > { %v798_v21 = vsel %vm722_vm0, %v611_v5, 0.0  ;;  %v799_v11 = vsel %vm722_vm0, %v653_v14, 0.0  ;;  %v6226_v41 = vsel %vm9957_vm14, %v6225_v9, %v9905_v34  ;;  %v583_v3 = vsub.f32 %v9933_v32, %v9953_v0 }
 0x2de   : > { %vm2212_vm11 = vcmp.eq.f32.partialorder %v2211_v20, 1.0  ;;  %v625_v50 = vand.u32 2147483647, %v499_v48  ;;  %v5556_v37 = vmul.f32 5.0, %v5936_v54  ;;  %v2907_v2 = vsub.s32 0, %v9965_v47 }
 0x2df   : > { %v667_v33 = vand.u32 2147483647, %v541_v52  ;;  %v730_v55 = vadd.f32 %v729_v58, %v728_v16  ;;  %v2213_v7 = vsel %vm2212_vm11, 0.0, %v2211_v20  ;;  %v2215_v45 = vand.u32 2147483648, %v2166_v43 }
 0x2e0   : > { %v731_v8 = vsel %vm722_vm0, %v681_v23, 0.0  ;;  %v800_v24 = vadd.f32 %v799_v11, %v798_v21  ;;  %v5570_v5 = vadd.f32 %v6226_v41, %v5556_v37  ;;  %v5836_v14 = vmin.u32 %v2907_v2, %v9965_v47  ;;  %v6808_v11 = vld [vmem:[%s7135_s15 + $0xf0] sm:$0xff] }
 0x2e1   : > { %v2927_v39 = vsub.s32 4, %v2903_v4  ;;  %v801_v34 = vsel %vm722_vm0, %v695_v27, 0.0  ;;  %vm9980_vm12 = vcmp.le.f32.partialorder %v2841_v17, 0.7853982  ;;  %vm2843_vm13 = vcmp.lt.s32.totalorder %v9747_v56, 0 }
 0x2e2   : > { %v6440_v9 = vand.u32 2147483648, %v9756_v60  ;;  %v2214_v43 = vand.u32 2147483647, %v2213_v7  ;;  %v5612_v22 = vadd.f32 %v9893_v63, %v5570_v5  ;;  %v2897_v52 = vadd.s32 %v9880_v57, %v9877_v36  ;;  %v6807_v36 = vld [vmem:[%s7135_s15 + $0x80] sm:$0xff] }
 0x2e3   : > { %v2909_v59 = vclz %v5836_v14  ;;  %v709_v44 = vand.u32 2147483647, %v583_v3  ;;  %v732_v27 = vadd.f32 %v731_v8, %v730_v55  ;;  %v802_v17 = vadd.f32 %v801_v34, %v800_v24  ;;  %v6809_v24 = vld [vmem:[%s7135_s15 + $0x160] sm:$0xff]  ;;  %v6811_v34 = vld [vmem:[%s7135_s15 + $0x2b0] sm:$0xff] }
 0x2e4   : > { %v2216_v23 = vor.u32 %v2215_v45, %v2214_v43  ;;  %v868_v53 = vsel %vm722_vm0, %v625_v50, 0.0  ;;  %v6525_v20 = vtrunc.f32 %v5612_v22  ;;  %v2928_v58 = vsel %vm2843_vm13, %v2927_v39, %v2903_v4  ;;  %v6810_v14 = vld [vmem:[%s7135_s15 + $0x240] sm:$0xff] }
 0x2e5   : > { %v5837_v16 = vadd.s32 4294967294, %v2909_v59  ;;  %v869_v54 = vsel %vm722_vm0, %v667_v33, 0.0  ;;  %v1028_v57 = vsel %vm722_vm0, %v6807_v36, 0.0  ;;  %v1029_v41 = vsel %vm722_vm0, %v6808_v11, 0.0 }
 0x2e6   : > { %vm2320_vm15 = vcmp.ne.f32.partialorder %v2216_v23, 0.0  ;;  %vm2334_vm1 = vcmp.lt.f32.partialorder %v2216_v23, 0.0  ;;  %v2362_v63 = vadd.f32 1.0, %v2216_v23  ;;  %v6526_v21 = vcvt.f32.s32 %v6525_v20 }
 0x2e7   : > { %vm5838_vm2 = vcmp.lt.s32.totalorder %v5837_v16, 0  ;;  %vm2348_vm3 = vmand %vm2334_vm1, %vm2320_vm15  ;;  %v871_v4 = vsel %vm722_vm0, %v709_v44, 0.0  ;;  %v2930_v50 = vsel %vm9980_vm12, 0, %v2928_v58  ;;  %v1030_v2 = vadd.f32 %v1029_v41, %v1028_v57 }
 0x2e8   : > { %v2912_v3 = vsel %vm5838_vm2, 0, %v5837_v16  ;;  %v2376_v37 = vsel %vm2348_vm3, %v2362_v63, %v2216_v23  ;;  %5640 = vst.msk [vmem:[%s7930_s9 + $0x28] sm:$0xff] %vm722_vm0, %v6526_v21  ;;  %vm10005_vm4 = vcmp.lt.f32.partialorder %v6435_v35, 8388608.0  ;;  %v1031_v5 = vsel %vm722_vm0, %v6809_v24, 0.0 }
 0x2e9   : > { %v2913_v33 = vsub.s32 32, %v2912_v3  ;;  %v2914_v55 = vshll.u32 %v9965_v47, %v2912_v3  ;;  %v2917_v7 = vsub.s32 4294967266, %v2912_v3  ;;  %v2390_v45 = vmul.f32 6.2831855, %v2376_v37 }
 0x2ea   : > { %v1098_v39 = vsel %vm722_vm0, %v6810_v14, 0.0  ;;  %v1099_v43 = vsel %vm722_vm0, %v6811_v34, 0.0  ;;  %v870_v22 = vadd.f32 %v869_v54, %v868_v53  ;;  %v1032_v23 = vadd.f32 %v1031_v5, %v1030_v2 }
 0x2eb   : > { %v2915_v59 = vshrl.u32 %v2897_v52, %v2913_v33  ;;  %v2918_v47 = vadd.s32 127, %v2917_v7  ;;  %v2404_v44 = vmul.f32 2.0, %v2390_v45  ;;  %v1100_v20 = vadd.f32 %v1099_v43, %v1098_v39 }
 0x2ec   : > { %v1101_v35 = vsel %vm722_vm0, %v9492_v38, 0.0  ;;  %v1168_v16 = vsel %vm722_vm0, %v9504_v61, 0.0  ;;  %v1169_v58 = vsel %vm722_vm0, %v9517_v18, 0.0  ;;  %v1171_v52 = vsel %vm722_vm0, %v9635_v51, 0.0 }
 0x2ed   : > { %v2916_v63 = vor.u32 %v2915_v59, %v2914_v55  ;;  %v2919_v36 = vshll.u32 %v2918_v47, 23  ;;  %v10021_v57 = vmul.f32 3.1415927, %v2404_v44  ;;  %v1170_v21 = vadd.f32 %v1169_v58, %v1168_v16 }
 0x2ee   : > { %v1102_v53 = vadd.f32 %v1101_v35, %v1100_v20  ;;  %v10025_v54 = vmul.f32 0.33333334, %v1032_v23  ;;  %v872_v11 = vadd.f32 %v871_v4, %v870_v22  ;;  %v938_v61 = vsel %vm722_vm0, %v732_v27, 0.0 }
 0x2ef   : > { %v2920_v41 = vor.u32 4788187, %v2919_v36  ;;  %v2923_v38 = vcvt.s32.f32 %v2916_v63  ;;  %v2738_v3 = vand.u32 2147483647, %v10021_v57  ;;  %v2741_v18 = vand.u32 2139095040, %v10021_v57 }
 0x2f0   : > { %v1172_v37 = vadd.f32 %v1171_v52, %v1170_v21  ;;  %v10030_v2 = vmul.f32 0.33333334, %v1102_v53  ;;  %v939_v33 = vsel %vm722_vm0, %v802_v17, 0.0  ;;  %v4422_v7 = vadd.s32 3, %v2930_v50 }
 0x2f1   : > { %v2921_v55 = vand.u32 2147483647, %v2920_v41  ;;  %v10037_v51 = vor.u32 %v6440_v9, %v6439_v28  ;;  %v2745_v4 = vand.u32 8388607, %v2738_v3  ;;  %v2742_v45 = vshrl.u32 %v2741_v18, 23 }
 0x2f2   : > { %v1258_v27 = vmul.f32 0.33333334, %v1172_v37  ;;  %v1800_v24 = vmax.f32 %v10025_v54, %v10030_v2  ;;  %v1828_v5 = vmin.f32 %v10025_v54, %v10030_v2  ;;  %v940_v14 = vadd.f32 %v939_v33, %v938_v61 }
 0x2f3   : > { %v2924_v17 = vmul.f32 %v2923_v38, %v2921_v55  ;;  %v5831_v39 = vadd.s32 4294967169, %v2742_v45  ;;  %v941_v28 = vsel %vm722_vm0, %v872_v11, 0.0  ;;  %v10048_v43 = vand.u32 3, %v2930_v50 }
 0x2f4   : > { %v10045_v34 = vmax.f32 %v1800_v24, %v1258_v27  ;;  %v1842_v13 = vmin.f32 %v1828_v5, %v1258_v27  ;;  %v10050_v22 = vand.u32 3, %v4422_v7  ;;  %v6442_v59 = vsel %vm10005_vm4, %v10037_v51, %v9756_v60  ;;  %v10166_v60 = vld [vmem:[%s7135_s15 + $0xe0] sm:$0xff]  ;;  %v10169_v51 = vld [vmem:[%s7135_s15 + $0x150] sm:$0xff] }
 0x2f5   : > { %v2925_v9 = vxor.u32 2147483648, %v2924_v17  ;;  %v2746_v47 = vor.u32 8388608, %v2745_v4  ;;  %v2748_v44 = vadd.s32 1, %v5831_v39  ;;  %v942_v58 = vadd.f32 %v941_v28, %v940_v14 }
 0x2f6   : > { %v10057_v23 = vsub.f32 %v10045_v34, %v1842_v13  ;;  %v1870_v20 = vadd.f32 1e-08, %v10045_v34  ;;  %v1954_v50 = vsub.f32 %v10045_v34, %v10025_v54  ;;  %v10065_v16 = vsub.f32 %v10045_v34, %v1258_v27 }
 0x2f7   : > { %v2926_v35 = vsel %vm2843_vm13, %v2925_v9, %v2924_v17  ;;  %vm2749_vm5 = vcmp.gt.s32.totalorder %v2748_v44, 0  ;;  %v10074_v53 = vsub.f32 %v10045_v34, %v10030_v2  ;;  %v10076_v41 = vshll.u32 %v2746_v47, 8 }
 0x2f8   : > { %v2929_v63 = vsel %vm9980_vm12, %v9747_v56, %v2926_v35  ;;  %6701 = vrcp.f32 %v1870_v20  ;;  %vm1912_vm6 = vcmp.eq.f32.partialorder %v10057_v23, 0.0  ;;  %v2750_v36 = vsel %vm2749_vm5, %v2748_v44, 0 }
 0x2f9   : > { %6703 = vcosq.f32 %v2929_v63  ;;  %v1926_v21 = vsel %vm1912_vm6, 1.0, %v10057_v23  ;;  %v2751_v52 = vshrl.u32 %v2750_v36, 5  ;;  %v2752_v11 = vand.u32 31, %v2750_v36 }
 0x2fa   : > { %6705 = vsinq.f32 %v2929_v63  ;;  %vm2024_vm7 = vcmp.eq.f32.partialorder %v10045_v34, %v10030_v2  ;;  %v2038_v48 = vsub.f32 %v1954_v50, %v10065_v16  ;;  %v2052_v38 = vmul.f32 2.0, %v1926_v21 }
 0x2fb   : > { %6707 = vrcp.f32 %v1926_v21  ;;  %v2753_v61 = vsub.s32 32, %v2752_v11  ;;  %v2755_v18 = vshll.u32 %v6968_v25, %v2752_v11  ;;  %v2758_v37 = vshll.u32 %v6969_v40, %v2752_v11 }
 0x2fc   : > { %v2761_v33 = vshll.u32 %v6970_v15, %v2752_v11  ;;  %vm1996_vm8 = vcmp.eq.f32.partialorder %v10045_v34, %v10025_v54  ;;  %v2764_v55 = vshll.u32 %v10887_v31, %v2752_v11  ;;  %v2767_v7 = vshll.u32 %v10885_v42, %v2752_v11 }
 0x2fd   : > { %vm2770_vm9 = vcmp.lt.s32.totalorder %v2751_v52, 1  ;;  %v2080_v4 = vsub.f32 %v10074_v53, %v1954_v50  ;;  %vm2939_vm10 = vcmp.eq.s32.totalorder %v10048_v43, 2  ;;  %v2754_v45 = vshrl.u32 %v6968_v25, %v2753_v61 }
 0x2fe   : > { %v2756_v27 = vshrl.u32 %v6969_v40, %v2753_v61  ;;  %v2759_v24 = vshrl.u32 %v6970_v15, %v2753_v61  ;;  %v2762_v5 = vshrl.u32 %v10887_v31, %v2753_v61  ;;  %vm2936_vm14 = vcmp.eq.s32.totalorder %v10048_v43, 0 }
 0x2ff   : > { %vm4425_vm11 = vcmp.eq.s32.totalorder %v10050_v22, 0  ;;  %v2765_v17 = vshrl.u32 %v10885_v42, %v2753_v61  ;;  %v2768_v14 = vshrl.u32 %v10927_v49, %v2753_v61  ;;  %vm2772_vm12 = vcmp.lt.s32.totalorder %v2751_v52, 3 }
 0x300   : > { %vm2773_vm13 = vcmp.lt.s32.totalorder %v2751_v52, 4  ;;  %v2757_v39 = vor.u32 %v2756_v27, %v2755_v18  ;;  %v2760_v13 = vor.u32 %v2759_v24, %v2758_v37  ;;  %v2763_v28 = vor.u32 %v2762_v5, %v2761_v33 }
 0x301   : > { %v2066_v9 = vadd.f32 %v2052_v38, %v2038_v48  ;;  %v2766_v47 = vor.u32 %v2765_v17, %v2764_v55  ;;  %v2769_v44 = vor.u32 %v2768_v14, %v2767_v7  ;;  %v2094_v20 = vmul.f32 4.0, %v1926_v21 }
 0x302   : > { %v1005_v35 = vmul.f32 0.33333334, %v942_v58  ;;  %vm2771_vm15 = vcmp.lt.s32.totalorder %v2751_v52, 2  ;;  %v2775_v50 = vsel %vm2773_vm13, %v2763_v28, 2102212464  ;;  %v2778_v63 = vsel %vm2770_vm9, %v2757_v39, %v2760_v13 }
 0x303   : > { %v2782_v36 = vsel %vm2770_vm9, %v2760_v13, %v2763_v28  ;;  %v2779_v11 = vsel %vm2773_vm13, %v2766_v47, 920167782  ;;  %v2783_v42 = vsel %vm2773_vm13, %v2769_v44, 1326507024  ;;  %v2010_v61 = vsub.f32 %v10065_v16, %v10074_v53 }
 0x304   : > { %v2108_v31 = vadd.f32 %v2094_v20, %v2080_v4  ;;  %6041 = vmatprep.subr.mxu0 %v1005_v35  ;;  %v2774_v18 = vsel %vm2770_vm9, %v2754_v45, %v2757_v39  ;;  %v2776_v48 = vsel %vm2772_vm12, %v2760_v13, %v2775_v50  ;;  %v2780_v21 = vsel %vm2772_vm12, %v2763_v28, %v2779_v11 }
 0x305   : > { %v2784_v58 = vsel %vm2772_vm12, %v2766_v47, %v2783_v42  ;;  %6042 = vmatpush3.msra.mxu0 %v1005_v35  ;;  %v6702_v38 = vpop.eup %6701  ;;  %vm4428_vm1 = vcmp.eq.s32.totalorder %v10050_v22, 2  ;;  %v2781_v37 = vsel %vm2771_vm15, %v2778_v63, %v2780_v21  ;;  %v2777_v24 = vsel %vm2771_vm15, %v2774_v18, %v2776_v48  ;;  %v302_v48 = vld [vmem:[%s7135_s15] sm:$0xff]  ;;  %v10163_v21 = vld [vmem:[%s7135_s15 + $0x70] sm:$0xff] }
 0x306   : > { %v2785_v33 = vsel %vm2771_vm15, %v2782_v36, %v2784_v58  ;;  %v2122_v16 = vsel %vm2024_vm7, %v2066_v9, %v2108_v31  ;;  %v6704_v53 = vpop.eup %6703  ;;  %v10117_v4 = vmul.u32.u64.low %v10076_v41, %v2781_v37  ;;  %v10118_v42 = vmul.u32.u64.high %v10076_v41, %v2781_v37, %v10117_v4 }
 0x307   : > { %v10113_v55 = vmul.u32.u64.low %v10076_v41, %v2785_v33  ;;  %v10114_v7 = vmul.u32.u64.high %v10076_v41, %v2785_v33, %v10113_v55  ;;  %v6706_v45 = vpop.eup %6705  ;;  %v2940_v27 = vxor.u32 2147483648, %v6704_v53  ;;  %v10123_v5 = vmul.f32 %v6702_v38, %v10057_v23 }
 0x308   : > { %v2136_v31 = vsel %vm1996_vm8, %v2010_v61, %v2122_v16  ;;  %v6708_v2 = vpop.eup %6707  ;;  %vm2933_vm2 = vweird.f32 %v9747_v56  ;;  %vm2935_vm3 = vcmp.lt.s32.totalorder %v10048_v43, 2  ;;  %v2937_v17 = vxor.u32 2147483648, %v6706_v45  ;;  %v358_v16 = vld [vmem:[%s7135_s15 + $0x1c0] sm:$0xff] }
 0x309   : > { %vm4424_vm5 = vcmp.lt.s32.totalorder %v10050_v22, 2  ;;  %v2941_v14 = vsel %vm2939_vm10, %v2940_v27, %v6706_v45  ;;  %v4430_v52 = vsel %vm4428_vm1, %v2940_v27, %v6706_v45  ;;  %v5498_v23 = vmul.f32 4.0, %v9777_v12  ;;  %v10181_v55 = vld [vmem:[%s7135_s15 + $0x2a0] sm:$0xff]  ;;  %v10184_v27 = vld [vmem:[%s7135_s15 + $0x310] sm:$0xff] }
 0x30a   : > { %v2150_v39 = vmul.f32 %v6708_v2, %v2136_v31  ;;  %v2938_v54 = vsel %vm2936_vm14, %v6704_v53, %v2937_v17  ;;  %v4427_v13 = vsel %vm4425_vm11, %v6704_v53, %v2937_v17  ;;  %v2793_v28 = vmul.u32 %v10076_v41, %v2777_v24  ;;  %v10178_v53 = vld [vmem:[%s7135_s15 + $0x230] sm:$0xff]  ;;  %v414_v24 = vld [vmem:[%s7135_s15 + $0x380] sm:$0xff] }
 0x30b   : > { %vm2795_vm6 = vc.u32 %v10114_v7, %v10117_v4  ;;  %v2942_v9 = vsel %vm2935_vm3, %v2938_v54, %v2941_v14  ;;  %v4431_v47 = vsel %vm4424_vm5, %v4427_v13, %v4430_v52  ;;  %v2796_v44 = vadd.s32 1, %v10118_v42  ;;  %v10190_v14 = vld [vmem:[%s7135_s15 + $0x3f0] sm:$0xff]  ;;  %v10193_v52 = vld [vmem:[%s7135_s15 + $0x460] sm:$0xff] }
 0x30c   : > { %v10144_v20 = vmul.f32 0.16666667, %v2150_v39  ;;  %v2943_v12 = vsel %vm2933_vm2, nan, %v2942_v9  ;;  %v4432_v43 = vsel %vm2933_vm2, nan, %v4431_v47  ;;  %v5949_v63 = vadd.f32 -1.0, %v6442_v59 }
 0x30d   : > { %v3875_v22 = vmul.f32 %v2943_v12, %v9662_v19  ;;  %v5373_v41 = vmul.f32 %v4432_v43, %v9662_v19  ;;  %v2797_v35 = vsel %vm2795_vm6, %v2796_v44, %v10118_v42  ;;  %v10159_v56 = vadd.f32 1.0, %v5498_v23  ;;  %v10196_v23 = vld [vmem:[%s7135_s15 + $0x4d0] sm:$0xff] }
 0x30e   : > { %v2197_v50 = vand.u32 2147483647, %v10144_v20  ;;  %v2798_v36 = vadd.s32 %v2797_v35, %v2793_v28  ;;  %v10171_v59 = vmul.f32 25.0, %v5949_v63  ;;  %v470_v31 = vsub.f32 %v302_v48, %v10163_v21 }
 0x30f   : > { %v3889_v11 = vadd.f32 1.0, %v3875_v22  ;;  %v5387_v61 = vadd.f32 1.0, %v5373_v41  ;;  %v484_v39 = vsub.f32 %v10163_v21, %v10166_v60  ;;  %v498_v54 = vsub.f32 %v10166_v60, %v10169_v51 }
 0x310   : > { %v2200_v19 = vfloor.f32 %v2197_v50  ;;  %v2799_v18 = vadd.s32 536870912, %v2798_v36  ;;  %v512_v9 = vsub.f32 %v358_v16, %v10178_v53  ;;  %v526_v47 = vsub.f32 %v10178_v53, %v10181_v55 }
 0x311   : > { %v3903_v8 = vmul.f32 0.5, %v3889_v11  ;;  %v5401_v58 = vmul.f32 0.5, %v5387_v61  ;;  %v2205_v43 = vand.u32 2147483648, %v10144_v20  ;;  %v540_v22 = vsub.f32 %v10181_v55, %v10184_v27 }
 0x312   : > { %v2201_v38 = vsub.f32 %v2197_v50, %v2200_v19  ;;  %v10173_v37 = vshrl.u32 %v2799_v18, 30  ;;  %v554_v35 = vsub.f32 %v414_v24, %v10190_v14  ;;  %v568_v50 = vsub.f32 %v10190_v14, %v10193_v52 }
 0x313   : > { %v5415_v42 = vmul.f32 4.0, %v3903_v8  ;;  %v5457_v45 = vmul.f32 4.0, %v5401_v58  ;;  %v582_v63 = vsub.f32 %v10193_v52, %v10196_v23  ;;  %v596_v19 = vand.u32 2147483647, %v470_v31 }
 0x314   : > { %vm2202_vm4 = vcmp.eq.f32.partialorder %v2201_v38, 1.0  ;;  %v2801_v2 = vshll.u32 %v10173_v37, 30  ;;  %v10221_v8 = vand.u32 2147483647, %v484_v39  ;;  %vm2740_vm7 = vcmp.lt.s32.totalorder %v10021_v57, 0 }
 0x315   : > { %v2203_v17 = vsel %vm2202_vm4, 0.0, %v2201_v38  ;;  %v10202_v13 = vadd.f32 1.0, %v5415_v42  ;;  %v5471_v28 = vadd.f32 1.0, %v5457_v45  ;;  %v2794_v24 = vadd.s32 %v10117_v4, %v10114_v7 }
 0x316   : > { %v10207_v44 = vsub.s32 %v2798_v36, %v2801_v2  ;;  %v2204_v12 = vand.u32 2147483647, %v2203_v17  ;;  %v10227_v2 = vand.u32 2147483647, %v498_v54  ;;  %v638_v31 = vand.u32 2147483647, %v512_v9 }
 0x317   : > { %v6213_v41 = vcvt.f32.s32 %v10202_v13  ;;  %v6211_v11 = vand.u32 2147483647, %v10202_v13  ;;  %v6325_v36 = vcvt.f32.s32 %v5471_v28  ;;  %v6216_v18 = vand.u32 2147483648, %v10202_v13 }
 0x318   : > { %v2804_v61 = vsub.s32 0, %v10207_v44  ;;  %v6323_v48 = vand.u32 2147483647, %v5471_v28  ;;  %v6328_v38 = vand.u32 2147483648, %v5471_v28  ;;  %v2206_v42 = vor.u32 %v2205_v43, %v2204_v12 }
 0x319   : > { %v6214_v20 = vcvt.s32.f32 %v6213_v41  ;;  %v6326_v58 = vcvt.s32.f32 %v6325_v36  ;;  %vm10229_vm8 = vcmp.lt.f32.partialorder %v6211_v11, 8388608.0  ;;  %vm10239_vm11 = vcmp.le.f32.partialorder %v2738_v3, 0.7853982 }
 0x31a   : > { %v5832_v16 = vmin.u32 %v2804_v61, %v10207_v44  ;;  %vm2319_vm9 = vcmp.ne.f32.partialorder %v2206_v42, 0.0  ;;  %vm10233_vm10 = vcmp.lt.f32.partialorder %v6323_v48, 8388608.0  ;;  %vm2333_vm14 = vcmp.lt.f32.partialorder %v2206_v42, 0.0 }
 0x31b   : > { %v6215_v45 = vand.u32 2147483647, %v6214_v20  ;;  %v6327_v39 = vand.u32 2147483647, %v6326_v58  ;;  %v2361_v12 = vadd.f32 1.0, %v2206_v42  ;;  %vm2347_vm12 = vmand %vm2333_vm14, %vm2319_vm9  ;;  %v2824_v11 = vsub.s32 4, %v10173_v37 }
 0x31c   : > { %v2806_v41 = vclz %v5832_v16  ;;  %v10243_v54 = vand.u32 2147483647, %v526_v47  ;;  %v10245_v9 = vand.u32 2147483647, %v540_v22  ;;  %v680_v20 = vand.u32 2147483647, %v554_v35 }
 0x31d   : > { %v6217_v36 = vor.u32 %v6216_v18, %v6215_v45  ;;  %v6329_v43 = vor.u32 %v6328_v38, %v6327_v39  ;;  %v2375_v61 = vsel %vm2347_vm12, %v2361_v12, %v2206_v42  ;;  %v10248_v18 = vand.u32 2147483647, %v568_v50 }
 0x31e   : > { %v5833_v4 = vadd.s32 4294967294, %v2806_v41  ;;  %v2389_v58 = vmul.f32 6.2831855, %v2375_v61  ;;  %v1023_v22 = vsel %vm722_vm0, %v9873_v10, 0.0  ;;  %v1024_v16 = vsel %vm722_vm0, %v9890_v26, 0.0 }
 0x31f   : > { %v6218_v48 = vsel %vm10229_vm8, %v6217_v36, %v10202_v13  ;;  %v6330_v3 = vsel %vm10233_vm10, %v6329_v43, %v5471_v28  ;;  %v2825_v33 = vsel %vm2740_vm7, %v2824_v11, %v10173_v37  ;;  %v723_v13 = vsel %vm722_vm0, %v596_v19, 0.0 }
 0x320   : > { %vm5834_vm13 = vcmp.lt.s32.totalorder %v5833_v4, 0  ;;  %v5935_v38 = vadd.f32 -1.0, %v6330_v3  ;;  %v2403_v45 = vmul.f32 2.0, %v2389_v58  ;;  %v724_v28 = vsel %vm722_vm0, %v638_v31, 0.0 }
 0x321   : > { %v2809_v47 = vsel %vm5834_vm13, 0, %v5833_v4  ;;  %v1025_v36 = vadd.f32 %v1024_v16, %v1023_v22  ;;  %v1093_v12 = vsel %vm722_vm0, %v9898_v46, 0.0  ;;  %v10271_v43 = vand.u32 2147483647, %v582_v63 }
 0x322   : > { %v2810_v35 = vsub.s32 32, %v2809_v47  ;;  %v2811_v50 = vshll.u32 %v10207_v44, %v2809_v47  ;;  %v2814_v42 = vsub.s32 4294967266, %v2809_v47  ;;  %v5555_v17 = vmul.f32 5.0, %v5935_v38 }
 0x323   : > { %v10265_v10 = vmul.f32 3.1415927, %v2403_v45  ;;  %v1026_v44 = vsel %vm722_vm0, %v9937_v62, 0.0  ;;  %v2827_v11 = vsel %vm10239_vm11, 0, %v2825_v33  ;;  %v725_v62 = vadd.f32 %v724_v28, %v723_v13 }
 0x324   : > { %v2812_v39 = vshrl.u32 %v2794_v24, %v2810_v35  ;;  %v2815_v41 = vadd.s32 127, %v2814_v42  ;;  %v5569_v26 = vadd.f32 %v6218_v48, %v5555_v17  ;;  %v1094_v24 = vsel %vm722_vm0, %v9901_v6, 0.0 }
 0x325   : > { %v2635_v19 = vand.u32 2147483647, %v10265_v10  ;;  %v2638_v61 = vand.u32 2139095040, %v10265_v10  ;;  %v1027_v63 = vadd.f32 %v1026_v44, %v1025_v36  ;;  %v1095_v47 = vadd.f32 %v1094_v24, %v1093_v12 }
 0x326   : > { %v2813_v4 = vor.u32 %v2812_v39, %v2811_v50  ;;  %v2816_v37 = vshll.u32 %v2815_v41, 23  ;;  %v5611_v31 = vadd.f32 %v10171_v59, %v5569_v26  ;;  %v1096_v6 = vsel %vm722_vm0, %v9942_v1, 0.0 }
 0x327   : > { %v2642_v46 = vand.u32 8388607, %v2635_v19  ;;  %v2639_v38 = vshrl.u32 %v2638_v61, 23  ;;  %v4318_v22 = vadd.s32 3, %v2827_v11  ;;  %v1163_v16 = vsel %vm722_vm0, %v9913_v29, 0.0 }
 0x328   : > { %v2817_v48 = vor.u32 4788187, %v2816_v37  ;;  %v2820_v3 = vcvt.s32.f32 %v2813_v4  ;;  %v6523_v58 = vtrunc.f32 %v5611_v31  ;;  %v1164_v35 = vsel %vm722_vm0, %v9933_v32, 0.0 }
 0x329   : > { %v5827_v42 = vadd.s32 4294967169, %v2639_v38  ;;  %v1097_v45 = vadd.f32 %v1096_v6, %v1095_v47  ;;  %v1165_v17 = vadd.f32 %v1164_v35, %v1163_v16  ;;  %v2643_v13 = vor.u32 8388608, %v2642_v46 }
 0x32a   : > { %v2818_v59 = vand.u32 2147483647, %v2817_v48  ;;  %v6524_v50 = vcvt.f32.s32 %v6523_v58  ;;  %v1166_v28 = vsel %vm722_vm0, %v9953_v0, 0.0  ;;  %v10290_v39 = vmul.f32 0.33333334, %v1027_v63 }
 0x32b   : > { %v10294_v1 = vand.u32 3, %v2827_v11  ;;  %v2645_v41 = vadd.s32 1, %v5827_v42  ;;  %v1167_v29 = vadd.f32 %v1166_v28, %v1165_v17  ;;  %v10296_v36 = vmul.f32 0.33333334, %v1097_v45 }
 0x32c   : > { %v2821_v33 = vmul.f32 %v2820_v3, %v2818_v59  ;;  %5639 = vst.msk [vmem:[%s7930_s9 + $0x20] sm:$0xff] %vm722_vm0, %v6524_v50  ;;  %v726_v26 = vsel %vm722_vm0, %v680_v20, 0.0  ;;  %v793_v44 = vsel %vm722_vm0, %v10221_v8, 0.0  ;;  %v794_v12 = vsel %vm722_vm0, %v10243_v54, 0.0 }
 0x32d   : > { %vm2646_vm15 = vcmp.gt.s32.totalorder %v2645_v41, 0  ;;  %v10303_v0 = vmul.f32 0.33333334, %v1167_v29  ;;  %v1799_v4 = vmax.f32 %v10290_v39, %v10296_v36  ;;  %v1827_v37 = vmin.f32 %v10290_v39, %v10296_v36 }
 0x32e   : > { %v2822_v32 = vxor.u32 2147483648, %v2821_v33  ;;  %v10311_v31 = vand.u32 3, %v4318_v22  ;;  %v2647_v20 = vsel %vm2646_vm15, %v2645_v41, 0  ;;  %v10313_v11 = vshll.u32 %v2643_v13, 8 }
 0x32f   : > { %v2648_v54 = vshrl.u32 %v2647_v20, 5  ;;  %v2649_v61 = vand.u32 31, %v2647_v20  ;;  %v10318_v48 = vadd.f32 %v726_v26, %v725_v62  ;;  %v10321_v3 = vmax.f32 %v1799_v4, %v10303_v0 }
 0x330   : > { %v2823_v24 = vsel %vm2740_vm7, %v2822_v32, %v2821_v33  ;;  %v1841_v46 = vmin.f32 %v1827_v37, %v10303_v0  ;;  %v795_v63 = vadd.f32 %v794_v12, %v793_v44  ;;  %v10982_v6 = vmov 2102212464  }
 0x331   : > { %v2826_v8 = vsel %vm10239_vm11, %v10021_v57, %v2823_v24  ;;  %v2650_v58 = vsub.s32 32, %v2649_v61  ;;  %v2652_v38 = vshll.u32 %v6968_v25, %v2649_v61  ;;  %v2655_v47 = vshll.u32 %v6969_v40, %v2649_v61 }
 0x332   : > { %6709 = vcosq.f32 %v2826_v8  ;;  %v2658_v7 = vshll.u32 %v6970_v15, %v2649_v61  ;;  %v2661_v59 = vshll.u32 %v10982_v6, %v2649_v61  ;;  %v10983_v22 = vmov 920167782  }
 0x333   : > { %6711 = vsinq.f32 %v2826_v8  ;;  %v2664_v62 = vshll.u32 %v10983_v22, %v2649_v61  ;;  %vm2667_vm1 = vcmp.lt.s32.totalorder %v2648_v54, 1  ;;  %v2651_v16 = vshrl.u32 %v6968_v25, %v2650_v58 }
 0x334   : > { %v2653_v35 = vshrl.u32 %v6969_v40, %v2650_v58  ;;  %v2656_v50 = vshrl.u32 %v6970_v15, %v2650_v58  ;;  %v2659_v42 = vshrl.u32 %v10982_v6, %v2650_v58  ;;  %v2662_v45 = vshrl.u32 %v10983_v22, %v2650_v58 }
 0x335   : > { %v2665_v17 = vshrl.u32 %v10927_v49, %v2650_v58  ;;  %vm2668_vm2 = vcmp.lt.s32.totalorder %v2648_v54, 2  ;;  %vm2669_vm3 = vcmp.lt.s32.totalorder %v2648_v54, 3  ;;  %vm2836_vm5 = vcmp.eq.s32.totalorder %v10294_v1, 2 }
 0x336   : > { %vm4324_vm6 = vcmp.eq.s32.totalorder %v10311_v31, 2  ;;  %v2654_v33 = vor.u32 %v2653_v35, %v2652_v38  ;;  %v2657_v13 = vor.u32 %v2656_v50, %v2655_v47  ;;  %v2660_v28 = vor.u32 %v2659_v42, %v2658_v7 }
 0x337   : > { %vm2670_vm4 = vcmp.lt.s32.totalorder %v2648_v54, 4  ;;  %vm2833_vm7 = vcmp.eq.s32.totalorder %v10294_v1, 0  ;;  %vm4321_vm8 = vcmp.eq.s32.totalorder %v10311_v31, 0  ;;  %v2663_v41 = vor.u32 %v2662_v45, %v2661_v59 }
 0x338   : > { %v2666_v29 = vor.u32 %v2665_v17, %v2664_v62  ;;  %v10340_v32 = vsub.f32 %v10321_v3, %v1841_v46  ;;  %v1869_v26 = vadd.f32 1e-08, %v10321_v3  ;;  %vm2832_vm9 = vcmp.lt.s32.totalorder %v10294_v1, 2 }
 0x339   : > { %vm4320_vm10 = vcmp.lt.s32.totalorder %v10311_v31, 2  ;;  %v2671_v44 = vsel %vm2667_vm1, %v2651_v16, %v2654_v33  ;;  %v2672_v12 = vsel %vm2670_vm4, %v2660_v28, 2102212464  ;;  %v2675_v4 = vsel %vm2667_vm1, %v2654_v33, %v2657_v13 }
 0x33a   : > { %v2679_v37 = vsel %vm2667_vm1, %v2657_v13, %v2660_v28  ;;  %vm2830_vm14 = vweird.f32 %v10021_v57  ;;  %v2673_v24 = vsel %vm2669_vm3, %v2657_v13, %v2672_v12  ;;  %v2676_v20 = vsel %vm2670_vm4, %v2663_v41, 920167782 }
 0x33b   : > { %v2680_v8 = vsel %vm2670_vm4, %v2666_v29, 1326507024  ;;  %6713 = vrcp.f32 %v1869_v26  ;;  %v2677_v61 = vsel %vm2669_vm3, %v2660_v28, %v2676_v20  ;;  %vm1911_vm11 = vcmp.eq.f32.partialorder %v10340_v32, 0.0 }
 0x33c   : > { %v2681_v46 = vsel %vm2669_vm3, %v2663_v41, %v2680_v8  ;;  %v796_v58 = vsel %vm722_vm0, %v10248_v18, 0.0  ;;  %v2674_v38 = vsel %vm2668_vm2, %v2671_v44, %v2673_v24  ;;  %v2678_v47 = vsel %vm2668_vm2, %v2675_v4, %v2677_v61 }
 0x33d   : > { %v2682_v7 = vsel %vm2668_vm2, %v2679_v37, %v2681_v46  ;;  %v1925_v59 = vsel %vm1911_vm11, 1.0, %v10340_v32  ;;  %v10367_v35 = vmul.u32.u64.low %v10313_v11, %v2678_v47  ;;  %v10368_v50 = vmul.u32.u64.high %v10313_v11, %v2678_v47, %v10367_v35 }
 0x33e   : > { %v10363_v62 = vmul.u32.u64.low %v10313_v11, %v2682_v7  ;;  %v10364_v16 = vmul.u32.u64.high %v10313_v11, %v2682_v7, %v10363_v62  ;;  %6715 = vrcp.f32 %v1925_v59  ;;  %v1953_v18 = vsub.f32 %v10321_v3, %v10290_v39 }
 0x33f   : > { %v1967_v42 = vsub.f32 %v10321_v3, %v10296_v36  ;;  %v1981_v54 = vsub.f32 %v10321_v3, %v10303_v0  ;;  %v6710_v45 = vpop.eup %6709  ;;  %v2051_v17 = vmul.f32 2.0, %v1925_v59  ;;  %v2093_v33 = vmul.f32 4.0, %v1925_v59 }
 0x340   : > { %v797_v13 = vadd.f32 %v796_v58, %v795_v63  ;;  %v863_v28 = vsel %vm722_vm0, %v10227_v2, 0.0  ;;  %v6712_v41 = vpop.eup %6711  ;;  %v2837_v29 = vxor.u32 2147483648, %v6710_v45  ;;  %v2690_v26 = vmul.u32 %v10313_v11, %v2674_v38 }
 0x341   : > { %v2037_v44 = vsub.f32 %v1953_v18, %v1981_v54  ;;  %v2079_v12 = vsub.f32 %v1967_v42, %v1953_v18  ;;  %v2834_v4 = vxor.u32 2147483648, %v6712_v41  ;;  %vm2692_vm12 = vc.u32 %v10364_v16, %v10367_v35 }
 0x342   : > { %v2693_v37 = vadd.s32 1, %v10368_v50  ;;  %vm1995_vm13 = vcmp.eq.f32.partialorder %v10321_v3, %v10290_v39  ;;  %v2838_v0 = vsel %vm2836_vm5, %v2837_v29, %v6712_v41  ;;  %v4326_v2 = vsel %vm4324_vm6, %v2837_v29, %v6712_v41  ;;  %v1271_v39 = vld [vmem:[#allocation6 + $0x8] sm:$0xff] }
 0x343   : > { %v2065_v63 = vadd.f32 %v2051_v17, %v2037_v44  ;;  %v2107_v24 = vadd.f32 %v2093_v33, %v2079_v12  ;;  %v2835_v11 = vsel %vm2833_vm7, %v6710_v45, %v2834_v4  ;;  %v4323_v20 = vsel %vm4321_vm8, %v6710_v45, %v2834_v4 }
 0x344   : > { %v2694_v8 = vsel %vm2692_vm12, %v2693_v37, %v10368_v50  ;;  %v864_v61 = vsel %vm722_vm0, %v10245_v9, 0.0  ;;  %v2839_v46 = vsel %vm2832_vm9, %v2835_v11, %v2838_v0  ;;  %v4327_v58 = vsel %vm4320_vm10, %v4323_v20, %v4326_v2 }
 0x345   : > { %v2695_v38 = vadd.s32 %v2694_v8, %v2690_v26  ;;  %vm2023_vm15 = vcmp.eq.f32.partialorder %v10321_v3, %v10296_v36  ;;  %v2840_v47 = vsel %vm2830_vm14, nan, %v2839_v46  ;;  %v4328_v7 = vsel %vm2830_vm14, nan, %v4327_v58  ;;  %v1272_v58 = vld [vmem:[#allocation6 + $0x10] sm:$0xff] }
 0x346   : > { %v2009_v59 = vsub.f32 %v1981_v54, %v1967_v42  ;;  %v865_v62 = vadd.f32 %v864_v61, %v863_v28  ;;  %v3874_v9 = vmul.f32 %v2840_v47, %v9867_v30  ;;  %v5372_v1 = vmul.f32 %v4328_v7, %v9867_v30 }
 0x347   : > { %v2696_v50 = vadd.s32 536870912, %v2695_v38  ;;  %v866_v31 = vsel %vm722_vm0, %v10271_v43, 0.0  ;;  %v2121_v45 = vsel %vm2023_vm15, %v2065_v63, %v2107_v24  ;;  %v933_v36 = vsel %vm722_vm0, %v10318_v48, 0.0 }
 0x348   : > { %v6714_v18 = vpop.eup %6713  ;;  %v867_v17 = vadd.f32 %v866_v31, %v865_v62  ;;  %v934_v33 = vsel %vm722_vm0, %v797_v13, 0.0  ;;  %v3888_v57 = vadd.f32 1.0, %v3874_v9  ;;  %v5386_v41 = vadd.f32 1.0, %v5372_v1  ;;  %v1273_v31 = vld [vmem:[#allocation6 + $0x18] sm:$0xff] }
 0x349   : > { %v10413_v42 = vshrl.u32 %v2696_v50, 30  ;;  %v10416_v54 = vmul.f32 %v6714_v18, %v10340_v32  ;;  %v10984_v30 = vcvt.f32.s32 %v10159_v56  ;;  %v935_v29 = vadd.f32 %v934_v33, %v933_v36  ;;  %v1274_v33 = vld [vmem:[#allocation6 + $0x20] sm:$0xff] }
 0x34a   : > { %v936_v43 = vsel %vm722_vm0, %v867_v17, 0.0  ;;  %v3902_v26 = vmul.f32 0.5, %v3888_v57  ;;  %v5400_v44 = vmul.f32 0.5, %v5386_v41  ;;  %v2135_v48 = vsel %vm1995_vm13, %v2009_v59, %v2121_v45 }
 0x34b   : > { %v6430_v28 = vcvt.s32.f32 %v10984_v30  ;;  %v2698_v12 = vshll.u32 %v10413_v42, 30  ;;  %v6716_v13 = vpop.eup %6715  ;;  %v937_v4 = vadd.f32 %v936_v43, %v935_v29  ;;  %v6432_v63 = vand.u32 2147483648, %v10159_v56 }
 0x34c   : > { %v5414_v37 = vmul.f32 4.0, %v3902_v26  ;;  %v5456_v0 = vmul.f32 4.0, %v5400_v44  ;;  %v2149_v24 = vmul.f32 %v6716_v13, %v2135_v48  ;;  %v6427_v61 = vand.u32 2147483647, %v10159_v56 }
 0x34d   : > { %v10425_v32 = vsub.s32 %v2695_v38, %v2698_v12  ;;  %v6431_v2 = vand.u32 2147483647, %v6430_v28  ;;  %v1004_v11 = vmul.f32 0.33333334, %v937_v4  ;;  %v1275_v12 = vld [vmem:[#allocation6 + $0x28] sm:$0xff]  ;;  %v2691_v4 = vadd.s32 %v10367_v35, %v10364_v16  ;;  %v1277_v35 = vld [vmem:[#allocation6 + $0x38] sm:$0xff] }
 0x34e   : > { %v10428_v20 = vadd.f32 1.0, %v5414_v37  ;;  %v5470_v8 = vadd.f32 1.0, %v5456_v0  ;;  %v2164_v7 = vmul.f32 0.16666667, %v2149_v24  ;;  %vm10435_vm1 = vcmp.lt.f32.partialorder %v6427_v61, 8388608.0  ;;  %v1276_v37 = vld [vmem:[#allocation6 + $0x30] sm:$0xff] }
 0x34f   : > { %v2701_v46 = vsub.s32 0, %v10425_v32  ;;  %6043 = vmatprep.subr.mxu0 %v1004_v11  ;;  %v6433_v59 = vor.u32 %v6432_v63, %v6431_v2  ;;  %vm2637_vm4 = vcmp.lt.s32.totalorder %v10265_v10, 0  ;;  %vm10483_vm10 = vcmp.le.f32.partialorder %v2635_v19, 0.7853982 }
 0x350   : > { %v6205_v47 = vcvt.f32.s32 %v10428_v20  ;;  %6044 = vmatpush3.msra.mxu0 %v1004_v11  ;;  %v6317_v38 = vcvt.f32.s32 %v5470_v8  ;;  %v6315_v1 = vand.u32 2147483647, %v5470_v8  ;;  %v6208_v18 = vand.u32 2147483648, %v10428_v20 }
 0x351   : > { %v5828_v62 = vmin.u32 %v2701_v46, %v10425_v32  ;;  %6046 = vmatmul.mubr.msk.f32.vlgmr.msra.gmra.mxu0 %vm722_vm0, %v1271_v39  ;;  %v6320_v17 = vand.u32 2147483648, %v5470_v8  ;;  %v6203_v57 = vand.u32 2147483647, %v10428_v20  ;;  %v2187_v30 = vand.u32 2147483647, %v2164_v7 }
 0x352   : > { %v6206_v9 = vcvt.s32.f32 %v6205_v47  ;;  %6048 = vmatprep.mubr.msk.f32.mxu0 %vm722_vm0, %v1272_v58  ;;  %v6318_v45 = vcvt.s32.f32 %v6317_v38  ;;  %v6434_v29 = vsel %vm10435_vm1, %v6433_v59, %v10159_v56  ;;  %vm10446_vm2 = vcmp.lt.f32.partialorder %v6315_v1, 8388608.0 }
 0x353   : > { %v2703_v36 = vclz %v5828_v62  ;;  %v2190_v44 = vfloor.f32 %v2187_v30  ;;  %vm10453_vm5 = vcmp.lt.f32.partialorder %v6203_v57, 8388608.0  ;;  %v5948_v0 = vadd.f32 -1.0, %v6434_v29 }
 0x354   : > { %v6207_v41 = vand.u32 2147483647, %v6206_v9  ;;  %v6319_v28 = vand.u32 2147483647, %v6318_v45  ;;  %v2195_v16 = vand.u32 2147483648, %v2164_v7  ;;  %v1279_v45 = vld [vmem:[#allocation6 + $0x48] sm:$0xff]  ;;  %vm2727_vm15 = vweird.f32 %v10265_v10 }
 0x355   : > { %v5829_v43 = vadd.s32 4294967294, %v2703_v36  ;;  %6049 = vmatmul.mubr.msk.f32.gmra.mxu0 %vm722_vm0, %v1273_v31  ;;  %v2191_v63 = vsub.f32 %v2187_v30, %v2190_v44  ;;  %v5596_v9 = vmul.f32 25.0, %v5948_v0  ;;  %v2721_v31 = vsub.s32 4, %v10413_v42 }
 0x356   : > { %6051 = vmatprep.mubr.msk.f32.mxu0 %vm722_vm0, %v1274_v33  ;;  %v6209_v48 = vor.u32 %v6208_v18, %v6207_v41  ;;  %v6321_v13 = vor.u32 %v6320_v17, %v6319_v28  ;;  %v5497_v36 = vmul.f32 4.0, %v10045_v34  ;;  %v1280_v33 = vld [vmem:[#allocation6 + $0x50] sm:$0xff]  ;;  %v1018_v29 = vsel %vm722_vm0, %v10163_v21, 0.0 }
 0x357   : > { %vm5830_vm3 = vcmp.lt.s32.totalorder %v5829_v43, 0  ;;  %vm2192_vm6 = vcmp.eq.f32.partialorder %v2191_v63, 1.0  ;;  %v2722_v28 = vsel %vm2637_vm4, %v2721_v31, %v10413_v42  ;;  %v1089_v0 = vsel %vm722_vm0, %v10181_v55, 0.0 }
 0x358   : > { %v2706_v2 = vsel %vm5830_vm3, 0, %v5829_v43  ;;  %v6322_v24 = vsel %vm10446_vm2, %v6321_v13, %v5470_v8  ;;  %v6210_v58 = vsel %vm10453_vm5, %v6209_v48, %v10428_v20  ;;  %v2193_v59 = vsel %vm2192_vm6, 0.0, %v2191_v63  ;;  %v1278_v8 = vld [vmem:[#allocation6 + $0x40] sm:$0xff]  ;;  %v1281_v48 = vld [vmem:[#allocation6 + $0x58] sm:$0xff] }
 0x359   : > { %v2707_v11 = vsub.s32 32, %v2706_v2  ;;  %v2708_v61 = vshll.u32 %v10425_v32, %v2706_v2  ;;  %v2711_v46 = vsub.s32 4294967266, %v2706_v2  ;;  %6052 = vmatmul.mubr.msk.f32.gmra.mxu0 %vm722_vm0, %v1275_v12  ;;  %v5934_v39 = vadd.f32 -1.0, %v6322_v24 }
 0x35a   : > { %6054 = vmatprep.mubr.msk.f32.mxu0 %vm722_vm0, %v1276_v37  ;;  %v2194_v32 = vand.u32 2147483647, %v2193_v59  ;;  %v1019_v43 = vsel %vm722_vm0, %v10166_v60, 0.0  ;;  %v1021_v12 = vsel %vm722_vm0, %v10169_v51, 0.0  ;;  %v1088_v13 = vsel %vm722_vm0, %v10178_v53, 0.0 }
 0x35b   : > { %v2709_v47 = vshrl.u32 %v2691_v4, %v2707_v11  ;;  %v2712_v38 = vadd.s32 127, %v2711_v46  ;;  %v5554_v62 = vmul.f32 5.0, %v5934_v39  ;;  %v1020_v44 = vadd.f32 %v1019_v43, %v1018_v29  ;;  %v1282_v4 = vld [vmem:[#allocation6 + $0x60] sm:$0xff]  ;;  %v1283_v46 = vld [vmem:[#allocation6 + $0x68] sm:$0xff] }
 0x35c   : > { %v2196_v18 = vor.u32 %v2195_v16, %v2194_v32  ;;  %v2724_v51 = vsel %vm10483_vm10, 0, %v2722_v28  ;;  %v1090_v19 = vadd.f32 %v1089_v0, %v1088_v13  ;;  %v1091_v24 = vsel %vm722_vm0, %v10184_v27, 0.0 }
 0x35d   : > { %v2710_v1 = vor.u32 %v2709_v47, %v2708_v61  ;;  %v2713_v50 = vshll.u32 %v2712_v38, 23  ;;  %6055 = vmatmul.mubr.msk.f32.gmra.mxu0 %vm722_vm0, %v1277_v35  ;;  %v5568_v7 = vadd.f32 %v6210_v58, %v5554_v62  ;;  %v1022_v56 = vadd.f32 %v1021_v12, %v1020_v44 }
 0x35e   : > { %6057 = vmatprep.mubr.msk.f32.mxu0 %vm722_vm0, %v1278_v8  ;;  %vm2318_vm7 = vcmp.ne.f32.partialorder %v2196_v18, 0.0  ;;  %vm2332_vm8 = vcmp.lt.f32.partialorder %v2196_v18, 0.0  ;;  %v2360_v41 = vadd.f32 1.0, %v2196_v18  ;;  %v10498_v53 = vadd.f32 1.0, %v5497_v36 }
 0x35f   : > { %v2714_v20 = vor.u32 4788187, %v2713_v50  ;;  %v2717_v17 = vcvt.s32.f32 %v2710_v1  ;;  %v5610_v57 = vadd.f32 %v5596_v9, %v5568_v7  ;;  %vm2346_vm9 = vmand %vm2332_vm8, %vm2318_vm7  ;;  %v1158_v11 = vsel %vm722_vm0, %v10190_v14, 0.0 }
 0x360   : > { %v2374_v26 = vsel %vm2346_vm9, %v2360_v41, %v2196_v18  ;;  %v1159_v61 = vsel %vm722_vm0, %v10193_v52, 0.0  ;;  %v1161_v55 = vsel %vm722_vm0, %v10196_v23, 0.0  ;;  %v1092_v16 = vadd.f32 %v1091_v24, %v1090_v19 }
 0x361   : > { %v2715_v30 = vand.u32 2147483647, %v2714_v20  ;;  %6058 = vmatmul.mubr.msk.f32.gmra.mxu0 %vm722_vm0, %v1279_v45  ;;  %v6521_v34 = vtrunc.f32 %v5610_v57  ;;  %v2388_v60 = vmul.f32 6.2831855, %v2374_v26  ;;  %v1160_v35 = vadd.f32 %v1159_v61, %v1158_v11 }
 0x362   : > { %6060 = vmatprep.mubr.msk.f32.mxu0 %vm722_vm0, %v1280_v33  ;;  %v4214_v58 = vadd.s32 3, %v2724_v51  ;;  %v10514_v47 = vmul.f32 0.33333334, %v1022_v56  ;;  %v10519_v59 = vmul.f32 0.33333334, %v1092_v16  ;;  %v10521_v8 = vand.u32 3, %v2724_v51 }
 0x363   : > { %v2718_v21 = vmul.f32 %v2717_v17, %v2715_v30  ;;  %v6522_v37 = vcvt.f32.s32 %v6521_v34  ;;  %v2402_v63 = vmul.f32 2.0, %v2388_v60  ;;  %v1162_v38 = vadd.f32 %v1161_v55, %v1160_v35  ;;  %v1474_v35 = vld [vmem:[#allocation7 + $0x68] sm:$0xff] }
 0x364   : > { %v6421_v62 = vcvt.f32.s32 %v10498_v53  ;;  %v10526_v1 = vand.u32 3, %v4214_v58  ;;  %v1798_v31 = vmax.f32 %v10514_v47, %v10519_v59  ;;  %v1826_v7 = vmin.f32 %v10514_v47, %v10519_v59  ;;  %6066 = vmatprep.subr.mxu1 %v1474_v35 }
 0x365   : > { %v2719_v2 = vxor.u32 2147483648, %v2718_v21  ;;  %6061 = vmatmul.mubr.msk.f32.gmra.mxu0 %vm722_vm0, %v1281_v48  ;;  %5638 = vst.msk [vmem:[%s7930_s9 + $0x18] sm:$0xff] %vm722_vm0, %v6522_v37  ;;  %v10509_v39 = vmul.f32 3.1415927, %v2402_v63  ;;  %v1256_v50 = vmul.f32 0.33333334, %v1162_v38  ;;  %6067 = vmatpush3.msra.mxu1 %v1474_v35 }
 0x366   : > { %6063 = vmatprep.mubr.msk.f32.mxu0 %vm722_vm0, %v1282_v4  ;;  %vm2730_vm14 = vcmp.eq.s32.totalorder %v10521_v8, 0  ;;  %vm2733_vm11 = vcmp.eq.s32.totalorder %v10521_v8, 2  ;;  %v10536_v36 = vcvt.s32.f32 %v6421_v62  ;;  %vm2729_vm12 = vcmp.lt.s32.totalorder %v10521_v8, 2  ;;  %v1472_v8 = vld [vmem:[#allocation7 + $0x58] sm:$0xff] }
 0x367   : > { %v2720_v27 = vsel %vm2637_vm4, %v2719_v2, %v2718_v21  ;;  %v2532_v52 = vand.u32 2147483647, %v10509_v39  ;;  %v2535_v23 = vand.u32 2139095040, %v10509_v39  ;;  %v10532_v20 = vmax.f32 %v1798_v31, %v1256_v50  ;;  %v1473_v31 = vld [vmem:[#allocation7 + $0x60] sm:$0xff] }
 0x368   : > { %v2723_v14 = vsel %vm10483_vm10, %v10265_v10, %v2720_v27  ;;  %v1840_v17 = vmin.f32 %v1826_v7, %v1256_v50  ;;  %vm4216_vm13 = vcmp.lt.s32.totalorder %v10526_v1, 2  ;;  %vm4217_vm1 = vcmp.eq.s32.totalorder %v10526_v1, 0  ;;  %6068 = vmatprep.subr.mxu1 %v1473_v31 }
 0x369   : > { %6717 = vcosq.f32 %v2723_v14  ;;  %6064 = vmatmul.mubr.msk.f32.gmra.mxu0 %vm722_vm0, %v1283_v46  ;;  %v2536_v9 = vshrl.u32 %v2535_v23, 23  ;;  %v2539_v32 = vand.u32 8388607, %v2532_v52  ;;  %v1868_v41 = vadd.f32 1e-08, %v10532_v20  ;;  %6069 = vmatpush3.msra.mxu1 %v1473_v31  ;;  %v1468_v31 = vld [vmem:[#allocation7 + $0x38] sm:$0xff] }
 0x36a   : > { %6719 = vsinq.f32 %v2723_v14  ;;  %v10541_v57 = vsub.f32 %v10532_v20, %v1840_v17  ;;  %v10546_v30 = vsub.f32 %v10532_v20, %v10514_v47  ;;  %v10550_v28 = vsub.f32 %v10532_v20, %v10519_v59  ;;  %6070 = vmatprep.subr.mxu1 %v1472_v8 }
 0x36b   : > { %v5823_v18 = vadd.s32 4294967169, %v2536_v9  ;;  %v2540_v45 = vor.u32 8388608, %v2539_v32  ;;  %vm4220_vm2 = vcmp.eq.s32.totalorder %v10526_v1, 2  ;;  %v10556_v29 = vsub.f32 %v10532_v20, %v1256_v50  ;;  %6071 = vmatpush3.msra.mxu1 %v1472_v8 }
 0x36c   : > { %6721 = vrcp.f32 %v1868_v41  ;;  %vm1910_vm5 = vcmp.eq.f32.partialorder %v10541_v57, 0.0  ;;  %v2078_v48 = vsub.f32 %v10550_v28, %v10546_v30  ;;  %vm2022_vm7 = vcmp.eq.f32.partialorder %v10532_v20, %v10519_v59 }
 0x36d   : > { %v2542_v33 = vadd.s32 1, %v5823_v18  ;;  %v10558_v34 = vshll.u32 %v2540_v45, 8  ;;  %v10564_v12 = vsel %vm1910_vm5, 1.0, %v10541_v57  ;;  %v2008_v42 = vsub.f32 %v10556_v29, %v10550_v28 }
 0x36e   : > { %6723 = vrcp.f32 %v10564_v12  ;;  %v2036_v21 = vsub.f32 %v10546_v30, %v10556_v29  ;;  %v10574_v60 = vmul.f32 2.0, %v10564_v12  ;;  %vm1994_vm10 = vcmp.eq.f32.partialorder %v10532_v20, %v10514_v47 }
 0x36f   : > { %vm2543_vm3 = vcmp.gt.s32.totalorder %v2542_v33, 0 }
 0x370   : > { %v2544_v43 = vsel %vm2543_vm3, %v2542_v33, 0 }
 0x371   : > { %v10561_v26 = vshrl.u32 %v2544_v43, 5  ;;  %v2546_v44 = vand.u32 31, %v2544_v43 }
 0x373   : > { %v2547_v13 = vsub.s32 32, %v2546_v44  ;;  %v2549_v4 = vshll.u32 %v6968_v25, %v2546_v44  ;;  %v2552_v37 = vshll.u32 %v6969_v40, %v2546_v44  ;;  %v2555_v51 = vshll.u32 %v6970_v15, %v2546_v44 }
 0x374   : > { %v2558_v0 = vshll.u32 %v10982_v6, %v2546_v44  ;;  %v2561_v2 = vshll.u32 %v10983_v22, %v2546_v44  ;;  %vm2564_vm6 = vcmp.lt.s32.totalorder %v10561_v26, 1  ;;  %vm2565_vm4 = vcmp.lt.s32.totalorder %v10561_v26, 2 }
 0x375   : > { %v2548_v24 = vshrl.u32 %v6968_v25, %v2547_v13  ;;  %v2550_v11 = vshrl.u32 %v6969_v40, %v2547_v13  ;;  %v2553_v61 = vshrl.u32 %v6970_v15, %v2547_v13  ;;  %v2556_v46 = vshrl.u32 %v10982_v6, %v2547_v13 }
 0x376   : > { %v6718_v56 = vpop.eup %6717  ;;  %v2559_v27 = vshrl.u32 %v10983_v22, %v2547_v13  ;;  %v2562_v16 = vshrl.u32 %v10927_v49, %v2547_v13  ;;  %vm2566_vm8 = vcmp.lt.s32.totalorder %v10561_v26, 3  ;;  %vm2567_vm9 = vcmp.lt.s32.totalorder %v10561_v26, 4 }
 0x377   : > { %v6720_v63 = vpop.eup %6719  ;;  %v2734_v19 = vxor.u32 2147483648, %v6718_v56  ;;  %v2551_v23 = vor.u32 %v2550_v11, %v2549_v4  ;;  %v2554_v38 = vor.u32 %v2553_v61, %v2552_v37  ;;  %v2557_v32 = vor.u32 %v2556_v46, %v2555_v51  ;;  %v1470_v46 = vld [vmem:[#allocation7 + $0x48] sm:$0xff] }
 0x378   : > { %v2731_v55 = vxor.u32 2147483648, %v6720_v63  ;;  %v2560_v50 = vor.u32 %v2559_v27, %v2558_v0  ;;  %v2563_v45 = vor.u32 %v2562_v16, %v2561_v2 }
 0x379   : > { %v2735_v14 = vsel %vm2733_vm11, %v2734_v19, %v6720_v63  ;;  %v4222_v58 = vsel %vm4220_vm2, %v2734_v19, %v6720_v63  ;;  %v2568_v41 = vsel %vm2564_vm6, %v2548_v24, %v2551_v23  ;;  %v2569_v44 = vsel %vm2567_vm9, %v2557_v32, 2102212464  ;;  %v6722_v0 = vpop.eup %6721 }
 0x37a   : > { %v2732_v62 = vsel %vm2730_vm14, %v6718_v56, %v2731_v55  ;;  %v4219_v9 = vsel %vm4217_vm1, %v6718_v56, %v2731_v55  ;;  %v2572_v13 = vsel %vm2564_vm6, %v2551_v23, %v2554_v38  ;;  %v2570_v10 = vsel %vm2566_vm8, %v2554_v38, %v2569_v44  ;;  %v1471_v56 = vld [vmem:[#allocation7 + $0x50] sm:$0xff] }
 0x37b   : > { %v2736_v7 = vsel %vm2729_vm12, %v2732_v62, %v2735_v14  ;;  %v4223_v18 = vsel %vm4216_vm13, %v4219_v9, %v4222_v58  ;;  %v2573_v4 = vsel %vm2567_vm9, %v2560_v50, 920167782  ;;  %v2576_v37 = vsel %vm2564_vm6, %v2554_v38, %v2557_v32  ;;  %6072 = vmatprep.subr.mxu1 %v1471_v56  ;;  %v6724_v27 = vpop.eup %6723  ;;  %v1469_v62 = vld [vmem:[#allocation7 + $0x40] sm:$0xff] }
 0x37c   : > { %v2737_v17 = vsel %vm2727_vm15, nan, %v2736_v7  ;;  %v4224_v33 = vsel %vm2727_vm15, nan, %v4223_v18  ;;  %v2577_v51 = vsel %vm2567_vm9, %v2563_v45, 1326507024  ;;  %v2092_v19 = vmul.f32 4.0, %v10564_v12  ;;  %6073 = vmatpush3.msra.mxu1 %v1471_v56 }
 0x37d   : > { %v3873_v1 = vmul.f32 %v2737_v17, %v10123_v5  ;;  %v5371_v43 = vmul.f32 %v4224_v33, %v10123_v5  ;;  %v2574_v5 = vsel %vm2566_vm8, %v2557_v32, %v2573_v4  ;;  %v2571_v24 = vsel %vm2565_vm4, %v2568_v41, %v2570_v10  ;;  %6074 = vmatprep.subr.mxu1 %v1470_v46  ;;  %v1465_v4 = vld [vmem:[#allocation7 + $0x20] sm:$0xff] }
 0x37e   : > { %v2575_v11 = vsel %vm2565_vm4, %v2572_v13, %v2574_v5  ;;  %v2578_v61 = vsel %vm2566_vm8, %v2560_v50, %v2577_v51  ;;  %v10629_v55 = vmul.f32 %v6722_v0, %v10541_v57  ;;  %v2064_v14 = vadd.f32 %v10574_v60, %v2036_v21  ;;  %6075 = vmatpush3.msra.mxu1 %v1470_v46  ;;  %v1464_v5 = vld [vmem:[#allocation7 + $0x18] sm:$0xff] }
 0x37f   : > { %v3887_v2 = vadd.f32 1.0, %v3873_v1  ;;  %v5385_v63 = vadd.f32 1.0, %v5371_v43  ;;  %v2579_v12 = vsel %vm2565_vm4, %v2576_v37, %v2578_v61  ;;  %v2106_v21 = vadd.f32 %v2092_v19, %v2078_v48  ;;  %6076 = vmatprep.subr.mxu1 %v1469_v62  ;;  %v1467_v48 = vld [vmem:[#allocation7 + $0x30] sm:$0xff]  ;;  %v1466_v1 = vld [vmem:[#allocation7 + $0x28] sm:$0xff] }
 0x380   : > { %v10638_v58 = vmul.u32.u64.low %v10558_v34, %v2579_v12  ;;  %v10639_v23 = vmul.u32.u64.high %v10558_v34, %v2579_v12, %v10638_v58  ;;  %v10642_v57 = vmul.u32.u64.low %v10558_v34, %v2575_v11  ;;  %v10643_v38 = vmul.u32.u64.high %v10558_v34, %v2575_v11, %v10642_v57  ;;  %6077 = vmatpush3.msra.mxu1 %v1469_v62 }
 0x381   : > { %v3901_v16 = vmul.f32 0.5, %v3887_v2  ;;  %v5399_v35 = vmul.f32 0.5, %v5385_v63  ;;  %v6419_v60 = vand.u32 2147483647, %v10498_v53  ;;  %v6423_v32 = vand.u32 2147483647, %v10536_v36  ;;  %6078 = vmatprep.subr.mxu1 %v1468_v31 }
 0x382   : > { %v6424_v50 = vand.u32 2147483648, %v10498_v53  ;;  %v2587_v45 = vmul.u32 %v10558_v34, %v2571_v24  ;;  %v2120_v17 = vsel %vm2022_vm7, %v2064_v14, %v2106_v21  ;;  %vm2589_vm14 = vc.u32 %v10639_v23, %v10642_v57  ;;  %6079 = vmatpush3.msra.mxu1 %v1468_v31  ;;  %v1462_v58 = vld [vmem:[#allocation7 + $0x8] sm:$0xff] }
 0x383   : > { %v5413_v9 = vmul.f32 4.0, %v3901_v16  ;;  %v5455_v26 = vmul.f32 4.0, %v5399_v35  ;;  %v2590_v30 = vadd.s32 1, %v10643_v38  ;;  %v2134_v36 = vsel %vm1994_vm10, %v2008_v42, %v2120_v17  ;;  %6080 = vmatprep.subr.mxu1 %v1467_v48 }
 0x384   : > { %v6425_v33 = vor.u32 %v6424_v50, %v6423_v32  ;;  %v2148_v8 = vmul.f32 %v6724_v27, %v2134_v36  ;;  %6081 = vmatpush3.msra.mxu1 %v1467_v48  ;;  %vm10671_vm11 = vcmp.lt.f32.partialorder %v6419_v60, 8388608.0  ;;  %v1463_v27 = vld [vmem:[#allocation7 + $0x10] sm:$0xff]  ;;  %vm2534_vm6 = vcmp.lt.s32.totalorder %v10509_v39, 0 }
 0x385   : > { %v10654_v7 = vadd.f32 1.0, %v5413_v9  ;;  %v5469_v18 = vadd.f32 1.0, %v5455_v26  ;;  %v2591_v41 = vsel %vm2589_vm14, %v2590_v30, %v10643_v38  ;;  %6082 = vmatprep.subr.mxu1 %v1466_v1  ;;  %v1461_v26 = vld [vmem:[#allocation7] sm:$0xff]  ;;  %vm2533_vm4 = vcmp.le.f32.partialorder %v2532_v52, 0.7853982 }
 0x386   : > { %v2592_v47 = vadd.s32 %v2591_v41, %v2587_v45  ;;  %v2163_v10 = vmul.f32 0.16666667, %v2148_v8  ;;  %6083 = vmatpush3.msra.mxu1 %v1466_v1  ;;  %v6426_v2 = vsel %vm10671_vm11, %v6425_v33, %v10498_v53  ;;  %v2588_v41 = vadd.s32 %v10642_v57, %v10639_v23 }
 0x387   : > { %v6197_v34 = vcvt.f32.s32 %v10654_v7  ;;  %v6309_v59 = vcvt.f32.s32 %v5469_v18  ;;  %v6307_v44 = vand.u32 2147483647, %v5469_v18  ;;  %v6200_v29 = vand.u32 2147483648, %v10654_v7  ;;  %6084 = vmatprep.subr.mxu1 %v1465_v4 }
 0x388   : > { %v6312_v13 = vand.u32 2147483648, %v5469_v18  ;;  %v6195_v37 = vand.u32 2147483647, %v10654_v7  ;;  %v2593_v56 = vadd.s32 536870912, %v2592_v47  ;;  %v2177_v63 = vand.u32 2147483647, %v2163_v10  ;;  %6085 = vmatpush3.msra.mxu1 %v1465_v4 }
 0x389   : > { %v6198_v43 = vcvt.s32.f32 %v6197_v34  ;;  %v6310_v42 = vcvt.s32.f32 %v6309_v59  ;;  %vm10680_vm12 = vcmp.lt.f32.partialorder %v6307_v44, 8388608.0  ;;  %6086 = vmatprep.subr.mxu1 %v1464_v5  ;;  %v5947_v53 = vadd.f32 -1.0, %v6426_v2 }
 0x38a   : > { %v10684_v24 = vshrl.u32 %v2593_v56, 30  ;;  %v2180_v46 = vfloor.f32 %v2177_v63  ;;  %6087 = vmatpush3.msra.mxu1 %v1464_v5  ;;  %vm10686_vm13 = vcmp.lt.f32.partialorder %v6195_v37, 8388608.0  ;;  %v2185_v31 = vand.u32 2147483648, %v2163_v10 }
 0x38b   : > { %v6199_v51 = vand.u32 2147483647, %v6198_v43  ;;  %v6311_v0 = vand.u32 2147483647, %v6310_v42  ;;  %6088 = vmatprep.subr.mxu1 %v1463_v27  ;;  %v5595_v60 = vmul.f32 25.0, %v5947_v53 }
 0x38c   : > { %v2595_v35 = vshll.u32 %v10684_v24, 30  ;;  %v2181_v14 = vsub.f32 %v2177_v63, %v2180_v46  ;;  %6089 = vmatpush3.msra.mxu1 %v1463_v27  ;;  %v2618_v23 = vsub.s32 4, %v10684_v24 }
 0x38d   : > { %v6201_v11 = vor.u32 %v6200_v29, %v6199_v51  ;;  %v6313_v61 = vor.u32 %v6312_v13, %v6311_v0  ;;  %6090 = vmatprep.subr.mxu1 %v1462_v58 }
 0x38e   : > { %v2596_v62 = vsub.s32 %v2592_v47, %v2595_v35  ;;  %vm2182_vm15 = vcmp.eq.f32.partialorder %v2181_v14, 1.0  ;;  %6091 = vmatpush3.msra.mxu1 %v1462_v58  ;;  %v2619_v5 = vsel %vm2534_vm6, %v2618_v23, %v10684_v24 }
 0x38f   : > { %v6314_v12 = vsel %vm10680_vm12, %v6313_v61, %v5469_v18  ;;  %v6202_v9 = vsel %vm10686_vm13, %v6201_v11, %v10654_v7  ;;  %6092 = vmatprep.subr.mxu1 %v1461_v26  ;;  %v2183_v50 = vsel %vm2182_vm15, 0.0, %v2181_v14  ;;  %v2621_v16 = vsel %vm2533_vm4, 0, %v2619_v5 }
 0x390   : > { %v5933_v38 = vadd.f32 -1.0, %v6314_v12  ;;  %v2598_v32 = vsub.s32 0, %v2596_v62  ;;  %6093 = vmatpush3.msra.mxu1 %v1461_v26  ;;  %v2184_v17 = vand.u32 2147483647, %v2183_v50  ;;  %v4110_v24 = vadd.s32 3, %v2621_v16 }
 0x391   : > { %v2625_v26 = vand.u32 3, %v2621_v16 }
 0x392   : > { %v5553_v21 = vmul.f32 5.0, %v5933_v38  ;;  %v5824_v45 = vmin.u32 %v2598_v32, %v2596_v62  ;;  %v2186_v48 = vor.u32 %v2185_v31, %v2184_v17  ;;  %v4111_v50 = vand.u32 3, %v4110_v24 }
 0x393   : > { %vm2630_vm11 = vcmp.eq.s32.totalorder %v2625_v26, 2  ;;  %vm2627_vm13 = vcmp.eq.s32.totalorder %v2625_v26, 0 }
 0x394   : > { %v5567_v18 = vadd.f32 %v6202_v9, %v5553_v21  ;;  %v2600_v36 = vclz %v5824_v45  ;;  %vm2317_vm1 = vcmp.ne.f32.partialorder %v2186_v48, 0.0  ;;  %vm2331_vm2 = vcmp.lt.f32.partialorder %v2186_v48, 0.0 }
 0x395   : > { %v2359_v7 = vadd.f32 1.0, %v2186_v48  ;;  %vm2345_vm5 = vmand %vm2331_vm2, %vm2317_vm1  ;;  %vm4116_vm12 = vcmp.eq.s32.totalorder %v4111_v50, 2  ;;  %vm4113_vm15 = vcmp.eq.s32.totalorder %v4111_v50, 0  ;;  %vm2626_vm1 = vcmp.lt.s32.totalorder %v2625_v26, 2 }
 0x396   : > { %v5609_v30 = vadd.f32 %v5595_v60, %v5567_v18  ;;  %v5825_v59 = vadd.s32 4294967294, %v2600_v36  ;;  %vm4112_vm2 = vcmp.lt.s32.totalorder %v4111_v50, 2 }
 0x397   : > { %v2373_v1 = vsel %vm2345_vm5, %v2359_v7, %v2186_v48 }
 0x398   : > { %v6519_v34 = vtrunc.f32 %v5609_v30  ;;  %vm5826_vm3 = vcmp.lt.s32.totalorder %v5825_v59, 0  ;;  %v2387_v47 = vmul.f32 6.2831855, %v2373_v1 }
 0x399   : > { %v2603_v8 = vsel %vm5826_vm3, 0, %v5825_v59  ;;  %vm2624_vm3 = vweird.f32 %v10509_v39 }
 0x39a   : > { %v6520_v33 = vcvt.f32.s32 %v6519_v34  ;;  %v2604_v43 = vsub.s32 32, %v2603_v8  ;;  %v2605_v44 = vshll.u32 %v2596_v62, %v2603_v8  ;;  %v2608_v28 = vsub.s32 4294967266, %v2603_v8 }
 0x39b   : > { %v2401_v13 = vmul.f32 2.0, %v2387_v47 }
 0x39c   : > { %5637 = vst.msk [vmem:[%s7930_s9 + $0x10] sm:$0xff] %vm722_vm0, %v6520_v33  ;;  %v2606_v29 = vshrl.u32 %v2588_v41, %v2604_v43  ;;  %v2609_v42 = vadd.s32 127, %v2608_v28 }
 0x39d   : > { %v10700_v37 = vmul.f32 3.1415927, %v2401_v13 }
 0x39e   : > { %v2607_v10 = vor.u32 %v2606_v29, %v2605_v44  ;;  %v2610_v4 = vshll.u32 %v2609_v42, 23 }
 0x39f   : > { %v2432_v57 = vand.u32 2139095040, %v10700_v37  ;;  %v2429_v61 = vand.u32 2147483647, %v10700_v37 }
 0x3a0   : > { %v2611_v51 = vor.u32 4788187, %v2610_v4  ;;  %v2614_v56 = vcvt.s32.f32 %v2607_v10 }
 0x3a1   : > { %v2433_v2 = vshrl.u32 %v2432_v57, 23  ;;  %v2436_v35 = vand.u32 8388607, %v2429_v61 }
 0x3a2   : > { %v2612_v0 = vand.u32 2147483647, %v2611_v51 }
 0x3a3   : > { %v5819_v19 = vadd.s32 4294967169, %v2433_v2  ;;  %v2437_v21 = vor.u32 8388608, %v2436_v35 }
 0x3a4   : > { %v2615_v63 = vmul.f32 %v2614_v56, %v2612_v0 }
 0x3a5   : > { %v2439_v46 = vadd.s32 1, %v5819_v19  ;;  %v2477_v41 = vshll.u32 %v2437_v21, 8 }
 0x3a6   : > { %v2616_v11 = vxor.u32 2147483648, %v2615_v63 }
 0x3a7   : > { %vm2440_vm7 = vcmp.gt.s32.totalorder %v2439_v46, 0 }
 0x3a8   : > { %v2617_v27 = vsel %vm2534_vm6, %v2616_v11, %v2615_v63  ;;  %v2441_v12 = vsel %vm2440_vm7, %v2439_v46, 0 }
 0x3a9   : > { %v2620_v53 = vsel %vm2533_vm4, %v10509_v39, %v2617_v27  ;;  %v2443_v14 = vand.u32 31, %v2441_v12  ;;  %v2442_v58 = vshrl.u32 %v2441_v12, 5 }
 0x3aa   : > { %6725 = vcosq.f32 %v2620_v53 }
 0x3ab   : > { %6727 = vsinq.f32 %v2620_v53  ;;  %v2444_v38 = vsub.s32 32, %v2443_v14  ;;  %v2446_v52 = vshll.u32 %v6968_v25, %v2443_v14  ;;  %v2449_v62 = vshll.u32 %v6969_v40, %v2443_v14 }
 0x3ac   : > { %v2452_v9 = vshll.u32 %v6970_v15, %v2443_v14  ;;  %v2455_v60 = vshll.u32 %v10982_v6, %v2443_v14  ;;  %v2458_v32 = vshll.u32 %v10983_v22, %v2443_v14  ;;  %vm2461_vm8 = vcmp.lt.s32.totalorder %v2442_v58, 1 }
 0x3ad   : > { %v2447_v31 = vshrl.u32 %v6969_v40, %v2444_v38  ;;  %v2450_v18 = vshrl.u32 %v6970_v15, %v2444_v38  ;;  %v2453_v45 = vshrl.u32 %v10982_v6, %v2444_v38  ;;  %v2445_v17 = vshrl.u32 %v6968_v25, %v2444_v38 }
 0x3ae   : > { %v2456_v30 = vshrl.u32 %v10983_v22, %v2444_v38  ;;  %v2459_v36 = vshrl.u32 %v10927_v49, %v2444_v38  ;;  %vm2464_vm9 = vcmp.lt.s32.totalorder %v2442_v58, 4  ;;  %vm2463_vm10 = vcmp.lt.s32.totalorder %v2442_v58, 3 }
 0x3af   : > { %v2448_v48 = vor.u32 %v2447_v31, %v2446_v52  ;;  %v2451_v34 = vor.u32 %v2450_v18, %v2449_v62  ;;  %v2454_v59 = vor.u32 %v2453_v45, %v2452_v9  ;;  %vm2462_vm14 = vcmp.lt.s32.totalorder %v2442_v58, 2 }
 0x3b0   : > { %v2457_v7 = vor.u32 %v2456_v30, %v2455_v60  ;;  %v2460_v33 = vor.u32 %v2459_v36, %v2458_v32  ;;  %v5496_v25 = vmul.f32 4.0, %v10321_v3 }
 0x3b1   : > { %v2466_v40 = vsel %vm2464_vm9, %v2454_v59, 2102212464  ;;  %v2469_v15 = vsel %vm2461_vm8, %v2448_v48, %v2451_v34  ;;  %v2473_v6 = vsel %vm2461_vm8, %v2451_v34, %v2454_v59  ;;  %v2465_v49 = vsel %vm2461_vm8, %v2445_v17, %v2448_v48 }
 0x3b2   : > { %v2470_v22 = vsel %vm2464_vm9, %v2457_v7, 920167782  ;;  %v2474_v8 = vsel %vm2464_vm9, %v2460_v33, 1326507024  ;;  %v2467_v1 = vsel %vm2463_vm10, %v2451_v34, %v2466_v40  ;;  %v5510_v57 = vadd.f32 1.0, %v5496_v25 }
 0x3b3   : > { %v2471_v43 = vsel %vm2463_vm10, %v2454_v59, %v2470_v22  ;;  %v2475_v44 = vsel %vm2463_vm10, %v2457_v7, %v2474_v8  ;;  %v2468_v56 = vsel %vm2462_vm14, %v2465_v49, %v2467_v1  ;;  %vm2431_vm9 = vcmp.lt.s32.totalorder %v10700_v37, 0 }
 0x3b4   : > { %v2472_v28 = vsel %vm2462_vm14, %v2469_v15, %v2471_v43  ;;  %v2476_v47 = vsel %vm2462_vm14, %v2473_v6, %v2475_v44  ;;  %v2484_v19 = vmul.u32 %v2477_v41, %v2468_v56  ;;  %v6413_v35 = vcvt.f32.s32 %v5510_v57 }
 0x3b5   : > { %v10729_v42 = vmul.u32.u64.low %v2477_v41, %v2476_v47  ;;  %v10730_v13 = vmul.u32.u64.high %v2477_v41, %v2476_v47, %v10729_v42  ;;  %v10732_v10 = vmul.u32.u64.low %v2477_v41, %v2472_v28  ;;  %v10733_v4 = vmul.u32.u64.high %v2477_v41, %v2472_v28, %v10732_v10 }
 0x3b6   : > { %v6414_v52 = vcvt.s32.f32 %v6413_v35  ;;  %v6416_v31 = vand.u32 2147483648, %v5510_v57  ;;  %v6411_v30 = vand.u32 2147483647, %v5510_v57  ;;  %vm2430_vm10 = vcmp.le.f32.partialorder %v2429_v61, 0.7853982 }
 0x3b7   : > { %v6726_v29 = vpop.eup %6725  ;;  %vm2486_vm5 = vc.u32 %v10730_v13, %v10732_v10  ;;  %v2487_v27 = vadd.s32 1, %v10733_v4  ;;  %v2485_v42 = vadd.s32 %v10732_v10, %v10730_v13 }
 0x3b8   : > { %v6728_v3 = vpop.eup %6727  ;;  %v2631_v51 = vxor.u32 2147483648, %v6726_v29  ;;  %v6415_v50 = vand.u32 2147483647, %v6414_v52  ;;  %vm6412_vm6 = vcmp.lt.f32.partialorder %v6411_v30, 8388608.0 }
 0x3b9   : > { %v2628_v23 = vxor.u32 2147483648, %v6728_v3  ;;  %v2488_v24 = vsel %vm2486_vm5, %v2487_v27, %v10733_v4 }
 0x3ba   : > { %v2632_v0 = vsel %vm2630_vm11, %v2631_v51, %v6728_v3  ;;  %v4118_v2 = vsel %vm4116_vm12, %v2631_v51, %v6728_v3  ;;  %v2489_v14 = vadd.s32 %v2488_v24, %v2484_v19  ;;  %v6417_v34 = vor.u32 %v6416_v31, %v6415_v50 }
 0x3bb   : > { %v2629_v63 = vsel %vm2627_vm13, %v6726_v29, %v2628_v23  ;;  %v4115_v5 = vsel %vm4113_vm15, %v6726_v29, %v2628_v23 }
 0x3bc   : > { %v2633_v11 = vsel %vm2626_vm1, %v2629_v63, %v2632_v0  ;;  %v4119_v46 = vsel %vm4112_vm2, %v4115_v5, %v4118_v2  ;;  %v2490_v62 = vadd.s32 536870912, %v2489_v14  ;;  %v6418_v49 = vsel %vm6412_vm6, %v6417_v34, %v5510_v57 }
 0x3bd   : > { %v2634_v16 = vsel %vm2624_vm3, nan, %v2633_v11  ;;  %v4120_v53 = vsel %vm2624_vm3, nan, %v4119_v46  ;;  %v5946_v47 = vadd.f32 -1.0, %v6418_v49  ;;  %vm2521_vm2 = vweird.f32 %v10700_v37 }
 0x3be   : > { %v3872_v12 = vmul.f32 %v2634_v16, %v10416_v54  ;;  %v5370_v39 = vmul.f32 %v4120_v53, %v10416_v54  ;;  %v2491_v21 = vshrl.u32 %v2490_v62, 30 }
 0x3bf   : > { %v5594_v2 = vmul.f32 25.0, %v5946_v47 }
 0x3c0   : > { %v3886_v58 = vadd.f32 1.0, %v3872_v12  ;;  %v5384_v38 = vadd.f32 1.0, %v5370_v39  ;;  %v2492_v18 = vshll.u32 %v2491_v21, 30  ;;  %v2515_v39 = vsub.s32 4, %v2491_v21 }
 0x3c2   : > { %v3900_v9 = vmul.f32 0.5, %v3886_v58  ;;  %v5398_v26 = vmul.f32 0.5, %v5384_v38  ;;  %v2493_v36 = vsub.s32 %v2489_v14, %v2492_v18  ;;  %v2516_v58 = vsel %vm2431_vm9, %v2515_v39, %v2491_v21 }
 0x3c3   : > { %v2518_v52 = vsel %vm2430_vm10, 0, %v2516_v58 }
 0x3c4   : > { %v5412_v60 = vmul.f32 4.0, %v3900_v9  ;;  %v5454_v32 = vmul.f32 4.0, %v5398_v26  ;;  %v2495_v59 = vsub.s32 0, %v2493_v36  ;;  %v4006_v62 = vadd.s32 3, %v2518_v52 }
 0x3c5   : > { %v2522_v9 = vand.u32 3, %v2518_v52 }
 0x3c6   : > { %v5426_v45 = vadd.f32 1.0, %v5412_v60  ;;  %v5468_v17 = vadd.f32 1.0, %v5454_v32  ;;  %v5820_v6 = vmin.u32 %v2495_v59, %v2493_v36  ;;  %v4007_v26 = vand.u32 3, %v4006_v62 }
 0x3c7   : > { %v5495_v60 = vmul.f32 4.0, %v10532_v20  ;;  %vm2527_vm14 = vcmp.eq.s32.totalorder %v2522_v9, 2  ;;  %vm2524_vm12 = vcmp.eq.s32.totalorder %v2522_v9, 0  ;;  %vm2523_vm15 = vcmp.lt.s32.totalorder %v2522_v9, 2 }
 0x3c8   : > { %v6189_v54 = vcvt.f32.s32 %v5426_v45  ;;  %v6301_v48 = vcvt.f32.s32 %v5468_v17  ;;  %v6299_v33 = vand.u32 2147483647, %v5468_v17  ;;  %v6192_v41 = vand.u32 2147483648, %v5426_v45 }
 0x3c9   : > { %v6304_v15 = vand.u32 2147483648, %v5468_v17  ;;  %v6187_v25 = vand.u32 2147483647, %v5426_v45  ;;  %v2497_v1 = vclz %v5820_v6  ;;  %vm4012_vm11 = vcmp.eq.s32.totalorder %v4007_v26, 2 }
 0x3ca   : > { %v6190_v7 = vcvt.s32.f32 %v6189_v54  ;;  %v6302_v40 = vcvt.s32.f32 %v6301_v48  ;;  %vm6300_vm4 = vcmp.lt.f32.partialorder %v6299_v33, 8388608.0  ;;  %vm4009_vm13 = vcmp.eq.s32.totalorder %v4007_v26, 0 }
 0x3cb   : > { %v5821_v28 = vadd.s32 4294967294, %v2497_v1  ;;  %vm6188_vm7 = vcmp.lt.f32.partialorder %v6187_v25, 8388608.0  ;;  %vm4008_vm1 = vcmp.lt.s32.totalorder %v4007_v26, 2  ;;  %v5509_v21 = vadd.f32 1.0, %v5495_v60 }
 0x3cc   : > { %v6191_v22 = vand.u32 2147483647, %v6190_v7  ;;  %v6303_v8 = vand.u32 2147483647, %v6302_v40 }
 0x3cd   : > { %vm5822_vm8 = vcmp.lt.s32.totalorder %v5821_v28, 0  ;;  %v6405_v34 = vcvt.f32.s32 %v5509_v21 }
 0x3ce   : > { %v6193_v43 = vor.u32 %v6192_v41, %v6191_v22  ;;  %v6305_v44 = vor.u32 %v6304_v15, %v6303_v8  ;;  %v2500_v3 = vsel %vm5822_vm8, 0, %v5821_v28  ;;  %v6408_v8 = vand.u32 2147483648, %v5509_v21 }
 0x3cf   : > { %v2501_v56 = vsub.s32 32, %v2500_v3  ;;  %v2502_v23 = vshll.u32 %v2493_v36, %v2500_v3  ;;  %v2505_v0 = vsub.s32 4294967266, %v2500_v3  ;;  %v6406_v40 = vcvt.s32.f32 %v6405_v34 }
 0x3d0   : > { %v6306_v29 = vsel %vm6300_vm4, %v6305_v44, %v5468_v17  ;;  %v6194_v51 = vsel %vm6188_vm7, %v6193_v43, %v5426_v45  ;;  %v6403_v43 = vand.u32 2147483647, %v5509_v21 }
 0x3d1   : > { %v5932_v4 = vadd.f32 -1.0, %v6306_v29  ;;  %v2503_v63 = vshrl.u32 %v2485_v42, %v2501_v56  ;;  %v2506_v5 = vadd.s32 127, %v2505_v0  ;;  %v6407_v22 = vand.u32 2147483647, %v6406_v40 }
 0x3d2   : > { %vm6404_vm3 = vcmp.lt.f32.partialorder %v6403_v43, 8388608.0 }
 0x3d3   : > { %v5552_v57 = vmul.f32 5.0, %v5932_v4  ;;  %v2504_v11 = vor.u32 %v2503_v63, %v2502_v23  ;;  %v2507_v46 = vshll.u32 %v2506_v5, 23  ;;  %v6409_v47 = vor.u32 %v6408_v8, %v6407_v22 }
 0x3d5   : > { %v5566_v19 = vadd.f32 %v6194_v51, %v5552_v57  ;;  %v2508_v16 = vor.u32 4788187, %v2507_v46  ;;  %v2511_v53 = vcvt.s32.f32 %v2504_v11  ;;  %v6410_v0 = vsel %vm6404_vm3, %v6409_v47, %v5509_v21 }
 0x3d6   : > { %v5945_v63 = vadd.f32 -1.0, %v6410_v0 }
 0x3d7   : > { %v5608_v27 = vadd.f32 %v5594_v2, %v5566_v19  ;;  %v2509_v13 = vand.u32 2147483647, %v2508_v16 }
 0x3d9   : > { %v6517_v35 = vtrunc.f32 %v5608_v27  ;;  %v2512_v12 = vmul.f32 %v2511_v53, %v2509_v13  ;;  %v5593_v27 = vmul.f32 25.0, %v5945_v63 }
 0x3db   : > { %v6518_v10 = vcvt.f32.s32 %v6517_v35  ;;  %v2513_v24 = vxor.u32 2147483648, %v2512_v12 }
 0x3dd   : > { %5636 = vst.msk [vmem:[%s7930_s9 + $0x8] sm:$0xff] %vm722_vm0, %v6518_v10  ;;  %v2514_v14 = vsel %vm2431_vm9, %v2513_v24, %v2512_v12 }
 0x3de   : > { %v2517_v38 = vsel %vm2430_vm10, %v10700_v37, %v2514_v14 }
 0x3df   : > { %6729 = vcosq.f32 %v2517_v38 }
 0x3e0   : > { %6731 = vsinq.f32 %v2517_v38 }
 0x3ec   : > { %v6730_v32 = vpop.eup %6729 }
 0x3ed   : > { %v6732_v50 = vpop.eup %6731  ;;  %v2528_v31 = vxor.u32 2147483648, %v6730_v32 }
 0x3ee   : > { %v2525_v61 = vxor.u32 2147483648, %v6732_v50 }
 0x3ef   : > { %v2529_v18 = vsel %vm2527_vm14, %v2528_v31, %v6732_v50  ;;  %v4014_v45 = vsel %vm4012_vm11, %v2528_v31, %v6732_v50 }
 0x3f0   : > { %v2526_v17 = vsel %vm2524_vm12, %v6730_v32, %v2525_v61  ;;  %v4011_v30 = vsel %vm4009_vm13, %v6730_v32, %v2525_v61 }
 0x3f1   : > { %v2530_v36 = vsel %vm2523_vm15, %v2526_v17, %v2529_v18  ;;  %v4015_v54 = vsel %vm4008_vm1, %v4011_v30, %v4014_v45 }
 0x3f2   : > { %v2531_v20 = vsel %vm2521_vm2, nan, %v2530_v36  ;;  %v4016_v48 = vsel %vm2521_vm2, nan, %v4015_v54 }
 0x3f3   : > { %v3871_v59 = vmul.f32 %v2531_v20, %v10629_v55  ;;  %v5369_v7 = vmul.f32 %v4016_v48, %v10629_v55 }
 0x3f5   : > { %v3885_v33 = vadd.f32 1.0, %v3871_v59  ;;  %v5383_v41 = vadd.f32 1.0, %v5369_v7 }
 0x3f7   : > { %v3899_v15 = vmul.f32 0.5, %v3885_v33  ;;  %v5397_v6 = vmul.f32 0.5, %v5383_v41 }
 0x3f9   : > { %v5411_v25 = vmul.f32 4.0, %v3899_v15  ;;  %v5453_v37 = vmul.f32 4.0, %v5397_v6 }
 0x3fb   : > { %v5425_v49 = vadd.f32 1.0, %v5411_v25  ;;  %v5467_v1 = vadd.f32 1.0, %v5453_v37 }
 0x3fd   : > { %v6181_v44 = vcvt.f32.s32 %v5425_v49  ;;  %v6293_v28 = vcvt.f32.s32 %v5467_v1  ;;  %v6291_v42 = vand.u32 2147483647, %v5467_v1  ;;  %v6184_v4 = vand.u32 2147483648, %v5425_v49 }
 0x3fe   : > { %v6296_v3 = vand.u32 2147483648, %v5467_v1  ;;  %v6179_v51 = vand.u32 2147483647, %v5425_v49 }
 0x3ff   : > { %v6182_v29 = vcvt.s32.f32 %v6181_v44  ;;  %v6294_v55 = vcvt.s32.f32 %v6293_v28  ;;  %vm6292_vm5 = vcmp.lt.f32.partialorder %v6291_v42, 8388608.0 }
 0x400   : > { %vm6180_vm6 = vcmp.lt.f32.partialorder %v6179_v51, 8388608.0 }
 0x401   : > { %v6183_v56 = vand.u32 2147483647, %v6182_v29  ;;  %v6295_v23 = vand.u32 2147483647, %v6294_v55 }
 0x403   : > { %v6185_v57 = vor.u32 %v6184_v4, %v6183_v56  ;;  %v6297_v2 = vor.u32 %v6296_v3, %v6295_v23 }
 0x405   : > { %v6298_v5 = vsel %vm6292_vm5, %v6297_v2, %v5467_v1  ;;  %v6186_v11 = vsel %vm6180_vm6, %v6185_v57, %v5425_v49 }
 0x406   : > { %v5931_v19 = vadd.f32 -1.0, %v6298_v5 }
 0x408   : > { %v5551_v46 = vmul.f32 5.0, %v5931_v19 }
 0x40a   : > { %v5565_v53 = vadd.f32 %v6186_v11, %v5551_v46 }
 0x40c   : > { %v5607_v13 = vadd.f32 %v5593_v27, %v5565_v53 }
 0x40e   : > { %v6515_v12 = vtrunc.f32 %v5607_v13 }
 0x410   : > { %v6516_v24 = vcvt.f32.s32 %v6515_v12 }
 0x411   : > { %v6047_v16 = vpop.f32.mrf.mxu0 }
 0x412   : > { %5635 = vst.msk [vmem:[%s7930_s9] sm:$0xff] %vm722_vm0, %v6516_v24 }
 0x413   : > { %v1392_v35 = vpop.f32.mrf.mxu0 }
 0x414   : > { %6094 = vmatprep.mubr.msk.f32.mxu1 %vm722_vm0, %v1392_v35 }
 0x415   : > { %v6050_v10 = vpop.f32.mrf.mxu0  ;;  %6095 = vmatmul.mubr.msk.f32.vlgmr.msra.gmra.mxu1 %vm722_vm0, %v6047_v16 }
 0x417   : > { %v1402_v39 = vpop.f32.mrf.mxu0 }
 0x418   : > { %6097 = vmatprep.mubr.msk.f32.mxu1 %vm722_vm0, %v1402_v39 }
 0x419   : > { %v6053_v14 = vpop.f32.mrf.mxu0  ;;  %6098 = vmatmul.mubr.msk.f32.gmra.mxu1 %vm722_vm0, %v6050_v10 }
 0x41b   : > { %v1412_v58 = vpop.f32.mrf.mxu0 }
 0x41c   : > { %6100 = vmatprep.mubr.msk.f32.mxu1 %vm722_vm0, %v1412_v58 }
 0x41d   : > { %v6056_v38 = vpop.f32.mrf.mxu0  ;;  %6101 = vmatmul.mubr.msk.f32.gmra.mxu1 %vm722_vm0, %v6053_v14 }
 0x41f   : > { %v1422_v52 = vpop.f32.mrf.mxu0 }
 0x420   : > { %6103 = vmatprep.mubr.msk.f32.mxu1 %vm722_vm0, %v1422_v52 }
 0x421   : > { %v6059_v62 = vpop.f32.mrf.mxu0  ;;  %6104 = vmatmul.mubr.msk.f32.gmra.mxu1 %vm722_vm0, %v6056_v38 }
 0x423   : > { %v1432_v9 = vpop.f32.mrf.mxu0 }
 0x424   : > { %6106 = vmatprep.mubr.msk.f32.mxu1 %vm722_vm0, %v1432_v9 }
 0x425   : > { %v6062_v26 = vpop.f32.mrf.mxu0  ;;  %6107 = vmatmul.mubr.msk.f32.gmra.mxu1 %vm722_vm0, %v6059_v62 }
 0x427   : > { %v1442_v60 = vpop.f32.mrf.mxu0 }
 0x428   : > { %6109 = vmatprep.mubr.msk.f32.mxu1 %vm722_vm0, %v1442_v60 }
 0x429   : > { %v6065_v32 = vpop.f32.mrf.mxu0  ;;  %6110 = vmatmul.mubr.msk.f32.gmra.mxu1 %vm722_vm0, %v6062_v26 }
 0x42b   : > { %v1452_v50 = vpop.f32.mrf.mxu0 }
 0x42c   : > { %6112 = vmatprep.mubr.msk.f32.mxu1 %vm722_vm0, %v1452_v50 }
 0x42d   : > { %6113 = vmatmul.mubr.msk.f32.gmra.mxu1 %vm722_vm0, %v6065_v32 }
 0x4d5   : > { %v6096_v31 = vpop.f32.mrf.mxu1 }
 0x4d6   : > { %v1653_v33 = vsel %vm722_vm0, %v6096_v31, inf }
 0x4d7   : > { %v1583_v61 = vpop.f32.mrf.mxu1 }
 0x4d8   : > { %v1652_v41 = vsel %vm722_vm0, %v1583_v61, inf }
 0x4d9   : > { %v6099_v21 = vpop.f32.mrf.mxu1 }
 0x4da   : > { %v1655_v44 = vsel %vm722_vm0, %v6099_v21, inf }
 0x4db   : > { %v1593_v18 = vpop.f32.mrf.mxu1 }
 0x4dc   : > { %v1654_v40 = vsel %vm722_vm0, %v1593_v18, inf }
 0x4dd   : > { %v6102_v45 = vpop.f32.mrf.mxu1 }
 0x4de   : > { %v1658_v34 = vsel %vm722_vm0, %v6102_v45, inf }
 0x4df   : > { %v1603_v17 = vpop.f32.mrf.mxu1  ;;  %v1659_v8 = vmin.f32 %v1653_v33, %v1658_v34 }
 0x4e0   : > { %v1656_v59 = vsel %vm722_vm0, %v1603_v17, inf }
 0x4e1   : > { %v6105_v30 = vpop.f32.mrf.mxu1  ;;  %v1657_v49 = vmin.f32 %v1652_v41, %v1656_v59 }
 0x4e2   : > { %v1662_v6 = vsel %vm722_vm0, %v6105_v30, inf }
 0x4e3   : > { %v1613_v36 = vpop.f32.mrf.mxu1  ;;  %v1663_v29 = vmin.f32 %v1655_v44, %v1662_v6 }
 0x4e4   : > { %v1660_v7 = vsel %vm722_vm0, %v1613_v36, inf }
 0x4e5   : > { %v6108_v54 = vpop.f32.mrf.mxu1  ;;  %v1661_v1 = vmin.f32 %v1654_v40, %v1660_v7 }
 0x4e6   : > { %v1666_v25 = vsel %vm722_vm0, %v6108_v54, inf }
 0x4e7   : > { %v1623_v20 = vpop.f32.mrf.mxu1  ;;  %v1667_v42 = vmin.f32 %v1659_v8, %v1666_v25 }
 0x4e8   : > { %v1664_v37 = vsel %vm722_vm0, %v1623_v20, inf }
 0x4e9   : > { %v6111_v48 = vpop.f32.mrf.mxu1  ;;  %v1665_v4 = vmin.f32 %v1657_v49, %v1664_v37 }
 0x4ea   : > { %v1670_v28 = vsel %vm722_vm0, %v6111_v48, inf }
 0x4eb   : > { %v1633_v15 = vpop.f32.mrf.mxu1  ;;  %v1671_v56 = vmin.f32 %v1663_v29, %v1670_v28 }
 0x4ec   : > { %v1668_v22 = vsel %vm722_vm0, %v1633_v15, inf }
 0x4ed   : > { %v6114_v43 = vpop.f32.mrf.mxu1  ;;  %v1669_v55 = vmin.f32 %v1661_v1, %v1668_v22 }
 0x4ee   : > { %v1674_v47 = vsel %vm722_vm0, %v6114_v43, inf }
 0x4ef   : > { %v1643_v3 = vpop.f32.mrf.mxu1  ;;  %v1675_v23 = vmin.f32 %v1667_v42, %v1674_v47  ;;  %v1677_v2 = vmin.f32 %v1669_v55, %v1671_v56  ;;  %v1756_v56 = vld [vmem:[#allocation4] sm:$0xff] }
 0x4f0   : > { %v1672_v51 = vsel %vm722_vm0, %v1643_v3, inf }
 0x4f1   : > { %v1673_v0 = vmin.f32 %v1665_v4, %v1672_v51 }
 0x4f3   : > { %v1676_v57 = vmin.f32 %v1673_v0, %v1675_v23  ;;  %v1757_v23 = vld [vmem:[#allocation4 + $0x8] sm:$0xff] }
 0x4f5   : > { %v1678_v63 = vmin.f32 %v1676_v57, %v1677_v2 }
 0x4f7   : > { %1679 = vmin.xlane.f32.xlu0 %v1678_v63 }
 0x580   : > { %v1680_v5 = vpop.xlane.xlu0 %1679 }
 0x581   : > { %v1681_v19 = vrot.slane %v1680_v5, 4 }
 0x583   : > { %v1682_v11 = vmin.f32 %v1680_v5, %v1681_v19  ;;  %v1758_v5 = vld [vmem:[#allocation4 + $0x10] sm:$0xff]  ;;  %v1759_v19 = vld [vmem:[#allocation4 + $0x18] sm:$0xff] }
 0x585   : > { %v1683_v46 = vrot.slane %v1682_v11, 2 }
 0x587   : > { %v1684_v27 = vmin.f32 %v1682_v11, %v1683_v46  ;;  %v1760_v11 = vld [vmem:[#allocation4 + $0x20] sm:$0xff] }
 0x589   : > { %v1685_v16 = vrot.slane %v1684_v27, 1 }
 0x58b   : > { %v1686_v53 = vmin.f32 %v1684_v27, %v1685_v16 }
 0x58d   : > { %6119 = vpush %v1686_v53 }
 0x5be   : > { %s6120_s7 = spop %6119 }
 0x5bf   : > { %v1688_v35 = vstv %s6120_s7 }
 0x5c0   : > { %v1689_v13 = vsub.f32 %v1583_v61, %v1688_v35  ;;  %v1690_v10 = vsub.f32 %v6096_v31, %v1688_v35  ;;  %v1691_v12 = vsub.f32 %v1593_v18, %v1688_v35  ;;  %v1692_v39 = vsub.f32 %v6099_v21, %v1688_v35 }
 0x5c1   : > { %v1693_v24 = vsub.f32 %v1603_v17, %v1688_v35  ;;  %v1694_v14 = vsub.f32 %v6102_v45, %v1688_v35  ;;  %v1695_v58 = vsub.f32 %v1613_v36, %v1688_v35  ;;  %v1696_v38 = vsub.f32 %v6105_v30, %v1688_v35 }
 0x5c2   : > { %v10788_v52 = vsub.f32 %v1623_v20, %v1688_v35  ;;  %v10790_v62 = vsub.f32 %v6108_v54, %v1688_v35  ;;  %v10792_v9 = vsub.f32 %v1633_v15, %v1688_v35  ;;  %v10794_v26 = vsub.f32 %v6111_v48, %v1688_v35 }
 0x5c3   : > { %v10796_v60 = vsub.f32 %v1643_v3, %v1688_v35  ;;  %v10798_v32 = vsub.f32 %v6114_v43, %v1688_v35  ;;  %v1703_v50 = vsel %vm722_vm0, %v1689_v13, -inf  ;;  %v1704_v31 = vsel %vm722_vm0, %v1690_v10, -inf  ;;  %v1761_v35 = vld [vmem:[#allocation4 + $0x28] sm:$0xff] }
 0x5c4   : > { %v1705_v61 = vsel %vm722_vm0, %v1691_v12, -inf  ;;  %v1706_v21 = vsel %vm722_vm0, %v1692_v39, -inf  ;;  %v1707_v18 = vsel %vm722_vm0, %v1693_v24, -inf  ;;  %v1709_v45 = vsel %vm722_vm0, %v1694_v14, -inf }
 0x5c5   : > { %v1708_v17 = vmax.f32 %v1703_v50, %v1707_v18  ;;  %v1710_v30 = vmax.f32 %v1704_v31, %v1709_v45  ;;  %v1711_v36 = vsel %vm722_vm0, %v1695_v58, -inf  ;;  %v1713_v54 = vsel %vm722_vm0, %v1696_v38, -inf  ;;  %v1762_v50 = vld [vmem:[#allocation4 + $0x30] sm:$0xff]  ;;  %v1763_v31 = vld [vmem:[#allocation4 + $0x38] sm:$0xff]  ;;  %v1768_v18 = vld [vmem:[#allocation4 + $0x60] sm:$0xff] }
 0x5c6   : > { %v1712_v20 = vmax.f32 %v1705_v61, %v1711_v36  ;;  %v1714_v48 = vmax.f32 %v1706_v21, %v1713_v54  ;;  %v1715_v34 = vsel %vm722_vm0, %v10788_v52, -inf  ;;  %v1717_v59 = vsel %vm722_vm0, %v10790_v62, -inf  ;;  %v1767_v21 = vld [vmem:[#allocation4 + $0x58] sm:$0xff]  ;;  %v1769_v45 = vld [vmem:[#allocation4 + $0x68] sm:$0xff] }
 0x5c7   : > { %v1716_v7 = vmax.f32 %v1708_v17, %v1715_v34  ;;  %v1718_v33 = vmax.f32 %v1710_v30, %v1717_v59  ;;  %v1719_v41 = vsel %vm722_vm0, %v10792_v9, -inf  ;;  %v1721_v40 = vsel %vm722_vm0, %v10794_v26, -inf }
 0x5c8   : > { %v1720_v15 = vmax.f32 %v1712_v20, %v1719_v41  ;;  %v1722_v6 = vmax.f32 %v1714_v48, %v1721_v40  ;;  %v1723_v25 = vsel %vm722_vm0, %v10796_v60, -inf  ;;  %v1725_v37 = vsel %vm722_vm0, %v10798_v32, -inf }
 0x5c9   : > { %v1724_v22 = vmax.f32 %v1716_v7, %v1723_v25  ;;  %v1726_v8 = vmax.f32 %v1718_v33, %v1725_v37 }
 0x5ca   : > { %v1728_v1 = vmax.f32 %v1720_v15, %v1722_v6 }
 0x5cb   : > { %v1727_v49 = vmax.f32 %v1724_v22, %v1726_v8 }
 0x5cd   : > { %v1729_v43 = vmax.f32 %v1727_v49, %v1728_v1 }
 0x5cf   : > { %1730 = vmax.xlane.f32.xlu0 %v1729_v43 }
 0x658   : > { %v1731_v44 = vpop.xlane.xlu0 %1730 }
 0x659   : > { %v1732_v28 = vrot.slane %v1731_v44, 4 }
 0x65b   : > { %v1733_v47 = vmax.f32 %v1731_v44, %v1732_v28 }
 0x65d   : > { %v1734_v29 = vrot.slane %v1733_v47, 2 }
 0x65f   : > { %v1735_v42 = vmax.f32 %v1733_v47, %v1734_v29 }
 0x661   : > { %v1736_v4 = vrot.slane %v1735_v42, 1 }
 0x663   : > { %v1737_v55 = vmax.f32 %v1735_v42, %v1736_v4 }
 0x665   : > { %6121 = vpush %v1737_v55 }
 0x696   : > { %s6122_s11 = spop %6121 }
 0x697   : > { %s1739_s13 = sadd.f32 1e-08, %s6122_s11 }
 0x699   : > { %v1740_v3 = vstv %s1739_s13 }
 0x69a   : > { %6733 = vrcp.f32 %v1740_v3 }
 0x6a7   : > { %v6734_v51 = vpop.eup %6733 }
 0x6a8   : > { %v1742_v0 = vmul.f32 %v6734_v51, %v1689_v13  ;;  %v1743_v57 = vmul.f32 %v6734_v51, %v1690_v10  ;;  %v1744_v2 = vmul.f32 %v6734_v51, %v1691_v12  ;;  %v1745_v63 = vmul.f32 %v6734_v51, %v1692_v39 }
 0x6a9   : > { %v1746_v46 = vmul.f32 %v6734_v51, %v1693_v24  ;;  %v1747_v27 = vmul.f32 %v6734_v51, %v1694_v14  ;;  %v1748_v16 = vmul.f32 %v6734_v51, %v1695_v58  ;;  %v1749_v53 = vmul.f32 %v6734_v51, %v1696_v38  ;;  %v1764_v24 = vld [vmem:[#allocation4 + $0x40] sm:$0xff]  ;;  %v1765_v14 = vld [vmem:[#allocation4 + $0x48] sm:$0xff]  ;;  %v1766_v58 = vld [vmem:[#allocation4 + $0x50] sm:$0xff] }
 0x6aa   : > { %v1750_v13 = vmul.f32 %v6734_v51, %v10788_v52  ;;  %v1751_v10 = vmul.f32 %v6734_v51, %v10790_v62  ;;  %v1752_v12 = vmul.f32 %v6734_v51, %v10792_v9  ;;  %v1753_v39 = vmul.f32 %v6734_v51, %v10794_v26 }
 0x6ab   : > { %v1754_v38 = vmul.f32 %v6734_v51, %v10796_v60  ;;  %v1755_v61 = vmul.f32 %v6734_v51, %v10798_v32  ;;  %v1770_v17 = vmul.f32 %v1756_v56, %v1742_v0  ;;  %v1771_v52 = vmul.f32 %v1757_v23, %v1743_v57 }
 0x6ac   : > { %v1772_v62 = vmul.f32 %v1758_v5, %v1744_v2  ;;  %v1773_v9 = vmul.f32 %v1759_v19, %v1745_v63  ;;  %v1774_v26 = vmul.f32 %v1760_v11, %v1746_v46  ;;  %v1775_v30 = vmul.f32 %v1761_v35, %v1747_v27 }
 0x6ad   : > { %v1776_v36 = vmul.f32 %v1762_v50, %v1748_v16  ;;  %v1777_v60 = vmul.f32 %v1763_v31, %v1749_v53  ;;  %v1778_v32 = vmul.f32 %v1764_v24, %v1750_v13  ;;  %v1779_v54 = vmul.f32 %v1765_v14, %v1751_v10  ;;  %1784 = vst.msk [vmem:[%s10825_s17] sm:$0xff] %vm722_vm0, %v1770_v17 }
 0x6ae   : > { %1785 = vst.msk [vmem:[%s10825_s17 + $0x8] sm:$0xff] %vm722_vm0, %v1771_v52  ;;  %v1780_v20 = vmul.f32 %v1766_v58, %v1752_v12  ;;  %v1781_v48 = vmul.f32 %v1767_v21, %v1753_v39  ;;  %v1782_v34 = vmul.f32 %v1768_v18, %v1754_v38  ;;  %v1783_v59 = vmul.f32 %v1769_v45, %v1755_v61 }
 0x6af   : > { %1786 = vst.msk [vmem:[%s10825_s17 + $0x10] sm:$0xff] %vm722_vm0, %v1772_v62  ;;  %1787 = vst.msk [vmem:[%s10825_s17 + $0x18] sm:$0xff] %vm722_vm0, %v1773_v9 }
 0x6b0   : > { %1788 = vst.msk [vmem:[%s10825_s17 + $0x20] sm:$0xff] %vm722_vm0, %v1774_v26  ;;  %1789 = vst.msk [vmem:[%s10825_s17 + $0x28] sm:$0xff] %vm722_vm0, %v1775_v30 }
 0x6b1   : > { %1790 = vst.msk [vmem:[%s10825_s17 + $0x30] sm:$0xff] %vm722_vm0, %v1776_v36  ;;  %1791 = vst.msk [vmem:[%s10825_s17 + $0x38] sm:$0xff] %vm722_vm0, %v1777_v60 }
 0x6b2   : > { %1792 = vst.msk [vmem:[%s10825_s17 + $0x40] sm:$0xff] %vm722_vm0, %v1778_v32  ;;  %1793 = vst.msk [vmem:[%s10825_s17 + $0x48] sm:$0xff] %vm722_vm0, %v1779_v54 }
 0x6b3   : > { %1794 = vst.msk [vmem:[%s10825_s17 + $0x50] sm:$0xff] %vm722_vm0, %v1780_v20  ;;  %1795 = vst.msk [vmem:[%s10825_s17 + $0x58] sm:$0xff] %vm722_vm0, %v1781_v48 }
 0x6b4   : > { %1796 = vst.msk [vmem:[%s10825_s17 + $0x60] sm:$0xff] %vm722_vm0, %v1782_v34  ;;  %1797 = vst.msk [vmem:[%s10825_s17 + $0x68] sm:$0xff] %vm722_vm0, %v1783_v59 }
 0x6b5 PF: > { %s10999_s22 = smov %s7083_s18  ;;  %p18_p8 = scmp.ge.s32.totalorder %s7083_s18, 5  }
 0x6b6   : > { %s11000_s18 = smov %s6952_s19  ;;  %s11001_s19 = smov %s6956_s20 }
 0x6b7   : > { %s11002_s20 = smov %s7093_s27  ;;  %s11003_s21 = smov %s10999_s22 }
 0x6b8   :  { %20 = sbr.rel (!%p18_p8) target bundleno = 5 (0x5), region = 100 }
 0x6bd   :  { %5686 = vsyncpa [#allocation3], 1 }
 0x6be   :  { %5688 = vsyncpa [#allocation3 + $0x1], 1 }
 0x6bf   :  { %5689 = vsyncpa [#allocation5], 1 }
 0x6c0   :  { %5690 = vsyncpa [#allocation8], 1 }

// kernel: forward_v2.3
= control target key start
LH: loop header
LB: loop body
LE: loop exit
PB: predicated region body
PF: predicated region fallthrough
CT: control target
= control target key end

     0   :  { %s3167_s0 = inlined_call_operand.vmem [shape: f32[3,112,112], index: 0, kind: input, shape index: {}]   ;;  %s3168_s1 = inlined_call_operand.vmem [shape: f32[112,112], index: 1, kind: input, shape index: {}]   ;;  %s3169_s2 = inlined_call_operand.vmem [shape: f32[112,112], index: 2, kind: input, shape index: {}]   ;;  %s3170_s3 = inlined_call_operand.vmem [shape: f32[3,3,4,112,112], index: 3, kind: input, shape index: {}, may-alias: {3,4}]   ;;  %s3171_s4 = inlined_call_operand.vmem [shape: f32[3,3,4,112,112], index: 4, kind: input, shape index: {}, may-alias: {3,4}]   ;;  %s3172_s5 = inlined_call_operand.hbm [shape: f32[3,3,4,112,112], index: 5, kind: output, shape index: {}]  }
   0x1   :  { %3175 = sst [smem:[#allocation54_spill]] %s3172_s5 }
   0x2   :  { %10 = vsyncpa [#allocation5], 0 }
   0x3   :  { %12 = vsyncpa [#allocation5 + $0x1], 0  ;;  %s2124_s18 = smov 0   ;;  %s2126_s19 = smov 0  }
   0x4   :  { %s2128_s20 = smov 0   ;;  %s2130_s21 = smov 0  }
   0x5   :  { %s2132_s22 = smov 0   ;;  %s2134_s23 = smov 0  }
   0x6   :  { %s2136_s24 = smov 0   ;;  %s2138_s25 = smov 0  }
   0x7   :  { %s2140_s26 = smov 0   ;;  %s2142_s27 = smov 0  }
   0x8 LB: > { %s1679_s28 = sadd.s32 4294967295, %s2085_s27   ;;  %s27_s29 = sadd.s32 1, %s2077_s25  ;;  %s2085_s27 = sphi %s2142_s27, %s18_s27   ;;  %s2081_s26 = sphi %s2140_s26, %s3279_s26   ;;  %s2077_s25 = sphi %s2138_s25, %s3278_s25   ;;  %s2073_s24 = sphi %s2136_s24, %s3277_s24   ;;  %s2069_s23 = sphi %s2134_s23, %s3276_s23   ;;  %s2065_s22 = sphi %s2132_s22, %s3275_s22   ;;  %s2061_s21 = sphi %s2130_s21, %s3274_s21   ;;  %s2057_s20 = sphi %s2128_s20, %s3273_s20   ;;  %s2053_s19 = sphi %s2126_s19, %s3272_s19   ;;  %s2049_s18 = sphi %s2124_s18, %s3271_s18  }
   0x9   : > { %p28_p0 = scmp.ge.s32.totalorder %s27_s29, 4  ;;  %s30_s30 = sadd.s32 1, %s2081_s26 }
   0xa   : > { %p114_p1 = scmp.ne.s32.totalorder %s2065_s22, %s2061_s21  ;;  %p115_p2 = scmp.eq.s32.totalorder %s2085_s27, 0 }
   0xb   : > { %s3281_s29 = smov (%p28_p0, %s27_s29), 0  ;;  %s3283_s30 = smov (!%p28_p0, %s30_s30), %s2081_s26 }
   0xc   : > { %3176 = sst [smem:[#allocation9_spill]] %s3281_s29  ;;  %s107_s6 = sadd.s32 1, %s2065_s22 }
   0xd   : > { %p2189_p3 = por %p115_p2, %p114_p1  ;;  %p32_p4 = scmp.ge.s32.totalorder %s3283_s30, 3 }
   0xe   : > { %s130_s8 = sadd.s32 2, %s2081_s26  ;;  %s2196_s9 = ssub.s32 %s2077_s25, %s3281_s29 }
   0xf   : > { %s132_s10 = ssub.s32 0, %s130_s8  ;;  %s3285_s30 = smov (%p32_p4, %s3283_s30), 0 }
  0x10   : > { %3178 = sst [smem:[#allocation10_spill]] %s3285_s30  ;;  %s1681_s11 = smin.u32 %s132_s10, %s130_s8 }
  0x11   : > { %s102_s12 = ssub.s32 %s2081_s26, %s3285_s30  ;;  %1997 = sdivrem.u32 %s1681_s11, 3 }
  0x12   : > { %s104_s13 = sor.u32 %s2196_s9, %s102_s12  ;;  %s144_s14 = sadd.s32 2, %s3285_s30 }
  0x13   : > { %s1680_s15 = sadd.s32 4294967294, %s2085_s27   ;;  %p105_p5 = scmp.eq.s32.totalorder %s104_s13, 0 }
  0x14   : > { %s146_s16 = ssub.s32 0, %s144_s14  ;;  %p170_p6 = scmp.ne.s32.totalorder %s2057_s20, %s2053_s19 }
  0x15   : > { %s2206_s17 = scalar_select %p105_p5, %s2065_s22, %s107_s6  }
  0x16   : > { %s1684_s29 = smin.u32 %s146_s16, %s144_s14  ;;  %p202_p7 = scmp.eq.s32.totalorder %s1679_s28, 11 }
  0x17   : > { %3179 = sst [smem:[#allocation11_spill]] %s2206_s17  ;;  %1999 = sdivrem.u32 %s1684_s29, 3 }
  0x18   : > { %p2212_p8 = por %p170_p6, %p115_p2  ;;  %p207_p9 = scmp.ne.s32.totalorder %s2061_s21, %s2049_s18 }
  0x19   : > { %p2221_p10 = por %p202_p7, %p114_p1  ;;  %p208_p11 = scmp.eq.s32.totalorder %s1680_s15, 11 }
  0x1a   : > { %s1998_s6 = spop.drf %1997  ;;  %s163_s14 = sadd.s32 1, %s2057_s20 }
  0x1b   : > { %p2225_p12 = por %p208_p11, %p207_p9  ;;  %p1683_p13 = scmp.lt.s32.totalorder %s1998_s6, 0 }
  0x1c   : > { %s142_s29 = sadd.s32 3, %s1998_s6  ;;  %p1688_p2 = scmp.ge.s32.totalorder %s2085_s27, 12 }
  0x1d   : > { %s3287_s29 = smov (!%p1683_p13, %s142_s29), %s1998_s6 }
  0x20   : > { %s2000_s28 = spop.drf %1999 }
  0x21   : > { %p1686_p0 = scmp.lt.s32.totalorder %s2000_s28, 0  ;;  %s156_s11 = sadd.s32 3, %s2000_s28 }
  0x23   : > { %s3289_s11 = smov (!%p1686_p0, %s156_s11), %s2000_s28 }
  0x24   : > { %s158_s12 = ssub.s32 %s3287_s29, %s3289_s11  ;;  %230 = sbr.rel (%p1688_p2) target bundleno = 101 (0x65), region = 24 }
  0x25   : > { %s160_s13 = sor.u32 %s158_s12, %s2196_s9 }
  0x26   : > { %p161_p1 = scmp.eq.s32.totalorder %s160_s13, 0 }
  0x28   : > { %s2235_s16 = scalar_select %p161_p1, %s2057_s20, %s163_s14  }
  0x29   : > { %241 = sbr.rel (!%p2189_p3) target bundleno = 71 (0x47), region = 32  ;;  %s243_s15 = sand.u32 (%p2189_p3), 1, %s2065_s22  }
  0x2a   : > { %s1882_s6 = smul.u32 (%p2189_p3), 14, %s2077_s25 }
  0x2b   : > { %s1881_s30 = smul.u32 (%p2189_p3), 336, %s243_s15 }
  0x2c   : > { %s1883_s17 = smul.u32 (%p2189_p3), 168, %s2081_s26 }
  0x2d   : > { %s2251_s7 = scalar_lea.vmem (%p2189_p3), [#allocation2], %s1881_s30 }
  0x2e   : > { %s248_s28 = sadd.s32 %s1883_s17, %s1882_s6 }
  0x2f   : > { %s1689_s11 = sshll.u32 %s248_s28, 3 }
  0x30   : > { %s2246_s13 = scalar_lea.vmem %s3170_s3, %s1689_s11 }
  0x31   : > { %v361_v0 = vld [vmem:[%s2246_s13] sm:$0xff]  ;;  %v363_v1 = vld [vmem:[%s2246_s13 + $0x8] sm:$0xff]  ;;  %v365_v2 = vld [vmem:[%s2246_s13 + $0x10] sm:$0xff] }
  0x32   : > { %362 = vst [vmem:[%s2251_s7] sm:$0xff] %v361_v0  ;;  %364 = vst [vmem:[%s2251_s7 + $0x8] sm:$0xff] %v363_v1  ;;  %v367_v3 = vld [vmem:[%s2246_s13 + $0x18] sm:$0xff]  ;;  %v369_v4 = vld [vmem:[%s2246_s13 + $0x20] sm:$0xff] }
  0x33   : > { %366 = vst [vmem:[%s2251_s7 + $0x10] sm:$0xff] %v365_v2  ;;  %v371_v5 = vld [vmem:[%s2246_s13 + $0x28] sm:$0xff]  ;;  %368 = vst [vmem:[%s2251_s7 + $0x18] sm:$0xff] %v367_v3  ;;  %v373_v6 = vld [vmem:[%s2246_s13 + $0x30] sm:$0xff] }
  0x34   : > { %370 = vst [vmem:[%s2251_s7 + $0x20] sm:$0xff] %v369_v4  ;;  %372 = vst [vmem:[%s2251_s7 + $0x28] sm:$0xff] %v371_v5  ;;  %v375_v7 = vld [vmem:[%s2246_s13 + $0x38] sm:$0xff]  ;;  %v377_v8 = vld [vmem:[%s2246_s13 + $0x40] sm:$0xff] }
  0x35   : > { %374 = vst [vmem:[%s2251_s7 + $0x30] sm:$0xff] %v373_v6  ;;  %376 = vst [vmem:[%s2251_s7 + $0x38] sm:$0xff] %v375_v7  ;;  %v379_v9 = vld [vmem:[%s2246_s13 + $0x48] sm:$0xff]  ;;  %v381_v10 = vld [vmem:[%s2246_s13 + $0x50] sm:$0xff] }
  0x36   : > { %378 = vst [vmem:[%s2251_s7 + $0x40] sm:$0xff] %v377_v8  ;;  %v383_v11 = vld [vmem:[%s2246_s13 + $0x58] sm:$0xff]  ;;  %380 = vst [vmem:[%s2251_s7 + $0x48] sm:$0xff] %v379_v9  ;;  %v385_v12 = vld [vmem:[%s2246_s13 + $0x60] sm:$0xff] }
  0x37   : > { %382 = vst [vmem:[%s2251_s7 + $0x50] sm:$0xff] %v381_v10  ;;  %384 = vst [vmem:[%s2251_s7 + $0x58] sm:$0xff] %v383_v11  ;;  %v387_v13 = vld [vmem:[%s2246_s13 + $0x68] sm:$0xff]  ;;  %v389_v14 = vld [vmem:[%s2246_s13 + $0x1c0] sm:$0xff] }
  0x38   : > { %386 = vst [vmem:[%s2251_s7 + $0x60] sm:$0xff] %v385_v12  ;;  %388 = vst [vmem:[%s2251_s7 + $0x68] sm:$0xff] %v387_v13  ;;  %v391_v15 = vld [vmem:[%s2246_s13 + $0x1c8] sm:$0xff]  ;;  %v393_v16 = vld [vmem:[%s2246_s13 + $0x1d0] sm:$0xff] }
  0x39   : > { %390 = vst [vmem:[%s2251_s7 + $0x70] sm:$0xff] %v389_v14  ;;  %v395_v17 = vld [vmem:[%s2246_s13 + $0x1d8] sm:$0xff]  ;;  %392 = vst [vmem:[%s2251_s7 + $0x78] sm:$0xff] %v391_v15  ;;  %v397_v18 = vld [vmem:[%s2246_s13 + $0x1e0] sm:$0xff] }
  0x3a   : > { %394 = vst [vmem:[%s2251_s7 + $0x80] sm:$0xff] %v393_v16  ;;  %396 = vst [vmem:[%s2251_s7 + $0x88] sm:$0xff] %v395_v17  ;;  %v399_v19 = vld [vmem:[%s2246_s13 + $0x1e8] sm:$0xff]  ;;  %v401_v20 = vld [vmem:[%s2246_s13 + $0x1f0] sm:$0xff] }
  0x3b   : > { %398 = vst [vmem:[%s2251_s7 + $0x90] sm:$0xff] %v397_v18  ;;  %400 = vst [vmem:[%s2251_s7 + $0x98] sm:$0xff] %v399_v19  ;;  %v403_v21 = vld [vmem:[%s2246_s13 + $0x1f8] sm:$0xff]  ;;  %v405_v22 = vld [vmem:[%s2246_s13 + $0x200] sm:$0xff] }
  0x3c   : > { %402 = vst [vmem:[%s2251_s7 + $0xa0] sm:$0xff] %v401_v20  ;;  %v407_v23 = vld [vmem:[%s2246_s13 + $0x208] sm:$0xff]  ;;  %404 = vst [vmem:[%s2251_s7 + $0xa8] sm:$0xff] %v403_v21  ;;  %v409_v24 = vld [vmem:[%s2246_s13 + $0x210] sm:$0xff] }
  0x3d   : > { %406 = vst [vmem:[%s2251_s7 + $0xb0] sm:$0xff] %v405_v22  ;;  %408 = vst [vmem:[%s2251_s7 + $0xb8] sm:$0xff] %v407_v23  ;;  %v411_v25 = vld [vmem:[%s2246_s13 + $0x218] sm:$0xff]  ;;  %v413_v26 = vld [vmem:[%s2246_s13 + $0x220] sm:$0xff] }
  0x3e   : > { %410 = vst [vmem:[%s2251_s7 + $0xc0] sm:$0xff] %v409_v24  ;;  %412 = vst [vmem:[%s2251_s7 + $0xc8] sm:$0xff] %v411_v25  ;;  %v415_v27 = vld [vmem:[%s2246_s13 + $0x228] sm:$0xff]  ;;  %v417_v28 = vld [vmem:[%s2246_s13 + $0x380] sm:$0xff] }
  0x3f   : > { %414 = vst [vmem:[%s2251_s7 + $0xd0] sm:$0xff] %v413_v26  ;;  %v419_v29 = vld [vmem:[%s2246_s13 + $0x388] sm:$0xff]  ;;  %416 = vst [vmem:[%s2251_s7 + $0xd8] sm:$0xff] %v415_v27  ;;  %v421_v30 = vld [vmem:[%s2246_s13 + $0x390] sm:$0xff] }
  0x40   : > { %418 = vst [vmem:[%s2251_s7 + $0xe0] sm:$0xff] %v417_v28  ;;  %420 = vst [vmem:[%s2251_s7 + $0xe8] sm:$0xff] %v419_v29  ;;  %v423_v31 = vld [vmem:[%s2246_s13 + $0x398] sm:$0xff]  ;;  %v425_v32 = vld [vmem:[%s2246_s13 + $0x3a0] sm:$0xff] }
  0x41   : > { %422 = vst [vmem:[%s2251_s7 + $0xf0] sm:$0xff] %v421_v30  ;;  %424 = vst [vmem:[%s2251_s7 + $0xf8] sm:$0xff] %v423_v31  ;;  %v427_v33 = vld [vmem:[%s2246_s13 + $0x3a8] sm:$0xff]  ;;  %v429_v34 = vld [vmem:[%s2246_s13 + $0x3b0] sm:$0xff] }
  0x42   : > { %426 = vst [vmem:[%s2251_s7 + $0x100] sm:$0xff] %v425_v32  ;;  %v431_v35 = vld [vmem:[%s2246_s13 + $0x3b8] sm:$0xff]  ;;  %428 = vst [vmem:[%s2251_s7 + $0x108] sm:$0xff] %v427_v33  ;;  %v433_v36 = vld [vmem:[%s2246_s13 + $0x3c0] sm:$0xff] }
  0x43   : > { %430 = vst [vmem:[%s2251_s7 + $0x110] sm:$0xff] %v429_v34  ;;  %432 = vst [vmem:[%s2251_s7 + $0x118] sm:$0xff] %v431_v35  ;;  %v435_v37 = vld [vmem:[%s2246_s13 + $0x3c8] sm:$0xff]  ;;  %v437_v38 = vld [vmem:[%s2246_s13 + $0x3d0] sm:$0xff] }
  0x44   : > { %434 = vst [vmem:[%s2251_s7 + $0x120] sm:$0xff] %v433_v36  ;;  %436 = vst [vmem:[%s2251_s7 + $0x128] sm:$0xff] %v435_v37  ;;  %v439_v39 = vld [vmem:[%s2246_s13 + $0x3d8] sm:$0xff]  ;;  %v441_v40 = vld [vmem:[%s2246_s13 + $0x3e0] sm:$0xff] }
  0x45   : > { %438 = vst [vmem:[%s2251_s7 + $0x130] sm:$0xff] %v437_v38  ;;  %v443_v41 = vld [vmem:[%s2246_s13 + $0x3e8] sm:$0xff]  ;;  %440 = vst [vmem:[%s2251_s7 + $0x138] sm:$0xff] %v439_v39 }
  0x46   : > { %442 = vst [vmem:[%s2251_s7 + $0x140] sm:$0xff] %v441_v40  ;;  %444 = vst [vmem:[%s2251_s7 + $0x148] sm:$0xff] %v443_v41 }
  0x47 PF: > { %450 = sbr.rel (!%p2212_p8) target bundleno = 101 (0x65), region = 70  ;;  %s452_s30 = sand.u32 (%p2212_p8), 1, %s2057_s20  }
  0x48   : > { %s1885_s17 = smul.u32 (%p2212_p8), 14, %s2077_s25 }
  0x49   : > { %s1884_s14 = smul.u32 (%p2212_p8), 336, %s452_s30 }
  0x4a   : > { %s1886_s15 = smul.u32 (%p2212_p8), 168, %s3287_s29 }
  0x4b   : > { %s2347_s5 = scalar_lea.vmem (%p2212_p8), [#allocation3], %s1884_s14 }
  0x4c   : > { %s471_s6 = sadd.s32 %s1886_s15, %s1885_s17 }
  0x4d   : > { %s1693_s28 = sshll.u32 %s471_s6, 3 }
  0x4e   : > { %s2342_s12 = scalar_lea.vmem %s3171_s4, %s1693_s28 }
  0x4f   : > { %v584_v42 = vld [vmem:[%s2342_s12] sm:$0xff]  ;;  %v586_v43 = vld [vmem:[%s2342_s12 + $0x8] sm:$0xff]  ;;  %v588_v44 = vld [vmem:[%s2342_s12 + $0x10] sm:$0xff] }
  0x50   : > { %585 = vst [vmem:[%s2347_s5] sm:$0xff] %v584_v42  ;;  %587 = vst [vmem:[%s2347_s5 + $0x8] sm:$0xff] %v586_v43  ;;  %v590_v45 = vld [vmem:[%s2342_s12 + $0x18] sm:$0xff]  ;;  %v592_v46 = vld [vmem:[%s2342_s12 + $0x20] sm:$0xff] }
  0x51   : > { %589 = vst [vmem:[%s2347_s5 + $0x10] sm:$0xff] %v588_v44  ;;  %v594_v47 = vld [vmem:[%s2342_s12 + $0x28] sm:$0xff]  ;;  %591 = vst [vmem:[%s2347_s5 + $0x18] sm:$0xff] %v590_v45  ;;  %v596_v48 = vld [vmem:[%s2342_s12 + $0x30] sm:$0xff] }
  0x52   : > { %593 = vst [vmem:[%s2347_s5 + $0x20] sm:$0xff] %v592_v46  ;;  %595 = vst [vmem:[%s2347_s5 + $0x28] sm:$0xff] %v594_v47  ;;  %v598_v49 = vld [vmem:[%s2342_s12 + $0x38] sm:$0xff]  ;;  %v600_v50 = vld [vmem:[%s2342_s12 + $0x40] sm:$0xff] }
  0x53   : > { %597 = vst [vmem:[%s2347_s5 + $0x30] sm:$0xff] %v596_v48  ;;  %599 = vst [vmem:[%s2347_s5 + $0x38] sm:$0xff] %v598_v49  ;;  %v602_v51 = vld [vmem:[%s2342_s12 + $0x48] sm:$0xff]  ;;  %v604_v52 = vld [vmem:[%s2342_s12 + $0x50] sm:$0xff] }
  0x54   : > { %601 = vst [vmem:[%s2347_s5 + $0x40] sm:$0xff] %v600_v50  ;;  %v606_v53 = vld [vmem:[%s2342_s12 + $0x58] sm:$0xff]  ;;  %603 = vst [vmem:[%s2347_s5 + $0x48] sm:$0xff] %v602_v51  ;;  %v608_v54 = vld [vmem:[%s2342_s12 + $0x60] sm:$0xff] }
  0x55   : > { %605 = vst [vmem:[%s2347_s5 + $0x50] sm:$0xff] %v604_v52  ;;  %607 = vst [vmem:[%s2347_s5 + $0x58] sm:$0xff] %v606_v53  ;;  %v610_v55 = vld [vmem:[%s2342_s12 + $0x68] sm:$0xff]  ;;  %v612_v56 = vld [vmem:[%s2342_s12 + $0x1c0] sm:$0xff] }
  0x56   : > { %609 = vst [vmem:[%s2347_s5 + $0x60] sm:$0xff] %v608_v54  ;;  %611 = vst [vmem:[%s2347_s5 + $0x68] sm:$0xff] %v610_v55  ;;  %v614_v57 = vld [vmem:[%s2342_s12 + $0x1c8] sm:$0xff]  ;;  %v616_v58 = vld [vmem:[%s2342_s12 + $0x1d0] sm:$0xff] }
  0x57   : > { %613 = vst [vmem:[%s2347_s5 + $0x70] sm:$0xff] %v612_v56  ;;  %v618_v59 = vld [vmem:[%s2342_s12 + $0x1d8] sm:$0xff]  ;;  %615 = vst [vmem:[%s2347_s5 + $0x78] sm:$0xff] %v614_v57  ;;  %v620_v60 = vld [vmem:[%s2342_s12 + $0x1e0] sm:$0xff] }
  0x58   : > { %617 = vst [vmem:[%s2347_s5 + $0x80] sm:$0xff] %v616_v58  ;;  %619 = vst [vmem:[%s2347_s5 + $0x88] sm:$0xff] %v618_v59  ;;  %v622_v61 = vld [vmem:[%s2342_s12 + $0x1e8] sm:$0xff]  ;;  %v624_v62 = vld [vmem:[%s2342_s12 + $0x1f0] sm:$0xff] }
  0x59   : > { %621 = vst [vmem:[%s2347_s5 + $0x90] sm:$0xff] %v620_v60  ;;  %623 = vst [vmem:[%s2347_s5 + $0x98] sm:$0xff] %v622_v61  ;;  %v626_v63 = vld [vmem:[%s2342_s12 + $0x1f8] sm:$0xff]  ;;  %v628_v0 = vld [vmem:[%s2342_s12 + $0x200] sm:$0xff] }
  0x5a   : > { %625 = vst [vmem:[%s2347_s5 + $0xa0] sm:$0xff] %v624_v62  ;;  %v630_v1 = vld [vmem:[%s2342_s12 + $0x208] sm:$0xff]  ;;  %627 = vst [vmem:[%s2347_s5 + $0xa8] sm:$0xff] %v626_v63  ;;  %v632_v2 = vld [vmem:[%s2342_s12 + $0x210] sm:$0xff] }
  0x5b   : > { %629 = vst [vmem:[%s2347_s5 + $0xb0] sm:$0xff] %v628_v0  ;;  %631 = vst [vmem:[%s2347_s5 + $0xb8] sm:$0xff] %v630_v1  ;;  %v634_v3 = vld [vmem:[%s2342_s12 + $0x218] sm:$0xff]  ;;  %v636_v4 = vld [vmem:[%s2342_s12 + $0x220] sm:$0xff] }
  0x5c   : > { %633 = vst [vmem:[%s2347_s5 + $0xc0] sm:$0xff] %v632_v2  ;;  %635 = vst [vmem:[%s2347_s5 + $0xc8] sm:$0xff] %v634_v3  ;;  %v638_v5 = vld [vmem:[%s2342_s12 + $0x228] sm:$0xff]  ;;  %v640_v6 = vld [vmem:[%s2342_s12 + $0x380] sm:$0xff] }
  0x5d   : > { %637 = vst [vmem:[%s2347_s5 + $0xd0] sm:$0xff] %v636_v4  ;;  %v642_v7 = vld [vmem:[%s2342_s12 + $0x388] sm:$0xff]  ;;  %639 = vst [vmem:[%s2347_s5 + $0xd8] sm:$0xff] %v638_v5  ;;  %v644_v8 = vld [vmem:[%s2342_s12 + $0x390] sm:$0xff] }
  0x5e   : > { %641 = vst [vmem:[%s2347_s5 + $0xe0] sm:$0xff] %v640_v6  ;;  %643 = vst [vmem:[%s2347_s5 + $0xe8] sm:$0xff] %v642_v7  ;;  %v646_v9 = vld [vmem:[%s2342_s12 + $0x398] sm:$0xff]  ;;  %v648_v10 = vld [vmem:[%s2342_s12 + $0x3a0] sm:$0xff] }
  0x5f   : > { %645 = vst [vmem:[%s2347_s5 + $0xf0] sm:$0xff] %v644_v8  ;;  %647 = vst [vmem:[%s2347_s5 + $0xf8] sm:$0xff] %v646_v9  ;;  %v650_v11 = vld [vmem:[%s2342_s12 + $0x3a8] sm:$0xff]  ;;  %v652_v12 = vld [vmem:[%s2342_s12 + $0x3b0] sm:$0xff] }
  0x60   : > { %649 = vst [vmem:[%s2347_s5 + $0x100] sm:$0xff] %v648_v10  ;;  %v654_v13 = vld [vmem:[%s2342_s12 + $0x3b8] sm:$0xff]  ;;  %651 = vst [vmem:[%s2347_s5 + $0x108] sm:$0xff] %v650_v11  ;;  %v656_v14 = vld [vmem:[%s2342_s12 + $0x3c0] sm:$0xff] }
  0x61   : > { %653 = vst [vmem:[%s2347_s5 + $0x110] sm:$0xff] %v652_v12  ;;  %655 = vst [vmem:[%s2347_s5 + $0x118] sm:$0xff] %v654_v13  ;;  %v658_v15 = vld [vmem:[%s2342_s12 + $0x3c8] sm:$0xff]  ;;  %v660_v16 = vld [vmem:[%s2342_s12 + $0x3d0] sm:$0xff] }
  0x62   : > { %657 = vst [vmem:[%s2347_s5 + $0x120] sm:$0xff] %v656_v14  ;;  %659 = vst [vmem:[%s2347_s5 + $0x128] sm:$0xff] %v658_v15  ;;  %v662_v17 = vld [vmem:[%s2342_s12 + $0x3d8] sm:$0xff]  ;;  %v664_v18 = vld [vmem:[%s2342_s12 + $0x3e0] sm:$0xff] }
  0x63   : > { %661 = vst [vmem:[%s2347_s5 + $0x130] sm:$0xff] %v660_v16  ;;  %v666_v19 = vld [vmem:[%s2342_s12 + $0x3e8] sm:$0xff]  ;;  %663 = vst [vmem:[%s2347_s5 + $0x138] sm:$0xff] %v662_v17 }
  0x64   : > { %665 = vst [vmem:[%s2347_s5 + $0x140] sm:$0xff] %v664_v18  ;;  %667 = vst [vmem:[%s2347_s5 + $0x148] sm:$0xff] %v666_v19 }
  0x65 PF: > { %p1694_p3 = scmp.ge.s32.totalorder %s2085_s27, 1  ;;  %p672_p4 = scmp.lt.s32.totalorder %s2085_s27, 13 }
  0x67   : > { %p673_p5 = pnand %p1694_p3, %p672_p4 }
  0x69   : > { %676 = sbr.rel (%p673_p5) target bundleno = 1072 (0x430), region = 108 }
  0x6e   : > { %p722_p6 = scmp.lt.s32.totalorder %s2073_s24, 2  ;;  %v755_v20 = vld [vmem:[%s3168_s1] sm:$0xff]  ;;  %vm769_vm0 = vcmask 916480   ;;  %v960_v21 = vld [vmem:[%s3169_s2 + $0x68] sm:$0xff]  ;;  %v958_v23 = vld [vmem:[%s3169_s2 + $0x58] sm:$0xff]  ;;  %s679_s5 = sand.u32 1, %s2061_s21  }
  0x6f   : > { %1811 = vmatprep.mubr.msk.f32.mxu0 %vm769_vm0, %v755_v20  ;;  %1832 = vmatprep.subr.mxu1 %v960_v21  ;;  %v959_v22 = vld [vmem:[%s3169_s2 + $0x60] sm:$0xff]  ;;  %v957_v26 = vld [vmem:[%s3169_s2 + $0x50] sm:$0xff]  ;;  %v956_v28 = vld [vmem:[%s3169_s2 + $0x48] sm:$0xff]  ;;  %s686_s13 = sand.u32 1, %s2053_s19   ;;  %s1523_s15 = scalar_lea.sflag [#allocation5], %s679_s5 }
  0x70   : > { %s723_s7 = scalar_select %p722_p6, %s2073_s24, 2  ;;  %1833 = vmatpush3.msra.mxu1 %v960_v21  ;;  %v955_v30 = vld [vmem:[%s3169_s2 + $0x40] sm:$0xff]  ;;  %v954_v32 = vld [vmem:[%s3169_s2 + $0x38] sm:$0xff]  ;;  %v953_v34 = vld [vmem:[%s3169_s2 + $0x30] sm:$0xff] }
  0x71   : > { %1834 = vmatprep.subr.mxu1 %v959_v22  ;;  %v952_v36 = vld [vmem:[%s3169_s2 + $0x28] sm:$0xff]  ;;  %v951_v38 = vld [vmem:[%s3169_s2 + $0x20] sm:$0xff]  ;;  %v950_v40 = vld [vmem:[%s3169_s2 + $0x18] sm:$0xff] }
  0x72   : > { %s1889_s30 = smul.u32 112, %s723_s7  ;;  %1835 = vmatpush3.msra.mxu1 %v959_v22  ;;  %v949_v42 = vld [vmem:[%s3169_s2 + $0x10] sm:$0xff]  ;;  %v756_v47 = vld [vmem:[%s3168_s1 + $0x8] sm:$0xff]  ;;  %v758_v49 = vld [vmem:[%s3168_s1 + $0x18] sm:$0xff] }
  0x73   : > { %1836 = vmatprep.subr.mxu1 %v958_v23  ;;  %v757_v48 = vld [vmem:[%s3168_s1 + $0x10] sm:$0xff]  ;;  %v759_v50 = vld [vmem:[%s3168_s1 + $0x20] sm:$0xff]  ;;  %v760_v51 = vld [vmem:[%s3168_s1 + $0x28] sm:$0xff]  ;;  %s1888_s7 = smul.u32 336, %s686_s13 }
  0x74   : > { %s2447_s9 = scalar_lea.vmem %s3167_s0, %s1889_s30  ;;  %1837 = vmatpush3.msra.mxu1 %v958_v23  ;;  %v761_v52 = vld [vmem:[%s3168_s1 + $0x30] sm:$0xff]  ;;  %v762_v53 = vld [vmem:[%s3168_s1 + $0x38] sm:$0xff]  ;;  %v763_v54 = vld [vmem:[%s3168_s1 + $0x40] sm:$0xff]  ;;  %s2633_s30 = smul.u32 336, %s679_s5 }
  0x75   : > { %v754_v24 = vld [vmem:[%s2447_s9 + $0x68] sm:$0xff]  ;;  %v753_v25 = vld [vmem:[%s2447_s9 + $0x60] sm:$0xff]  ;;  %v752_v27 = vld [vmem:[%s2447_s9 + $0x58] sm:$0xff]  ;;  %1838 = vmatprep.subr.mxu1 %v957_v26  ;;  %s2625_s19 = scalar_lea.vmem [#allocation3], %s1888_s7 }
  0x76   : > { %1783 = vmatprep.subr.mxu0 %v754_v24  ;;  %v751_v29 = vld [vmem:[%s2447_s9 + $0x50] sm:$0xff]  ;;  %1839 = vmatpush3.msra.mxu1 %v957_v26  ;;  %v750_v31 = vld [vmem:[%s2447_s9 + $0x48] sm:$0xff]  ;;  %v749_v33 = vld [vmem:[%s2447_s9 + $0x40] sm:$0xff]  ;;  %s2774_s17 = scalar_lea.vmem [#allocation2], %s2633_s30  ;;  %s2981_s14 = scalar_lea.vmem [#allocation4], %s2633_s30 }
  0x77   : > { %1784 = vmatpush3.msra.mxu0 %v754_v24  ;;  %1840 = vmatprep.subr.mxu1 %v956_v28  ;;  %v748_v35 = vld [vmem:[%s2447_s9 + $0x38] sm:$0xff]  ;;  %v747_v37 = vld [vmem:[%s2447_s9 + $0x30] sm:$0xff]  ;;  %v746_v39 = vld [vmem:[%s2447_s9 + $0x28] sm:$0xff] }
  0x78   : > { %1785 = vmatprep.subr.mxu0 %v753_v25  ;;  %1841 = vmatpush3.msra.mxu1 %v956_v28  ;;  %v745_v41 = vld [vmem:[%s2447_s9 + $0x20] sm:$0xff]  ;;  %v744_v43 = vld [vmem:[%s2447_s9 + $0x18] sm:$0xff]  ;;  %v743_v44 = vld [vmem:[%s2447_s9 + $0x10] sm:$0xff] }
  0x79   : > { %1786 = vmatpush3.msra.mxu0 %v753_v25  ;;  %1842 = vmatprep.subr.mxu1 %v955_v30  ;;  %v742_v45 = vld [vmem:[%s2447_s9 + $0x8] sm:$0xff]  ;;  %v741_v46 = vld [vmem:[%s2447_s9] sm:$0xff]  ;;  %v765_v56 = vld [vmem:[%s3168_s1 + $0x50] sm:$0xff] }
  0x7a   : > { %1787 = vmatprep.subr.mxu0 %v752_v27  ;;  %1843 = vmatpush3.msra.mxu1 %v955_v30  ;;  %v764_v55 = vld [vmem:[%s3168_s1 + $0x48] sm:$0xff]  ;;  %v766_v57 = vld [vmem:[%s3168_s1 + $0x58] sm:$0xff]  ;;  %v767_v58 = vld [vmem:[%s3168_s1 + $0x60] sm:$0xff] }
  0x7b   : > { %1788 = vmatpush3.msra.mxu0 %v752_v27  ;;  %1844 = vmatprep.subr.mxu1 %v954_v32  ;;  %v768_v59 = vld [vmem:[%s3168_s1 + $0x68] sm:$0xff]  ;;  %v947_v61 = vld [vmem:[%s3169_s2] sm:$0xff] }
  0x7c   : > { %1789 = vmatprep.subr.mxu0 %v751_v29  ;;  %1845 = vmatpush3.msra.mxu1 %v954_v32  ;;  %v948_v60 = vld [vmem:[%s3169_s2 + $0x8] sm:$0xff] }
  0x7d   : > { %1790 = vmatpush3.msra.mxu0 %v751_v29  ;;  %1846 = vmatprep.subr.mxu1 %v953_v34 }
  0x7e   : > { %1791 = vmatprep.subr.mxu0 %v750_v31  ;;  %1847 = vmatpush3.msra.mxu1 %v953_v34 }
  0x7f   : > { %1792 = vmatpush3.msra.mxu0 %v750_v31  ;;  %1848 = vmatprep.subr.mxu1 %v952_v36 }
  0x80   : > { %1793 = vmatprep.subr.mxu0 %v749_v33  ;;  %1849 = vmatpush3.msra.mxu1 %v952_v36 }
  0x81   : > { %1794 = vmatpush3.msra.mxu0 %v749_v33  ;;  %1850 = vmatprep.subr.mxu1 %v951_v38 }
  0x82   : > { %1795 = vmatprep.subr.mxu0 %v748_v35  ;;  %1851 = vmatpush3.msra.mxu1 %v951_v38 }
  0x83   : > { %1796 = vmatpush3.msra.mxu0 %v748_v35  ;;  %1852 = vmatprep.subr.mxu1 %v950_v40 }
  0x84   : > { %1797 = vmatprep.subr.mxu0 %v747_v37  ;;  %1853 = vmatpush3.msra.mxu1 %v950_v40 }
  0x85   : > { %1798 = vmatpush3.msra.mxu0 %v747_v37  ;;  %1854 = vmatprep.subr.mxu1 %v949_v42 }
  0x86   : > { %1799 = vmatprep.subr.mxu0 %v746_v39  ;;  %1855 = vmatpush3.msra.mxu1 %v949_v42 }
  0x87   : > { %1800 = vmatpush3.msra.mxu0 %v746_v39  ;;  %1856 = vmatprep.subr.mxu1 %v948_v60 }
  0x88   : > { %1801 = vmatprep.subr.mxu0 %v745_v41  ;;  %1857 = vmatpush3.msra.mxu1 %v948_v60 }
  0x89   : > { %1802 = vmatpush3.msra.mxu0 %v745_v41  ;;  %1858 = vmatprep.subr.mxu1 %v947_v61 }
  0x8a   : > { %1803 = vmatprep.subr.mxu0 %v744_v43  ;;  %1859 = vmatpush3.msra.mxu1 %v947_v61 }
  0x8b   : > { %1804 = vmatpush3.msra.mxu0 %v744_v43 }
  0x8c   : > { %1805 = vmatprep.subr.mxu0 %v743_v44 }
  0x8d   : > { %1806 = vmatpush3.msra.mxu0 %v743_v44 }
  0x8e   : > { %1807 = vmatprep.subr.mxu0 %v742_v45 }
  0x8f   : > { %1808 = vmatpush3.msra.mxu0 %v742_v45 }
  0x90   : > { %1809 = vmatprep.subr.mxu0 %v741_v46 }
  0x91   : > { %1810 = vmatpush3.msra.mxu0 %v741_v46 }
  0x92   : > { %1812 = vmatmul.mubr.msk.f32.vlgmr.msra.gmra.mxu0 %vm769_vm0, %v756_v47 }
  0x93   : > { %1814 = vmatprep.mubr.msk.f32.mxu0 %vm769_vm0, %v757_v48 }
  0x96   : > { %1815 = vmatmul.mubr.msk.f32.gmra.mxu0 %vm769_vm0, %v758_v49 }
  0x97   : > { %1817 = vmatprep.mubr.msk.f32.mxu0 %vm769_vm0, %v759_v50 }
  0x9a   : > { %1818 = vmatmul.mubr.msk.f32.gmra.mxu0 %vm769_vm0, %v760_v51 }
  0x9b   : > { %1820 = vmatprep.mubr.msk.f32.mxu0 %vm769_vm0, %v761_v52 }
  0x9e   : > { %1821 = vmatmul.mubr.msk.f32.gmra.mxu0 %vm769_vm0, %v762_v53 }
  0x9f   : > { %1823 = vmatprep.mubr.msk.f32.mxu0 %vm769_vm0, %v763_v54 }
  0xa2   : > { %1824 = vmatmul.mubr.msk.f32.gmra.mxu0 %vm769_vm0, %v764_v55 }
  0xa3   : > { %1826 = vmatprep.mubr.msk.f32.mxu0 %vm769_vm0, %v765_v56 }
  0xa6   : > { %1827 = vmatmul.mubr.msk.f32.gmra.mxu0 %vm769_vm0, %v766_v57 }
  0xa7   : > { %1829 = vmatprep.mubr.msk.f32.mxu0 %vm769_vm0, %v767_v58 }
  0xaa   : > { %1830 = vmatmul.mubr.msk.f32.gmra.mxu0 %vm769_vm0, %v768_v59 }
 0x152   : > { %v1813_v62 = vpop.f32.mrf.mxu0 }
 0x154   : > { %v878_v63 = vpop.f32.mrf.mxu0 }
 0x155   : > { %1860 = vmatprep.mubr.msk.f32.mxu1 %vm769_vm0, %v878_v63 }
 0x156   : > { %v1816_v0 = vpop.f32.mrf.mxu0  ;;  %1861 = vmatmul.mubr.msk.f32.vlgmr.msra.gmra.mxu1 %vm769_vm0, %v1813_v62 }
 0x158   : > { %v888_v1 = vpop.f32.mrf.mxu0 }
 0x159   : > { %1863 = vmatprep.mubr.msk.f32.mxu1 %vm769_vm0, %v888_v1 }
 0x15a   : > { %v1819_v2 = vpop.f32.mrf.mxu0  ;;  %1864 = vmatmul.mubr.msk.f32.gmra.mxu1 %vm769_vm0, %v1816_v0 }
 0x15c   : > { %v898_v3 = vpop.f32.mrf.mxu0 }
 0x15d   : > { %1866 = vmatprep.mubr.msk.f32.mxu1 %vm769_vm0, %v898_v3 }
 0x15e   : > { %v1822_v4 = vpop.f32.mrf.mxu0  ;;  %1867 = vmatmul.mubr.msk.f32.gmra.mxu1 %vm769_vm0, %v1819_v2 }
 0x160   : > { %v908_v5 = vpop.f32.mrf.mxu0 }
 0x161   : > { %1869 = vmatprep.mubr.msk.f32.mxu1 %vm769_vm0, %v908_v5 }
 0x162   : > { %v1825_v6 = vpop.f32.mrf.mxu0  ;;  %1870 = vmatmul.mubr.msk.f32.gmra.mxu1 %vm769_vm0, %v1822_v4 }
 0x164   : > { %v918_v7 = vpop.f32.mrf.mxu0 }
 0x165   : > { %1872 = vmatprep.mubr.msk.f32.mxu1 %vm769_vm0, %v918_v7 }
 0x166   : > { %v1828_v8 = vpop.f32.mrf.mxu0  ;;  %1873 = vmatmul.mubr.msk.f32.gmra.mxu1 %vm769_vm0, %v1825_v6 }
 0x168   : > { %v928_v9 = vpop.f32.mrf.mxu0 }
 0x169   : > { %1875 = vmatprep.mubr.msk.f32.mxu1 %vm769_vm0, %v928_v9 }
 0x16a   : > { %v1831_v10 = vpop.f32.mrf.mxu0  ;;  %1876 = vmatmul.mubr.msk.f32.gmra.mxu1 %vm769_vm0, %v1828_v8 }
 0x16c   : > { %v938_v11 = vpop.f32.mrf.mxu0 }
 0x16d   : > { %1878 = vmatprep.mubr.msk.f32.mxu1 %vm769_vm0, %v938_v11 }
 0x16e   : > { %1879 = vmatmul.mubr.msk.f32.gmra.mxu1 %vm769_vm0, %v1831_v10 }
 0x216   : > { %v1862_v12 = vpop.f32.mrf.mxu1 }
 0x217   : > { %v1139_v26 = vsel %vm769_vm0, %v1862_v12, inf }
 0x218   : > { %v1069_v13 = vpop.f32.mrf.mxu1 }
 0x219   : > { %v1138_v27 = vsel %vm769_vm0, %v1069_v13, inf }
 0x21a   : > { %v1865_v14 = vpop.f32.mrf.mxu1 }
 0x21b   : > { %v1141_v38 = vsel %vm769_vm0, %v1865_v14, inf }
 0x21c   : > { %v1079_v15 = vpop.f32.mrf.mxu1 }
 0x21d   : > { %v1140_v28 = vsel %vm769_vm0, %v1079_v15, inf }
 0x21e   : > { %v1868_v16 = vpop.f32.mrf.mxu1 }
 0x21f   : > { %v1144_v23 = vsel %vm769_vm0, %v1868_v16, inf }
 0x220   : > { %v1089_v17 = vpop.f32.mrf.mxu1  ;;  %v1145_v34 = vmin.f32 %v1139_v26, %v1144_v23 }
 0x221   : > { %v1142_v24 = vsel %vm769_vm0, %v1089_v17, inf }
 0x222   : > { %v1871_v18 = vpop.f32.mrf.mxu1  ;;  %v1143_v35 = vmin.f32 %v1138_v27, %v1142_v24 }
 0x223   : > { %v1148_v30 = vsel %vm769_vm0, %v1871_v18, inf }
 0x224   : > { %v1099_v19 = vpop.f32.mrf.mxu1  ;;  %v1149_v41 = vmin.f32 %v1141_v38, %v1148_v30 }
 0x225   : > { %v1146_v25 = vsel %vm769_vm0, %v1099_v19, inf }
 0x226   : > { %v1874_v20 = vpop.f32.mrf.mxu1  ;;  %v1147_v36 = vmin.f32 %v1140_v28, %v1146_v25 }
 0x227   : > { %v1152_v31 = vsel %vm769_vm0, %v1874_v20, inf }
 0x228   : > { %v1109_v21 = vpop.f32.mrf.mxu1  ;;  %v1153_v42 = vmin.f32 %v1145_v34, %v1152_v31 }
 0x229   : > { %v1150_v32 = vsel %vm769_vm0, %v1109_v21, inf }
 0x22a   : > { %v1877_v22 = vpop.f32.mrf.mxu1  ;;  %v1151_v43 = vmin.f32 %v1143_v35, %v1150_v32 }
 0x22b   : > { %v1156_v39 = vsel %vm769_vm0, %v1877_v22, inf }
 0x22c   : > { %v1119_v29 = vpop.f32.mrf.mxu1  ;;  %v1157_v47 = vmin.f32 %v1149_v41, %v1156_v39 }
 0x22d   : > { %v1154_v33 = vsel %vm769_vm0, %v1119_v29, inf }
 0x22e   : > { %v1880_v37 = vpop.f32.mrf.mxu1  ;;  %v1155_v44 = vmin.f32 %v1147_v36, %v1154_v33 }
 0x22f   : > { %v1160_v40 = vsel %vm769_vm0, %v1880_v37, inf }
 0x230   : > { %v1129_v45 = vpop.f32.mrf.mxu1  ;;  %v1161_v48 = vmin.f32 %v1153_v42, %v1160_v40  ;;  %v1163_v51 = vmin.f32 %v1155_v44, %v1157_v47 }
 0x231   : > { %v1158_v46 = vsel %vm769_vm0, %v1129_v45, inf }
 0x232   : > { %v1159_v49 = vmin.f32 %v1151_v43, %v1158_v46 }
 0x234   : > { %v1162_v50 = vmin.f32 %v1159_v49, %v1161_v48 }
 0x236   : > { %v1164_v52 = vmin.f32 %v1162_v50, %v1163_v51 }
 0x238   : > { %1165 = vmin.xlane.f32.xlu0 %v1164_v52 }
 0x2c1   : > { %v1166_v53 = vpop.xlane.xlu0 %1165 }
 0x2c2   : > { %v1167_v54 = vrot.slane %v1166_v53, 4 }
 0x2c4   : > { %v1168_v55 = vmin.f32 %v1166_v53, %v1167_v54 }
 0x2c6   : > { %v1169_v56 = vrot.slane %v1168_v55, 2 }
 0x2c8   : > { %v1170_v57 = vmin.f32 %v1168_v55, %v1169_v56 }
 0x2ca   : > { %v1171_v58 = vrot.slane %v1170_v57, 1 }
 0x2cc   : > { %v1172_v59 = vmin.f32 %v1170_v57, %v1171_v58 }
 0x2ce   : > { %1890 = vpush %v1172_v59  ;;  %v1284_v59 = vld [vmem:[%s2625_s19] sm:$0xff] }
 0x2ff   : > { %s1891_s12 = spop %1890 }
 0x300   : > { %v1174_v60 = vstv %s1891_s12 }
 0x301   : > { %v1175_v61 = vsub.f32 %v1069_v13, %v1174_v60  ;;  %v1176_v62 = vsub.f32 %v1862_v12, %v1174_v60  ;;  %v1177_v63 = vsub.f32 %v1079_v15, %v1174_v60  ;;  %v1178_v0 = vsub.f32 %v1865_v14, %v1174_v60 }
 0x302   : > { %v1179_v1 = vsub.f32 %v1089_v17, %v1174_v60  ;;  %v1180_v2 = vsub.f32 %v1868_v16, %v1174_v60  ;;  %v1181_v3 = vsub.f32 %v1099_v19, %v1174_v60  ;;  %v1182_v4 = vsub.f32 %v1871_v18, %v1174_v60 }
 0x303   : > { %v1183_v5 = vsub.f32 %v1109_v21, %v1174_v60  ;;  %v1184_v6 = vsub.f32 %v1874_v20, %v1174_v60  ;;  %v1185_v7 = vsub.f32 %v1119_v29, %v1174_v60  ;;  %v1186_v8 = vsub.f32 %v1877_v22, %v1174_v60 }
 0x304   : > { %v2579_v9 = vsub.f32 %v1129_v45, %v1174_v60  ;;  %v2581_v10 = vsub.f32 %v1880_v37, %v1174_v60  ;;  %v1189_v11 = vsel %vm769_vm0, %v1175_v61, -inf  ;;  %v1190_v23 = vsel %vm769_vm0, %v1176_v62, -inf  ;;  %v1285_v60 = vld [vmem:[%s2625_s19 + $0x8] sm:$0xff] }
 0x305   : > { %v1191_v12 = vsel %vm769_vm0, %v1177_v63, -inf  ;;  %v1192_v13 = vsel %vm769_vm0, %v1178_v0, -inf  ;;  %v1193_v14 = vsel %vm769_vm0, %v1179_v1, -inf  ;;  %v1195_v15 = vsel %vm769_vm0, %v1180_v2, -inf }
 0x306   : > { %v1194_v16 = vmax.f32 %v1189_v11, %v1193_v14  ;;  %v1196_v17 = vmax.f32 %v1190_v23, %v1195_v15  ;;  %v1197_v18 = vsel %vm769_vm0, %v1181_v3, -inf  ;;  %v1199_v19 = vsel %vm769_vm0, %v1182_v4, -inf  ;;  %v1296_v14 = vld [vmem:[%s2625_s19 + $0x60] sm:$0xff]  ;;  %v1297_v15 = vld [vmem:[%s2625_s19 + $0x68] sm:$0xff] }
 0x307   : > { %v1198_v20 = vmax.f32 %v1191_v12, %v1197_v18  ;;  %v1200_v21 = vmax.f32 %v1192_v13, %v1199_v19  ;;  %v1201_v22 = vsel %vm769_vm0, %v1183_v5, -inf  ;;  %v1203_v24 = vsel %vm769_vm0, %v1184_v6, -inf }
 0x308   : > { %v1202_v25 = vmax.f32 %v1194_v16, %v1201_v22  ;;  %v1204_v26 = vmax.f32 %v1196_v17, %v1203_v24  ;;  %v1205_v27 = vsel %vm769_vm0, %v1185_v7, -inf  ;;  %v1207_v28 = vsel %vm769_vm0, %v1186_v8, -inf  ;;  %v1298_v16 = vld [vmem:[%s2625_s19 + $0x70] sm:$0xff]  ;;  %v1299_v17 = vld [vmem:[%s2625_s19 + $0x78] sm:$0xff]  ;;  %v1300_v22 = vld [vmem:[%s2625_s19 + $0x80] sm:$0xff] }
 0x309   : > { %v1206_v29 = vmax.f32 %v1198_v20, %v1205_v27  ;;  %v1208_v30 = vmax.f32 %v1200_v21, %v1207_v28  ;;  %v1209_v31 = vsel %vm769_vm0, %v2579_v9, -inf  ;;  %v1211_v32 = vsel %vm769_vm0, %v2581_v10, -inf  ;;  %v1301_v24 = vld [vmem:[%s2625_s19 + $0x88] sm:$0xff] }
 0x30a   : > { %v1210_v33 = vmax.f32 %v1202_v25, %v1209_v31  ;;  %v1212_v34 = vmax.f32 %v1204_v26, %v1211_v32  ;;  %v1302_v25 = vld [vmem:[%s2625_s19 + $0x90] sm:$0xff]  ;;  %v1304_v31 = vld [vmem:[%s2625_s19 + $0xa0] sm:$0xff]  ;;  %v1305_v32 = vld [vmem:[%s2625_s19 + $0xa8] sm:$0xff] }
 0x30b   : > { %v1214_v36 = vmax.f32 %v1206_v29, %v1208_v30  ;;  %v1303_v30 = vld [vmem:[%s2625_s19 + $0x98] sm:$0xff] }
 0x30c   : > { %v1213_v35 = vmax.f32 %v1210_v33, %v1212_v34 }
 0x30e   : > { %v1215_v37 = vmax.f32 %v1213_v35, %v1214_v36 }
 0x310   : > { %1216 = vmax.xlane.f32.xlu0 %v1215_v37  ;;  %v1306_v37 = vld [vmem:[%s2625_s19 + $0xb0] sm:$0xff] }
 0x399   : > { %v1217_v38 = vpop.xlane.xlu0 %1216 }
 0x39a   : > { %v1218_v39 = vrot.slane %v1217_v38, 4 }
 0x39c   : > { %v1219_v40 = vmax.f32 %v1217_v38, %v1218_v39  ;;  %v1307_v38 = vld [vmem:[%s2625_s19 + $0xb8] sm:$0xff]  ;;  %v1308_v39 = vld [vmem:[%s2625_s19 + $0xc0] sm:$0xff] }
 0x39e   : > { %v1220_v41 = vrot.slane %v1219_v40, 2 }
 0x3a0   : > { %v1221_v42 = vmax.f32 %v1219_v40, %v1220_v41 }
 0x3a2   : > { %v1222_v43 = vrot.slane %v1221_v42, 1 }
 0x3a4   : > { %v1223_v44 = vmax.f32 %v1221_v42, %v1222_v43 }
 0x3a6   : > { %1892 = vpush %v1223_v44  ;;  %v1309_v44 = vld [vmem:[%s2625_s19 + $0xc8] sm:$0xff] }
 0x3d7   : > { %s1893_s9 = spop %1892 }
 0x3d8   : > { %s1225_s29 = sadd.f32 1e-08, %s1893_s9 }
 0x3da   : > { %v1226_v45 = vstv %s1225_s29 }
 0x3db   : > { %2001 = vrcp.f32 %v1226_v45  ;;  %v1310_v45 = vld [vmem:[%s2625_s19 + $0xd0] sm:$0xff] }
 0x3e8   : > { %v2002_v46 = vpop.eup %2001 }
 0x3e9   : > { %v2601_v47 = vmul.f32 %v2002_v46, %v1175_v61  ;;  %v2603_v48 = vmul.f32 %v2002_v46, %v1176_v62  ;;  %v2605_v49 = vmul.f32 %v2002_v46, %v1177_v63  ;;  %v2607_v50 = vmul.f32 %v2002_v46, %v1178_v0  ;;  %v1286_v61 = vld [vmem:[%s2625_s19 + $0x10] sm:$0xff]  ;;  %v1287_v62 = vld [vmem:[%s2625_s19 + $0x18] sm:$0xff] }
 0x3ea   : > { %v2609_v51 = vmul.f32 %v2002_v46, %v1179_v1  ;;  %v2611_v52 = vmul.f32 %v2002_v46, %v1180_v2  ;;  %v2613_v53 = vmul.f32 %v2002_v46, %v1181_v3  ;;  %v2615_v54 = vmul.f32 %v2002_v46, %v1182_v4  ;;  %v1288_v1 = vld [vmem:[%s2625_s19 + $0x20] sm:$0xff]  ;;  %v1289_v2 = vld [vmem:[%s2625_s19 + $0x28] sm:$0xff]  ;;  %v1290_v3 = vld [vmem:[%s2625_s19 + $0x30] sm:$0xff] }
 0x3eb   : > { %v2617_v55 = vmul.f32 %v2002_v46, %v1183_v5  ;;  %v2619_v56 = vmul.f32 %v2002_v46, %v1184_v6  ;;  %v2621_v57 = vmul.f32 %v2002_v46, %v1185_v7  ;;  %v2623_v58 = vmul.f32 %v2002_v46, %v1186_v8  ;;  %v1291_v4 = vld [vmem:[%s2625_s19 + $0x38] sm:$0xff]  ;;  %v1292_v7 = vld [vmem:[%s2625_s19 + $0x40] sm:$0xff]  ;;  %v1293_v8 = vld [vmem:[%s2625_s19 + $0x48] sm:$0xff] }
 0x3ec   : > { %v2636_v63 = vmul.f32 %v2002_v46, %v2579_v9  ;;  %v2639_v0 = vmul.f32 %v2002_v46, %v2581_v10  ;;  %v2646_v5 = vsub.f32 1.0, %v2601_v47  ;;  %v2649_v6 = vsub.f32 1.0, %v2603_v48  ;;  %v1294_v9 = vld [vmem:[%s2625_s19 + $0x50] sm:$0xff]  ;;  %v1295_v10 = vld [vmem:[%s2625_s19 + $0x58] sm:$0xff] }
 0x3ed   : > { %v2656_v11 = vsub.f32 1.0, %v2605_v49  ;;  %v2659_v23 = vsub.f32 1.0, %v2607_v50  ;;  %v2662_v12 = vsub.f32 1.0, %v2609_v51  ;;  %v2665_v13 = vsub.f32 1.0, %v2611_v52  ;;  %v1311_v46 = vld [vmem:[%s2625_s19 + $0xd8] sm:$0xff] }
 0x3ee   : > { %v2672_v18 = vsub.f32 1.0, %v2613_v53  ;;  %v2675_v19 = vsub.f32 1.0, %v2615_v54  ;;  %v2678_v20 = vsub.f32 1.0, %v2617_v55  ;;  %v2681_v21 = vsub.f32 1.0, %v2619_v56 }
 0x3ef   : > { %v2687_v26 = vsub.f32 1.0, %v2621_v57  ;;  %v2690_v27 = vsub.f32 1.0, %v2623_v58  ;;  %v2693_v28 = vsub.f32 1.0, %v2636_v63  ;;  %v2696_v29 = vsub.f32 1.0, %v2639_v0 }
 0x3f0   : > { %v2702_v33 = vmul.f32 %v2646_v5, %v1284_v59  ;;  %v2705_v34 = vmul.f32 %v2649_v6, %v1285_v60  ;;  %v2708_v35 = vmul.f32 %v2656_v11, %v1286_v61  ;;  %v2711_v36 = vmul.f32 %v2659_v23, %v1287_v62 }
 0x3f1   : > { %v2717_v40 = vmul.f32 %v2662_v12, %v1288_v1  ;;  %v2720_v41 = vmul.f32 %v2665_v13, %v1289_v2  ;;  %v2723_v42 = vmul.f32 %v2672_v18, %v1290_v3  ;;  %v2726_v43 = vmul.f32 %v2675_v19, %v1291_v4  ;;  %v1312_v1 = vld [vmem:[%s2625_s19 + $0xe0] sm:$0xff]  ;;  %v1313_v2 = vld [vmem:[%s2625_s19 + $0xe8] sm:$0xff]  ;;  %v1314_v3 = vld [vmem:[%s2625_s19 + $0xf0] sm:$0xff] }
 0x3f2   : > { %3183 = vst [vmem:[#allocation12_spill] sm:$0xff] %v2705_v34  ;;  %3184 = vst [vmem:[#allocation13_spill] sm:$0xff] %v2708_v35  ;;  %v2732_v59 = vmul.f32 %v2678_v20, %v1292_v7  ;;  %v2735_v60 = vmul.f32 %v2681_v21, %v1293_v8  ;;  %v2738_v61 = vmul.f32 %v2687_v26, %v1294_v9  ;;  %v1281_v35 = vld [vmem:[%s2774_s17 + $0x138] sm:$0xff] }
 0x3f3   : > { %3185 = vst [vmem:[#allocation14_spill] sm:$0xff] %v2711_v36  ;;  %3186 = vst [vmem:[#allocation15_spill] sm:$0xff] %v2717_v40  ;;  %v2741_v62 = vmul.f32 %v2690_v27, %v1295_v10  ;;  %v2747_v4 = vmul.f32 %v2693_v28, %v1296_v14  ;;  %v2750_v7 = vmul.f32 %v2696_v29, %v1297_v15  ;;  %v1315_v10 = vld [vmem:[%s2625_s19 + $0xf8] sm:$0xff]  ;;  %v1255_v40 = vld [vmem:[%s2774_s17 + $0x68] sm:$0xff] }
 0x3f4   : > { %3187 = vst [vmem:[#allocation16_spill] sm:$0xff] %v2720_v41  ;;  %3188 = vst [vmem:[#allocation17_spill] sm:$0xff] %v2723_v42  ;;  %v2753_v8 = vmul.f32 %v2646_v5, %v1298_v16  ;;  %v2756_v9 = vmul.f32 %v2649_v6, %v1299_v17  ;;  %v2768_v14 = vmul.f32 %v2662_v12, %v1302_v25  ;;  %v1242_v16 = vld [vmem:[%s2774_s17] sm:$0xff]  ;;  %v1243_v17 = vld [vmem:[%s2774_s17 + $0x8] sm:$0xff] }
 0x3f5   : > { %3189 = vst [vmem:[#allocation18_spill] sm:$0xff] %v2726_v43  ;;  %3190 = vst [vmem:[#allocation19_spill] sm:$0xff] %v2732_v59  ;;  %v2765_v59 = vmul.f32 %v2659_v23, %v1301_v24  ;;  %v2771_v15 = vmul.f32 %v2665_v13, %v1303_v30  ;;  %v1319_v24 = vld [vmem:[%s2625_s19 + $0x118] sm:$0xff]  ;;  %v1320_v25 = vld [vmem:[%s2625_s19 + $0x120] sm:$0xff]  ;;  %v2785_v30 = vmul.f32 %v2675_v19, %v1305_v32 }
 0x3f6   : > { %3191 = vst [vmem:[#allocation20_spill] sm:$0xff] %v2735_v60  ;;  %3192 = vst [vmem:[#allocation21_spill] sm:$0xff] %v2738_v61  ;;  %v1317_v61 = vld [vmem:[%s2625_s19 + $0x108] sm:$0xff]  ;;  %v2762_v60 = vmul.f32 %v2656_v11, %v1300_v22  ;;  %v1318_v22 = vld [vmem:[%s2625_s19 + $0x110] sm:$0xff]  ;;  %v2801_v32 = vmul.f32 %v2687_v26, %v1308_v39 }
 0x3f7   : > { %3193 = vst [vmem:[#allocation22_spill] sm:$0xff] %v2741_v62  ;;  %3194 = vst [vmem:[#allocation23_spill] sm:$0xff] %v2747_v4  ;;  %v1316_v62 = vld [vmem:[%s2625_s19 + $0x100] sm:$0xff]  ;;  %v1323_v4 = vld [vmem:[%s2625_s19 + $0x138] sm:$0xff] }
 0x3f8   : > { %3195 = vst [vmem:[#allocation24_spill] sm:$0xff] %v2750_v7  ;;  %3196 = vst [vmem:[#allocation25_spill] sm:$0xff] %v2753_v8  ;;  %v1246_v8 = vld [vmem:[%s2774_s17 + $0x20] sm:$0xff]  ;;  %v1247_v7 = vld [vmem:[%s2774_s17 + $0x28] sm:$0xff]  ;;  %v2835_v36 = vmul.f32 %v2662_v12, %v1316_v62 }
 0x3f9   : > { %3197 = vst [vmem:[#allocation26_spill] sm:$0xff] %v2756_v9  ;;  %3198 = vst [vmem:[#allocation27_spill] sm:$0xff] %v2762_v60  ;;  %v1244_v60 = vld [vmem:[%s2774_s17 + $0x10] sm:$0xff]  ;;  %v1245_v9 = vld [vmem:[%s2774_s17 + $0x18] sm:$0xff] }
 0x3fa   : > { %3199 = vst [vmem:[#allocation28_spill] sm:$0xff] %v2765_v59  ;;  %3200 = vst [vmem:[#allocation29_spill] sm:$0xff] %v2768_v14  ;;  %v2782_v14 = vmul.f32 %v2672_v18, %v1304_v31  ;;  %v2791_v59 = vmul.f32 %v2681_v21, %v1307_v38  ;;  %v1321_v31 = vld [vmem:[%s2625_s19 + $0x128] sm:$0xff]  ;;  %v2807_v38 = vmul.f32 %v2693_v28, %v1310_v45  ;;  %v1250_v43 = vld [vmem:[%s2774_s17 + $0x40] sm:$0xff] }
 0x3fb   : > { %3201 = vst [vmem:[#allocation30_spill] sm:$0xff] %v2771_v15  ;;  %3203 = vst [vmem:[#allocation32_spill] sm:$0xff] %v2785_v30  ;;  %v2788_v15 = vmul.f32 %v2678_v20, %v1306_v37  ;;  %v2804_v37 = vmul.f32 %v2690_v27, %v1309_v44  ;;  %v1249_v30 = vld [vmem:[%s2774_s17 + $0x38] sm:$0xff]  ;;  %v1251_v42 = vld [vmem:[%s2774_s17 + $0x48] sm:$0xff]  ;;  %v2819_v44 = vmul.f32 %v2646_v5, %v1312_v1 }
 0x3fc   : > { %3202 = vst [vmem:[#allocation31_spill] sm:$0xff] %v2782_v14  ;;  %3205 = vst [vmem:[#allocation34_spill] sm:$0xff] %v2791_v59  ;;  %v1322_v14 = vld [vmem:[%s2625_s19 + $0x130] sm:$0xff]  ;;  %v2810_v59 = vmul.f32 %v2696_v29, %v1311_v46  ;;  %v1324_v41 = vld [vmem:[%s2625_s19 + $0x140] sm:$0xff]  ;;  %v2825_v45 = vmul.f32 %v2656_v11, %v1314_v3  ;;  %v2828_v46 = vmul.f32 %v2659_v23, %v1315_v10 }
 0x3fd   : > { %3204 = vst [vmem:[#allocation33_spill] sm:$0xff] %v2788_v15  ;;  %3206 = vst [vmem:[#allocation35_spill] sm:$0xff] %v2801_v32  ;;  %v1248_v15 = vld [vmem:[%s2774_s17 + $0x30] sm:$0xff]  ;;  %v1325_v39 = vld [vmem:[%s2625_s19 + $0x148] sm:$0xff]  ;;  %v2838_v5 = vmul.f32 %v2665_v13, %v1317_v61  ;;  %v2844_v11 = vmul.f32 %v2675_v19, %v1319_v24  ;;  %v2851_v10 = vmul.f32 %v2678_v20, %v1320_v25 }
 0x3fe   : > { %3207 = vst [vmem:[#allocation36_spill] sm:$0xff] %v2804_v37  ;;  %3208 = vst [vmem:[#allocation37_spill] sm:$0xff] %v2807_v38  ;;  %v2822_v37 = vmul.f32 %v2649_v6, %v1313_v2  ;;  %v1253_v38 = vld [vmem:[%s2774_s17 + $0x58] sm:$0xff]  ;;  %v1254_v32 = vld [vmem:[%s2774_s17 + $0x60] sm:$0xff]  ;;  %v2841_v6 = vmul.f32 %v2672_v18, %v1318_v22  ;;  %v2854_v12 = vmul.f32 %v2681_v21, %v1321_v31 }
 0x3ff   : > { %3209 = vst [vmem:[#allocation38_spill] sm:$0xff] %v2810_v59  ;;  %3210 = vst [vmem:[#allocation39_spill] sm:$0xff] %v2819_v44  ;;  %v1252_v59 = vld [vmem:[%s2774_s17 + $0x50] sm:$0xff]  ;;  %v1257_v1 = vld [vmem:[%s2774_s17 + $0x78] sm:$0xff]  ;;  %v2857_v13 = vmul.f32 %v2687_v26, %v1322_v14  ;;  %v2860_v18 = vmul.f32 %v2690_v27, %v1323_v4  ;;  %v2866_v22 = vmul.f32 %v2693_v28, %v1324_v41 }
 0x400   : > { %3211 = vst [vmem:[#allocation40_spill] sm:$0xff] %v2822_v37  ;;  %3212 = vst [vmem:[#allocation41_spill] sm:$0xff] %v2825_v45  ;;  %v1256_v23 = vld [vmem:[%s2774_s17 + $0x70] sm:$0xff]  ;;  %v1258_v2 = vld [vmem:[%s2774_s17 + $0x80] sm:$0xff]  ;;  %v2869_v20 = vmul.f32 %v2696_v29, %v1325_v39  ;;  %v2872_v21 = vmul.f32 %v1242_v16, %v2601_v47  ;;  %v2875_v26 = vmul.f32 %v1243_v17, %v2603_v48 }
 0x401   : > { %3213 = vst [vmem:[#allocation42_spill] sm:$0xff] %v2828_v46  ;;  %3214 = vst [vmem:[#allocation43_spill] sm:$0xff] %v2835_v36  ;;  %v1259_v3 = vld [vmem:[%s2774_s17 + $0x88] sm:$0xff]  ;;  %v1260_v19 = vld [vmem:[%s2774_s17 + $0x90] sm:$0xff]  ;;  %v1398_v24 = vmul.f32 %v1244_v60, %v2605_v49  ;;  %v1399_v28 = vmul.f32 %v1245_v9, %v2607_v50  ;;  %v1400_v41 = vmul.f32 %v1246_v8, %v2609_v51 }
 0x402   : > { %3215 = vst [vmem:[#allocation44_spill] sm:$0xff] %v2838_v5  ;;  %3216 = vst [vmem:[#allocation45_spill] sm:$0xff] %v2841_v6  ;;  %v1261_v61 = vld [vmem:[%s2774_s17 + $0x98] sm:$0xff]  ;;  %v1262_v62 = vld [vmem:[%s2774_s17 + $0xa0] sm:$0xff]  ;;  %v1401_v29 = vmul.f32 %v1247_v7, %v2611_v52  ;;  %v1402_v31 = vmul.f32 %v1248_v15, %v2613_v53  ;;  %v1403_v39 = vmul.f32 %v1249_v30, %v2615_v54 }
 0x403   : > { %3217 = vst [vmem:[#allocation46_spill] sm:$0xff] %v2844_v11  ;;  %3218 = vst [vmem:[#allocation47_spill] sm:$0xff] %v2851_v10  ;;  %v1263_v27 = vld [vmem:[%s2774_s17 + $0xa8] sm:$0xff]  ;;  %v1264_v4 = vld [vmem:[%s2774_s17 + $0xb0] sm:$0xff]  ;;  %v1405_v60 = vmul.f32 %v1251_v42, %v2619_v56  ;;  %v1406_v7 = vmul.f32 %v1252_v59, %v2621_v57  ;;  %v1409_v15 = vmul.f32 %v1255_v40, %v2639_v0 }
 0x404   : > { %3219 = vst [vmem:[#allocation48_spill] sm:$0xff] %v2854_v12  ;;  %3220 = vst [vmem:[#allocation49_spill] sm:$0xff] %v2857_v13  ;;  %v1265_v14 = vld [vmem:[%s2774_s17 + $0xb8] sm:$0xff]  ;;  %v1266_v16 = vld [vmem:[%s2774_s17 + $0xc0] sm:$0xff]  ;;  %v1408_v13 = vmul.f32 %v1254_v32, %v2636_v63  ;;  %v1410_v42 = vmul.f32 %v1256_v23, %v2601_v47  ;;  %v1411_v10 = vmul.f32 %v1257_v1, %v2603_v48 }
 0x405   : > { %3221 = vst [vmem:[#allocation50_spill] sm:$0xff] %v2860_v18  ;;  %3222 = vst [vmem:[#allocation51_spill] sm:$0xff] %v2866_v22  ;;  %v1267_v25 = vld [vmem:[%s2774_s17 + $0xc8] sm:$0xff]  ;;  %v1268_v17 = vld [vmem:[%s2774_s17 + $0xd0] sm:$0xff]  ;;  %v1407_v18 = vmul.f32 %v1253_v38, %v2623_v58  ;;  %v1412_v11 = vmul.f32 %v1258_v2, %v2605_v49  ;;  %v1413_v59 = vmul.f32 %v1259_v3, %v2607_v50 }
 0x406   : > { %3223 = vst [vmem:[#allocation52_spill] sm:$0xff] %v2869_v20  ;;  %3224 = vst [vmem:[#allocation53_spill] sm:$0xff] %v2875_v26  ;;  %v1404_v20 = vmul.f32 %v1250_v43, %v2617_v55  ;;  %v1269_v9 = vld [vmem:[%s2774_s17 + $0xd8] sm:$0xff]  ;;  %v1270_v8 = vld [vmem:[%s2774_s17 + $0xe0] sm:$0xff]  ;;  %v1414_v40 = vmul.f32 %v1260_v19, %v2609_v51  ;;  %v1415_v5 = vmul.f32 %v1261_v61, %v2611_v52 }
 0x407   : > { %v1271_v22 = vld [vmem:[%s2774_s17 + $0xe8] sm:$0xff]  ;;  %v1272_v30 = vld [vmem:[%s2774_s17 + $0xf0] sm:$0xff]  ;;  %v1273_v43 = vld [vmem:[%s2774_s17 + $0xf8] sm:$0xff]  ;;  %v1416_v36 = vmul.f32 %v1262_v62, %v2613_v53  ;;  %v1417_v23 = vmul.f32 %v1263_v27, %v2615_v54  ;;  %v1418_v2 = vmul.f32 %v1264_v4, %v2617_v55  ;;  %v1419_v3 = vmul.f32 %v1265_v14, %v2619_v56 }
 0x408   : > { %v1274_v12 = vld [vmem:[%s2774_s17 + $0x100] sm:$0xff]  ;;  %v1275_v38 = vld [vmem:[%s2774_s17 + $0x108] sm:$0xff]  ;;  %v1276_v32 = vld [vmem:[%s2774_s17 + $0x110] sm:$0xff]  ;;  %v1420_v37 = vmul.f32 %v1266_v16, %v2621_v57  ;;  %v1421_v44 = vmul.f32 %v1267_v25, %v2623_v58  ;;  %v1422_v61 = vmul.f32 %v1268_v17, %v2636_v63  ;;  %v1423_v62 = vmul.f32 %v1269_v9, %v2639_v0 }
 0x409   : > { %v1277_v6 = vld [vmem:[%s2774_s17 + $0x118] sm:$0xff]  ;;  %v1278_v46 = vld [vmem:[%s2774_s17 + $0x120] sm:$0xff]  ;;  %v1279_v1 = vld [vmem:[%s2774_s17 + $0x128] sm:$0xff]  ;;  %v2925_v27 = vmul.f32 %v1270_v8, %v2601_v47  ;;  %v2928_v34 = vmul.f32 %v1271_v22, %v2603_v48  ;;  %v2931_v4 = vmul.f32 %v1272_v30, %v2605_v49  ;;  %v2934_v14 = vmul.f32 %v1273_v43, %v2607_v50 }
 0x40a   : > { %v1280_v45 = vld [vmem:[%s2774_s17 + $0x130] sm:$0xff]  ;;  %v1282_v26 = vld [vmem:[%s2774_s17 + $0x140] sm:$0xff]  ;;  %v1283_v19 = vld [vmem:[%s2774_s17 + $0x148] sm:$0xff]  ;;  %v2937_v16 = vmul.f32 %v1274_v12, %v2609_v51  ;;  %v2940_v25 = vmul.f32 %v1275_v38, %v2611_v52  ;;  %v2943_v17 = vmul.f32 %v1276_v32, %v2613_v53  ;;  %v2946_v47 = vmul.f32 %v1277_v6, %v2615_v54 }
 0x40b   : > { %v2949_v48 = vmul.f32 %v1278_v46, %v2617_v55  ;;  %v2952_v49 = vmul.f32 %v1279_v1, %v2619_v56  ;;  %v2955_v50 = vmul.f32 %v1280_v45, %v2621_v57  ;;  %v2958_v51 = vmul.f32 %v1281_v35, %v2623_v58  ;;  %v3225_v55 = vld [vmem:[#allocation12_spill] sm:$0xff]  ;;  %v3227_v6 = vld [vmem:[#allocation13_spill] sm:$0xff]  ;;  %v3228_v57 = vld [vmem:[#allocation14_spill] sm:$0xff] }
 0x40c   : > { %v2961_v52 = vmul.f32 %v1282_v26, %v2636_v63  ;;  %v2964_v53 = vmul.f32 %v1283_v19, %v2639_v0  ;;  %v1438_v54 = vadd.f32 %v2872_v21, %v2702_v33  ;;  %v1440_v12 = vadd.f32 %v1398_v24, %v3227_v6  ;;  %v3229_v22 = vld [vmem:[#allocation15_spill] sm:$0xff]  ;;  %v3230_v58 = vld [vmem:[#allocation16_spill] sm:$0xff]  ;;  %v3231_v8 = vld [vmem:[#allocation17_spill] sm:$0xff] }
 0x40d   : > { %v3226_v46 = vld [vmem:[#allocation53_spill] sm:$0xff]  ;;  %v1441_v45 = vadd.f32 %v1399_v28, %v3228_v57  ;;  %v1442_v9 = vadd.f32 %v1400_v41, %v3229_v22  ;;  %v1443_v35 = vadd.f32 %v1401_v29, %v3230_v58  ;;  %v1444_v63 = vadd.f32 %v1402_v31, %v3231_v8  ;;  %v3232_v26 = vld [vmem:[#allocation18_spill] sm:$0xff]  ;;  %v3233_v0 = vld [vmem:[#allocation19_spill] sm:$0xff] }
 0x40e   : > { %v1439_v56 = vadd.f32 %v3226_v46, %v3225_v55  ;;  %v1445_v30 = vadd.f32 %v1403_v39, %v3232_v26  ;;  %v1446_v43 = vadd.f32 %v1404_v20, %v3233_v0  ;;  %v3234_v38 = vld [vmem:[#allocation20_spill] sm:$0xff]  ;;  %v3235_v33 = vld [vmem:[#allocation21_spill] sm:$0xff]  ;;  %v3236_v1 = vld [vmem:[#allocation22_spill] sm:$0xff]  ;;  %1480 = vst.msk [vmem:[%s2981_s14] sm:$0xff] %vm769_vm0, %v1438_v54 }
 0x40f   : > { %v1447_v32 = vadd.f32 %v1405_v60, %v3234_v38  ;;  %v1448_v21 = vadd.f32 %v1406_v7, %v3235_v33  ;;  %v1449_v19 = vadd.f32 %v1407_v18, %v3236_v1  ;;  %1482 = vst.msk [vmem:[%s2981_s14 + $0x10] sm:$0xff] %vm769_vm0, %v1440_v12  ;;  %1483 = vst.msk [vmem:[%s2981_s14 + $0x18] sm:$0xff] %vm769_vm0, %v1441_v45  ;;  %v3237_v18 = vld [vmem:[#allocation23_spill] sm:$0xff]  ;;  %v3238_v24 = vld [vmem:[#allocation24_spill] sm:$0xff] }
 0x410   : > { %1481 = vst.msk [vmem:[%s2981_s14 + $0x8] sm:$0xff] %vm769_vm0, %v1439_v56  ;;  %v1450_v20 = vadd.f32 %v1408_v13, %v3237_v18  ;;  %v1451_v28 = vadd.f32 %v1409_v15, %v3238_v24  ;;  %v3239_v41 = vld [vmem:[#allocation25_spill] sm:$0xff]  ;;  %v3240_v31 = vld [vmem:[#allocation26_spill] sm:$0xff]  ;;  %1484 = vst.msk [vmem:[%s2981_s14 + $0x20] sm:$0xff] %vm769_vm0, %v1442_v9 }
 0x411   : > { %v1452_v29 = vadd.f32 %v1410_v42, %v3239_v41  ;;  %v1453_v39 = vadd.f32 %v1411_v10, %v3240_v31  ;;  %1485 = vst.msk [vmem:[%s2981_s14 + $0x28] sm:$0xff] %vm769_vm0, %v1443_v35  ;;  %1486 = vst.msk [vmem:[%s2981_s14 + $0x30] sm:$0xff] %vm769_vm0, %v1444_v63  ;;  %v3241_v60 = vld [vmem:[#allocation27_spill] sm:$0xff]  ;;  %v3242_v7 = vld [vmem:[#allocation28_spill] sm:$0xff] }
 0x412   : > { %1487 = vst.msk [vmem:[%s2981_s14 + $0x38] sm:$0xff] %vm769_vm0, %v1445_v30  ;;  %v1454_v13 = vadd.f32 %v1412_v11, %v3241_v60  ;;  %v1455_v15 = vadd.f32 %v1413_v59, %v3242_v7  ;;  %v3243_v54 = vld [vmem:[#allocation29_spill] sm:$0xff]  ;;  %v3244_v55 = vld [vmem:[#allocation30_spill] sm:$0xff]  ;;  %1488 = vst.msk [vmem:[%s2981_s14 + $0x40] sm:$0xff] %vm769_vm0, %v1446_v43 }
 0x413   : > { %v1456_v42 = vadd.f32 %v1414_v40, %v3243_v54  ;;  %v1457_v10 = vadd.f32 %v1415_v5, %v3244_v55  ;;  %1489 = vst.msk [vmem:[%s2981_s14 + $0x48] sm:$0xff] %vm769_vm0, %v1447_v32  ;;  %1490 = vst.msk [vmem:[%s2981_s14 + $0x50] sm:$0xff] %vm769_vm0, %v1448_v21  ;;  %v3245_v46 = vld [vmem:[#allocation31_spill] sm:$0xff]  ;;  %v3246_v56 = vld [vmem:[#allocation32_spill] sm:$0xff] }
 0x414   : > { %1491 = vst.msk [vmem:[%s2981_s14 + $0x58] sm:$0xff] %vm769_vm0, %v1449_v19  ;;  %v1458_v11 = vadd.f32 %v1416_v36, %v3245_v46  ;;  %v1459_v59 = vadd.f32 %v1417_v23, %v3246_v56  ;;  %v3247_v6 = vld [vmem:[#allocation33_spill] sm:$0xff]  ;;  %v3248_v12 = vld [vmem:[#allocation34_spill] sm:$0xff]  ;;  %1492 = vst.msk [vmem:[%s2981_s14 + $0x60] sm:$0xff] %vm769_vm0, %v1450_v20 }
 0x415   : > { %v1460_v40 = vadd.f32 %v1418_v2, %v3247_v6  ;;  %v1461_v5 = vadd.f32 %v1419_v3, %v3248_v12  ;;  %1493 = vst.msk [vmem:[%s2981_s14 + $0x68] sm:$0xff] %vm769_vm0, %v1451_v28  ;;  %1494 = vst.msk [vmem:[%s2981_s14 + $0x70] sm:$0xff] %vm769_vm0, %v1452_v29  ;;  %v3249_v57 = vld [vmem:[#allocation35_spill] sm:$0xff]  ;;  %v3250_v45 = vld [vmem:[#allocation36_spill] sm:$0xff] }
 0x416   : > { %1495 = vst.msk [vmem:[%s2981_s14 + $0x78] sm:$0xff] %vm769_vm0, %v1453_v39  ;;  %v1462_v36 = vadd.f32 %v1420_v37, %v3249_v57  ;;  %v1463_v23 = vadd.f32 %v1421_v44, %v3250_v45  ;;  %v3251_v22 = vld [vmem:[#allocation37_spill] sm:$0xff]  ;;  %v3252_v9 = vld [vmem:[#allocation38_spill] sm:$0xff]  ;;  %1496 = vst.msk [vmem:[%s2981_s14 + $0x80] sm:$0xff] %vm769_vm0, %v1454_v13 }
 0x417   : > { %v1464_v2 = vadd.f32 %v1422_v61, %v3251_v22  ;;  %v1465_v3 = vadd.f32 %v1423_v62, %v3252_v9  ;;  %1497 = vst.msk [vmem:[%s2981_s14 + $0x88] sm:$0xff] %vm769_vm0, %v1455_v15  ;;  %1498 = vst.msk [vmem:[%s2981_s14 + $0x90] sm:$0xff] %vm769_vm0, %v1456_v42  ;;  %v3253_v58 = vld [vmem:[#allocation39_spill] sm:$0xff]  ;;  %v3254_v44 = vld [vmem:[#allocation40_spill] sm:$0xff] }
 0x418   : > { %1499 = vst.msk [vmem:[%s2981_s14 + $0x98] sm:$0xff] %vm769_vm0, %v1457_v10  ;;  %v1466_v37 = vadd.f32 %v2925_v27, %v3253_v58  ;;  %v1467_v61 = vadd.f32 %v2928_v34, %v3254_v44  ;;  %v3255_v35 = vld [vmem:[#allocation41_spill] sm:$0xff]  ;;  %v3256_v8 = vld [vmem:[#allocation42_spill] sm:$0xff]  ;;  %1500 = vst.msk [vmem:[%s2981_s14 + $0xa0] sm:$0xff] %vm769_vm0, %v1458_v11 }
 0x419   : > { %v1468_v62 = vadd.f32 %v2931_v4, %v3255_v35  ;;  %v1469_v63 = vadd.f32 %v2934_v14, %v3256_v8  ;;  %1501 = vst.msk [vmem:[%s2981_s14 + $0xa8] sm:$0xff] %vm769_vm0, %v1459_v59  ;;  %1502 = vst.msk [vmem:[%s2981_s14 + $0xb0] sm:$0xff] %vm769_vm0, %v1460_v40  ;;  %v3257_v27 = vld [vmem:[#allocation43_spill] sm:$0xff]  ;;  %v3258_v26 = vld [vmem:[#allocation44_spill] sm:$0xff] }
 0x41a   : > { %1503 = vst.msk [vmem:[%s2981_s14 + $0xb8] sm:$0xff] %vm769_vm0, %v1461_v5  ;;  %v1470_v34 = vadd.f32 %v2937_v16, %v3257_v27  ;;  %v1471_v4 = vadd.f32 %v2940_v25, %v3258_v26  ;;  %v3259_v30 = vld [vmem:[#allocation45_spill] sm:$0xff]  ;;  %v3260_v0 = vld [vmem:[#allocation46_spill] sm:$0xff]  ;;  %1504 = vst.msk [vmem:[%s2981_s14 + $0xc0] sm:$0xff] %vm769_vm0, %v1462_v36 }
 0x41b   : > { %v1472_v14 = vadd.f32 %v2943_v17, %v3259_v30  ;;  %v1473_v43 = vadd.f32 %v2946_v47, %v3260_v0  ;;  %1505 = vst.msk [vmem:[%s2981_s14 + $0xc8] sm:$0xff] %vm769_vm0, %v1463_v23  ;;  %1506 = vst.msk [vmem:[%s2981_s14 + $0xd0] sm:$0xff] %vm769_vm0, %v1464_v2  ;;  %v3261_v16 = vld [vmem:[#allocation47_spill] sm:$0xff]  ;;  %v3262_v17 = vld [vmem:[#allocation48_spill] sm:$0xff] }
 0x41c   : > { %1507 = vst.msk [vmem:[%s2981_s14 + $0xd8] sm:$0xff] %vm769_vm0, %v1465_v3  ;;  %v1474_v25 = vadd.f32 %v2949_v48, %v3261_v16  ;;  %v1475_v47 = vadd.f32 %v2952_v49, %v3262_v17  ;;  %v3263_v38 = vld [vmem:[#allocation49_spill] sm:$0xff]  ;;  %v3264_v33 = vld [vmem:[#allocation50_spill] sm:$0xff]  ;;  %1508 = vst.msk [vmem:[%s2981_s14 + $0xe0] sm:$0xff] %vm769_vm0, %v1466_v37 }
 0x41d   : > { %v1476_v32 = vadd.f32 %v2955_v50, %v3263_v38  ;;  %v1477_v21 = vadd.f32 %v2958_v51, %v3264_v33  ;;  %1509 = vst.msk [vmem:[%s2981_s14 + $0xe8] sm:$0xff] %vm769_vm0, %v1467_v61  ;;  %1510 = vst.msk [vmem:[%s2981_s14 + $0xf0] sm:$0xff] %vm769_vm0, %v1468_v62  ;;  %v3265_v48 = vld [vmem:[#allocation51_spill] sm:$0xff]  ;;  %v3266_v1 = vld [vmem:[#allocation52_spill] sm:$0xff] }
 0x41e   : > { %1511 = vst.msk [vmem:[%s2981_s14 + $0xf8] sm:$0xff] %vm769_vm0, %v1469_v63  ;;  %v1478_v49 = vadd.f32 %v2961_v52, %v3265_v48  ;;  %v1479_v50 = vadd.f32 %v2964_v53, %v3266_v1  ;;  %1512 = vst.msk [vmem:[%s2981_s14 + $0x100] sm:$0xff] %vm769_vm0, %v1470_v34 }
 0x41f   : > { %1513 = vst.msk [vmem:[%s2981_s14 + $0x108] sm:$0xff] %vm769_vm0, %v1471_v4  ;;  %1514 = vst.msk [vmem:[%s2981_s14 + $0x110] sm:$0xff] %vm769_vm0, %v1472_v14 }
 0x420   : > { %1515 = vst.msk [vmem:[%s2981_s14 + $0x118] sm:$0xff] %vm769_vm0, %v1473_v43  ;;  %1516 = vst.msk [vmem:[%s2981_s14 + $0x120] sm:$0xff] %vm769_vm0, %v1474_v25 }
 0x421   : > { %1517 = vst.msk [vmem:[%s2981_s14 + $0x128] sm:$0xff] %vm769_vm0, %v1475_v47  ;;  %1518 = vst.msk [vmem:[%s2981_s14 + $0x130] sm:$0xff] %vm769_vm0, %v1476_v32 }
 0x422   : > { %1519 = vst.msk [vmem:[%s2981_s14 + $0x138] sm:$0xff] %vm769_vm0, %v1477_v21  ;;  %1520 = vst.msk [vmem:[%s2981_s14 + $0x140] sm:$0xff] %vm769_vm0, %v1478_v49 }
 0x423   : > { %1521 = vst.msk [vmem:[%s2981_s14 + $0x148] sm:$0xff] %vm769_vm0, %v1479_v50 }
 0x424   : > { %s1894_s6 = smul.u32 14, %s2069_s23  ;;  %s1548_s28 = sshll.u32 %s2981_s14, 4  ;;  %s1549_s28 = int_to_ptr.vmem [resolvable:$true] %s1548_s28 }
 0x425   : > { %s1895_s11 = smul.u32 168, %s2073_s24  ;;  %s2087_s9 = smov 1792  }
 0x426   : > { %1896 = sst [smem:[#allocation7]] (%p2221_p10), %s2087_s9  ;;  %s2088_s5 = smov 7168  }
 0x427   : > { %s1535_s12 = sadd.s32 %s1895_s11, %s1894_s6  ;;  %1897 = sst [smem:[#allocation7 + $0x1]] (%p2221_p10), %s2088_s5 }
 0x428   : > { %s1724_s29 = sshll.u32 %s1535_s12, 7  ;;  %s3267_s19 = sld [smem:[#allocation54_spill]] }
 0x429   : > { %s2089_s17 = smov 14   ;;  %s2090_s23 = smov 128  }
 0x42a   : > { %1898 = sst [smem:[#allocation7 + $0x2]] (%p2221_p10), %s2089_s17  ;;  %s2091_s24 = smov 8  }
 0x42b   : > { %1899 = sst [smem:[#allocation7 + $0x3]] (%p2221_p10), %s2090_s23  ;;  %s2092_s14 = smov 131072  }
 0x42c   : > { %1900 = sst [smem:[#allocation7 + $0x4]] (%p2221_p10), %s2090_s23  ;;  %s2093_s6 = smov 0  }
 0x42d   : > { %1901 = sst [smem:[#allocation7 + $0x5]] (%p2221_p10), %s2091_s24 }
 0x42e   : > { %s1537_s30 = scalar_lea.hbm %s3267_s19, %s1724_s29 }
 0x42f   : > { %1902 = dma.general (%p2221_p10), %s1549_s28, 5376, %s1537_s30, %s1523_s15, %s2092_s14, [#allocation7], %s2093_s6, 0  }
 0x430 PF: > { %p1908_p7 = scmp.ge.s32.totalorder %s2085_s27, 2  ;;  %s1576_s11 = sand.u32 1, %s2049_s18  }
 0x431   : > { %s1577_s12 = scalar_lea.sflag [#allocation5], %s1576_s11 }
 0x432   : > { %p1905_p8 = pnand %p1908_p7, %p2225_p12 }
 0x434   : > { %p1906_p9 = pneg %p1905_p8 }
 0x436   : > { %2044 = dma.done.wait (%p1906_p9), %s1577_s12, 5376  }
 0x437   : > { %2046 = vsyncadd (%p1906_p9), %s1577_s12, 4294961920  ;;  %s18_s27 = sadd.s32 1, %s2085_s27   ;;  %s3268_s8 = sld [smem:[#allocation11_spill]] }
 0x438   : > { %p15_p11 = scmp.ge.s32.totalorder %s18_s27, 14   ;;  %s3269_s15 = sld [smem:[#allocation9_spill]] }
 0x439   : > { %s3270_s28 = sld [smem:[#allocation10_spill]]  ;;  %s3271_s18 = smov %s2061_s21 }
 0x43a   : > { %s3272_s19 = smov %s2057_s20  ;;  %s3273_s20 = smov %s2235_s16 }
 0x43b   : > { %s3274_s21 = smov %s2065_s22  ;;  %s3276_s23 = smov %s2077_s25 }
 0x43c   : > { %s3277_s24 = smov %s2081_s26  ;;  %17 = sbr.rel (!%p15_p11) target bundleno = 8 (0x8), region = 172 }
 0x43d   : > { %s3275_s22 = smov %s3268_s8 }
 0x43e   : > { %s3278_s25 = smov %s3269_s15 }
 0x43f   : > { %s3279_s26 = smov %s3270_s28 }
 0x441   :  { %1582 = vsyncpa [#allocation5], 1 }
 0x442   :  { %1584 = vsyncpa [#allocation5 + $0x1], 1 }

</bundles_post_ra>
